<compile_context>
chip_gen: v7x
topology: tpu7x:2x2x1
jax: 0.10.0
libtpu: 0.0.40
codegen_flags: <defaults>
</compile_context>

<pallas_src>
import jax
import jax.numpy as jnp
from jax import lax
from jax.experimental import pallas as pl
from jax.experimental.pallas import tpu as pltpu

_BN_EPS = 1e-5
_MXU_DTYPE = jnp.bfloat16  # bf16 MXU inputs / stored activations, f32 accumulation


# ---------------------------------------------------------------------------
# sizing helpers
# ---------------------------------------------------------------------------
def _round_up(x, m):
    return (x + m - 1) // m * m


def _vmem_limit_bytes():
    try:
        phys = int(pltpu.get_tpu_info().vmem_capacity_bytes)
    except Exception:
        phys = 64 << 20  # conservative (v7x per-core VMEM)
    return min(int(phys * 7 // 8), 96 << 20)


_VMEM_LIMIT = _vmem_limit_bytes()
_TILE_BUDGET = min(int(_VMEM_LIMIT * 0.6), 48 << 20)


def _pick_sub_rows(rows, w, target=256):
    """Largest divisor of `rows` whose sub-tile (rows_sub*W pixels) <= target."""
    best = 1
    for d in range(1, rows + 1):
        if rows % d == 0 and d * w <= target:
            best = d
    return best


def _pick_rows(h, w, cin, cpad, in_itemsize):
    """Largest row-chunk R (divisor of H, lane/sublane legal) fitting the VMEM budget."""

    def est(r):
        rs = _pick_sub_rows(r, w)
        return (r * w * cin * in_itemsize * 2          # input chunk, double-buffered
                + 2 * w * cin * in_itemsize * 2        # halo rows
                + 9 * cin * cpad * 2 * 2               # resident bf16 weights
                + r * w * cpad * 2 * 2                 # bf16 conv output, double-buffered
                + 2 * 8 * cpad * 4 * 2                 # stat blocks
                + (r + 2) * (w + 2) * cin * 2          # hbuf scratch (bf16)
                + rs * w * cpad * 4                    # f32 accumulator sub-tile
                + rs * w * 3 * cin * 2 * 2)            # folded lhs temporaries

    divisors = [d for d in range(h, 0, -1) if h % d == 0]
    cand = [d for d in divisors if (d * w) % 8 == 0] or divisors
    # TODO(synk): support (row_chunk * W) % 8 != 0 spatial sizes via a masked last block.
    for r in cand:
        if est(r) <= _TILE_BUDGET:
            return r
    return cand[-1]


# ---------------------------------------------------------------------------
# weight massaging: PyTorch [Cout, Cin, 3, 3] -> folded tap matrices
# ---------------------------------------------------------------------------
def _prep_weight(w_pt, cin_act, cpad_out, k_fold):
    """-> [9 // k_fold, k_fold * cin_act, cpad_out] bf16 (group-major tap order)."""
    cout, cin_raw, kh, kw = w_pt.shape
    w = jnp.transpose(w_pt, (2, 3, 1, 0))                       # [3, 3, cin, cout]
    w = jnp.pad(w, ((0, 0), (0, 0),
                    (0, cin_act - cin_raw), (0, cpad_out - cout)))
    return w.reshape(9 // k_fold, k_fold * cin_act, cpad_out).astype(_MXU_DTYPE)


# ---------------------------------------------------------------------------
# Fused (optional BN+ReLU pre-op) -> conv3x3 -> per-channel sum / sum-of-squares
# ---------------------------------------------------------------------------
def _make_conv_kernel(R, W, cin, cpad, groups, n_chunks, apply_pre):
    k_fold = len(groups[0])
    RS = _pick_sub_rows(R, W)
    n_sub = R // RS
    RSW = RS * W

    def kernel(*refs):
        if apply_pre:
            sc_ref, sh_ref, x_ref, top_ref, bot_ref, w_ref = refs[:6]
            y_ref, sum_ref, sq_ref, hbuf = refs[6:]
        else:
            x_ref, top_ref, bot_ref, w_ref = refs[:4]
            y_ref, sum_ref, sq_ref, hbuf = refs[4:]
        i = pl.program_id(1)

        def pre(v):
            v = v.astype(jnp.float32)
            if apply_pre:  # fused BatchNorm(scale/shift form) + ReLU of the previous layer
                v = jnp.maximum(v * sc_ref[...].reshape(1, 1, cin)
                                + sh_ref[...].reshape(1, 1, cin), 0.0)
            return v.astype(_MXU_DTYPE)

        # ---- build the zero-padded, (optionally) BN+ReLU'd activation tile (bf16, cast once)
        zcol = jnp.zeros((R + 2, 1, cin), _MXU_DTYPE)
        hbuf[:, 0:1, :] = zcol                              # left image border
        hbuf[:, W + 1:W + 2, :] = zcol                      # right image border
        hbuf[1:R + 1, 1:W + 1, :] = pre(x_ref[0])           # interior rows of this chunk
        zrow = jnp.zeros((1, W, cin), _MXU_DTYPE)
        hbuf[0:1, 1:W + 1, :] = jnp.where(i == 0, zrow, pre(top_ref[0]))
        hbuf[R + 1:R + 2, 1:W + 1, :] = jnp.where(i == n_chunks - 1, zrow, pre(bot_ref[0]))

        # ---- K-folded tap matmuls over row sub-tiles (f32 acc stays vreg-resident)
        def sub(s, carry):
            csum, csq = carry
            r0 = s * RS
            acc = jnp.zeros((RSW, cpad), jnp.float32)
            for g, taps in enumerate(groups):
                slabs = {}
                pieces = []
                for (dh, dw) in taps:
                    if dh not in slabs:
                        slabs[dh] = hbuf[pl.ds(r0 + dh, RS), :, :]   # [RS, W+2, cin]
                    pieces.append(slabs[dh][:, dw:dw + W, :])
                lhs = pieces[0] if len(pieces) == 1 else jnp.concatenate(pieces, axis=-1)
                lhs = lhs.reshape(RSW, k_fold * cin)
                acc = acc + jnp.dot(lhs, w_ref[g], preferred_element_type=jnp.float32)
            y_ref[pl.ds(r0 * W, RSW), :] = acc.astype(y_ref.dtype)
            return (csum + jnp.sum(acc, axis=0, keepdims=True),
                    csq + jnp.sum(acc * acc, axis=0, keepdims=True))

        init = (jnp.zeros((1, cpad), jnp.float32), jnp.zeros((1, cpad), jnp.float32))
        if n_sub == 1:
            csum, csq = sub(0, init)
        else:
            csum, csq = lax.fori_loop(0, n_sub, sub, init, unroll=(n_sub <= 8))
        # NOTE: single-pass (E[x^2]-E[x]^2) variance in f32; clamped >= 0 outside.
        sum_ref[...] = jnp.broadcast_to(csum, (8, cpad))
        sq_ref[...] = jnp.broadcast_to(csq, (8, cpad))

    return kernel


def conv3x3_bn_stats(x_nhwc, w_pt, cpad_out, scale=None, shift=None):
    """3x3 stride-1 'same' conv (no bias) + per-channel sum / sum-of-squares.

    If scale/shift are given, relu(x*scale + shift) (the previous layer's
    BatchNorm+ReLU) is applied to the loaded tile in-kernel, with the image
    border zero-padding applied AFTER the fusion (matching PyTorch semantics).
    Returns (y bf16 [N*H*W, cpad_out], col_sum, col_sumsq, row_chunk).
    """
    N, H, W, cin = x_nhwc.shape
    apply_pre = scale is not None

    # Fold taps into the contraction dim when lane-aligned (K = 3*cin >= 384 for
    # cin multiples of 128); otherwise fall back to per-tap K=cin matmuls.
    # TODO(synk): fold all 9 taps (K = 9*cin) for tiny-cin first layers once the
    # non-128-aligned minor-dim concatenate path is exercised/validated.
    k_fold = 3 if cin % 128 == 0 else 1
    taps = [(t // 3, t % 3) for t in range(9)]
    groups = [taps[g * k_fold:(g + 1) * k_fold] for g in range(9 // k_fold)]
    wg = _prep_weight(w_pt, cin, cpad_out, k_fold)

    R = _pick_rows(H, W, cin, cpad_out, x_nhwc.dtype.itemsize)
    n_chunks = H // R
    kernel = _make_conv_kernel(R, W, cin, cpad_out, groups, n_chunks, apply_pre)

    in_specs = []
    args = []
    if apply_pre:
        in_specs += [pl.BlockSpec((1, cin), lambda n, i: (0, 0)),
                     pl.BlockSpec((1, cin), lambda n, i: (0, 0))]
        args += [scale.reshape(1, cin).astype(jnp.float32),
                 shift.reshape(1, cin).astype(jnp.float32)]
    in_specs += [
        pl.BlockSpec((1, R, W, cin), lambda n, i: (n, i, 0, 0)),
        # halo rows: clamped row indices; the kernel zeroes them at image borders
        pl.BlockSpec((1, 1, W, cin), lambda n, i: (n, jnp.maximum(i * R - 1, 0), 0, 0)),
        pl.BlockSpec((1, 1, W, cin), lambda n, i: (n, jnp.minimum(i * R + R, H - 1), 0, 0)),
        # resident weights (constant index_map).
        # TODO(synk): pipeline_mode=pl.Buffered(1) here would save one weight copy on v7x.
        pl.BlockSpec(wg.shape, lambda n, i: (0, 0, 0)),
    ]
    args += [x_nhwc, x_nhwc, x_nhwc, wg]

    y, psum, psq = pl.pallas_call(
        kernel,
        out_shape=(
            jax.ShapeDtypeStruct((N * H * W, cpad_out), _MXU_DTYPE),
            jax.ShapeDtypeStruct((N * n_chunks * 8, cpad_out), jnp.float32),
            jax.ShapeDtypeStruct((N * n_chunks * 8, cpad_out), jnp.float32),
        ),
        grid=(N, n_chunks),
        in_specs=in_specs,
        out_specs=(
            pl.BlockSpec((R * W, cpad_out), lambda n, i: (n * n_chunks + i, 0)),
            pl.BlockSpec((8, cpad_out), lambda n, i: (n * n_chunks + i, 0)),
            pl.BlockSpec((8, cpad_out), lambda n, i: (n * n_chunks + i, 0)),
        ),
        scratch_shapes=[pltpu.VMEM((R + 2, W + 2, cin), _MXU_DTYPE)],
        compiler_params=pltpu.CompilerParams(
            dimension_semantics=("parallel", "parallel"),
            vmem_limit_bytes=_VMEM_LIMIT),
    )(*args)

    col_sum = jnp.sum(psum.reshape(N * n_chunks, 8, cpad_out)[:, 0, :], axis=0)
    col_sq = jnp.sum(psq.reshape(N * n_chunks, 8, cpad_out)[:, 0, :], axis=0)
    return y, col_sum, col_sq, R


# ---------------------------------------------------------------------------
# Final lane-dense scale/shift + ReLU (layer-2 BatchNorm apply)
# ---------------------------------------------------------------------------
def _apply_kernel(y_ref, sc_ref, sh_ref, o_ref):
    v = y_ref[...].astype(jnp.float32)
    o_ref[...] = jnp.maximum(v * sc_ref[...] + sh_ref[...], 0.0).astype(o_ref.dtype)


def bn_relu_apply(y, scale, shift, out_dtype, tile_rows):
    """y: [M, Cpad] bf16; scale/shift: [Cpad] f32 -> [M, Cpad] out_dtype."""
    M, cpad = y.shape
    assert M % tile_rows == 0
    return pl.pallas_call(
        _apply_kernel,
        out_shape=jax.ShapeDtypeStruct((M, cpad), out_dtype),
        grid=(M // tile_rows,),
        in_specs=[pl.BlockSpec((tile_rows, cpad), lambda i: (i, 0)),
                  pl.BlockSpec((1, cpad), lambda i: (0, 0)),
                  pl.BlockSpec((1, cpad), lambda i: (0, 0))],
        out_specs=pl.BlockSpec((tile_rows, cpad), lambda i: (i, 0)),
        compiler_params=pltpu.CompilerParams(
            dimension_semantics=("parallel",),
            vmem_limit_bytes=_VMEM_LIMIT),
    )(y, scale.reshape(1, cpad).astype(jnp.float32),
      shift.reshape(1, cpad).astype(jnp.float32))


# ---------------------------------------------------------------------------
# BatchNorm (training-mode, biased var) as per-channel scale / shift
# ---------------------------------------------------------------------------
def _bn_scale_shift(col_sum, col_sq, count, gamma, beta, cpad):
    mean = col_sum / count
    var = jnp.maximum(col_sq / count - mean * mean, 0.0)
    rstd = lax.rsqrt(var + _BN_EPS)
    g = jnp.pad(gamma.astype(jnp.float32), (0, cpad - gamma.shape[0]))
    b = jnp.pad(beta.astype(jnp.float32), (0, cpad - beta.shape[0]))
    scale = g * rstd                 # padded channels: gamma=0 -> scale=0
    shift = b - mean * scale         # padded channels: 0 -> ReLU(0)=0
    return scale, shift


# ---------------------------------------------------------------------------
# DoubleConv forward
# ---------------------------------------------------------------------------
def double_conv_forward(x, params):
    """x: [N, Cin, H, W] NCHW -> [N, Cout, H, W] NCHW."""
    N, cin, H, W = x.shape
    w1, g1, b1 = params["w1"], params["g1"], params["b1"]
    w2, g2, b2 = params["w2"], params["g2"], params["b2"]
    mid, cout = w1.shape[0], w2.shape[0]
    cpad1, cpad2 = _round_up(mid, 128), _round_up(cout, 128)
    count = N * H * W

    # TODO(synk): if the surrounding network is NHWC, drop both boundary
    # transposes; they are the only remaining XLA-side passes over activations.
    x_nhwc = jnp.transpose(x, (0, 2, 3, 1))

    # conv1 + in-kernel BN1 statistics (y1 stored bf16, stats from the f32 acc)
    y1, s1, q1, _ = conv3x3_bn_stats(x_nhwc, w1, cpad1)
    sc1, sh1 = _bn_scale_shift(s1, q1, count, g1, b1, cpad1)

    # conv2 with layer-1 BN+ReLU fused into its input path + BN2 statistics
    y2, s2, q2, r2 = conv3x3_bn_stats(y1.reshape(N, H, W, cpad1), w2, cpad2,
                                      scale=sc1, shift=sh1)
    sc2, sh2 = _bn_scale_shift(s2, q2, count, g2, b2, cpad2)

    # final lane-dense BN2 apply + ReLU
    out = bn_relu_apply(y2, sc2, sh2, x.dtype, tile_rows=r2 * W)
    out = out.reshape(N, H, W, cpad2)[..., :cout]
    return jnp.transpose(out, (0, 3, 1, 2))


def init_params(key, in_channels, out_channels, mid_channels=None):
    if not mid_channels:
        mid_channels = out_channels
    k1, k2 = jax.random.split(key)
    w1 = jax.random.normal(k1, (mid_channels, in_channels, 3, 3), jnp.float32)
    w1 = w1 * (2.0 / (in_channels * 9)) ** 0.5
    w2 = jax.random.normal(k2, (out_channels, mid_channels, 3, 3), jnp.float32)
    w2 = w2 * (2.0 / (mid_channels * 9)) ** 0.5
    return {
        "w1": w1, "g1": jnp.ones((mid_channels,), jnp.float32),
        "b1": jnp.zeros((mid_channels,), jnp.float32),
        "w2": w2, "g2": jnp.ones((out_channels,), jnp.float32),
        "b2": jnp.zeros((out_channels,), jnp.float32),
    }


# ---------------------------------------------------------------------------
# Pure-JAX f32 reference (loose check; the kernel uses bf16 MXU inputs/activations)
# ---------------------------------------------------------------------------
def _reference(x, params):
    def conv(h, w):
        return lax.conv_general_dilated(
            h, w, window_strides=(1, 1), padding=((1, 1), (1, 1)),
            dimension_numbers=("NCHW", "OIHW", "NCHW"))

    def bn_relu_ref(y, g, b):
        m = jnp.mean(y, axis=(0, 2, 3), keepdims=True)
        v = jnp.var(y, axis=(0, 2, 3), keepdims=True)   # biased, training mode
        yn = (y - m) * lax.rsqrt(v + _BN_EPS)
        return jnp.maximum(yn * g.reshape(1, -1, 1, 1) + b.reshape(1, -1, 1, 1), 0.0)

    h = bn_relu_ref(conv(x, params["w1"]), params["g1"], params["b1"])
    return bn_relu_ref(conv(h, params["w2"]), params["g2"], params["b2"])


if __name__ == "__main__":
    key = jax.random.PRNGKey(0)
    kx, kp = jax.random.split(key)

    N, C, H, W = 2, 4, 16, 16
    out_channels = 8

    x = jax.random.normal(kx, (N, C, H, W), jnp.float32)
    params = init_params(kp, C, out_channels)

    fwd = jax.jit(double_conv_forward)
    out = jax.block_until_ready(fwd(x, params))

    assert out.shape == (N, out_channels, H, W), out.shape
    assert out.dtype == jnp.float32

    ref = _reference(x, params)
    err = float(jnp.max(jnp.abs(out - ref)))
    assert err < 0.25, f"max |diff| vs f32 reference = {err}"  # bf16 MXU tolerance
    print("KERNEL_OK")
</pallas_src>

<mosaic_0001>
module attributes {stable_mosaic.version = 11 : i64} {
  func.func @kernel(%arg0: i32, %arg1: i32, %arg2: memref<1x16x16x4xf32, #tpu.memory_space<vmem>>, %arg3: memref<1x1x16x4xf32, #tpu.memory_space<vmem>>, %arg4: memref<1x1x16x4xf32, #tpu.memory_space<vmem>>, %arg5: memref<9x4x128xbf16, #tpu.memory_space<vmem>>, %arg6: memref<256x128xbf16, #tpu.memory_space<vmem>>, %arg7: memref<8x128xf32, #tpu.memory_space<vmem>>, %arg8: memref<8x128xf32, #tpu.memory_space<vmem>>, %arg9: memref<18x18x4xbf16, #tpu.memory_space<vmem>>) attributes {dimension_semantics = [#tpu.dimension_semantics<parallel>, #tpu.dimension_semantics<parallel>], iteration_bounds = array<i64: 2, 1>, scalar_prefetch = 0 : i64, scratch_operands = 1 : i64, tpu.core_type = #tpu.core_type<tc>, window_params = [{transform_indices = @transform_0, window_bounds = array<i64: 1, 16, 16, 4>}, {transform_indices = @transform_1, window_bounds = array<i64: 1, 1, 16, 4>}, {transform_indices = @transform_2, window_bounds = array<i64: 1, 1, 16, 4>}, {pipeline_mode = #tpu.pipeline_mode<synchronous>, transform_indices = @transform_3, window_bounds = array<i64: 9, 4, 128>}, {transform_indices = @transform_4, window_bounds = array<i64: 256, 128>}, {transform_indices = @transform_5, window_bounds = array<i64: 8, 128>}, {transform_indices = @transform_6, window_bounds = array<i64: 8, 128>}]} {
    %cst = arith.constant 0.000000e+00 : bf16
    %0 = vector.broadcast %cst : bf16 to vector<18x1x4xbf16>
    %c0 = arith.constant 0 : index
    %c0_0 = arith.constant 0 : index
    %c0_1 = arith.constant 0 : index
    %1 = vector.load %arg9[%c0, %c0_0, %c0_1] : memref<18x18x4xbf16, #tpu.memory_space<vmem>>, vector<18x1x4xbf16>
    tpu.vector_store %arg9[%c0, %c0_0, %c0_1], %0 {strides = array<i32>} : memref<18x18x4xbf16, #tpu.memory_space<vmem>>, vector<18x1x4xbf16>,
    %c0_2 = arith.constant 0 : index
    %c17 = arith.constant 17 : index
    %c0_3 = arith.constant 0 : index
    %2 = vector.load %arg9[%c0_2, %c17, %c0_3] : memref<18x18x4xbf16, #tpu.memory_space<vmem>>, vector<18x1x4xbf16>
    tpu.vector_store %arg9[%c0_2, %c17, %c0_3], %0 {strides = array<i32>} : memref<18x18x4xbf16, #tpu.memory_space<vmem>>, vector<18x1x4xbf16>,
    %c0_4 = arith.constant 0 : index
    %c0_5 = arith.constant 0 : index
    %c0_6 = arith.constant 0 : index
    %c0_7 = arith.constant 0 : index
    %3 = vector.load %arg2[%c0_4, %c0_5, %c0_6, %c0_7] : memref<1x16x16x4xf32, #tpu.memory_space<vmem>>, vector<1x16x16x4xf32>
    %4 = vector.shape_cast %3 : vector<1x16x16x4xf32> to vector<16x16x4xf32>
    %5 = arith.truncf %4 : vector<16x16x4xf32> to vector<16x16x4xbf16>
    %c1 = arith.constant 1 : index
    %c1_8 = arith.constant 1 : index
    %c0_9 = arith.constant 0 : index
    %6 = vector.load %arg9[%c1, %c1_8, %c0_9] : memref<18x18x4xbf16, #tpu.memory_space<vmem>>, vector<16x16x4xbf16>
    tpu.vector_store %arg9[%c1, %c1_8, %c0_9], %5 {strides = array<i32>} : memref<18x18x4xbf16, #tpu.memory_space<vmem>>, vector<16x16x4xbf16>,
    %cst_10 = arith.constant 0.000000e+00 : bf16
    %7 = vector.broadcast %cst_10 : bf16 to vector<1x16x4xbf16>
    %c0_i32 = arith.constant 0 : i32
    %8 = arith.cmpi eq, %arg1, %c0_i32 : i32
    %c0_11 = arith.constant 0 : index
    %c0_12 = arith.constant 0 : index
    %c0_13 = arith.constant 0 : index
    %c0_14 = arith.constant 0 : index
    %9 = vector.load %arg3[%c0_11, %c0_12, %c0_13, %c0_14] : memref<1x1x16x4xf32, #tpu.memory_space<vmem>>, vector<1x1x16x4xf32>
    %10 = vector.shape_cast %9 : vector<1x1x16x4xf32> to vector<1x16x4xf32>
    %11 = arith.truncf %10 : vector<1x16x4xf32> to vector<1x16x4xbf16>
    %12 = arith.select %8, %7, %11 : vector<1x16x4xbf16>
    %c0_15 = arith.constant 0 : index
    %c1_16 = arith.constant 1 : index
    %c0_17 = arith.constant 0 : index
    %13 = vector.load %arg9[%c0_15, %c1_16, %c0_17] : memref<18x18x4xbf16, #tpu.memory_space<vmem>>, vector<1x16x4xbf16>
    tpu.vector_store %arg9[%c0_15, %c1_16, %c0_17], %12 {strides = array<i32>} : memref<18x18x4xbf16, #tpu.memory_space<vmem>>, vector<1x16x4xbf16>,
    %c0_i32_18 = arith.constant 0 : i32
    %14 = arith.cmpi eq, %arg1, %c0_i32_18 : i32
    %c0_19 = arith.constant 0 : index
    %c0_20 = arith.constant 0 : index
    %c0_21 = arith.constant 0 : index
    %c0_22 = arith.constant 0 : index
    %15 = vector.load %arg4[%c0_19, %c0_20, %c0_21, %c0_22] : memref<1x1x16x4xf32, #tpu.memory_space<vmem>>, vector<1x1x16x4xf32>
    %16 = vector.shape_cast %15 : vector<1x1x16x4xf32> to vector<1x16x4xf32>
    %17 = arith.truncf %16 : vector<1x16x4xf32> to vector<1x16x4xbf16>
    %18 = arith.select %14, %7, %17 : vector<1x16x4xbf16>
    %c17_23 = arith.constant 17 : index
    %c1_24 = arith.constant 1 : index
    %c0_25 = arith.constant 0 : index
    %19 = vector.load %arg9[%c17_23, %c1_24, %c0_25] : memref<18x18x4xbf16, #tpu.memory_space<vmem>>, vector<1x16x4xbf16>
    tpu.vector_store %arg9[%c17_23, %c1_24, %c0_25], %18 {strides = array<i32>} : memref<18x18x4xbf16, #tpu.memory_space<vmem>>, vector<1x16x4xbf16>,
    %cst_26 = arith.constant 0.000000e+00 : f32
    %20 = vector.broadcast %cst_26 : f32 to vector<1x128xf32>
    %cst_27 = arith.constant 0.000000e+00 : f32
    %21 = vector.broadcast %cst_27 : f32 to vector<1x128xf32>
    %cst_28 = arith.constant 0.000000e+00 : f32
    %22 = vector.broadcast %cst_28 : f32 to vector<256x128xf32>
    %c0_29 = arith.constant 0 : index
    %c0_30 = arith.constant 0 : index
    %c0_31 = arith.constant 0 : index
    %23 = vector.load %arg9[%c0_29, %c0_30, %c0_31] : memref<18x18x4xbf16, #tpu.memory_space<vmem>>, vector<16x18x4xbf16>
    %24 = vector.extract_strided_slice %23 {offsets = [0, 0, 0], sizes = [16, 16, 4], strides = [1, 1, 1]} : vector<16x18x4xbf16> to vector<16x16x4xbf16>
    %25 = vector.shape_cast %24 : vector<16x16x4xbf16> to vector<256x4xbf16>
    %c0_32 = arith.constant 0 : index
    %c0_33 = arith.constant 0 : index
    %c0_34 = arith.constant 0 : index
    %26 = vector.load %arg5[%c0_32, %c0_33, %c0_34] : memref<9x4x128xbf16, #tpu.memory_space<vmem>>, vector<1x4x128xbf16>
    %27 = vector.shape_cast %26 : vector<1x4x128xbf16> to vector<4x128xbf16>
    %cst_35 = arith.constant dense<0.000000e+00> : vector<256x128xf32>
    %28 = tpu.matmul %25, %27, %cst_35 {dimension_numbers = #tpu.dot_dimension_numbers<[1], [0], [0], [1], [0, 0, 1, 1], [], []>} : vector<256x4xbf16>, vector<4x128xbf16>, vector<256x128xf32> -> vector<256x128xf32>
    %29 = arith.addf %22, %28 : vector<256x128xf32>
    %c0_36 = arith.constant 0 : index
    %c0_37 = arith.constant 0 : index
    %c0_38 = arith.constant 0 : index
    %30 = vector.load %arg9[%c0_36, %c0_37, %c0_38] : memref<18x18x4xbf16, #tpu.memory_space<vmem>>, vector<16x18x4xbf16>
    %31 = vector.extract_strided_slice %30 {offsets = [0, 1, 0], sizes = [16, 16, 4], strides = [1, 1, 1]} : vector<16x18x4xbf16> to vector<16x16x4xbf16>
    %32 = vector.shape_cast %31 : vector<16x16x4xbf16> to vector<256x4xbf16>
    %c1_39 = arith.constant 1 : index
    %c0_40 = arith.constant 0 : index
    %c0_41 = arith.constant 0 : index
    %33 = vector.load %arg5[%c1_39, %c0_40, %c0_41] : memref<9x4x128xbf16, #tpu.memory_space<vmem>>, vector<1x4x128xbf16>
    %34 = vector.shape_cast %33 : vector<1x4x128xbf16> to vector<4x128xbf16>
    %cst_42 = arith.constant dense<0.000000e+00> : vector<256x128xf32>
    %35 = tpu.matmul %32, %34, %cst_42 {dimension_numbers = #tpu.dot_dimension_numbers<[1], [0], [0], [1], [0, 0, 1, 1], [], []>} : vector<256x4xbf16>, vector<4x128xbf16>, vector<256x128xf32> -> vector<256x128xf32>
    %36 = arith.addf %29, %35 : vector<256x128xf32>
    %c0_43 = arith.constant 0 : index
    %c0_44 = arith.constant 0 : index
    %c0_45 = arith.constant 0 : index
    %37 = vector.load %arg9[%c0_43, %c0_44, %c0_45] : memref<18x18x4xbf16, #tpu.memory_space<vmem>>, vector<16x18x4xbf16>
    %38 = vector.extract_strided_slice %37 {offsets = [0, 2, 0], sizes = [16, 16, 4], strides = [1, 1, 1]} : vector<16x18x4xbf16> to vector<16x16x4xbf16>
    %39 = vector.shape_cast %38 : vector<16x16x4xbf16> to vector<256x4xbf16>
    %c2 = arith.constant 2 : index
    %c0_46 = arith.constant 0 : index
    %c0_47 = arith.constant 0 : index
    %40 = vector.load %arg5[%c2, %c0_46, %c0_47] : memref<9x4x128xbf16, #tpu.memory_space<vmem>>, vector<1x4x128xbf16>
    %41 = vector.shape_cast %40 : vector<1x4x128xbf16> to vector<4x128xbf16>
    %cst_48 = arith.constant dense<0.000000e+00> : vector<256x128xf32>
    %42 = tpu.matmul %39, %41, %cst_48 {dimension_numbers = #tpu.dot_dimension_numbers<[1], [0], [0], [1], [0, 0, 1, 1], [], []>} : vector<256x4xbf16>, vector<4x128xbf16>, vector<256x128xf32> -> vector<256x128xf32>
    %43 = arith.addf %36, %42 : vector<256x128xf32>
    %c1_49 = arith.constant 1 : index
    %c0_50 = arith.constant 0 : index
    %c0_51 = arith.constant 0 : index
    %44 = vector.load %arg9[%c1_49, %c0_50, %c0_51] : memref<18x18x4xbf16, #tpu.memory_space<vmem>>, vector<16x18x4xbf16>
    %45 = vector.extract_strided_slice %44 {offsets = [0, 0, 0], sizes = [16, 16, 4], strides = [1, 1, 1]} : vector<16x18x4xbf16> to vector<16x16x4xbf16>
    %46 = vector.shape_cast %45 : vector<16x16x4xbf16> to vector<256x4xbf16>
    %c3 = arith.constant 3 : index
    %c0_52 = arith.constant 0 : index
    %c0_53 = arith.constant 0 : index
    %47 = vector.load %arg5[%c3, %c0_52, %c0_53] : memref<9x4x128xbf16, #tpu.memory_space<vmem>>, vector<1x4x128xbf16>
    %48 = vector.shape_cast %47 : vector<1x4x128xbf16> to vector<4x128xbf16>
    %cst_54 = arith.constant dense<0.000000e+00> : vector<256x128xf32>
    %49 = tpu.matmul %46, %48, %cst_54 {dimension_numbers = #tpu.dot_dimension_numbers<[1], [0], [0], [1], [0, 0, 1, 1], [], []>} : vector<256x4xbf16>, vector<4x128xbf16>, vector<256x128xf32> -> vector<256x128xf32>
    %50 = arith.addf %43, %49 : vector<256x128xf32>
    %c1_55 = arith.constant 1 : index
    %c0_56 = arith.constant 0 : index
    %c0_57 = arith.constant 0 : index
    %51 = vector.load %arg9[%c1_55, %c0_56, %c0_57] : memref<18x18x4xbf16, #tpu.memory_space<vmem>>, vector<16x18x4xbf16>
    %52 = vector.extract_strided_slice %51 {offsets = [0, 1, 0], sizes = [16, 16, 4], strides = [1, 1, 1]} : vector<16x18x4xbf16> to vector<16x16x4xbf16>
    %53 = vector.shape_cast %52 : vector<16x16x4xbf16> to vector<256x4xbf16>
    %c4 = arith.constant 4 : index
    %c0_58 = arith.constant 0 : index
    %c0_59 = arith.constant 0 : index
    %54 = vector.load %arg5[%c4, %c0_58, %c0_59] : memref<9x4x128xbf16, #tpu.memory_space<vmem>>, vector<1x4x128xbf16>
    %55 = vector.shape_cast %54 : vector<1x4x128xbf16> to vector<4x128xbf16>
    %cst_60 = arith.constant dense<0.000000e+00> : vector<256x128xf32>
    %56 = tpu.matmul %53, %55, %cst_60 {dimension_numbers = #tpu.dot_dimension_numbers<[1], [0], [0], [1], [0, 0, 1, 1], [], []>} : vector<256x4xbf16>, vector<4x128xbf16>, vector<256x128xf32> -> vector<256x128xf32>
    %57 = arith.addf %50, %56 : vector<256x128xf32>
    %c1_61 = arith.constant 1 : index
    %c0_62 = arith.constant 0 : index
    %c0_63 = arith.constant 0 : index
    %58 = vector.load %arg9[%c1_61, %c0_62, %c0_63] : memref<18x18x4xbf16, #tpu.memory_space<vmem>>, vector<16x18x4xbf16>
    %59 = vector.extract_strided_slice %58 {offsets = [0, 2, 0], sizes = [16, 16, 4], strides = [1, 1, 1]} : vector<16x18x4xbf16> to vector<16x16x4xbf16>
    %60 = vector.shape_cast %59 : vector<16x16x4xbf16> to vector<256x4xbf16>
    %c5 = arith.constant 5 : index
    %c0_64 = arith.constant 0 : index
    %c0_65 = arith.constant 0 : index
    %61 = vector.load %arg5[%c5, %c0_64, %c0_65] : memref<9x4x128xbf16, #tpu.memory_space<vmem>>, vector<1x4x128xbf16>
    %62 = vector.shape_cast %61 : vector<1x4x128xbf16> to vector<4x128xbf16>
    %cst_66 = arith.constant dense<0.000000e+00> : vector<256x128xf32>
    %63 = tpu.matmul %60, %62, %cst_66 {dimension_numbers = #tpu.dot_dimension_numbers<[1], [0], [0], [1], [0, 0, 1, 1], [], []>} : vector<256x4xbf16>, vector<4x128xbf16>, vector<256x128xf32> -> vector<256x128xf32>
    %64 = arith.addf %57, %63 : vector<256x128xf32>
    %c2_67 = arith.constant 2 : index
    %c0_68 = arith.constant 0 : index
    %c0_69 = arith.constant 0 : index
    %65 = vector.load %arg9[%c2_67, %c0_68, %c0_69] : memref<18x18x4xbf16, #tpu.memory_space<vmem>>, vector<16x18x4xbf16>
    %66 = vector.extract_strided_slice %65 {offsets = [0, 0, 0], sizes = [16, 16, 4], strides = [1, 1, 1]} : vector<16x18x4xbf16> to vector<16x16x4xbf16>
    %67 = vector.shape_cast %66 : vector<16x16x4xbf16> to vector<256x4xbf16>
    %c6 = arith.constant 6 : index
    %c0_70 = arith.constant 0 : index
    %c0_71 = arith.constant 0 : index
    %68 = vector.load %arg5[%c6, %c0_70, %c0_71] : memref<9x4x128xbf16, #tpu.memory_space<vmem>>, vector<1x4x128xbf16>
    %69 = vector.shape_cast %68 : vector<1x4x128xbf16> to vector<4x128xbf16>
    %cst_72 = arith.constant dense<0.000000e+00> : vector<256x128xf32>
    %70 = tpu.matmul %67, %69, %cst_72 {dimension_numbers = #tpu.dot_dimension_numbers<[1], [0], [0], [1], [0, 0, 1, 1], [], []>} : vector<256x4xbf16>, vector<4x128xbf16>, vector<256x128xf32> -> vector<256x128xf32>
    %71 = arith.addf %64, %70 : vector<256x128xf32>
    %c2_73 = arith.constant 2 : index
    %c0_74 = arith.constant 0 : index
    %c0_75 = arith.constant 0 : index
    %72 = vector.load %arg9[%c2_73, %c0_74, %c0_75] : memref<18x18x4xbf16, #tpu.memory_space<vmem>>, vector<16x18x4xbf16>
    %73 = vector.extract_strided_slice %72 {offsets = [0, 1, 0], sizes = [16, 16, 4], strides = [1, 1, 1]} : vector<16x18x4xbf16> to vector<16x16x4xbf16>
    %74 = vector.shape_cast %73 : vector<16x16x4xbf16> to vector<256x4xbf16>
    %c7 = arith.constant 7 : index
    %c0_76 = arith.constant 0 : index
    %c0_77 = arith.constant 0 : index
    %75 = vector.load %arg5[%c7, %c0_76, %c0_77] : memref<9x4x128xbf16, #tpu.memory_space<vmem>>, vector<1x4x128xbf16>
    %76 = vector.shape_cast %75 : vector<1x4x128xbf16> to vector<4x128xbf16>
    %cst_78 = arith.constant dense<0.000000e+00> : vector<256x128xf32>
    %77 = tpu.matmul %74, %76, %cst_78 {dimension_numbers = #tpu.dot_dimension_numbers<[1], [0], [0], [1], [0, 0, 1, 1], [], []>} : vector<256x4xbf16>, vector<4x128xbf16>, vector<256x128xf32> -> vector<256x128xf32>
    %78 = arith.addf %71, %77 : vector<256x128xf32>
    %c2_79 = arith.constant 2 : index
    %c0_80 = arith.constant 0 : index
    %c0_81 = arith.constant 0 : index
    %79 = vector.load %arg9[%c2_79, %c0_80, %c0_81] : memref<18x18x4xbf16, #tpu.memory_space<vmem>>, vector<16x18x4xbf16>
    %80 = vector.extract_strided_slice %79 {offsets = [0, 2, 0], sizes = [16, 16, 4], strides = [1, 1, 1]} : vector<16x18x4xbf16> to vector<16x16x4xbf16>
    %81 = vector.shape_cast %80 : vector<16x16x4xbf16> to vector<256x4xbf16>
    %c8 = arith.constant 8 : index
    %c0_82 = arith.constant 0 : index
    %c0_83 = arith.constant 0 : index
    %82 = vector.load %arg5[%c8, %c0_82, %c0_83] : memref<9x4x128xbf16, #tpu.memory_space<vmem>>, vector<1x4x128xbf16>
    %83 = vector.shape_cast %82 : vector<1x4x128xbf16> to vector<4x128xbf16>
    %cst_84 = arith.constant dense<0.000000e+00> : vector<256x128xf32>
    %84 = tpu.matmul %81, %83, %cst_84 {dimension_numbers = #tpu.dot_dimension_numbers<[1], [0], [0], [1], [0, 0, 1, 1], [], []>} : vector<256x4xbf16>, vector<4x128xbf16>, vector<256x128xf32> -> vector<256x128xf32>
    %85 = arith.addf %78, %84 : vector<256x128xf32>
    %86 = arith.truncf %85 : vector<256x128xf32> to vector<256x128xbf16>
    %c0_85 = arith.constant 0 : index
    %c0_86 = arith.constant 0 : index
    %87 = vector.load %arg6[%c0_85, %c0_86] : memref<256x128xbf16, #tpu.memory_space<vmem>>, vector<256x128xbf16>
    tpu.vector_store %arg6[%c0_85, %c0_86], %86 {strides = array<i32>} : memref<256x128xbf16, #tpu.memory_space<vmem>>, vector<256x128xbf16>,
    %cst_87 = arith.constant dense<0.000000e+00> : vector<128xf32>
    %88 = vector.multi_reduction <add>, %85, %cst_87 [0] : vector<256x128xf32> to vector<128xf32>
    %89 = vector.shape_cast %88 : vector<128xf32> to vector<1x128xf32>
    %90 = arith.addf %20, %89 : vector<1x128xf32>
    %91 = arith.mulf %85, %85 : vector<256x128xf32>
    %cst_88 = arith.constant dense<0.000000e+00> : vector<128xf32>
    %92 = vector.multi_reduction <add>, %91, %cst_88 [0] : vector<256x128xf32> to vector<128xf32>
    %93 = vector.shape_cast %92 : vector<128xf32> to vector<1x128xf32>
    %94 = arith.addf %21, %93 : vector<1x128xf32>
    %95 = vector.shape_cast %90 : vector<1x128xf32> to vector<1x128xf32>
    %96 = vector.broadcast %95 : vector<1x128xf32> to vector<8x128xf32>
    %c0_89 = arith.constant 0 : index
    %c0_90 = arith.constant 0 : index
    %97 = vector.load %arg7[%c0_89, %c0_90] : memref<8x128xf32, #tpu.memory_space<vmem>>, vector<8x128xf32>
    tpu.vector_store %arg7[%c0_89, %c0_90], %96 {strides = array<i32>} : memref<8x128xf32, #tpu.memory_space<vmem>>, vector<8x128xf32>,
    %98 = vector.shape_cast %94 : vector<1x128xf32> to vector<1x128xf32>
    %99 = vector.broadcast %98 : vector<1x128xf32> to vector<8x128xf32>
    %c0_91 = arith.constant 0 : index
    %c0_92 = arith.constant 0 : index
    %100 = vector.load %arg8[%c0_91, %c0_92] : memref<8x128xf32, #tpu.memory_space<vmem>>, vector<8x128xf32>
    tpu.vector_store %arg8[%c0_91, %c0_92], %99 {strides = array<i32>} : memref<8x128xf32, #tpu.memory_space<vmem>>, vector<8x128xf32>,
    return
  }
  func.func @transform_0(%arg0: i32, %arg1: i32) -> (i32, i32, i32, i32) {
    %c0_i32 = arith.constant 0 : i32
    %c0_i32_0 = arith.constant 0 : i32
    %c0_i32_1 = arith.constant 0 : i32
    return %arg0, %arg1, %c0_i32, %c0_i32_0 : i32, i32, i32, i32
  }
  func.func @transform_1(%arg0: i32, %arg1: i32) -> (i32, i32, i32, i32) {
    %c16_i32 = arith.constant 16 : i32
    %0 = arith.muli %arg1, %c16_i32 : i32
    %c1_i32 = arith.constant 1 : i32
    %1 = arith.subi %0, %c1_i32 : i32
    %c0_i32 = arith.constant 0 : i32
    %2 = arith.maxsi %1, %c0_i32 : i32
    %c0_i32_0 = arith.constant 0 : i32
    %c0_i32_1 = arith.constant 0 : i32
    %c0_i32_2 = arith.constant 0 : i32
    return %arg0, %2, %c0_i32_0, %c0_i32_1 : i32, i32, i32, i32
  }
  func.func @transform_2(%arg0: i32, %arg1: i32) -> (i32, i32, i32, i32) {
    %c16_i32 = arith.constant 16 : i32
    %0 = arith.muli %arg1, %c16_i32 : i32
    %c16_i32_0 = arith.constant 16 : i32
    %1 = arith.addi %0, %c16_i32_0 : i32
    %c15_i32 = arith.constant 15 : i32
    %2 = arith.minsi %1, %c15_i32 : i32
    %c0_i32 = arith.constant 0 : i32
    %c0_i32_1 = arith.constant 0 : i32
    %c0_i32_2 = arith.constant 0 : i32
    return %arg0, %2, %c0_i32, %c0_i32_1 : i32, i32, i32, i32
  }
  func.func @transform_3(%arg0: i32, %arg1: i32) -> (i32, i32, i32) {
    %c0_i32 = arith.constant 0 : i32
    %c0_i32_0 = arith.constant 0 : i32
    %c0_i32_1 = arith.constant 0 : i32
    %c0_i32_2 = arith.constant 0 : i32
    return %c0_i32, %c0_i32_0, %c0_i32_1 : i32, i32, i32
  }
  func.func @transform_4(%arg0: i32, %arg1: i32) -> (i32, i32) {
    %c1_i32 = arith.constant 1 : i32
    %0 = arith.muli %arg0, %c1_i32 : i32
    %1 = arith.addi %0, %arg1 : i32
    %c0_i32 = arith.constant 0 : i32
    %c0_i32_0 = arith.constant 0 : i32
    return %1, %c0_i32 : i32, i32
  }
  func.func @transform_5(%arg0: i32, %arg1: i32) -> (i32, i32) {
    %c1_i32 = arith.constant 1 : i32
    %0 = arith.muli %arg0, %c1_i32 : i32
    %1 = arith.addi %0, %arg1 : i32
    %c0_i32 = arith.constant 0 : i32
    %c0_i32_0 = arith.constant 0 : i32
    return %1, %c0_i32 : i32, i32
  }
  func.func @transform_6(%arg0: i32, %arg1: i32) -> (i32, i32) {
    %c1_i32 = arith.constant 1 : i32
    %0 = arith.muli %arg0, %c1_i32 : i32
    %1 = arith.addi %0, %arg1 : i32
    %c0_i32 = arith.constant 0 : i32
    %c0_i32_0 = arith.constant 0 : i32
    return %1, %c0_i32 : i32, i32
  }
}

module attributes {stable_mosaic.version = 11 : i64} {
  func.func @kernel(%arg0: i32, %arg1: i32, %arg2: memref<1x128xf32, #tpu.memory_space<vmem>>, %arg3: memref<1x128xf32, #tpu.memory_space<vmem>>, %arg4: memref<1x16x16x128xbf16, #tpu.memory_space<vmem>>, %arg5: memref<1x1x16x128xbf16, #tpu.memory_space<vmem>>, %arg6: memref<1x1x16x128xbf16, #tpu.memory_space<vmem>>, %arg7: memref<3x384x128xbf16, #tpu.memory_space<vmem>>, %arg8: memref<256x128xbf16, #tpu.memory_space<vmem>>, %arg9: memref<8x128xf32, #tpu.memory_space<vmem>>, %arg10: memref<8x128xf32, #tpu.memory_space<vmem>>, %arg11: memref<18x18x128xbf16, #tpu.memory_space<vmem>>) attributes {dimension_semantics = [#tpu.dimension_semantics<parallel>, #tpu.dimension_semantics<parallel>], iteration_bounds = array<i64: 2, 1>, scalar_prefetch = 0 : i64, scratch_operands = 1 : i64, tpu.core_type = #tpu.core_type<tc>, window_params = [{pipeline_mode = #tpu.pipeline_mode<synchronous>, transform_indices = @transform_0, window_bounds = array<i64: 1, 128>}, {pipeline_mode = #tpu.pipeline_mode<synchronous>, transform_indices = @transform_1, window_bounds = array<i64: 1, 128>}, {transform_indices = @transform_2, window_bounds = array<i64: 1, 16, 16, 128>}, {transform_indices = @transform_3, window_bounds = array<i64: 1, 1, 16, 128>}, {transform_indices = @transform_4, window_bounds = array<i64: 1, 1, 16, 128>}, {pipeline_mode = #tpu.pipeline_mode<synchronous>, transform_indices = @transform_5, window_bounds = array<i64: 3, 384, 128>}, {transform_indices = @transform_6, window_bounds = array<i64: 256, 128>}, {transform_indices = @transform_7, window_bounds = array<i64: 8, 128>}, {transform_indices = @transform_8, window_bounds = array<i64: 8, 128>}]} {
    %cst = arith.constant 0.000000e+00 : bf16
    %0 = vector.broadcast %cst : bf16 to vector<18x1x128xbf16>
    %c0 = arith.constant 0 : index
    %c0_0 = arith.constant 0 : index
    %c0_1 = arith.constant 0 : index
    %1 = vector.load %arg11[%c0, %c0_0, %c0_1] : memref<18x18x128xbf16, #tpu.memory_space<vmem>>, vector<18x1x128xbf16>
    tpu.vector_store %arg11[%c0, %c0_0, %c0_1], %0 {strides = array<i32>} : memref<18x18x128xbf16, #tpu.memory_space<vmem>>, vector<18x1x128xbf16>,
    %c0_2 = arith.constant 0 : index
    %c17 = arith.constant 17 : index
    %c0_3 = arith.constant 0 : index
    %2 = vector.load %arg11[%c0_2, %c17, %c0_3] : memref<18x18x128xbf16, #tpu.memory_space<vmem>>, vector<18x1x128xbf16>
    tpu.vector_store %arg11[%c0_2, %c17, %c0_3], %0 {strides = array<i32>} : memref<18x18x128xbf16, #tpu.memory_space<vmem>>, vector<18x1x128xbf16>,
    %c0_4 = arith.constant 0 : index
    %c0_5 = arith.constant 0 : index
    %c0_6 = arith.constant 0 : index
    %c0_7 = arith.constant 0 : index
    %3 = vector.load %arg4[%c0_4, %c0_5, %c0_6, %c0_7] : memref<1x16x16x128xbf16, #tpu.memory_space<vmem>>, vector<1x16x16x128xbf16>
    %4 = vector.shape_cast %3 : vector<1x16x16x128xbf16> to vector<16x16x128xbf16>
    %5 = arith.extf %4 : vector<16x16x128xbf16> to vector<16x16x128xf32>
    %c0_8 = arith.constant 0 : index
    %c0_9 = arith.constant 0 : index
    %6 = vector.load %arg2[%c0_8, %c0_9] : memref<1x128xf32, #tpu.memory_space<vmem>>, vector<1x128xf32>
    %7 = vector.shape_cast %6 : vector<1x128xf32> to vector<1x1x128xf32>
    %8 = vector.broadcast %7 : vector<1x1x128xf32> to vector<16x16x128xf32>
    %9 = arith.mulf %5, %8 : vector<16x16x128xf32>
    %c0_10 = arith.constant 0 : index
    %c0_11 = arith.constant 0 : index
    %10 = vector.load %arg3[%c0_10, %c0_11] : memref<1x128xf32, #tpu.memory_space<vmem>>, vector<1x128xf32>
    %11 = vector.shape_cast %10 : vector<1x128xf32> to vector<1x1x128xf32>
    %12 = vector.broadcast %11 : vector<1x1x128xf32> to vector<16x16x128xf32>
    %13 = arith.addf %9, %12 : vector<16x16x128xf32>
    %cst_12 = arith.constant 0.000000e+00 : f32
    %14 = vector.broadcast %cst_12 : f32 to vector<16x16x128xf32>
    %15 = arith.maximumf %13, %14 : vector<16x16x128xf32>
    %16 = arith.truncf %15 : vector<16x16x128xf32> to vector<16x16x128xbf16>
    %c1 = arith.constant 1 : index
    %c1_13 = arith.constant 1 : index
    %c0_14 = arith.constant 0 : index
    %17 = vector.load %arg11[%c1, %c1_13, %c0_14] : memref<18x18x128xbf16, #tpu.memory_space<vmem>>, vector<16x16x128xbf16>
    tpu.vector_store %arg11[%c1, %c1_13, %c0_14], %16 {strides = array<i32>} : memref<18x18x128xbf16, #tpu.memory_space<vmem>>, vector<16x16x128xbf16>,
    %cst_15 = arith.constant 0.000000e+00 : bf16
    %18 = vector.broadcast %cst_15 : bf16 to vector<1x16x128xbf16>
    %c0_i32 = arith.constant 0 : i32
    %19 = arith.cmpi eq, %arg1, %c0_i32 : i32
    %c0_16 = arith.constant 0 : index
    %c0_17 = arith.constant 0 : index
    %c0_18 = arith.constant 0 : index
    %c0_19 = arith.constant 0 : index
    %20 = vector.load %arg5[%c0_16, %c0_17, %c0_18, %c0_19] : memref<1x1x16x128xbf16, #tpu.memory_space<vmem>>, vector<1x1x16x128xbf16>
    %21 = vector.shape_cast %20 : vector<1x1x16x128xbf16> to vector<1x16x128xbf16>
    %22 = arith.extf %21 : vector<1x16x128xbf16> to vector<1x16x128xf32>
    %c0_20 = arith.constant 0 : index
    %c0_21 = arith.constant 0 : index
    %23 = vector.load %arg2[%c0_20, %c0_21] : memref<1x128xf32, #tpu.memory_space<vmem>>, vector<1x128xf32>
    %24 = vector.shape_cast %23 : vector<1x128xf32> to vector<1x1x128xf32>
    %25 = vector.broadcast %24 : vector<1x1x128xf32> to vector<1x16x128xf32>
    %26 = arith.mulf %22, %25 : vector<1x16x128xf32>
    %c0_22 = arith.constant 0 : index
    %c0_23 = arith.constant 0 : index
    %27 = vector.load %arg3[%c0_22, %c0_23] : memref<1x128xf32, #tpu.memory_space<vmem>>, vector<1x128xf32>
    %28 = vector.shape_cast %27 : vector<1x128xf32> to vector<1x1x128xf32>
    %29 = vector.broadcast %28 : vector<1x1x128xf32> to vector<1x16x128xf32>
    %30 = arith.addf %26, %29 : vector<1x16x128xf32>
    %cst_24 = arith.constant 0.000000e+00 : f32
    %31 = vector.broadcast %cst_24 : f32 to vector<1x16x128xf32>
    %32 = arith.maximumf %30, %31 : vector<1x16x128xf32>
    %33 = arith.truncf %32 : vector<1x16x128xf32> to vector<1x16x128xbf16>
    %34 = arith.select %19, %18, %33 : vector<1x16x128xbf16>
    %c0_25 = arith.constant 0 : index
    %c1_26 = arith.constant 1 : index
    %c0_27 = arith.constant 0 : index
    %35 = vector.load %arg11[%c0_25, %c1_26, %c0_27] : memref<18x18x128xbf16, #tpu.memory_space<vmem>>, vector<1x16x128xbf16>
    tpu.vector_store %arg11[%c0_25, %c1_26, %c0_27], %34 {strides = array<i32>} : memref<18x18x128xbf16, #tpu.memory_space<vmem>>, vector<1x16x128xbf16>,
    %c0_i32_28 = arith.constant 0 : i32
    %36 = arith.cmpi eq, %arg1, %c0_i32_28 : i32
    %c0_29 = arith.constant 0 : index
    %c0_30 = arith.constant 0 : index
    %c0_31 = arith.constant 0 : index
    %c0_32 = arith.constant 0 : index
    %37 = vector.load %arg6[%c0_29, %c0_30, %c0_31, %c0_32] : memref<1x1x16x128xbf16, #tpu.memory_space<vmem>>, vector<1x1x16x128xbf16>
    %38 = vector.shape_cast %37 : vector<1x1x16x128xbf16> to vector<1x16x128xbf16>
    %39 = arith.extf %38 : vector<1x16x128xbf16> to vector<1x16x128xf32>
    %c0_33 = arith.constant 0 : index
    %c0_34 = arith.constant 0 : index
    %40 = vector.load %arg2[%c0_33, %c0_34] : memref<1x128xf32, #tpu.memory_space<vmem>>, vector<1x128xf32>
    %41 = vector.shape_cast %40 : vector<1x128xf32> to vector<1x1x128xf32>
    %42 = vector.broadcast %41 : vector<1x1x128xf32> to vector<1x16x128xf32>
    %43 = arith.mulf %39, %42 : vector<1x16x128xf32>
    %c0_35 = arith.constant 0 : index
    %c0_36 = arith.constant 0 : index
    %44 = vector.load %arg3[%c0_35, %c0_36] : memref<1x128xf32, #tpu.memory_space<vmem>>, vector<1x128xf32>
    %45 = vector.shape_cast %44 : vector<1x128xf32> to vector<1x1x128xf32>
    %46 = vector.broadcast %45 : vector<1x1x128xf32> to vector<1x16x128xf32>
    %47 = arith.addf %43, %46 : vector<1x16x128xf32>
    %cst_37 = arith.constant 0.000000e+00 : f32
    %48 = vector.broadcast %cst_37 : f32 to vector<1x16x128xf32>
    %49 = arith.maximumf %47, %48 : vector<1x16x128xf32>
    %50 = arith.truncf %49 : vector<1x16x128xf32> to vector<1x16x128xbf16>
    %51 = arith.select %36, %18, %50 : vector<1x16x128xbf16>
    %c17_38 = arith.constant 17 : index
    %c1_39 = arith.constant 1 : index
    %c0_40 = arith.constant 0 : index
    %52 = vector.load %arg11[%c17_38, %c1_39, %c0_40] : memref<18x18x128xbf16, #tpu.memory_space<vmem>>, vector<1x16x128xbf16>
    tpu.vector_store %arg11[%c17_38, %c1_39, %c0_40], %51 {strides = array<i32>} : memref<18x18x128xbf16, #tpu.memory_space<vmem>>, vector<1x16x128xbf16>,
    %cst_41 = arith.constant 0.000000e+00 : f32
    %53 = vector.broadcast %cst_41 : f32 to vector<1x128xf32>
    %cst_42 = arith.constant 0.000000e+00 : f32
    %54 = vector.broadcast %cst_42 : f32 to vector<1x128xf32>
    %cst_43 = arith.constant 0.000000e+00 : f32
    %55 = vector.broadcast %cst_43 : f32 to vector<256x128xf32>
    %c0_44 = arith.constant 0 : index
    %c0_45 = arith.constant 0 : index
    %c0_46 = arith.constant 0 : index
    %56 = vector.load %arg11[%c0_44, %c0_45, %c0_46] : memref<18x18x128xbf16, #tpu.memory_space<vmem>>, vector<16x18x128xbf16>
    %57 = vector.extract_strided_slice %56 {offsets = [0, 0, 0], sizes = [16, 16, 128], strides = [1, 1, 1]} : vector<16x18x128xbf16> to vector<16x16x128xbf16>
    %58 = vector.extract_strided_slice %56 {offsets = [0, 1, 0], sizes = [16, 16, 128], strides = [1, 1, 1]} : vector<16x18x128xbf16> to vector<16x16x128xbf16>
    %59 = vector.extract_strided_slice %56 {offsets = [0, 2, 0], sizes = [16, 16, 128], strides = [1, 1, 1]} : vector<16x18x128xbf16> to vector<16x16x128xbf16>
    %60 = tpu.concatenate %57, %58, %59 in 2 : vector<16x16x128xbf16>, vector<16x16x128xbf16>, vector<16x16x128xbf16> -> vector<16x16x384xbf16>
    %61 = vector.shape_cast %60 : vector<16x16x384xbf16> to vector<256x384xbf16>
    %c0_47 = arith.constant 0 : index
    %c0_48 = arith.constant 0 : index
    %c0_49 = arith.constant 0 : index
    %62 = vector.load %arg7[%c0_47, %c0_48, %c0_49] : memref<3x384x128xbf16, #tpu.memory_space<vmem>>, vector<1x384x128xbf16>
    %63 = vector.shape_cast %62 : vector<1x384x128xbf16> to vector<384x128xbf16>
    %cst_50 = arith.constant dense<0.000000e+00> : vector<256x128xf32>
    %64 = tpu.matmul %61, %63, %cst_50 {dimension_numbers = #tpu.dot_dimension_numbers<[1], [0], [0], [1], [0, 0, 1, 1], [], []>} : vector<256x384xbf16>, vector<384x128xbf16>, vector<256x128xf32> -> vector<256x128xf32>
    %65 = arith.addf %55, %64 : vector<256x128xf32>
    %c1_51 = arith.constant 1 : index
    %c0_52 = arith.constant 0 : index
    %c0_53 = arith.constant 0 : index
    %66 = vector.load %arg11[%c1_51, %c0_52, %c0_53] : memref<18x18x128xbf16, #tpu.memory_space<vmem>>, vector<16x18x128xbf16>
    %67 = vector.extract_strided_slice %66 {offsets = [0, 0, 0], sizes = [16, 16, 128], strides = [1, 1, 1]} : vector<16x18x128xbf16> to vector<16x16x128xbf16>
    %68 = vector.extract_strided_slice %66 {offsets = [0, 1, 0], sizes = [16, 16, 128], strides = [1, 1, 1]} : vector<16x18x128xbf16> to vector<16x16x128xbf16>
    %69 = vector.extract_strided_slice %66 {offsets = [0, 2, 0], sizes = [16, 16, 128], strides = [1, 1, 1]} : vector<16x18x128xbf16> to vector<16x16x128xbf16>
    %70 = tpu.concatenate %67, %68, %69 in 2 : vector<16x16x128xbf16>, vector<16x16x128xbf16>, vector<16x16x128xbf16> -> vector<16x16x384xbf16>
    %71 = vector.shape_cast %70 : vector<16x16x384xbf16> to vector<256x384xbf16>
    %c1_54 = arith.constant 1 : index
    %c0_55 = arith.constant 0 : index
    %c0_56 = arith.constant 0 : index
    %72 = vector.load %arg7[%c1_54, %c0_55, %c0_56] : memref<3x384x128xbf16, #tpu.memory_space<vmem>>, vector<1x384x128xbf16>
    %73 = vector.shape_cast %72 : vector<1x384x128xbf16> to vector<384x128xbf16>
    %cst_57 = arith.constant dense<0.000000e+00> : vector<256x128xf32>
    %74 = tpu.matmul %71, %73, %cst_57 {dimension_numbers = #tpu.dot_dimension_numbers<[1], [0], [0], [1], [0, 0, 1, 1], [], []>} : vector<256x384xbf16>, vector<384x128xbf16>, vector<256x128xf32> -> vector<256x128xf32>
    %75 = arith.addf %65, %74 : vector<256x128xf32>
    %c2 = arith.constant 2 : index
    %c0_58 = arith.constant 0 : index
    %c0_59 = arith.constant 0 : index
    %76 = vector.load %arg11[%c2, %c0_58, %c0_59] : memref<18x18x128xbf16, #tpu.memory_space<vmem>>, vector<16x18x128xbf16>
    %77 = vector.extract_strided_slice %76 {offsets = [0, 0, 0], sizes = [16, 16, 128], strides = [1, 1, 1]} : vector<16x18x128xbf16> to vector<16x16x128xbf16>
    %78 = vector.extract_strided_slice %76 {offsets = [0, 1, 0], sizes = [16, 16, 128], strides = [1, 1, 1]} : vector<16x18x128xbf16> to vector<16x16x128xbf16>
    %79 = vector.extract_strided_slice %76 {offsets = [0, 2, 0], sizes = [16, 16, 128], strides = [1, 1, 1]} : vector<16x18x128xbf16> to vector<16x16x128xbf16>
    %80 = tpu.concatenate %77, %78, %79 in 2 : vector<16x16x128xbf16>, vector<16x16x128xbf16>, vector<16x16x128xbf16> -> vector<16x16x384xbf16>
    %81 = vector.shape_cast %80 : vector<16x16x384xbf16> to vector<256x384xbf16>
    %c2_60 = arith.constant 2 : index
    %c0_61 = arith.constant 0 : index
    %c0_62 = arith.constant 0 : index
    %82 = vector.load %arg7[%c2_60, %c0_61, %c0_62] : memref<3x384x128xbf16, #tpu.memory_space<vmem>>, vector<1x384x128xbf16>
    %83 = vector.shape_cast %82 : vector<1x384x128xbf16> to vector<384x128xbf16>
    %cst_63 = arith.constant dense<0.000000e+00> : vector<256x128xf32>
    %84 = tpu.matmul %81, %83, %cst_63 {dimension_numbers = #tpu.dot_dimension_numbers<[1], [0], [0], [1], [0, 0, 1, 1], [], []>} : vector<256x384xbf16>, vector<384x128xbf16>, vector<256x128xf32> -> vector<256x128xf32>
    %85 = arith.addf %75, %84 : vector<256x128xf32>
    %86 = arith.truncf %85 : vector<256x128xf32> to vector<256x128xbf16>
    %c0_64 = arith.constant 0 : index
    %c0_65 = arith.constant 0 : index
    %87 = vector.load %arg8[%c0_64, %c0_65] : memref<256x128xbf16, #tpu.memory_space<vmem>>, vector<256x128xbf16>
    tpu.vector_store %arg8[%c0_64, %c0_65], %86 {strides = array<i32>} : memref<256x128xbf16, #tpu.memory_space<vmem>>, vector<256x128xbf16>,
    %cst_66 = arith.constant dense<0.000000e+00> : vector<128xf32>
    %88 = vector.multi_reduction <add>, %85, %cst_66 [0] : vector<256x128xf32> to vector<128xf32>
    %89 = vector.shape_cast %88 : vector<128xf32> to vector<1x128xf32>
    %90 = arith.addf %53, %89 : vector<1x128xf32>
    %91 = arith.mulf %85, %85 : vector<256x128xf32>
    %cst_67 = arith.constant dense<0.000000e+00> : vector<128xf32>
    %92 = vector.multi_reduction <add>, %91, %cst_67 [0] : vector<256x128xf32> to vector<128xf32>
    %93 = vector.shape_cast %92 : vector<128xf32> to vector<1x128xf32>
    %94 = arith.addf %54, %93 : vector<1x128xf32>
    %95 = vector.shape_cast %90 : vector<1x128xf32> to vector<1x128xf32>
    %96 = vector.broadcast %95 : vector<1x128xf32> to vector<8x128xf32>
    %c0_68 = arith.constant 0 : index
    %c0_69 = arith.constant 0 : index
    %97 = vector.load %arg9[%c0_68, %c0_69] : memref<8x128xf32, #tpu.memory_space<vmem>>, vector<8x128xf32>
    tpu.vector_store %arg9[%c0_68, %c0_69], %96 {strides = array<i32>} : memref<8x128xf32, #tpu.memory_space<vmem>>, vector<8x128xf32>,
    %98 = vector.shape_cast %94 : vector<1x128xf32> to vector<1x128xf32>
    %99 = vector.broadcast %98 : vector<1x128xf32> to vector<8x128xf32>
    %c0_70 = arith.constant 0 : index
    %c0_71 = arith.constant 0 : index
    %100 = vector.load %arg10[%c0_70, %c0_71] : memref<8x128xf32, #tpu.memory_space<vmem>>, vector<8x128xf32>
    tpu.vector_store %arg10[%c0_70, %c0_71], %99 {strides = array<i32>} : memref<8x128xf32, #tpu.memory_space<vmem>>, vector<8x128xf32>,
    return
  }
  func.func @transform_0(%arg0: i32, %arg1: i32) -> (i32, i32) {
    %c0_i32 = arith.constant 0 : i32
    %c0_i32_0 = arith.constant 0 : i32
    %c0_i32_1 = arith.constant 0 : i32
    return %c0_i32, %c0_i32_0 : i32, i32
  }
  func.func @transform_1(%arg0: i32, %arg1: i32) -> (i32, i32) {
    %c0_i32 = arith.constant 0 : i32
    %c0_i32_0 = arith.constant 0 : i32
    %c0_i32_1 = arith.constant 0 : i32
    return %c0_i32, %c0_i32_0 : i32, i32
  }
  func.func @transform_2(%arg0: i32, %arg1: i32) -> (i32, i32, i32, i32) {
    %c0_i32 = arith.constant 0 : i32
    %c0_i32_0 = arith.constant 0 : i32
    %c0_i32_1 = arith.constant 0 : i32
    return %arg0, %arg1, %c0_i32, %c0_i32_0 : i32, i32, i32, i32
  }
  func.func @transform_3(%arg0: i32, %arg1: i32) -> (i32, i32, i32, i32) {
    %c16_i32 = arith.constant 16 : i32
    %0 = arith.muli %arg1, %c16_i32 : i32
    %c1_i32 = arith.constant 1 : i32
    %1 = arith.subi %0, %c1_i32 : i32
    %c0_i32 = arith.constant 0 : i32
    %2 = arith.maxsi %1, %c0_i32 : i32
    %c0_i32_0 = arith.constant 0 : i32
    %c0_i32_1 = arith.constant 0 : i32
    %c0_i32_2 = arith.constant 0 : i32
    return %arg0, %2, %c0_i32_0, %c0_i32_1 : i32, i32, i32, i32
  }
  func.func @transform_4(%arg0: i32, %arg1: i32) -> (i32, i32, i32, i32) {
    %c16_i32 = arith.constant 16 : i32
    %0 = arith.muli %arg1, %c16_i32 : i32
    %c16_i32_0 = arith.constant 16 : i32
    %1 = arith.addi %0, %c16_i32_0 : i32
    %c15_i32 = arith.constant 15 : i32
    %2 = arith.minsi %1, %c15_i32 : i32
    %c0_i32 = arith.constant 0 : i32
    %c0_i32_1 = arith.constant 0 : i32
    %c0_i32_2 = arith.constant 0 : i32
    return %arg0, %2, %c0_i32, %c0_i32_1 : i32, i32, i32, i32
  }
  func.func @transform_5(%arg0: i32, %arg1: i32) -> (i32, i32, i32) {
    %c0_i32 = arith.constant 0 : i32
    %c0_i32_0 = arith.constant 0 : i32
    %c0_i32_1 = arith.constant 0 : i32
    %c0_i32_2 = arith.constant 0 : i32
    return %c0_i32, %c0_i32_0, %c0_i32_1 : i32, i32, i32
  }
  func.func @transform_6(%arg0: i32, %arg1: i32) -> (i32, i32) {
    %c1_i32 = arith.constant 1 : i32
    %0 = arith.muli %arg0, %c1_i32 : i32
    %1 = arith.addi %0, %arg1 : i32
    %c0_i32 = arith.constant 0 : i32
    %c0_i32_0 = arith.constant 0 : i32
    return %1, %c0_i32 : i32, i32
  }
  func.func @transform_7(%arg0: i32, %arg1: i32) -> (i32, i32) {
    %c1_i32 = arith.constant 1 : i32
    %0 = arith.muli %arg0, %c1_i32 : i32
    %1 = arith.addi %0, %arg1 : i32
    %c0_i32 = arith.constant 0 : i32
    %c0_i32_0 = arith.constant 0 : i32
    return %1, %c0_i32 : i32, i32
  }
  func.func @transform_8(%arg0: i32, %arg1: i32) -> (i32, i32) {
    %c1_i32 = arith.constant 1 : i32
    %0 = arith.muli %arg0, %c1_i32 : i32
    %1 = arith.addi %0, %arg1 : i32
    %c0_i32 = arith.constant 0 : i32
    %c0_i32_0 = arith.constant 0 : i32
    return %1, %c0_i32 : i32, i32
  }
}

module attributes {stable_mosaic.version = 11 : i64} {
  func.func @_apply_kernel(%arg0: i32, %arg1: memref<256x128xbf16, #tpu.memory_space<vmem>>, %arg2: memref<1x128xf32, #tpu.memory_space<vmem>>, %arg3: memref<1x128xf32, #tpu.memory_space<vmem>>, %arg4: memref<256x128xf32, #tpu.memory_space<vmem>>) attributes {dimension_semantics = [#tpu.dimension_semantics<parallel>], iteration_bounds = array<i64: 2>, scalar_prefetch = 0 : i64, scratch_operands = 0 : i64, tpu.core_type = #tpu.core_type<tc>, window_params = [{transform_indices = @transform_0, window_bounds = array<i64: 256, 128>}, {pipeline_mode = #tpu.pipeline_mode<synchronous>, transform_indices = @transform_1, window_bounds = array<i64: 1, 128>}, {pipeline_mode = #tpu.pipeline_mode<synchronous>, transform_indices = @transform_2, window_bounds = array<i64: 1, 128>}, {transform_indices = @transform_3, window_bounds = array<i64: 256, 128>}]} {
    %c0 = arith.constant 0 : index
    %c0_0 = arith.constant 0 : index
    %0 = vector.load %arg1[%c0, %c0_0] : memref<256x128xbf16, #tpu.memory_space<vmem>>, vector<256x128xbf16>
    %1 = arith.extf %0 : vector<256x128xbf16> to vector<256x128xf32>
    %c0_1 = arith.constant 0 : index
    %c0_2 = arith.constant 0 : index
    %2 = vector.load %arg2[%c0_1, %c0_2] : memref<1x128xf32, #tpu.memory_space<vmem>>, vector<1x128xf32>
    %3 = vector.broadcast %2 : vector<1x128xf32> to vector<256x128xf32>
    %4 = arith.mulf %1, %3 : vector<256x128xf32>
    %c0_3 = arith.constant 0 : index
    %c0_4 = arith.constant 0 : index
    %5 = vector.load %arg3[%c0_3, %c0_4] : memref<1x128xf32, #tpu.memory_space<vmem>>, vector<1x128xf32>
    %6 = vector.broadcast %5 : vector<1x128xf32> to vector<256x128xf32>
    %7 = arith.addf %4, %6 : vector<256x128xf32>
    %cst = arith.constant 0.000000e+00 : f32
    %8 = vector.broadcast %cst : f32 to vector<256x128xf32>
    %9 = arith.maximumf %7, %8 : vector<256x128xf32>
    %c0_5 = arith.constant 0 : index
    %c0_6 = arith.constant 0 : index
    %10 = vector.load %arg4[%c0_5, %c0_6] : memref<256x128xf32, #tpu.memory_space<vmem>>, vector<256x128xf32>
    tpu.vector_store %arg4[%c0_5, %c0_6], %9 {strides = array<i32>} : memref<256x128xf32, #tpu.memory_space<vmem>>, vector<256x128xf32>,
    return
  }
  func.func @transform_0(%arg0: i32) -> (i32, i32) {
    %c0_i32 = arith.constant 0 : i32
    %c0_i32_0 = arith.constant 0 : i32
    return %arg0, %c0_i32 : i32, i32
  }
  func.func @transform_1(%arg0: i32) -> (i32, i32) {
    %c0_i32 = arith.constant 0 : i32
    %c0_i32_0 = arith.constant 0 : i32
    %c0_i32_1 = arith.constant 0 : i32
    return %c0_i32, %c0_i32_0 : i32, i32
  }
  func.func @transform_2(%arg0: i32) -> (i32, i32) {
    %c0_i32 = arith.constant 0 : i32
    %c0_i32_0 = arith.constant 0 : i32
    %c0_i32_1 = arith.constant 0 : i32
    return %c0_i32, %c0_i32_0 : i32, i32
  }
  func.func @transform_3(%arg0: i32) -> (i32, i32) {
    %c0_i32 = arith.constant 0 : i32
    %c0_i32_0 = arith.constant 0 : i32
    return %arg0, %c0_i32 : i32, i32
  }
}

</mosaic_0001>

<bundles_post_ra>
// kernel: double_conv_forward.5
= control target key start
LH: loop header
LB: loop body
LE: loop exit
PB: predicated region body
PF: predicated region fallthrough
CT: control target
= control target key end

     0   :  { %s564_s12 = smov 0   ;;  %s711_s0 = inlined_call_operand.vmem [shape: bf16[512,128], index: 0, kind: input, shape index: {}]   ;;  %s712_s1 = inlined_call_operand.vmem [shape: f32[1,128], index: 1, kind: input, shape index: {}]   ;;  %s713_s2 = inlined_call_operand.vmem [shape: f32[1,128], index: 2, kind: input, shape index: {}]   ;;  %s714_s3 = inlined_call_operand.vmem [shape: f32[512,128], index: 3, kind: output, shape index: {}]  }
   0x1 LB: > { %s436_s13 = sadd.s32 4294967295, %s542_s12   ;;  %p440_p0 = scmp.ge.s32.totalorder %s542_s12, 1  ;;  %s542_s12 = sphi %s564_s12, %s13_s12  }
   0x2   : > { %p138_p1 = scmp.lt.s32.totalorder %s542_s12, 3 }
   0x4   : > { %p139_p2 = pnand %p440_p0, %p138_p1 }
   0x5   : > { %s441_s14 = sshll.u32 (!%p139_p2), %s436_s13, 5  ;;  %v583_v0 = vld [vmem:[%s712_s1] ss:$0 sm:$0xff] (!%p139_p2) }
   0x6   : > { %142 = sbr.rel (%p139_p2) target bundleno = 53 (0x35), region = 32  ;;  %p163_p3 = scmp.lt.s32.totalorder (!%p139_p2), %s441_s14, 63  ;;  %v592_v9 = vld [vmem:[%s713_s2] ss:$0 sm:$0xff] (!%p139_p2) }
   0xd   : > { %s716_s14 = smov (!%p163_p3, %s441_s14), 63 }
   0xe   : > { %s442_s15 = sshll.u32 %s716_s14, 2  ;;  %s444_s23 = sshll.u32 %s716_s14, 3 }
   0xf   : > { %s578_s18 = scalar_lea.vmem %s711_s0, %s442_s15  ;;  %s610_s26 = scalar_lea.vmem %s714_s3, %s444_s23 }
  0x10   : > { %v450_v1 = vld [vmem:[%s578_s18] sm:$0xff]   ;;  %v513_v2 = vld [vmem:[%s578_s18 + $0x8] sm:$0xff]   ;;  %v514_v3 = vld [vmem:[%s578_s18 + $0x10] sm:$0xff]  }
  0x11   : > { %v451_v4 = vunpack.c.l.bf16 %v450_v1  ;;  %v452_v5 = vunpack.c.h.bf16 %v450_v1  ;;  %v455_v6 = vunpack.c.l.bf16 %v513_v2  ;;  %v456_v7 = vunpack.c.h.bf16 %v513_v2  ;;  %v515_v8 = vld [vmem:[%s578_s18 + $0x18] sm:$0xff]   ;;  %v516_v30 = vld [vmem:[%s578_s18 + $0x20] sm:$0xff]   ;;  %v517_v31 = vld [vmem:[%s578_s18 + $0x28] sm:$0xff]  }
  0x12   : > { %v459_v10 = vunpack.c.l.bf16 %v514_v3  ;;  %v460_v11 = vunpack.c.h.bf16 %v514_v3  ;;  %v463_v12 = vunpack.c.l.bf16 %v515_v8  ;;  %v464_v13 = vunpack.c.h.bf16 %v515_v8  ;;  %v518_v36 = vld [vmem:[%s578_s18 + $0x30] sm:$0xff]   ;;  %v519_v37 = vld [vmem:[%s578_s18 + $0x38] sm:$0xff]   ;;  %v520_v3 = vld [vmem:[%s578_s18 + $0x40] sm:$0xff]  }
  0x13   : > { %v245_v14 = vmul.f32 %v451_v4, %v583_v0  ;;  %v246_v15 = vmul.f32 %v452_v5, %v583_v0  ;;  %v247_v16 = vmul.f32 %v455_v6, %v583_v0  ;;  %v248_v17 = vmul.f32 %v456_v7, %v583_v0  ;;  %v521_v4 = vld [vmem:[%s578_s18 + $0x48] sm:$0xff]  }
  0x14   : > { %v249_v18 = vmul.f32 %v459_v10, %v583_v0  ;;  %v250_v19 = vmul.f32 %v460_v11, %v583_v0  ;;  %v251_v20 = vmul.f32 %v463_v12, %v583_v0  ;;  %v252_v21 = vmul.f32 %v464_v13, %v583_v0  ;;  %v522_v10 = vld [vmem:[%s578_s18 + $0x50] sm:$0xff]   ;;  %v523_v11 = vld [vmem:[%s578_s18 + $0x58] sm:$0xff]  }
  0x15   : > { %v284_v22 = vadd.f32 %v592_v9, %v245_v14  ;;  %v285_v23 = vadd.f32 %v592_v9, %v246_v15  ;;  %v286_v24 = vadd.f32 %v592_v9, %v247_v16  ;;  %v287_v25 = vadd.f32 %v592_v9, %v248_v17 }
  0x16   : > { %v288_v26 = vadd.f32 %v592_v9, %v249_v18  ;;  %v289_v27 = vadd.f32 %v592_v9, %v250_v19  ;;  %v290_v28 = vadd.f32 %v592_v9, %v251_v20  ;;  %v291_v29 = vadd.f32 %v592_v9, %v252_v21 }
  0x17   : > { %v316_v32 = vmax.f32 %v284_v22, 0.0  ;;  %v317_v33 = vmax.f32 %v285_v23, 0.0  ;;  %v318_v34 = vmax.f32 %v286_v24, 0.0  ;;  %v319_v35 = vmax.f32 %v287_v25, 0.0 }
  0x18   : > { %v320_v38 = vmax.f32 %v288_v26, 0.0  ;;  %v321_v39 = vmax.f32 %v289_v27, 0.0  ;;  %v322_v40 = vmax.f32 %v290_v28, 0.0  ;;  %v323_v41 = vmax.f32 %v291_v29, 0.0 }
  0x19   : > { %348 = vst [vmem:[%s610_s26] sm:$0xff] %v316_v32  ;;  %349 = vst [vmem:[%s610_s26 + $0x8] sm:$0xff] %v317_v33  ;;  %v467_v42 = vunpack.c.l.bf16 %v516_v30  ;;  %v468_v43 = vunpack.c.h.bf16 %v516_v30  ;;  %v471_v44 = vunpack.c.l.bf16 %v517_v31  ;;  %v472_v45 = vunpack.c.h.bf16 %v517_v31 }
  0x1a   : > { %350 = vst [vmem:[%s610_s26 + $0x10] sm:$0xff] %v318_v34  ;;  %351 = vst [vmem:[%s610_s26 + $0x18] sm:$0xff] %v319_v35  ;;  %v475_v46 = vunpack.c.l.bf16 %v518_v36  ;;  %v476_v47 = vunpack.c.h.bf16 %v518_v36  ;;  %v479_v48 = vunpack.c.l.bf16 %v519_v37  ;;  %v480_v49 = vunpack.c.h.bf16 %v519_v37 }
  0x1b   : > { %352 = vst [vmem:[%s610_s26 + $0x20] sm:$0xff] %v320_v38  ;;  %353 = vst [vmem:[%s610_s26 + $0x28] sm:$0xff] %v321_v39  ;;  %v253_v50 = vmul.f32 %v467_v42, %v583_v0  ;;  %v254_v51 = vmul.f32 %v468_v43, %v583_v0  ;;  %v255_v52 = vmul.f32 %v471_v44, %v583_v0  ;;  %v483_v16 = vunpack.c.l.bf16 %v520_v3 }
  0x1c   : > { %354 = vst [vmem:[%s610_s26 + $0x30] sm:$0xff] %v322_v40  ;;  %355 = vst [vmem:[%s610_s26 + $0x38] sm:$0xff] %v323_v41  ;;  %v256_v53 = vmul.f32 %v472_v45, %v583_v0  ;;  %v257_v54 = vmul.f32 %v475_v46, %v583_v0  ;;  %v258_v55 = vmul.f32 %v476_v47, %v583_v0  ;;  %v484_v17 = vunpack.c.h.bf16 %v520_v3  ;;  %v524_v40 = vld [vmem:[%s578_s18 + $0x60] sm:$0xff]   ;;  %v525_v41 = vld [vmem:[%s578_s18 + $0x68] sm:$0xff]  }
  0x1d   : > { %v259_v56 = vmul.f32 %v479_v48, %v583_v0  ;;  %v260_v57 = vmul.f32 %v480_v49, %v583_v0  ;;  %v292_v58 = vadd.f32 %v592_v9, %v253_v50  ;;  %v293_v59 = vadd.f32 %v592_v9, %v254_v51  ;;  %v526_v46 = vld [vmem:[%s578_s18 + $0x70] sm:$0xff]   ;;  %v527_v47 = vld [vmem:[%s578_s18 + $0x78] sm:$0xff]  }
  0x1e   : > { %v294_v60 = vadd.f32 %v592_v9, %v255_v52  ;;  %v295_v61 = vadd.f32 %v592_v9, %v256_v53  ;;  %v296_v62 = vadd.f32 %v592_v9, %v257_v54  ;;  %v297_v63 = vadd.f32 %v592_v9, %v258_v55 }
  0x1f   : > { %v298_v1 = vadd.f32 %v592_v9, %v259_v56  ;;  %v299_v2 = vadd.f32 %v592_v9, %v260_v57  ;;  %v324_v5 = vmax.f32 %v292_v58, 0.0  ;;  %v325_v6 = vmax.f32 %v293_v59, 0.0 }
  0x20   : > { %v326_v7 = vmax.f32 %v294_v60, 0.0  ;;  %v327_v8 = vmax.f32 %v295_v61, 0.0  ;;  %v328_v12 = vmax.f32 %v296_v62, 0.0  ;;  %v329_v13 = vmax.f32 %v297_v63, 0.0 }
  0x21   : > { %v330_v14 = vmax.f32 %v298_v1, 0.0  ;;  %v331_v15 = vmax.f32 %v299_v2, 0.0  ;;  %356 = vst [vmem:[%s610_s26 + $0x40] sm:$0xff] %v324_v5  ;;  %357 = vst [vmem:[%s610_s26 + $0x48] sm:$0xff] %v325_v6  ;;  %v487_v18 = vunpack.c.l.bf16 %v521_v4  ;;  %v488_v19 = vunpack.c.h.bf16 %v521_v4 }
  0x22   : > { %358 = vst [vmem:[%s610_s26 + $0x50] sm:$0xff] %v326_v7  ;;  %359 = vst [vmem:[%s610_s26 + $0x58] sm:$0xff] %v327_v8  ;;  %v491_v20 = vunpack.c.l.bf16 %v522_v10  ;;  %v492_v21 = vunpack.c.h.bf16 %v522_v10  ;;  %v495_v22 = vunpack.c.l.bf16 %v523_v11  ;;  %v496_v23 = vunpack.c.h.bf16 %v523_v11 }
  0x23   : > { %360 = vst [vmem:[%s610_s26 + $0x60] sm:$0xff] %v328_v12  ;;  %361 = vst [vmem:[%s610_s26 + $0x68] sm:$0xff] %v329_v13  ;;  %v261_v24 = vmul.f32 %v483_v16, %v583_v0  ;;  %v262_v25 = vmul.f32 %v484_v17, %v583_v0  ;;  %v263_v26 = vmul.f32 %v487_v18, %v583_v0  ;;  %v499_v52 = vunpack.c.l.bf16 %v524_v40 }
  0x24   : > { %362 = vst [vmem:[%s610_s26 + $0x70] sm:$0xff] %v330_v14  ;;  %363 = vst [vmem:[%s610_s26 + $0x78] sm:$0xff] %v331_v15  ;;  %v264_v27 = vmul.f32 %v488_v19, %v583_v0  ;;  %v265_v28 = vmul.f32 %v491_v20, %v583_v0  ;;  %v266_v29 = vmul.f32 %v492_v21, %v583_v0  ;;  %v500_v53 = vunpack.c.h.bf16 %v524_v40 }
  0x25   : > { %v267_v30 = vmul.f32 %v495_v22, %v583_v0  ;;  %v268_v31 = vmul.f32 %v496_v23, %v583_v0  ;;  %v300_v32 = vadd.f32 %v592_v9, %v261_v24  ;;  %v301_v33 = vadd.f32 %v592_v9, %v262_v25 }
  0x26   : > { %v302_v34 = vadd.f32 %v592_v9, %v263_v26  ;;  %v303_v35 = vadd.f32 %v592_v9, %v264_v27  ;;  %v304_v36 = vadd.f32 %v592_v9, %v265_v28  ;;  %v305_v37 = vadd.f32 %v592_v9, %v266_v29 }
  0x27   : > { %v306_v38 = vadd.f32 %v592_v9, %v267_v30  ;;  %v307_v39 = vadd.f32 %v592_v9, %v268_v31  ;;  %v332_v42 = vmax.f32 %v300_v32, 0.0  ;;  %v333_v43 = vmax.f32 %v301_v33, 0.0 }
  0x28   : > { %v334_v44 = vmax.f32 %v302_v34, 0.0  ;;  %v335_v45 = vmax.f32 %v303_v35, 0.0  ;;  %v336_v48 = vmax.f32 %v304_v36, 0.0  ;;  %v337_v49 = vmax.f32 %v305_v37, 0.0 }
  0x29   : > { %v338_v50 = vmax.f32 %v306_v38, 0.0  ;;  %v339_v51 = vmax.f32 %v307_v39, 0.0  ;;  %364 = vst [vmem:[%s610_s26 + $0x80] sm:$0xff] %v332_v42  ;;  %365 = vst [vmem:[%s610_s26 + $0x88] sm:$0xff] %v333_v43  ;;  %v503_v54 = vunpack.c.l.bf16 %v525_v41  ;;  %v504_v55 = vunpack.c.h.bf16 %v525_v41 }
  0x2a   : > { %366 = vst [vmem:[%s610_s26 + $0x90] sm:$0xff] %v334_v44  ;;  %367 = vst [vmem:[%s610_s26 + $0x98] sm:$0xff] %v335_v45  ;;  %v507_v56 = vunpack.c.l.bf16 %v526_v46  ;;  %v508_v57 = vunpack.c.h.bf16 %v526_v46  ;;  %v511_v58 = vunpack.c.l.bf16 %v527_v47  ;;  %v512_v59 = vunpack.c.h.bf16 %v527_v47 }
  0x2b   : > { %368 = vst [vmem:[%s610_s26 + $0xa0] sm:$0xff] %v336_v48  ;;  %369 = vst [vmem:[%s610_s26 + $0xa8] sm:$0xff] %v337_v49  ;;  %v269_v60 = vmul.f32 %v499_v52, %v583_v0  ;;  %v270_v61 = vmul.f32 %v500_v53, %v583_v0  ;;  %v271_v62 = vmul.f32 %v503_v54, %v583_v0 }
  0x2c   : > { %370 = vst [vmem:[%s610_s26 + $0xb0] sm:$0xff] %v338_v50  ;;  %371 = vst [vmem:[%s610_s26 + $0xb8] sm:$0xff] %v339_v51  ;;  %v272_v63 = vmul.f32 %v504_v55, %v583_v0  ;;  %v273_v1 = vmul.f32 %v507_v56, %v583_v0  ;;  %v274_v2 = vmul.f32 %v508_v57, %v583_v0 }
  0x2d   : > { %v275_v3 = vmul.f32 %v511_v58, %v583_v0  ;;  %v276_v4 = vmul.f32 %v512_v59, %v583_v0  ;;  %v308_v5 = vadd.f32 %v592_v9, %v269_v60  ;;  %v309_v6 = vadd.f32 %v592_v9, %v270_v61 }
  0x2e   : > { %v310_v7 = vadd.f32 %v592_v9, %v271_v62  ;;  %v311_v8 = vadd.f32 %v592_v9, %v272_v63  ;;  %v312_v10 = vadd.f32 %v592_v9, %v273_v1  ;;  %v313_v11 = vadd.f32 %v592_v9, %v274_v2 }
  0x2f   : > { %v314_v0 = vadd.f32 %v592_v9, %v275_v3  ;;  %v315_v12 = vadd.f32 %v592_v9, %v276_v4  ;;  %v340_v13 = vmax.f32 %v308_v5, 0.0  ;;  %v341_v14 = vmax.f32 %v309_v6, 0.0 }
  0x30   : > { %v342_v15 = vmax.f32 %v310_v7, 0.0  ;;  %v343_v16 = vmax.f32 %v311_v8, 0.0  ;;  %v344_v17 = vmax.f32 %v312_v10, 0.0  ;;  %v345_v18 = vmax.f32 %v313_v11, 0.0 }
  0x31   : > { %v346_v19 = vmax.f32 %v314_v0, 0.0  ;;  %v347_v20 = vmax.f32 %v315_v12, 0.0  ;;  %372 = vst [vmem:[%s610_s26 + $0xc0] sm:$0xff] %v340_v13  ;;  %373 = vst [vmem:[%s610_s26 + $0xc8] sm:$0xff] %v341_v14 }
  0x32   : > { %374 = vst [vmem:[%s610_s26 + $0xd0] sm:$0xff] %v342_v15  ;;  %375 = vst [vmem:[%s610_s26 + $0xd8] sm:$0xff] %v343_v16 }
  0x33   : > { %376 = vst [vmem:[%s610_s26 + $0xe0] sm:$0xff] %v344_v17  ;;  %377 = vst [vmem:[%s610_s26 + $0xe8] sm:$0xff] %v345_v18 }
  0x34   : > { %378 = vst [vmem:[%s610_s26 + $0xf0] sm:$0xff] %v346_v19  ;;  %379 = vst [vmem:[%s610_s26 + $0xf8] sm:$0xff] %v347_v20 }
  0x35 PF: > { %s13_s12 = sadd.s32 1, %s542_s12  }
  0x36   : > { %p10_p4 = scmp.ge.s32.totalorder %s13_s12, 4  }
  0x38   :  { %12 = sbr.rel (!%p10_p4) target bundleno = 1 (0x1), region = 62 }

// kernel: double_conv_forward.4
= control target key start
LH: loop header
LB: loop body
LE: loop exit
PB: predicated region body
PF: predicated region fallthrough
CT: control target
= control target key end

     0   :  { %s6493_s27 = smov 0   ;;  %s6495_s28 = smov 0   ;;  %s7917_s0 = inlined_call_operand.vmem [shape: f32[1,128], index: 0, kind: input, shape index: {}]   ;;  %s7918_s1 = inlined_call_operand.vmem [shape: f32[1,128], index: 1, kind: input, shape index: {}]   ;;  %s7919_s2 = inlined_call_operand.vmem [shape: bf16[2,16,16,128], index: 2, kind: input, shape index: {}, may-alias: {2,3,4}]   ;;  %s7920_s3 = inlined_call_operand.vmem [shape: bf16[2,16,16,128], index: 3, kind: input, shape index: {}, may-alias: {2,3,4}]   ;;  %s7921_s4 = inlined_call_operand.vmem [shape: bf16[2,16,16,128], index: 4, kind: input, shape index: {}, may-alias: {2,3,4}]   ;;  %s7922_s5 = inlined_call_operand.vmem [shape: bf16[3,384,128], index: 5, kind: input, shape index: {}]   ;;  %s7923_s6 = inlined_call_operand.vmem [shape: bf16[512,128], index: 6, kind: output, shape index: {0}]   ;;  %s7924_s7 = inlined_call_operand.vmem [shape: f32[16,128], index: 7, kind: output, shape index: {1}]   ;;  %s7925_s8 = inlined_call_operand.vmem [shape: f32[16,128], index: 8, kind: output, shape index: {2}]  }
   0x1   :  { %s6497_s3 = smov 0  }
   0x2 LB: > { %s31_s4 = sadd.s32 1, %s6441_s28  ;;  %p4872_p0 = scmp.ge.s32.totalorder %s6445_s3, 1  ;;  %s6445_s3 = sphi %s6497_s3, %s19_s3   ;;  %s6441_s28 = sphi %s6495_s28, %s7941_s28   ;;  %s6437_s27 = sphi %s6493_s27, %s7940_s27  }
   0x3   : > { %p33_p1 = scmp.ge.s32.totalorder %s31_s4, 2  ;;  %p357_p2 = scmp.lt.s32.totalorder %s6445_s3, 3 }
   0x5   : > { %s7943_s4 = smov (%p33_p1, %s31_s4), 0  ;;  %p358_p3 = pnand %p4872_p0, %p357_p2 }
   0x7   : > { %361 = sbr.rel (%p358_p3) target bundleno = 641 (0x281), region = 44 }
   0xe   : > { %v6516_v0 = vld [vmem:[%s7922_s5 + $0x140] sm:$0xff]   ;;  %v6529_v3 = vld [vmem:[%s7922_s5 + $0x148] sm:$0xff]   ;;  %v6541_v6 = vld [vmem:[%s7922_s5 + $0x150] sm:$0xff]   ;;  %v6447_v8 = vmov 0   ;;  %p434_p4 = scmp.lt.s32.totalorder %s6437_s27, 1  ;;  %vm499_vm0 = vcmask 1040384  }
   0xf   : > { %v6219_v1 = vld [vmem:[%s7922_s5 + $0x100] sm:$0xff]   ;;  %6017 = vmatprep.subr.bf16.mxu1 %v6516_v0  ;;  %v6222_v4 = vld [vmem:[%s7922_s5 + $0x108] sm:$0xff]   ;;  %v6225_v7 = vld [vmem:[%s7922_s5 + $0x110] sm:$0xff]   ;;  %v4919_v9 = vcombine.low %v6447_v8, %v6447_v8  ;;  %v4920_v14 = vcombine.high %v6447_v8, %v6447_v8  ;;  %vm500_vm1 = vsmask.f32 256  ;;  %vm1205_vm7 = vcmask 1043456  }
  0x10   : > { %v6220_v2 = vld [vmem:[%s7922_s5 + $0xc0] sm:$0xff]   ;;  %6025 = vmatpush3.bf16.msra.mxu1 %v6516_v0  ;;  %5465 = vmatprep.subr.bf16.mxu0 %v6219_v1  ;;  %v6223_v5 = vld [vmem:[%s7922_s5 + $0xc8] sm:$0xff]   ;;  %v6226_v10 = vld [vmem:[%s7922_s5 + $0xd0] sm:$0xff]   ;;  %s6578_s15 = scalar_select %p434_p4, %s6437_s27, 1  ;;  %vm556_vm2 = vsmask.f32 7938 }
  0x11   : > { %5466 = vmatpush3.bf16.msra.mxu0 %v6220_v2  ;;  %6018 = vmatprep.subr.bf16.mxu1 %v6529_v3  ;;  %v6555_v11 = vld [vmem:[%s7922_s5 + $0x158] sm:$0xff]   ;;  %v1355_v12 = vshrl.u32 %v4919_v9, 16  ;;  %v1358_v15 = vshll.u32 %v4919_v9, 16  ;;  %v6568_v18 = vld [vmem:[%s7922_s5 + $0x160] sm:$0xff]   ;;  %v1363_v21 = vshrl.u32 %v4920_v14, 16  ;;  %v6588_v23 = vld [vmem:[%s7922_s5 + $0x168] sm:$0xff]  }
  0x12   : > { %5467 = vmatprep.subr.bf16.mxu0 %v6222_v4  ;;  %v6228_v13 = vld [vmem:[%s7922_s5 + $0x118] sm:$0xff]   ;;  %v6231_v19 = vld [vmem:[%s7922_s5 + $0x120] sm:$0xff]   ;;  %v6234_v24 = vld [vmem:[%s7922_s5 + $0x128] sm:$0xff]   ;;  %s5223_s22 = sshll.u32 %s6578_s15, 7  ;;  %v1366_v27 = vshll.u32 %v4920_v14, 16  ;;  %vm1841_vm9 = vcmask 1046528  }
  0x13   : > { %v6229_v16 = vld [vmem:[%s7922_s5 + $0xd8] sm:$0xff]   ;;  %v1357_v17 = vrot.slane %v1355_v12, 7  ;;  %v6232_v22 = vld [vmem:[%s7922_s5 + $0xe0] sm:$0xff]   ;;  %v6594_v25 = vrot.slane %v1363_v21, 7  ;;  %v6235_v26 = vld [vmem:[%s7922_s5 + $0xe8] sm:$0xff]   ;;  %s6610_s11 = scalar_lea.vmem %s7919_s2, %s5223_s22  ;;  %s4879_s19 = sshll.u32 %s6437_s27, 5 }
  0x14   : > { %6026 = vmatpush3.bf16.msra.mxu1 %v6529_v3  ;;  %v6236_v28 = vld [vmem:[%s7922_s5 + $0x170] sm:$0xff]   ;;  %v6239_v31 = vld [vmem:[%s7922_s5 + $0x178] sm:$0xff]   ;;  %v529_v34 = vld [vmem:[#allocation2 + $0x6c] sm:$0x1]  ;;  %vm882_vm4 = vsmask.f32 4368 }
  0x15   : > { %5468 = vmatpush3.bf16.msra.mxu0 %v6223_v5  ;;  %6019 = vmatprep.subr.bf16.mxu1 %v6541_v6  ;;  %v6573_v20 = vor.u32 %v1358_v15, %v1357_v17  ;;  %v6237_v29 = vld [vmem:[%s7922_s5 + $0x130] sm:$0xff]   ;;  %v1361_v32 = vrot.slane %v1357_v17, 4  ;;  %v6240_v33 = vld [vmem:[%s7922_s5 + $0x138] sm:$0xff]   ;;  %v1368_v35 = vor.u32 %v1366_v27, %v6594_v25  ;;  %vm6625_vm3 = vmand %vm499_vm0, %vm500_vm1  ;;  %v1370_v21 = vrot.slane %v6594_v25, 4  ;;  %p480_p5 = scmp.lt.s32.totalorder %s4879_s19, 63  ;;  %s4881_s23 = sshll.u32 %s6578_s15, 3 }
  0x16   : > { %5469 = vmatprep.subr.bf16.mxu0 %v6225_v7  ;;  %v6238_v30 = vld [vmem:[%s7922_s5 + $0xf0] sm:$0xff]   ;;  %v5442_v38 = vld [vmem:[%s6610_s11 + $0x40] sm:$0xff]   ;;  %v530_v39 = vsel %vm6625_vm3, 0, %v529_v34  ;;  %vm6634_vm5 = vmand %vm499_vm0, %vm556_vm2  ;;  %vm1632_vm10 = vsmask.f32 7424  ;;  %s490_s26 = scalar_lea.vmem %s7924_s7, %s4881_s23  ;;  %s496_s9 = scalar_lea.vmem %s7925_s8, %s4881_s23 }
  0x17   : > { %v585_v37 = vld [vmem:[#allocation2 + $0x74] sm:$0x1]  ;;  %v5325_v41 = vunpack.c.l.bf16 %v5442_v38  ;;  %v5326_v42 = vunpack.c.h.bf16 %v5442_v38  ;;  %v6641_v43 = vld [vmem:[%s7917_s0] ss:$0 sm:$0xff]  ;;  %531 = vst [vmem:[#allocation2 + $0x6c] sm:$0x1] %v530_v39  ;;  %vm6651_vm6 = vmor %vm500_vm1, %vm882_vm4 }
  0x18   : > { %6027 = vmatpush3.bf16.msra.mxu1 %v6541_v6  ;;  %v6646_v44 = vld [vmem:[%s7918_s1] ss:$0 sm:$0xff]  ;;  %v586_v45 = vsel %vm6634_vm5, 0, %v585_v37  ;;  %v6243_v49 = vld [vmem:[%s7922_s5 + $0xf8] sm:$0xff]   ;;  %v1369_v51 = vsel %vm6651_vm6, %v1361_v32, %v1368_v35  ;;  %v5443_v54 = vld [vmem:[%s6610_s11 + $0x48] sm:$0xff]   ;;  %s7945_s19 = smov (!%p480_p5, %s4879_s19), 63 }
  0x19   : > { %5470 = vmatpush3.bf16.msra.mxu0 %v6226_v10  ;;  %6020 = vmatprep.subr.bf16.mxu1 %v6555_v11  ;;  %587 = vst [vmem:[#allocation2 + $0x74] sm:$0x1] %v586_v45  ;;  %v699_v47 = vmul.f32 %v5325_v41, %v6641_v43  ;;  %v700_v48 = vmul.f32 %v5326_v42, %v6641_v43  ;;  %v532_v50 = vld [vmem:[#allocation2 + $0x78] sm:$0x1]  ;;  %v588_v53 = vld [vmem:[#allocation2 + $0x80] sm:$0x1]  ;;  %v5329_v58 = vunpack.c.l.bf16 %v5443_v54  ;;  %v5330_v60 = vunpack.c.h.bf16 %v5443_v54  ;;  %vm6693_vm8 = vmand %vm1205_vm7, %vm556_vm2 }
  0x1a   : > { %5471 = vmatprep.subr.bf16.mxu0 %v6228_v13  ;;  %v533_v52 = vsel %vm6625_vm3, 0, %v532_v50  ;;  %1377 = vst [vmem:[#allocation2 + $0x4] sm:$0xf] %v1369_v51  ;;  %1436 = vst [vmem:[#allocation2 + $0xd0] sm:$0xf] %v1369_v51  ;;  %v589_v57 = vsel %vm6634_vm5, 0, %v588_v53 }
  0x1b   : > { %v738_v55 = vadd.f32 %v6646_v44, %v699_v47  ;;  %v739_v56 = vadd.f32 %v6646_v44, %v700_v48  ;;  %534 = vst [vmem:[#allocation2 + $0x78] sm:$0x1] %v533_v52  ;;  %v6246_v59 = vld [vmem:[%s7922_s5 + $0x40] sm:$0xff]   ;;  %590 = vst [vmem:[#allocation2 + $0x80] sm:$0x1] %v589_v57  ;;  %v701_v1 = vmul.f32 %v5329_v58, %v6641_v43  ;;  %v5444_v53 = vld [vmem:[%s6610_s11 + $0x50] sm:$0xff]  }
  0x1c   : > { %6028 = vmatpush3.bf16.msra.mxu1 %v6555_v11  ;;  %v505_v61 = vld [vmem:[#allocation2 + $0xc] sm:$0x1]  ;;  %v561_v4 = vld [vmem:[#allocation2 + $0x14] sm:$0x1]  ;;  %v5292_v5 = vld [vmem:[%s6610_s11] sm:$0xff]   ;;  %v702_v7 = vmul.f32 %v5330_v60, %v6641_v43  ;;  %s4880_s27 = sshll.u32 %s7945_s19, 2 }
  0x1d   : > { %5472 = vmatpush3.bf16.msra.mxu0 %v6229_v16  ;;  %6021 = vmatprep.subr.bf16.mxu1 %v6568_v18  ;;  %v770_v62 = vmax.f32 %v738_v55, 0.0  ;;  %v771_v63 = vmax.f32 %v739_v56, 0.0  ;;  %v506_v2 = vsel %vm6625_vm3, 0, %v505_v61  ;;  %v562_v8 = vsel %vm6634_vm5, 0, %v561_v4  ;;  %v538_v58 = vld [vmem:[#allocation2 + $0x90] sm:$0x1]  ;;  %s7851_s22 = scalar_lea.vmem %s7923_s6, %s4880_s27 }
  0x1e   : > { %5473 = vmatprep.subr.bf16.mxu0 %v6231_v19  ;;  %507 = vst [vmem:[#allocation2 + $0xc] sm:$0x1] %v506_v2  ;;  %v5293_v9 = vunpack.c.l.bf16 %v5292_v5  ;;  %v5294_v10 = vunpack.c.h.bf16 %v5292_v5  ;;  %v740_v14 = vadd.f32 %v6646_v44, %v701_v1  ;;  %563 = vst [vmem:[#allocation2 + $0x14] sm:$0x1] %v562_v8  ;;  %v741_v15 = vadd.f32 %v6646_v44, %v702_v7  ;;  %v535_v19 = vld [vmem:[#allocation2 + $0x84] sm:$0x1] }
  0x1f   : > { %v5243_v12 = vpack.c.bf16 %v770_v62, %v770_v62  ;;  %v5244_v13 = vpack.c.bf16 %v771_v63, %v771_v63  ;;  %v536_v35 = vsel %vm6625_vm3, 0, %v535_v19  ;;  %v1263_v39 = vld [vmem:[#allocation2 + $0x6c] sm:$0xf]  ;;  %v5333_v5 = vunpack.c.l.bf16 %v5444_v53  ;;  %v6342_v38 = vld [vmem:[%s7922_s5 + $0x1f0] sm:$0xff]  }
  0x20   : > { %6029 = vmatpush3.bf16.msra.mxu1 %v6568_v18  ;;  %v683_v16 = vmul.f32 %v5293_v9, %v6641_v43  ;;  %v684_v17 = vmul.f32 %v5294_v10, %v6641_v43  ;;  %v1267_v41 = vld [vmem:[#allocation2 + $0x74] sm:$0x1]  ;;  %537 = vst [vmem:[#allocation2 + $0x84] sm:$0x1] %v536_v35  ;;  %v5334_v10 = vunpack.c.h.bf16 %v5444_v53 }
  0x21   : > { %5474 = vmatpush3.bf16.msra.mxu0 %v6232_v22  ;;  %6022 = vmatprep.subr.bf16.mxu1 %v6588_v23  ;;  %v1021_v22 = vshrl.u32 %v5243_v12, 16  ;;  %v1032_v27 = vshll.u32 %v5244_v13, 16 }
  0x22   : > { %5475 = vmatprep.subr.bf16.mxu0 %v6234_v24  ;;  %v1024_v24 = vshll.u32 %v5243_v12, 16  ;;  %v723_v32 = vadd.f32 %v6646_v44, %v684_v17  ;;  %v1270_v2 = vld [vmem:[#allocation2 + $0x78] sm:$0xf]  ;;  %v1274_v7 = vld [vmem:[#allocation2 + $0x80] sm:$0x1]  ;;  %v539_v12 = vsel %vm6625_vm3, 0, %v538_v58 }
  0x23   : > { %540 = vst [vmem:[#allocation2 + $0x90] sm:$0x1] %v539_v12  ;;  %v594_v17 = vld [vmem:[#allocation2 + $0x98] sm:$0x1] }
  0x24   : > { %6030 = vmatpush3.bf16.msra.mxu1 %v6588_v23  ;;  %v755_v48 = vmax.f32 %v723_v32, 0.0  ;;  %v704_v32 = vmul.f32 %v5334_v10, %v6641_v43 }
  0x25   : > { %5476 = vmatpush3.bf16.msra.mxu0 %v6235_v26  ;;  %6023 = vmatprep.subr.bf16.mxu1 %v6236_v28  ;;  %v1029_v26 = vshrl.u32 %v5244_v13, 16 }
  0x26   : > { %5477 = vmatprep.subr.bf16.mxu0 %v6237_v29  ;;  %v772_v29 = vmax.f32 %v740_v14, 0.0  ;;  %v5228_v4 = vpack.c.bf16 %v755_v48, %v755_v48 }
  0x27   : > { %v1031_v34 = vrot.slane %v1029_v26, 7  ;;  %v1207_v26 = vld [vmem:[#allocation2 + $0xc] sm:$0xf] }
  0x28   : > { %6031 = vmatpush3.bf16.msra.mxu1 %v6236_v28  ;;  %v591_v28 = vld [vmem:[#allocation2 + $0x8c] sm:$0x1]  ;;  %v5245_v42 = vpack.c.bf16 %v772_v29, %v772_v29 }
  0x29   : > { %5478 = vmatpush3.bf16.msra.mxu0 %v6238_v30  ;;  %6024 = vmatprep.subr.bf16.mxu1 %v6239_v31  ;;  %v773_v30 = vmax.f32 %v741_v15, 0.0  ;;  %v592_v37 = vsel %vm6634_vm5, 0, %v591_v28  ;;  %v1034_v51 = vor.u32 %v1032_v27, %v1031_v34  ;;  %v1036_v52 = vrot.slane %v1031_v34, 4  ;;  %v5445_v28 = vld [vmem:[%s6610_s11 + $0x58] sm:$0xff]  }
  0x2a   : > { %5479 = vmatprep.subr.bf16.mxu0 %v6240_v33  ;;  %v1023_v33 = vrot.slane %v1021_v22, 7  ;;  %593 = vst [vmem:[#allocation2 + $0x8c] sm:$0x1] %v592_v37  ;;  %v1038_v54 = vshrl.u32 %v5245_v42, 16  ;;  %v1041_v55 = vshll.u32 %v5245_v42, 16  ;;  %v893_v22 = vshrl.u32 %v5228_v4, 16 }
  0x2b   : > { %v5246_v45 = vpack.c.bf16 %v773_v30, %v773_v30  ;;  %v1268_v61 = vsel %vm6625_vm3, %v1036_v52, %v1267_v41  ;;  %v703_v27 = vmul.f32 %v5333_v5, %v6641_v43  ;;  %v743_v42 = vadd.f32 %v6646_v44, %v704_v32 }
  0x2c   : > { %6032 = vmatpush3.bf16.msra.mxu1 %v6239_v31  ;;  %v722_v31 = vadd.f32 %v6646_v44, %v683_v16  ;;  %v1027_v50 = vrot.slane %v1023_v33, 4  ;;  %1269 = vst [vmem:[#allocation2 + $0x74] sm:$0x1] %v1268_v61  ;;  %v1040_v63 = vrot.slane %v1038_v54, 7  ;;  %v895_v37 = vrot.slane %v893_v22, 7 }
  0x2d   : > { %5480 = vmatpush3.bf16.msra.mxu0 %v6243_v49  ;;  %5601 = vmatprep.subr.bf16.mxu1 %v6246_v59  ;;  %v1026_v49 = vor.u32 %v1024_v24, %v1023_v33  ;;  %v1046_v56 = vshrl.u32 %v5246_v45, 16  ;;  %v1049_v57 = vshll.u32 %v5246_v45, 16  ;;  %v896_v24 = vshll.u32 %v5228_v4, 16  ;;  %v5435_v33 = vld [vmem:[%s6610_s11 + $0x8] sm:$0xff]  }
  0x2e   : > { %5873 = vmatprep.subr.bf16.mxu0 %v6516_v0  ;;  %v754_v47 = vmax.f32 %v722_v31, 0.0  ;;  %v1035_v59 = vsel %vm6651_vm6, %v1027_v50, %v1034_v51  ;;  %v1043_v13 = vor.u32 %v1041_v55, %v1040_v63  ;;  %v1044_v14 = vrot.slane %v1040_v63, 4  ;;  %v564_v50 = vld [vmem:[#allocation2 + $0x20] sm:$0x1] }
  0x2f   : > { %v1264_v60 = vsel %vm6693_vm8, %v1026_v49, %v1263_v39  ;;  %1266 = vst [vmem:[#allocation2 + $0x70] sm:$0xf] %v1035_v59  ;;  %v1048_v1 = vrot.slane %v1046_v56, 7  ;;  %v1211_v39 = vld [vmem:[#allocation2 + $0x14] sm:$0x1]  ;;  %v742_v41 = vadd.f32 %v6646_v44, %v703_v27  ;;  %v595_v45 = vsel %vm6634_vm5, 0, %v594_v17 }
  0x30   : > { %v5227_v62 = vpack.c.bf16 %v754_v47, %v754_v47  ;;  %1265 = vst [vmem:[#allocation2 + $0x6c] sm:$0xf] %v1264_v60  ;;  %v1271_v30 = vsel %vm6693_vm8, %v1043_v13, %v1270_v2  ;;  %v5337_v47 = vunpack.c.l.bf16 %v5445_v28  ;;  %v5338_v48 = vunpack.c.h.bf16 %v5445_v28  ;;  %v508_v49 = vld [vmem:[#allocation2 + $0x18] sm:$0x1]  ;;  %596 = vst [vmem:[#allocation2 + $0x98] sm:$0x1] %v595_v45 }
  0x31   : > { %v1051_v15 = vor.u32 %v1049_v57, %v1048_v1  ;;  %v1053_v16 = vrot.slane %v1048_v1, 4  ;;  %1272 = vst [vmem:[#allocation2 + $0x78] sm:$0xf] %v1271_v30  ;;  %v898_v51 = vor.u32 %v896_v24, %v895_v37  ;;  %v5297_v53 = vunpack.c.l.bf16 %v5435_v33  ;;  %v6731_v2 = vld [vmem:[%s6610_s11 + $0x60] sm:$0xff]  }
  0x32   : > { %v885_v8 = vshrl.u32 %v5227_v62, 16  ;;  %v888_v9 = vshll.u32 %v5227_v62, 16  ;;  %v5298_v54 = vunpack.c.h.bf16 %v5435_v33  ;;  %v900_v57 = vrot.slane %v895_v37, 4  ;;  %v1277_v33 = vld [vmem:[#allocation2 + $0x84] sm:$0xf] }
  0x33   : > { %v1052_v29 = vsel %vm6651_vm6, %v1044_v14, %v1051_v15  ;;  %v1275_v31 = vsel %vm6625_vm3, %v1053_v16, %v1274_v7  ;;  %v6242_v56 = vld [vmem:[#allocation2 + $0x74] ss:$0 sps:$4 sm:$0x11]   ;;  %v774_v58 = vmax.f32 %v742_v41, 0.0  ;;  %v705_v59 = vmul.f32 %v5337_v47, %v6641_v43  ;;  %v6250_v41 = vld [vmem:[%s7922_s5 + $0x48] sm:$0xff]  }
  0x34   : > { %v887_v19 = vrot.slane %v885_v8, 7  ;;  %1273 = vst [vmem:[#allocation2 + $0x7c] sm:$0xf] %v1052_v29  ;;  %1276 = vst [vmem:[#allocation2 + $0x80] sm:$0x1] %v1275_v31  ;;  %v706_v60 = vmul.f32 %v5338_v48, %v6641_v43  ;;  %v775_v62 = vmax.f32 %v743_v42, 0.0  ;;  %v1212_v7 = vsel %vm6625_vm3, %v900_v57, %v1211_v39 }
  0x35   : > { %v509_v63 = vsel %vm6625_vm3, 0, %v508_v49  ;;  %v565_v1 = vsel %vm6634_vm5, 0, %v564_v50  ;;  %v2379_v5 = vrot.slane %v6242_v56, 1  ;;  %v5247_v8 = vpack.c.bf16 %v774_v58, %v774_v58  ;;  %1213 = vst [vmem:[#allocation2 + $0x14] sm:$0x1] %v1212_v7  ;;  %v6256_v7 = vld [vmem:[%s7922_s5 + $0x50] sm:$0xff]  }
  0x36   : > { %v890_v34 = vor.u32 %v888_v9, %v887_v19  ;;  %v891_v35 = vrot.slane %v887_v19, 4  ;;  %510 = vst [vmem:[#allocation2 + $0x18] sm:$0x1] %v509_v63  ;;  %566 = vst [vmem:[#allocation2 + $0x20] sm:$0x1] %v565_v1  ;;  %v6736_v9 = vld [vmem:[%s6610_s11 + $0x68] sm:$0xff]   ;;  %v5248_v10 = vpack.c.bf16 %v775_v62, %v775_v62  ;;  %v744_v12 = vadd.f32 %v6646_v44, %v705_v59 }
  0x37   : > { %v6241_v55 = vld [vmem:[#allocation2 + $0x6c] sm:$0xff]   ;;  %v745_v13 = vadd.f32 %v6646_v44, %v706_v60  ;;  %v685_v14 = vmul.f32 %v5297_v53, %v6641_v43  ;;  %v686_v16 = vmul.f32 %v5298_v54, %v6641_v43  ;;  %v5341_v17 = vunpack.c.l.bf16 %v6731_v2 }
  0x38   : > { %v1208_v52 = vsel %vm6693_vm8, %v890_v34, %v1207_v26  ;;  %v899_v61 = vsel %vm6651_vm6, %v891_v35, %v898_v51  ;;  %v2378_v4 = vrot.slane %v6241_v55, 1  ;;  %v5342_v19 = vunpack.c.h.bf16 %v6731_v2  ;;  %v6247_v26 = vld [vmem:[%s7922_s5] sm:$0xff]   ;;  %v1281_v48 = vld [vmem:[#allocation2 + $0x8c] sm:$0x1] }
  0x39   : > { %1209 = vst [vmem:[#allocation2 + $0xc] sm:$0xf] %v1208_v52  ;;  %1210 = vst [vmem:[#allocation2 + $0x10] sm:$0xf] %v899_v61  ;;  %v1055_v27 = vshrl.u32 %v5247_v8, 16  ;;  %v1058_v28 = vshll.u32 %v5247_v8, 16  ;;  %v724_v29 = vadd.f32 %v6646_v44, %v685_v14  ;;  %v5345_v30 = vunpack.c.l.bf16 %v6736_v9 }
  0x3a   : > { %v2380_v15 = vsel %vm1841_vm9, %v2378_v4, %v2379_v5  ;;  %v1063_v31 = vshrl.u32 %v5248_v10, 16  ;;  %v1066_v32 = vshll.u32 %v5248_v10, 16  ;;  %v776_v34 = vmax.f32 %v744_v12, 0.0  ;;  %v6251_v1 = vld [vmem:[%s7922_s5 + $0x8] sm:$0xff]   ;;  %v1284_v14 = vld [vmem:[#allocation2 + $0x90] sm:$0xf] }
  0x3b   : > { %5905 = vmatprep.mubr.bf16.mxu1 %v2380_v15  ;;  %v6244_v22 = vld [vmem:[#allocation2 + $0x78] sm:$0xff]   ;;  %v6245_v24 = vld [vmem:[#allocation2 + $0x80] ss:$0 sps:$4 sm:$0x11]   ;;  %v777_v35 = vmax.f32 %v745_v13, 0.0  ;;  %v1057_v42 = vrot.slane %v1055_v27, 7  ;;  %v725_v45 = vadd.f32 %v6646_v44, %v686_v16  ;;  %v6758_v61 = vmul.f32 %v5341_v17, %v6641_v43 }
  0x3c   : > { %v2381_v37 = vrot.slane %v6244_v22, 1  ;;  %v2382_v39 = vrot.slane %v6245_v24, 1  ;;  %v1065_v47 = vrot.slane %v1063_v31, 7  ;;  %v5249_v49 = vpack.c.bf16 %v776_v34, %v776_v34  ;;  %v6249_v57 = vld [vmem:[#allocation2 + $0x14] ss:$0 sps:$4 sm:$0x11]  }
  0x3d   : > { %v5250_v50 = vpack.c.bf16 %v777_v35, %v777_v35  ;;  %v756_v51 = vmax.f32 %v724_v29, 0.0  ;;  %v1060_v54 = vor.u32 %v1058_v28, %v1057_v42  ;;  %v1061_v55 = vrot.slane %v1057_v42, 4  ;;  %v541_v15 = vld [vmem:[#allocation2 + $0x9c] sm:$0x1]  ;;  %v597_v27 = vld [vmem:[#allocation2 + $0xa4] sm:$0x1] }
  0x3e   : > { %v2383_v52 = vsel %vm1841_vm9, %v2381_v37, %v2382_v39  ;;  %v757_v56 = vmax.f32 %v725_v45, 0.0  ;;  %v1068_v58 = vor.u32 %v1066_v32, %v1065_v47  ;;  %v1070_v59 = vrot.slane %v1065_v47, 4  ;;  %v544_v34 = vld [vmem:[#allocation2 + $0xa8] sm:$0x1]  ;;  %v1288_v42 = vld [vmem:[#allocation2 + $0x98] sm:$0x1] }
  0x3f   : > { %5906 = vmatmul.mubr.bf16.vlgmr.msra.gmra.mrb[0].mxu1 %v2383_v52  ;;  %v5229_v60 = vpack.c.bf16 %v756_v51, %v756_v51  ;;  %v1278_v4 = vsel %vm6693_vm8, %v1060_v54, %v1277_v33  ;;  %v1072_v5 = vshrl.u32 %v5249_v49, 16  ;;  %v2154_v8 = vshll.u32 %v6249_v57, 16  ;;  %v6260_v33 = vld [vmem:[%s7922_s5 + $0x58] sm:$0xff]   ;;  %v600_v57 = vld [vmem:[#allocation2 + $0xb0] sm:$0x1] }
  0x40   : > { %v6755_v53 = vld [vmem:[#allocation2 + $0xc] sm:$0xff]   ;;  %5602 = vmatpush3.bf16.msra.mxu1 %v6247_v26  ;;  %v1069_v10 = vsel %vm6651_vm6, %v1061_v55, %v1068_v58  ;;  %1279 = vst [vmem:[#allocation2 + $0x84] sm:$0xf] %v1278_v4  ;;  %v1282_v12 = vsel %vm6625_vm3, %v1070_v59, %v1281_v48  ;;  %v1075_v13 = vshll.u32 %v5249_v49, 16  ;;  %v1080_v22 = vshrl.u32 %v5250_v50, 16 }
  0x41   : > { %v2147_v62 = vshrl.u32 %v6755_v53, 16  ;;  %v2149_v63 = vshll.u32 %v6755_v53, 16  ;;  %5603 = vmatprep.subr.bf16.mxu1 %v6250_v41  ;;  %1280 = vst [vmem:[#allocation2 + $0x88] sm:$0xf] %v1069_v10  ;;  %1283 = vst [vmem:[#allocation2 + $0x8c] sm:$0x1] %v1282_v12  ;;  %v5230_v29 = vpack.c.bf16 %v757_v56, %v757_v56  ;;  %v746_v2 = vadd.f32 %v6646_v44, %v6758_v61 }
  0x42   : > { %v1074_v17 = vrot.slane %v1072_v5, 7  ;;  %v1083_v24 = vshll.u32 %v5250_v50, 16  ;;  %v6257_v26 = vld [vmem:[%s7922_s5 + $0x10] sm:$0xff]   ;;  %v2156_v28 = vrot.slane %v2154_v8, 1  ;;  %v902_v31 = vshrl.u32 %v5229_v60, 16  ;;  %v6261_v56 = vld [vmem:[%s7922_s5 + $0x18] sm:$0xff]  }
  0x43   : > { %v2151_v16 = vrot.slane %v2149_v63, 1  ;;  %v905_v32 = vshll.u32 %v5229_v60, 16  ;;  %v1082_v41 = vrot.slane %v1080_v22, 7  ;;  %v910_v47 = vshrl.u32 %v5230_v29, 16  ;;  %v1214_v55 = vld [vmem:[#allocation2 + $0x18] sm:$0xf] }
  0x44   : > { %5604 = vmatpush3.bf16.msra.mxu1 %v6251_v1  ;;  %v1077_v37 = vor.u32 %v1075_v13, %v1074_v17  ;;  %v1078_v39 = vrot.slane %v1074_v17, 4  ;;  %v904_v45 = vrot.slane %v902_v31, 7  ;;  %v913_v48 = vshll.u32 %v5230_v29, 16  ;;  %v6266_v1 = vld [vmem:[%s7922_s5 + $0x60] sm:$0xff]   ;;  %v567_v12 = vld [vmem:[#allocation2 + $0x2c] sm:$0x1] }
  0x45   : > { %v2152_v35 = vor.u32 %v2151_v16, %v2147_v62  ;;  %5605 = vmatprep.subr.bf16.mxu1 %v6256_v7  ;;  %v542_v49 = vsel %vm6625_vm3, 0, %v541_v15  ;;  %v1085_v51 = vor.u32 %v1083_v24, %v1082_v41  ;;  %v1087_v52 = vrot.slane %v1082_v41, 4  ;;  %v1218_v62 = vld [vmem:[#allocation2 + $0x20] sm:$0x1]  ;;  %v511_v10 = vld [vmem:[#allocation2 + $0x24] sm:$0x1] }
  0x46   : > { %v1285_v54 = vsel %vm6693_vm8, %v1077_v37, %v1284_v14  ;;  %543 = vst [vmem:[#allocation2 + $0x9c] sm:$0x1] %v542_v49  ;;  %v907_v58 = vor.u32 %v905_v32, %v904_v45  ;;  %v908_v59 = vrot.slane %v904_v45, 4  ;;  %v912_v60 = vrot.slane %v910_v47, 7  ;;  %v6804_v13 = vld [vmem:[%s6610_s11 + $0x10] sm:$0xff]   ;;  %v6267_v32 = vld [vmem:[%s7922_s5 + $0x20] sm:$0xff]  }
  0x47   : > { %v2157_v50 = vsel %vm1632_vm10, %v2152_v35, %v2156_v28  ;;  %1286 = vst [vmem:[#allocation2 + $0x90] sm:$0xf] %v1285_v54  ;;  %v598_v63 = vsel %vm6634_vm5, 0, %v597_v27  ;;  %v1086_v4 = vsel %vm6651_vm6, %v1078_v39, %v1085_v51  ;;  %v1289_v5 = vsel %vm6625_vm3, %v1087_v52, %v1288_v42  ;;  %v6270_v39 = vld [vmem:[%s7922_s5 + $0x68] sm:$0xff]   ;;  %v6838_v41 = vld [vmem:[%s6610_s11 + $0x70] sm:$0xff]   ;;  %v6843_v49 = vld [vmem:[%s6610_s11 + $0x78] sm:$0xff]  }
  0x48   : > { %2643 = vmatprep.mubr.bf16.mxu0 %v2157_v50  ;;  %5606 = vmatpush3.bf16.msra.mxu1 %v6257_v26  ;;  %599 = vst [vmem:[#allocation2 + $0xa4] sm:$0x1] %v598_v63  ;;  %v708_v7 = vmul.f32 %v5342_v19, %v6641_v43  ;;  %v545_v8 = vsel %vm6625_vm3, 0, %v544_v34  ;;  %1287 = vst [vmem:[#allocation2 + $0x94] sm:$0xf] %v1086_v4  ;;  %v915_v14 = vor.u32 %v913_v48, %v912_v60  ;;  %v6271_v54 = vld [vmem:[%s7922_s5 + $0x28] sm:$0xff]  }
  0x49   : > { %2644 = vmatmul.mubr.bf16.vlgmr.msra.gmra.mrb[0].mxu0 %v6755_v53  ;;  %v6252_v53 = vld [vmem:[#allocation2 + $0x84] sm:$0xff]   ;;  %1290 = vst [vmem:[#allocation2 + $0x98] sm:$0x1] %v1289_v5  ;;  %v917_v15 = vrot.slane %v912_v60, 4  ;;  %v1215_v16 = vsel %vm6693_vm8, %v907_v58, %v1214_v55  ;;  %5607 = vmatprep.subr.bf16.mxu1 %v6260_v33  ;;  %546 = vst [vmem:[#allocation2 + $0xa8] sm:$0x1] %v545_v8  ;;  %v5346_v22 = vunpack.c.h.bf16 %v6736_v9  ;;  %v5301_v37 = vunpack.c.l.bf16 %v6804_v13 }
  0x4a   : > { %5874 = vmatpush3.bf16.msra.mxu0 %v6516_v0  ;;  %v6253_v19 = vld [vmem:[#allocation2 + $0x8c] ss:$0 sps:$4 sm:$0x11]   ;;  %1216 = vst [vmem:[#allocation2 + $0x18] sm:$0xf] %v1215_v16  ;;  %v747_v17 = vadd.f32 %v6646_v44, %v708_v7  ;;  %v601_v0 = vsel %vm6634_vm5, 0, %v600_v57  ;;  %v709_v24 = vmul.f32 %v5345_v30, %v6641_v43  ;;  %v916_v61 = vsel %vm6651_vm6, %v908_v59, %v915_v14 }
  0x4b   : > { %5875 = vmatprep.subr.bf16.mxu0 %v6529_v3  ;;  %v2384_v26 = vrot.slane %v6252_v53, 1  ;;  %v1219_v27 = vsel %vm6625_vm3, %v917_v15, %v1218_v62  ;;  %v778_v28 = vmax.f32 %v746_v2, 0.0  ;;  %602 = vst [vmem:[#allocation2 + $0xb0] sm:$0x1] %v601_v0  ;;  %v2385_v29 = vrot.slane %v6253_v19, 1  ;;  %v6276_v55 = vld [vmem:[%s7922_s5 + $0x70] sm:$0xff]  }
  0x4c   : > { %1217 = vst [vmem:[#allocation2 + $0x1c] sm:$0xf] %v916_v61  ;;  %1220 = vst [vmem:[#allocation2 + $0x20] sm:$0x1] %v1219_v27  ;;  %5608 = vmatpush3.bf16.msra.mxu1 %v6261_v56  ;;  %v779_v31 = vmax.f32 %v747_v17, 0.0  ;;  %v710_v9 = vmul.f32 %v5346_v22, %v6641_v43  ;;  %v748_v30 = vadd.f32 %v6646_v44, %v709_v24  ;;  %v512_v34 = vsel %vm6625_vm3, 0, %v511_v10 }
  0x4d   : > { %v5251_v33 = vpack.c.bf16 %v778_v28, %v778_v28  ;;  %5609 = vmatprep.subr.bf16.mxu1 %v6266_v1  ;;  %v568_v35 = vsel %vm6634_vm5, 0, %v567_v12  ;;  %v2386_v42 = vsel %vm1841_vm9, %v2384_v26, %v2385_v29  ;;  %513 = vst [vmem:[#allocation2 + $0x24] sm:$0x1] %v512_v34  ;;  %v5302_v51 = vunpack.c.h.bf16 %v6804_v13  ;;  %v1291_v58 = vld [vmem:[#allocation2 + $0x9c] sm:$0xf]  ;;  %v6277_v26 = vld [vmem:[%s7922_s5 + $0x30] sm:$0xff]  }
  0x4e   : > { %5876 = vmatpush3.bf16.msra.mxu0 %v6529_v3  ;;  %v5252_v45 = vpack.c.bf16 %v779_v31, %v779_v31  ;;  %v749_v47 = vadd.f32 %v6646_v44, %v710_v9  ;;  %v780_v48 = vmax.f32 %v748_v30, 0.0  ;;  %569 = vst [vmem:[#allocation2 + $0x2c] sm:$0x1] %v568_v35  ;;  %5909 = vmatprep.mubr.bf16.mxu1 %v2386_v42  ;;  %v5349_v60 = vunpack.c.l.bf16 %v6838_v41  ;;  %v547_v31 = vld [vmem:[#allocation2 + $0xb4] sm:$0x1]  ;;  %v6280_v9 = vld [vmem:[%s7922_s5 + $0x78] sm:$0xff]  }
  0x4f   : > { %5877 = vmatprep.subr.bf16.mxu0 %v6541_v6  ;;  %v1089_v3 = vshrl.u32 %v5251_v33, 16  ;;  %v1092_v50 = vshll.u32 %v5251_v33, 16  ;;  %v687_v52 = vmul.f32 %v5301_v37, %v6641_v43  ;;  %v6254_v56 = vld [vmem:[#allocation2 + $0x90] sm:$0xff]   ;;  %v5350_v62 = vunpack.c.h.bf16 %v6838_v41  ;;  %v1295_v13 = vld [vmem:[#allocation2 + $0xa4] sm:$0x1] }
  0x50   : > { %v1097_v57 = vshrl.u32 %v5252_v45, 16  ;;  %v6854_v59 = vpack.c.bf16 %v780_v48, %v780_v48  ;;  %5610 = vmatpush3.bf16.msra.mxu1 %v6267_v32  ;;  %v6255_v63 = vld [vmem:[#allocation2 + $0x98] ss:$0 sps:$4 sm:$0x11]   ;;  %v688_v4 = vmul.f32 %v5302_v51, %v6641_v43  ;;  %v5353_v7 = vunpack.c.l.bf16 %v6843_v49  ;;  %v603_v35 = vld [vmem:[#allocation2 + $0xbc] sm:$0x1] }
  0x51   : > { %v1091_v1 = vrot.slane %v1089_v3, 7  ;;  %v726_v5 = vadd.f32 %v6646_v44, %v687_v52  ;;  %5611 = vmatprep.subr.bf16.mxu1 %v6270_v39  ;;  %v2387_v8 = vrot.slane %v6254_v56, 1  ;;  %v1100_v12 = vshll.u32 %v5252_v45, 16 }
  0x52   : > { %5878 = vmatpush3.bf16.msra.mxu0 %v6541_v6  ;;  %v1099_v10 = vrot.slane %v1097_v57, 7  ;;  %v781_v53 = vmax.f32 %v749_v47, 0.0  ;;  %v2388_v14 = vrot.slane %v6255_v63, 1  ;;  %v727_v2 = vadd.f32 %v6646_v44, %v688_v4 }
  0x53   : > { %5879 = vmatprep.subr.bf16.mxu0 %v6555_v11  ;;  %v6863_v15 = vld [vmem:[#allocation2 + $0x18] sm:$0xff]   ;;  %v1094_v16 = vor.u32 %v1092_v50, %v1091_v1  ;;  %v6867_v19 = vmul.f32 %v5349_v60, %v6641_v43  ;;  %v6259_v17 = vld [vmem:[#allocation2 + $0x20] ss:$0 sps:$4 sm:$0x11]   ;;  %v1095_v0 = vrot.slane %v1091_v1, 4  ;;  %v1106_v34 = vshrl.u32 %v6854_v59, 16 }
  0x54   : > { %v1102_v22 = vor.u32 %v1100_v12, %v1099_v10  ;;  %v1104_v6 = vrot.slane %v1099_v10, 4  ;;  %v5254_v24 = vpack.c.bf16 %v781_v53, %v781_v53  ;;  %5612 = vmatpush3.bf16.msra.mxu1 %v6271_v54  ;;  %v2389_v61 = vsel %vm1841_vm9, %v2387_v8, %v2388_v14  ;;  %v6281_v50 = vld [vmem:[%s7922_s5 + $0x38] sm:$0xff]   ;;  %v1298_v54 = vld [vmem:[#allocation2 + $0xa8] sm:$0xf]  ;;  %v6899_v1 = vld [vmem:[%s7922_s5 + $0x80] sm:$0xff]  }
  0x55   : > { %v2159_v27 = vshrl.u32 %v6863_v15, 16  ;;  %v2161_v28 = vshll.u32 %v6863_v15, 16  ;;  %v1292_v29 = vsel %vm6693_vm8, %v1094_v16, %v1291_v58  ;;  %5613 = vmatprep.subr.bf16.mxu1 %v6276_v55  ;;  %5910 = vmatmul.mubr.bf16.gmra.mrb[4].mxu1 %v2389_v61  ;;  %v2166_v30 = vshll.u32 %v6259_v17, 16  ;;  %v550_v10 = vld [vmem:[#allocation2 + $0xc0] sm:$0x1]  ;;  %v6909_v16 = vld [vmem:[%s6610_s11 + $0x18] sm:$0xff]  }
  0x56   : > { %5880 = vmatpush3.bf16.msra.mxu0 %v6555_v11  ;;  %v1103_v32 = vsel %vm6651_vm6, %v1095_v0, %v1102_v22  ;;  %1293 = vst [vmem:[#allocation2 + $0x9c] sm:$0xf] %v1292_v29  ;;  %v1296_v33 = vsel %vm6625_vm3, %v1104_v6, %v1295_v13  ;;  %v1109_v39 = vshll.u32 %v6854_v59, 16  ;;  %v1114_v11 = vshrl.u32 %v5254_v24, 16  ;;  %v1302_v59 = vld [vmem:[#allocation2 + $0xb0] sm:$0x1] }
  0x57   : > { %5881 = vmatprep.subr.bf16.mxu0 %v6568_v18  ;;  %v2163_v37 = vrot.slane %v2161_v28, 1  ;;  %1294 = vst [vmem:[#allocation2 + $0xa0] sm:$0xf] %v1103_v32  ;;  %1297 = vst [vmem:[#allocation2 + $0xa4] sm:$0x1] %v1296_v33  ;;  %v1117_v42 = vshll.u32 %v5254_v24, 16  ;;  %v750_v17 = vadd.f32 %v6646_v44, %v6867_v19  ;;  %v713_v61 = vmul.f32 %v5353_v7, %v6641_v43 }
  0x58   : > { %v2168_v45 = vrot.slane %v2166_v30, 1  ;;  %v1108_v47 = vrot.slane %v1106_v34, 7  ;;  %v758_v48 = vmax.f32 %v726_v5, 0.0  ;;  %v759_v3 = vmax.f32 %v727_v2, 0.0  ;;  %5614 = vmatpush3.bf16.msra.mxu1 %v6277_v26  ;;  %v1221_v2 = vld [vmem:[#allocation2 + $0x24] sm:$0xf] }
  0x59   : > { %v2164_v51 = vor.u32 %v2163_v37, %v2159_v27  ;;  %v1116_v52 = vrot.slane %v1114_v11, 7  ;;  %v548_v55 = vsel %vm6625_vm3, 0, %v547_v31  ;;  %v604_v56 = vsel %vm6634_vm5, 0, %v603_v35  ;;  %5615 = vmatprep.subr.bf16.mxu1 %v6280_v9  ;;  %v606_v0 = vld [vmem:[#allocation2 + $0xc8] sm:$0x1] }
  0x5a   : > { %5882 = vmatpush3.bf16.msra.mxu0 %v6568_v18  ;;  %v1111_v57 = vor.u32 %v1109_v39, %v1108_v47  ;;  %v1112_v58 = vrot.slane %v1108_v47, 4  ;;  %v5231_v60 = vpack.c.bf16 %v758_v48, %v758_v48  ;;  %v5232_v63 = vpack.c.bf16 %v759_v3, %v759_v3  ;;  %549 = vst [vmem:[#allocation2 + $0xb4] sm:$0x1] %v548_v55  ;;  %v6386_v19 = vld [vmem:[%s7922_s5 + $0x168] sm:$0xff]  }
  0x5b   : > { %605 = vst [vmem:[#allocation2 + $0xbc] sm:$0x1] %v604_v56  ;;  %5883 = vmatprep.subr.bf16.mxu0 %v6588_v23  ;;  %v2169_v4 = vsel %vm1632_vm10, %v2164_v51, %v2168_v45  ;;  %v1119_v5 = vor.u32 %v1117_v42, %v1116_v52  ;;  %v1121_v8 = vrot.slane %v1116_v52, 4  ;;  %v712_v18 = vmul.f32 %v5350_v62, %v6641_v43  ;;  %v514_v51 = vld [vmem:[#allocation2 + $0x30] sm:$0x1]  ;;  %v6944_v52 = vld [vmem:[%s6610_s11 + $0x20] sm:$0xff]  }
  0x5c   : > { %2651 = vmatprep.mubr.bf16.mxu0 %v2169_v4  ;;  %v1299_v12 = vsel %vm6693_vm8, %v1111_v57, %v1298_v54  ;;  %v919_v13 = vshrl.u32 %v5231_v60, 16  ;;  %v922_v53 = vshll.u32 %v5231_v60, 16  ;;  %v927_v14 = vshrl.u32 %v5232_v63, 16  ;;  %5616 = vmatpush3.bf16.msra.mxu1 %v6281_v50  ;;  %v6388_v54 = vld [vmem:[%s7922_s5 + $0x178] sm:$0xff]  }
  0x5d   : > { %2652 = vmatmul.mubr.bf16.gmra.mrb[4].mxu0 %v6863_v15  ;;  %v1120_v23 = vsel %vm6651_vm6, %v1112_v58, %v1119_v5  ;;  %1300 = vst [vmem:[#allocation2 + $0xa8] sm:$0xf] %v1299_v12  ;;  %v1303_v41 = vsel %vm6625_vm3, %v1121_v8, %v1302_v59  ;;  %v930_v62 = vshll.u32 %v5232_v63, 16  ;;  %5921 = vmatprep.subr.bf16.mxu1 %v6899_v1  ;;  %v1225_v15 = vld [vmem:[#allocation2 + $0x2c] sm:$0x1]  ;;  %v5354_v26 = vunpack.c.h.bf16 %v6843_v49 }
  0x5e   : > { %v6262_v22 = vld [vmem:[#allocation2 + $0x9c] sm:$0xff]   ;;  %1301 = vst [vmem:[#allocation2 + $0xac] sm:$0xf] %v1120_v23  ;;  %1304 = vst [vmem:[#allocation2 + $0xb0] sm:$0x1] %v1303_v41  ;;  %v921_v6 = vrot.slane %v919_v13, 7  ;;  %v751_v24 = vadd.f32 %v6646_v44, %v712_v18  ;;  %5884 = vmatpush3.bf16.msra.mxu0 %v6386_v19  ;;  %v5305_v9 = vunpack.c.l.bf16 %v6909_v16  ;;  %v5306_v8 = vunpack.c.h.bf16 %v6909_v16 }
  0x5f   : > { %v6263_v27 = vld [vmem:[#allocation2 + $0xa4] ss:$0 sps:$4 sm:$0x11]   ;;  %v929_v28 = vrot.slane %v927_v14, 7  ;;  %v782_v29 = vmax.f32 %v750_v17, 0.0  ;;  %v551_v31 = vsel %vm6625_vm3, 0, %v550_v10  ;;  %v714_v45 = vmul.f32 %v5354_v26, %v6641_v43 }
  0x60   : > { %v6387_v44 = vld [vmem:[%s7922_s5 + $0x170] sm:$0xff]   ;;  %v2390_v49 = vrot.slane %v6262_v22, 1  ;;  %v924_v7 = vor.u32 %v922_v53, %v921_v6  ;;  %v925_v30 = vrot.slane %v921_v6, 4  ;;  %v783_v32 = vmax.f32 %v751_v24, 0.0  ;;  %552 = vst [vmem:[#allocation2 + $0xc0] sm:$0x1] %v551_v31 }
  0x61   : > { %5885 = vmatprep.subr.bf16.mxu0 %v6387_v44  ;;  %v2391_v33 = vrot.slane %v6263_v27, 1  ;;  %v932_v34 = vor.u32 %v930_v62, %v929_v28  ;;  %v934_v35 = vrot.slane %v929_v28, 4  ;;  %v5255_v37 = vpack.c.bf16 %v782_v29, %v782_v29  ;;  %v1305_v57 = vld [vmem:[#allocation2 + $0xb4] sm:$0xf]  ;;  %v6952_v58 = vld [vmem:[%s7918_s1] ss:$0 sm:$0xff] }
  0x62   : > { %v1222_v39 = vsel %vm6693_vm8, %v924_v7, %v1221_v2  ;;  %v5256_v11 = vpack.c.bf16 %v783_v32, %v783_v32  ;;  %v607_v42 = vsel %vm6634_vm5, 0, %v606_v0  ;;  %5886 = vmatpush3.bf16.msra.mxu0 %v6387_v44  ;;  %v752_v59 = vadd.f32 %v6952_v58, %v713_v61  ;;  %v570_v60 = vld [vmem:[#allocation2 + $0x38] sm:$0x1]  ;;  %v6960_v18 = vld [vmem:[%s7917_s0] ss:$0 sm:$0xff] }
  0x63   : > { %v2392_v47 = vsel %vm1841_vm9, %v2390_v49, %v2391_v33  ;;  %v933_v48 = vsel %vm6651_vm6, %v925_v30, %v932_v34  ;;  %1223 = vst [vmem:[#allocation2 + $0x24] sm:$0xf] %v1222_v39  ;;  %v1226_v3 = vsel %vm6625_vm3, %v934_v35, %v1225_v15  ;;  %v1123_v50 = vshrl.u32 %v5255_v37, 16  ;;  %608 = vst [vmem:[#allocation2 + $0xc8] sm:$0x1] %v607_v42 }
  0x64   : > { %5887 = vmatprep.subr.bf16.mxu0 %v6388_v54  ;;  %5913 = vmatprep.mubr.bf16.mxu1 %v2392_v47  ;;  %1224 = vst [vmem:[#allocation2 + $0x28] sm:$0xf] %v933_v48  ;;  %1227 = vst [vmem:[#allocation2 + $0x2c] sm:$0x1] %v1226_v3  ;;  %v1126_v43 = vshll.u32 %v5255_v37, 16  ;;  %v1131_v55 = vshrl.u32 %v5256_v11, 16  ;;  %v753_v5 = vadd.f32 %v6952_v58, %v714_v45  ;;  %v5309_v23 = vunpack.c.l.bf16 %v6944_v52 }
  0x65   : > { %v1134_v56 = vshll.u32 %v5256_v11, 16  ;;  %v6264_v63 = vld [vmem:[#allocation2 + $0xa8] sm:$0xff]   ;;  %v1125_v4 = vrot.slane %v1123_v50, 7  ;;  %v689_v10 = vmul.f32 %v6960_v18, %v5305_v9  ;;  %v6265_v12 = vld [vmem:[#allocation2 + $0xb0] ss:$0 sps:$4 sm:$0x11]   ;;  %v690_v19 = vmul.f32 %v6960_v18, %v5306_v8 }
  0x66   : > { %v1133_v13 = vrot.slane %v1131_v55, 7  ;;  %v784_v53 = vmax.f32 %v752_v59, 0.0  ;;  %v515_v14 = vsel %vm6625_vm3, 0, %v514_v51  ;;  %5888 = vmatpush3.bf16.msra.mxu0 %v6388_v54  ;;  %v2393_v41 = vrot.slane %v6264_v63, 1  ;;  %v1309_v16 = vld [vmem:[#allocation2 + $0xbc] sm:$0x1] }
  0x67   : > { %v1128_v62 = vor.u32 %v1126_v43, %v1125_v4  ;;  %v1129_v2 = vrot.slane %v1125_v4, 4  ;;  %v785_v17 = vmax.f32 %v753_v5, 0.0  ;;  %516 = vst [vmem:[#allocation2 + $0x30] sm:$0x1] %v515_v14  ;;  %v2394_v0 = vrot.slane %v6265_v12, 1 }
  0x68   : > { %v1136_v22 = vor.u32 %v1134_v56, %v1133_v13  ;;  %v1138_v6 = vrot.slane %v1133_v13, 4  ;;  %v5257_v15 = vpack.c.bf16 %v784_v53, %v784_v53  ;;  %v571_v61 = vsel %vm6634_vm5, 0, %v570_v60  ;;  %v502_v9 = vld [vmem:[#allocation2] sm:$0x1]  ;;  %v558_v43 = vld [vmem:[#allocation2 + $0x8] sm:$0x1] }
  0x69   : > { %v1306_v24 = vsel %vm6693_vm8, %v1128_v62, %v1305_v57  ;;  %v5258_v26 = vpack.c.bf16 %v785_v17, %v785_v17  ;;  %v2395_v27 = vsel %vm1841_vm9, %v2393_v41, %v2394_v0  ;;  %572 = vst [vmem:[#allocation2 + $0x38] sm:$0x1] %v571_v61  ;;  %v728_v7 = vadd.f32 %v6952_v58, %v689_v10  ;;  %v1312_v45 = vld [vmem:[#allocation2 + $0xc0] sm:$0xf]  ;;  %v517_v60 = vld [vmem:[#allocation2 + $0x3c] sm:$0x1] }
  0x6a   : > { %v1137_v28 = vsel %vm6651_vm6, %v1129_v2, %v1136_v22  ;;  %1307 = vst [vmem:[#allocation2 + $0xb4] sm:$0xf] %v1306_v24  ;;  %v1310_v29 = vsel %vm6625_vm3, %v1138_v6, %v1309_v16  ;;  %v1140_v31 = vshrl.u32 %v5257_v15, 16  ;;  %5914 = vmatmul.mubr.bf16.gmra.mrb[8].mxu1 %v2395_v27  ;;  %v1143_v49 = vshll.u32 %v5257_v15, 16  ;;  %v1316_v56 = vld [vmem:[#allocation2 + $0xc8] sm:$0x1] }
  0x6b   : > { %v6268_v44 = vld [vmem:[#allocation2 + $0x24] sm:$0xff]   ;;  %1308 = vst [vmem:[#allocation2 + $0xb8] sm:$0xf] %v1137_v28  ;;  %1311 = vst [vmem:[#allocation2 + $0xbc] sm:$0x1] %v1310_v29  ;;  %v729_v30 = vadd.f32 %v6952_v58, %v690_v19  ;;  %v5310_v32 = vunpack.c.h.bf16 %v6944_v52  ;;  %v1148_v35 = vshrl.u32 %v5258_v26, 16  ;;  %v691_v39 = vmul.f32 %v6960_v18, %v5309_v23 }
  0x6c   : > { %v6269_v33 = vld [vmem:[#allocation2 + $0x2c] ss:$0 sps:$4 sm:$0x11]   ;;  %v1142_v34 = vrot.slane %v1140_v31, 7  ;;  %v1151_v37 = vshll.u32 %v5258_v26, 16  ;;  %v2171_v11 = vshrl.u32 %v6268_v44, 16 }
  0x6d   : > { %v2173_v42 = vshll.u32 %v6268_v44, 16  ;;  %v760_v47 = vmax.f32 %v728_v7, 0.0  ;;  %v761_v48 = vmax.f32 %v729_v30, 0.0  ;;  %v2178_v3 = vshll.u32 %v6269_v33, 16  ;;  %v573_v63 = vld [vmem:[#allocation2 + $0x44] sm:$0x1] }
  0x6e   : > { %v1145_v50 = vor.u32 %v1143_v49, %v1142_v34  ;;  %v1146_v51 = vrot.slane %v1142_v34, 4  ;;  %v1150_v54 = vrot.slane %v1148_v35, 7  ;;  %v503_v59 = vsel %vm6625_vm3, 0, %v502_v9  ;;  %v6984_v23 = vld [vmem:[#allocation2 + $0xc] sm:$0xff]   ;;  %v520_v9 = vld [vmem:[#allocation2 + $0x48] sm:$0x1] }
  0x6f   : > { %v2175_v55 = vrot.slane %v2173_v42, 1  ;;  %v5233_v57 = vpack.c.bf16 %v760_v47, %v760_v47  ;;  %v5234_v52 = vpack.c.bf16 %v761_v48, %v761_v48  ;;  %v2180_v4 = vrot.slane %v2178_v3, 1  ;;  %504 = vst [vmem:[#allocation2] sm:$0x1] %v503_v59  ;;  %v1228_v17 = vld [vmem:[#allocation2 + $0x30] sm:$0xf] }
  0x70   : > { %v1153_v5 = vor.u32 %v1151_v37, %v1150_v54  ;;  %v1155_v8 = vrot.slane %v1150_v54, 4  ;;  %v1313_v10 = vsel %vm6693_vm8, %v1145_v50, %v1312_v45  ;;  %v692_v0 = vmul.f32 %v6960_v18, %v5310_v32  ;;  %v6288_v61 = vld [vmem:[#allocation2 + $0x14] ss:$0 sps:$4 sm:$0x11]   ;;  %v1232_v27 = vld [vmem:[#allocation2 + $0x38] sm:$0x1] }
  0x71   : > { %v2176_v12 = vor.u32 %v2175_v55, %v2171_v11  ;;  %1314 = vst [vmem:[#allocation2 + $0xc0] sm:$0xf] %v1313_v10  ;;  %v936_v13 = vshrl.u32 %v5233_v57, 16  ;;  %v939_v53 = vshll.u32 %v5233_v57, 16  ;;  %v944_v14 = vshrl.u32 %v5234_v52, 16  ;;  %v5439_v48 = vld [vmem:[%s6610_s11 + $0x28] sm:$0xff]  }
  0x72   : > { %v6272_v41 = vld [vmem:[#allocation2 + $0xb4] sm:$0xff]   ;;  %v1154_v62 = vsel %vm6651_vm6, %v1146_v51, %v1153_v5  ;;  %v1317_v2 = vsel %vm6625_vm3, %v1155_v8, %v1316_v56  ;;  %v947_v16 = vshll.u32 %v5234_v52, 16  ;;  %v6273_v6 = vld [vmem:[#allocation2 + $0xbc] ss:$0 sps:$4 sm:$0x11]   ;;  %v559_v26 = vsel %vm6634_vm5, 0, %v558_v43 }
  0x73   : > { %v2181_v22 = vsel %vm1632_vm10, %v2176_v12, %v2180_v4  ;;  %1315 = vst [vmem:[#allocation2 + $0xc4] sm:$0xf] %v1154_v62  ;;  %1318 = vst [vmem:[#allocation2 + $0xc8] sm:$0x1] %v1317_v2  ;;  %v938_v15 = vrot.slane %v936_v13, 7  ;;  %v946_v24 = vrot.slane %v944_v14, 7  ;;  %v730_v31 = vadd.f32 %v6952_v58, %v691_v39 }
  0x74   : > { %2659 = vmatprep.mubr.bf16.mxu0 %v2181_v22  ;;  %v2396_v19 = vrot.slane %v6272_v41, 1  ;;  %560 = vst [vmem:[#allocation2 + $0x8] sm:$0x1] %v559_v26  ;;  %v518_v28 = vsel %vm6625_vm3, 0, %v517_v60  ;;  %v574_v29 = vsel %vm6634_vm5, 0, %v573_v63  ;;  %v2397_v49 = vrot.slane %v6273_v6, 1 }
  0x75   : > { %2660 = vmatmul.mubr.bf16.gmra.mrb[8].mxu0 %v6268_v44  ;;  %v941_v7 = vor.u32 %v939_v53, %v938_v15  ;;  %v942_v30 = vrot.slane %v938_v15, 4  ;;  %v949_v32 = vor.u32 %v947_v16, %v946_v24  ;;  %519 = vst [vmem:[#allocation2 + $0x3c] sm:$0x1] %v518_v28  ;;  %575 = vst [vmem:[#allocation2 + $0x44] sm:$0x1] %v574_v29  ;;  %v951_v33 = vrot.slane %v946_v24, 4 }
  0x76   : > { %v731_v34 = vadd.f32 %v6952_v58, %v692_v0  ;;  %v762_v35 = vmax.f32 %v730_v31, 0.0  ;;  %v1646_v37 = vshrl.u32 %v6984_v23, 16  ;;  %v576_v11 = vld [vmem:[#allocation2 + $0x50] sm:$0x1]  ;;  %v2398_v42 = vsel %vm1841_vm9, %v2396_v19, %v2397_v49  ;;  %v1374_v45 = vld [vmem:[#allocation2] sm:$0xf] }
  0x77   : > { %v950_v44 = vsel %vm6651_vm6, %v942_v30, %v949_v32  ;;  %v1229_v39 = vsel %vm6693_vm8, %v941_v7, %v1228_v17  ;;  %v1648_v47 = vshll.u32 %v6984_v23, 16  ;;  %5917 = vmatprep.mubr.bf16.mxu1 %v2398_v42  ;;  %v1233_v3 = vsel %vm6625_vm3, %v951_v33, %v1232_v27  ;;  %v7014_v43 = vld [vmem:[%s6610_s11 + $0x30] sm:$0xff]   ;;  %v7028_v6 = vld [vmem:[#allocation2 + $0x18] sm:$0xff]  }
  0x78   : > { %1230 = vst [vmem:[#allocation2 + $0x30] sm:$0xf] %v1229_v39  ;;  %1231 = vst [vmem:[#allocation2 + $0x34] sm:$0xf] %v950_v44  ;;  %v1375_v50 = vsel %vm6693_vm8, %v6573_v20, %v1374_v45  ;;  %v763_v51 = vmax.f32 %v731_v34, 0.0  ;;  %v5235_v54 = vpack.c.bf16 %v762_v35, %v762_v35  ;;  %v1653_v56 = vshll.u32 %v6288_v61, 16 }
  0x79   : > { %1234 = vst [vmem:[#allocation2 + $0x38] sm:$0x1] %v1233_v3  ;;  %1376 = vst [vmem:[#allocation2] sm:$0xf] %v1375_v50  ;;  %v1650_v55 = vrot.slane %v1648_v47, 1  ;;  %v521_v57 = vsel %vm6625_vm3, 0, %v520_v9  ;;  %v5313_v4 = vunpack.c.l.bf16 %v5439_v48  ;;  %v5314_v5 = vunpack.c.h.bf16 %v5439_v48 }
  0x7a   : > { %v577_v52 = vsel %vm6634_vm5, 0, %v576_v11  ;;  %v6274_v59 = vld [vmem:[#allocation2 + $0xc0] sm:$0xff]   ;;  %v5236_v60 = vpack.c.bf16 %v763_v51, %v763_v51  ;;  %v953_v63 = vshrl.u32 %v5235_v54, 16  ;;  %522 = vst [vmem:[#allocation2 + $0x48] sm:$0x1] %v521_v57  ;;  %v956_v12 = vshll.u32 %v5235_v54, 16 }
  0x7b   : > { %578 = vst [vmem:[#allocation2 + $0x50] sm:$0x1] %v577_v52  ;;  %v6275_v8 = vld [vmem:[#allocation2 + $0xc8] ss:$0 sps:$4 sm:$0x11]   ;;  %v5317_v13 = vunpack.c.l.bf16 %v7014_v43  ;;  %v2399_v53 = vrot.slane %v6274_v59, 1  ;;  %v693_v22 = vmul.f32 %v6960_v18, %v5313_v4  ;;  %v694_v19 = vmul.f32 %v6960_v18, %v5314_v5 }
  0x7c   : > { %v1378_v10 = vld [vmem:[#allocation2 + $0x8] sm:$0x1]  ;;  %v955_v41 = vrot.slane %v953_v63, 7  ;;  %v961_v62 = vshrl.u32 %v5236_v60, 16  ;;  %v2400_v2 = vrot.slane %v6275_v8, 1  ;;  %v964_v16 = vshll.u32 %v5236_v60, 16 }
  0x7d   : > { %v1379_v14 = vsel %vm6625_vm3, %v1370_v21, %v1378_v10  ;;  %v1235_v17 = vld [vmem:[#allocation2 + $0x3c] sm:$0xf]  ;;  %v7025_v0 = vrot.slane %v1653_v56, 1  ;;  %v1239_v61 = vld [vmem:[#allocation2 + $0x44] sm:$0x1]  ;;  %v732_v29 = vadd.f32 %v6952_v58, %v693_v22  ;;  %v1658_v31 = vshrl.u32 %v7028_v6, 16 }
  0x7e   : > { %1380 = vst [vmem:[#allocation2 + $0x8] sm:$0x1] %v1379_v14  ;;  %v958_v15 = vor.u32 %v956_v12, %v955_v41  ;;  %v959_v24 = vrot.slane %v955_v41, 4  ;;  %v963_v26 = vrot.slane %v961_v62, 7  ;;  %v2401_v27 = vsel %vm1841_vm9, %v2399_v53, %v2400_v2  ;;  %v523_v59 = vld [vmem:[#allocation2 + $0x54] sm:$0x1] }
  0x7f   : > { %v7032_v28 = vld [vmem:[#allocation2 + $0x30] sm:$0xff]   ;;  %v5318_v9 = vunpack.c.h.bf16 %v7014_v43  ;;  %5918 = vmatmul.mubr.bf16.gmra.mrb[12].mxu1 %v2401_v27  ;;  %v733_v33 = vadd.f32 %v6952_v58, %v694_v19  ;;  %v695_v34 = vmul.f32 %v6960_v18, %v5317_v13  ;;  %v764_v44 = vmax.f32 %v732_v29, 0.0  ;;  %v6292_v3 = vld [vmem:[#allocation2 + $0x20] ss:$0 sps:$4 sm:$0x11]   ;;  %v7062_v41 = vld [vmem:[%s6610_s11 + $0x38] sm:$0xff]  }
  0x80   : > { %v7037_v49 = vld [vmem:[#allocation2 + $0x38] ss:$0 sps:$4 sm:$0x11]   ;;  %v7039_v7 = vld [vmem:[#allocation2] sm:$0xff]   ;;  %v966_v30 = vor.u32 %v964_v16, %v963_v26  ;;  %v1236_v32 = vsel %vm6693_vm8, %v958_v15, %v1235_v17  ;;  %v2183_v35 = vshrl.u32 %v7032_v28, 16  ;;  %v2185_v11 = vshll.u32 %v7032_v28, 16 }
  0x81   : > { %v968_v42 = vrot.slane %v963_v26, 4  ;;  %1237 = vst [vmem:[#allocation2 + $0x3c] sm:$0xf] %v1236_v32  ;;  %v2190_v39 = vshll.u32 %v7037_v49, 16  ;;  %v1634_v45 = vshrl.u32 %v7039_v7, 16  ;;  %v1636_v47 = vshll.u32 %v7039_v7, 16 }
  0x82   : > { %v967_v48 = vsel %vm6651_vm6, %v959_v24, %v966_v30  ;;  %v2187_v50 = vrot.slane %v2185_v11, 1  ;;  %v765_v54 = vmax.f32 %v733_v33, 0.0  ;;  %v5237_v43 = vpack.c.bf16 %v764_v44, %v764_v44  ;;  %v1242_v16 = vld [vmem:[#allocation2 + $0x48] sm:$0xf]  ;;  %v579_v17 = vld [vmem:[#allocation2 + $0x5c] sm:$0x1] }
  0x83   : > { %1238 = vst [vmem:[#allocation2 + $0x40] sm:$0xf] %v967_v48  ;;  %v1240_v51 = vsel %vm6625_vm3, %v968_v42, %v1239_v61  ;;  %v2192_v56 = vrot.slane %v2190_v39, 1  ;;  %v1651_v52 = vor.u32 %v1650_v55, %v1646_v37  ;;  %v696_v60 = vmul.f32 %v6960_v18, %v5318_v9  ;;  %v1246_v24 = vld [vmem:[#allocation2 + $0x50] sm:$0x1]  ;;  %v6295_v19 = vld [vmem:[%s7922_s5 + $0x88] sm:$0xff]  }
  0x84   : > { %1241 = vst [vmem:[#allocation2 + $0x44] sm:$0x1] %v1240_v51  ;;  %v7058_v63 = vadd.f32 %v6952_v58, %v695_v34  ;;  %v2188_v4 = vor.u32 %v2187_v50, %v2183_v35  ;;  %v1638_v5 = vrot.slane %v1636_v47, 1  ;;  %v5238_v8 = vpack.c.bf16 %v765_v54, %v765_v54  ;;  %v7070_v27 = vld [vmem:[#allocation2 + $0x24] sm:$0xff]  }
  0x85   : > { %v6283_v57 = vld [vmem:[#allocation2 + $0x8] ss:$0 sps:$4 sm:$0x11]   ;;  %v970_v10 = vshrl.u32 %v5237_v43, 16  ;;  %v973_v13 = vshll.u32 %v5237_v43, 16  ;;  %v1660_v53 = vshll.u32 %v7028_v6, 16  ;;  %v1656_v42 = vsel %vm1632_vm10, %v1651_v52, %v7025_v0 }
  0x86   : > { %v1641_v12 = vshll.u32 %v6283_v57, 16  ;;  %v1665_v14 = vshll.u32 %v6292_v3, 16  ;;  %v2193_v62 = vsel %vm1632_vm10, %v2188_v4, %v2192_v56  ;;  %v1639_v37 = vor.u32 %v1638_v5, %v1634_v45  ;;  %v7075_v33 = vld [vmem:[#allocation2 + $0x2c] ss:$0 sps:$4 sm:$0x11]   ;;  %v6323_v34 = vld [vmem:[%s7922_s5 + $0x1c0] sm:$0xff]  }
  0x87   : > { %v972_v55 = vrot.slane %v970_v10, 7  ;;  %v978_v2 = vshrl.u32 %v5238_v8, 16  ;;  %2667 = vmatprep.mubr.bf16.mxu0 %v2193_v62  ;;  %v981_v15 = vshll.u32 %v5238_v8, 16  ;;  %v1662_v26 = vrot.slane %v1660_v53, 1  ;;  %v526_v45 = vld [vmem:[#allocation2 + $0x60] sm:$0x1]  ;;  %5737 = vmatprep.subr.bf16.mxu0 %v6323_v34 }
  0x88   : > { %v1643_v22 = vrot.slane %v1641_v12, 1  ;;  %v7065_v61 = vrot.slane %v1665_v14, 1  ;;  %2668 = vmatmul.mubr.bf16.gmra.mrb[12].mxu0 %v7032_v28  ;;  %v524_v32 = vsel %vm6625_vm3, 0, %v523_v59  ;;  %v580_v44 = vsel %vm6634_vm5, 0, %v579_v17 }
  0x89   : > { %v975_v29 = vor.u32 %v973_v13, %v972_v55  ;;  %v976_v9 = vrot.slane %v972_v55, 4  ;;  %v980_v30 = vrot.slane %v978_v2, 7  ;;  %525 = vst [vmem:[#allocation2 + $0x54] sm:$0x1] %v524_v32  ;;  %v735_v39 = vadd.f32 %v6952_v58, %v696_v60  ;;  %581 = vst [vmem:[#allocation2 + $0x5c] sm:$0x1] %v580_v44 }
  0x8a   : > { %v1644_v35 = vsel %vm1632_vm10, %v1639_v37, %v1643_v22  ;;  %v7081_v11 = vld [vmem:[#allocation2 + $0x3c] sm:$0xff]   ;;  %v5321_v51 = vunpack.c.l.bf16 %v7062_v41  ;;  %v1663_v43 = vor.u32 %v1662_v26, %v1658_v31  ;;  %v766_v56 = vmax.f32 %v7058_v63, 0.0  ;;  %v6302_v60 = vld [vmem:[%s7922_s5 + $0x90] sm:$0xff]   ;;  %v6301_v34 = vld [vmem:[#allocation2 + $0x38] ss:$0 sps:$4 sm:$0x11]  }
  0x8b   : > { %3109 = vmatprep.mubr.bf16.mxu1 %v1644_v35  ;;  %v7088_v47 = vld [vmem:[#allocation2 + $0x44] ss:$0 sps:$4 sm:$0x11]   ;;  %v983_v48 = vor.u32 %v981_v15, %v980_v30  ;;  %v985_v3 = vrot.slane %v980_v30, 4  ;;  %v1243_v50 = vsel %vm6693_vm8, %v975_v29, %v1242_v16  ;;  %v2195_v0 = vshrl.u32 %v7081_v11, 16  ;;  %v7114_v55 = vld [vmem:[#allocation2 + $0x30] sm:$0xff]  }
  0x8c   : > { %3110 = vmatmul.mubr.bf16.vlgmr.msra.gmra.mrb[16].mxu1 %v7039_v7  ;;  %v2197_v54 = vshll.u32 %v7081_v11, 16  ;;  %1244 = vst [vmem:[#allocation2 + $0x48] sm:$0xf] %v1243_v50  ;;  %v2202_v57 = vshll.u32 %v7088_v47, 16  ;;  %v767_v59 = vmax.f32 %v735_v39, 0.0  ;;  %v5239_v31 = vpack.c.bf16 %v766_v56, %v766_v56 }
  0x8d   : > { %5922 = vmatpush3.bf16.msra.mxu1 %v6899_v1  ;;  %3117 = vmatprep.mubr.bf16.mxu1 %v1656_v42  ;;  %v984_v52 = vsel %vm6651_vm6, %v976_v9, %v983_v48  ;;  %v1247_v7 = vsel %vm6625_vm3, %v985_v3, %v1246_v24  ;;  %v1672_v63 = vshll.u32 %v7070_v27, 16  ;;  %v582_v1 = vld [vmem:[#allocation2 + $0x68] sm:$0x1]  ;;  %v5322_v5 = vunpack.c.h.bf16 %v7062_v41  ;;  %v6307_v9 = vld [vmem:[%s7922_s5 + $0x98] sm:$0xff]  }
  0x8e   : > { %v2199_v4 = vrot.slane %v2197_v54, 1  ;;  %1245 = vst [vmem:[#allocation2 + $0x4c] sm:$0xf] %v984_v52  ;;  %1248 = vst [vmem:[#allocation2 + $0x50] sm:$0x1] %v1247_v7  ;;  %5923 = vmatprep.subr.bf16.mxu1 %v6295_v19  ;;  %v2204_v8 = vrot.slane %v2202_v57, 1  ;;  %v5240_v10 = vpack.c.bf16 %v767_v59, %v767_v59  ;;  %v1668_v15 = vsel %vm1632_vm10, %v1663_v43, %v7065_v61 }
  0x8f   : > { %v1677_v12 = vshll.u32 %v7075_v33, 16  ;;  %v527_v13 = vsel %vm6625_vm3, 0, %v526_v45  ;;  %v987_v14 = vshrl.u32 %v5239_v31, 16  ;;  %v990_v62 = vshll.u32 %v5239_v31, 16 }
  0x90   : > { %v2200_v53 = vor.u32 %v2199_v4, %v2195_v0  ;;  %v1670_v37 = vshrl.u32 %v7070_v27, 16  ;;  %528 = vst [vmem:[#allocation2 + $0x60] sm:$0x1] %v527_v13  ;;  %v995_v2 = vshrl.u32 %v5240_v10, 16  ;;  %v998_v16 = vshll.u32 %v5240_v10, 16  ;;  %v6312_v0 = vld [vmem:[%s7922_s5 + $0xa0] sm:$0xff]  }
  0x91   : > { %5924 = vmatpush3.bf16.msra.mxu1 %v6295_v19  ;;  %v1674_v17 = vrot.slane %v1672_v63, 1  ;;  %v583_v41 = vsel %vm6634_vm5, 0, %v582_v1  ;;  %v989_v24 = vrot.slane %v987_v14, 7  ;;  %v1249_v26 = vld [vmem:[#allocation2 + $0x54] sm:$0xf]  ;;  %v697_v29 = vmul.f32 %v6960_v18, %v5321_v51  ;;  %v6317_v13 = vld [vmem:[%s7922_s5 + $0xa8] sm:$0xff]  }
  0x92   : > { %v2205_v22 = vsel %vm1632_vm10, %v2200_v53, %v2204_v8  ;;  %584 = vst [vmem:[#allocation2 + $0x68] sm:$0x1] %v583_v41  ;;  %5925 = vmatprep.subr.bf16.mxu1 %v6302_v60  ;;  %v997_v19 = vrot.slane %v995_v2, 7  ;;  %v1253_v30 = vld [vmem:[#allocation2 + $0x5c] sm:$0x1]  ;;  %v1679_v32 = vrot.slane %v1677_v12, 1  ;;  %v698_v33 = vmul.f32 %v6960_v18, %v5322_v5 }
  0x93   : > { %2675 = vmatprep.mubr.bf16.mxu0 %v2205_v22  ;;  %v992_v61 = vor.u32 %v990_v62, %v989_v24  ;;  %v993_v35 = vrot.slane %v989_v24, 4  ;;  %v736_v42 = vadd.f32 %v6952_v58, %v697_v29  ;;  %v1684_v44 = vshll.u32 %v7114_v55, 16  ;;  %v7149_v12 = vld [vmem:[#allocation2 + $0x3c] sm:$0xff]   ;;  %v7154_v62 = vld [vmem:[#allocation2 + $0x44] ss:$0 sps:$4 sm:$0x11]  }
  0x94   : > { %2676 = vmatmul.mubr.bf16.gmra.mrb[16].mxu0 %v7081_v11  ;;  %3118 = vmatmul.mubr.bf16.gmra.mrb[20].mxu1 %v6984_v23  ;;  %v1000_v45 = vor.u32 %v998_v16, %v997_v19  ;;  %v1002_v48 = vrot.slane %v997_v19, 4  ;;  %v1675_v3 = vor.u32 %v1674_v17, %v1670_v37  ;;  %v737_v50 = vadd.f32 %v6952_v58, %v698_v33 }
  0x95   : > { %v7130_v39 = vld [vmem:[#allocation2 + $0x48] sm:$0xff]   ;;  %3125 = vmatprep.mubr.bf16.mxu1 %v1668_v15  ;;  %5926 = vmatpush3.bf16.msra.mxu1 %v6302_v60  ;;  %v7133_v18 = vld [vmem:[#allocation2 + $0x50] ss:$0 sps:$4 sm:$0x11]   ;;  %v1250_v23 = vsel %vm6693_vm8, %v992_v61, %v1249_v26  ;;  %v768_v51 = vmax.f32 %v736_v42, 0.0  ;;  %v1682_v59 = vshrl.u32 %v7114_v55, 16 }
  0x96   : > { %5927 = vmatprep.subr.bf16.mxu1 %v6307_v9  ;;  %v2207_v54 = vshrl.u32 %v7130_v39, 16  ;;  %v2209_v43 = vshll.u32 %v7130_v39, 16  ;;  %v1001_v56 = vsel %vm6651_vm6, %v993_v35, %v1000_v45  ;;  %1251 = vst [vmem:[#allocation2 + $0x54] sm:$0xf] %v1250_v23  ;;  %v1254_v58 = vsel %vm6625_vm3, %v1002_v48, %v1253_v30  ;;  %v7170_v35 = vld [vmem:[#allocation2 + $0x48] sm:$0xff]  }
  0x97   : > { %v2214_v57 = vshll.u32 %v7133_v18, 16  ;;  %1252 = vst [vmem:[#allocation2 + $0x58] sm:$0xf] %v1001_v56  ;;  %1255 = vst [vmem:[#allocation2 + $0x5c] sm:$0x1] %v1254_v58  ;;  %v769_v52 = vmax.f32 %v737_v50, 0.0  ;;  %v5241_v7 = vpack.c.bf16 %v768_v51, %v768_v51  ;;  %v1680_v4 = vsel %vm1632_vm10, %v1675_v3, %v1679_v32 }
  0x98   : > { %v2211_v60 = vrot.slane %v2209_v43, 1  ;;  %v1686_v31 = vrot.slane %v1684_v44, 1  ;;  %v1689_v63 = vshll.u32 %v6301_v34, 16  ;;  %v1256_v14 = vld [vmem:[#allocation2 + $0x60] sm:$0xf]  ;;  %v1694_v61 = vshrl.u32 %v7149_v12, 16 }
  0x99   : > { %5928 = vmatpush3.bf16.msra.mxu1 %v6307_v9  ;;  %v2216_v1 = vrot.slane %v2214_v57, 1  ;;  %v5242_v5 = vpack.c.bf16 %v769_v52, %v769_v52  ;;  %v1004_v8 = vshrl.u32 %v5241_v7, 16  ;;  %v1007_v10 = vshll.u32 %v5241_v7, 16  ;;  %v1260_v41 = vld [vmem:[#allocation2 + $0x68] sm:$0x1]  ;;  %v6335_v3 = vld [vmem:[%s7922_s5 + $0xb8] sm:$0xff]  }
  0x9a   : > { %5929 = vmatprep.subr.bf16.mxu1 %v6312_v0  ;;  %v2212_v53 = vor.u32 %v2211_v60, %v2207_v54  ;;  %v1687_v22 = vor.u32 %v1686_v31, %v1682_v59  ;;  %v1691_v15 = vrot.slane %v1689_v63, 1  ;;  %v1696_v9 = vshll.u32 %v7149_v12, 16  ;;  %v7185_v56 = vld [vmem:[#allocation2 + $0x6c] sm:$0xff]   ;;  %v6392_v31 = vld [vmem:[#allocation2 + $0x74] ss:$0 sps:$4 sm:$0x11]  }
  0x9b   : > { %v1006_v37 = vrot.slane %v1004_v8, 7  ;;  %v1012_v2 = vshrl.u32 %v5242_v5, 16  ;;  %v1015_v16 = vshll.u32 %v5242_v5, 16  ;;  %v1701_v48 = vshll.u32 %v7154_v62, 16 }
  0x9c   : > { %3126 = vmatmul.mubr.bf16.gmra.mrb[24].mxu1 %v7028_v6  ;;  %v2217_v17 = vsel %vm1632_vm10, %v2212_v53, %v2216_v1  ;;  %v6322_v6 = vld [vmem:[%s7922_s5 + $0xb0] sm:$0xff]   ;;  %v1692_v45 = vsel %vm1632_vm10, %v1687_v22, %v1691_v15  ;;  %v2245_v58 = vshll.u32 %v7185_v56, 16  ;;  %v1708_v59 = vshll.u32 %v7170_v35, 16  ;;  %v7207_v22 = vld [vmem:[#allocation2 + $0x78] sm:$0xff]  }
  0x9d   : > { %3133 = vmatprep.mubr.bf16.mxu1 %v1680_v4  ;;  %5930 = vmatpush3.bf16.msra.mxu1 %v6312_v0  ;;  %v1009_v24 = vor.u32 %v1007_v10, %v1006_v37  ;;  %v1010_v26 = vrot.slane %v1006_v37, 4  ;;  %v1014_v29 = vrot.slane %v1012_v2, 7  ;;  %v1698_v0 = vrot.slane %v1696_v9, 1  ;;  %v7188_v52 = vld [vmem:[#allocation2 + $0x50] ss:$0 sps:$4 sm:$0x11]  }
  0x9e   : > { %2683 = vmatprep.mubr.bf16.mxu0 %v2217_v17  ;;  %5931 = vmatprep.subr.bf16.mxu1 %v6317_v13  ;;  %v7163_v19 = vld [vmem:[#allocation2 + $0x54] sm:$0xff]   ;;  %v7165_v30 = vld [vmem:[#allocation2 + $0x5c] ss:$0 sps:$4 sm:$0x11]   ;;  %v1703_v7 = vrot.slane %v1701_v48, 1  ;;  %v2243_v4 = vshrl.u32 %v7185_v56, 16 }
  0x9f   : > { %2684 = vmatmul.mubr.bf16.gmra.mrb[20].mxu0 %v7130_v39  ;;  %v1017_v32 = vor.u32 %v1015_v16, %v1014_v29  ;;  %v1019_v33 = vrot.slane %v1014_v29, 4  ;;  %v1257_v34 = vsel %vm6693_vm8, %v1009_v24, %v1256_v14  ;;  %v2219_v42 = vshrl.u32 %v7163_v19, 16  ;;  %v7196_v8 = vld [vmem:[#allocation2 + $0x54] sm:$0xff]   ;;  %v7210_v24 = vld [vmem:[#allocation2 + $0x5c] ss:$0 sps:$4 sm:$0x11]  }
  0xa0   : > { %v2221_v44 = vshll.u32 %v7163_v19, 16  ;;  %1258 = vst [vmem:[#allocation2 + $0x60] sm:$0xf] %v1257_v34  ;;  %v2226_v50 = vshll.u32 %v7165_v30, 16  ;;  %v1699_v46 = vor.u32 %v1698_v0, %v1694_v61  ;;  %v2250_v63 = vshll.u32 %v6392_v31, 16 }
  0xa1   : > { %5932 = vmatpush3.bf16.msra.mxu1 %v6317_v13  ;;  %v1018_v23 = vsel %vm6651_vm6, %v1010_v26, %v1017_v32  ;;  %v1261_v51 = vsel %vm6625_vm3, %v1019_v33, %v1260_v41  ;;  %v1706_v1 = vshrl.u32 %v7170_v35, 16  ;;  %v1713_v5 = vshll.u32 %v7188_v52, 16  ;;  %v6394_v34 = vld [vmem:[#allocation2 + $0x80] ss:$0 sps:$4 sm:$0x11]  }
  0xa2   : > { %5933 = vmatprep.subr.bf16.mxu1 %v6322_v6  ;;  %v2223_v54 = vrot.slane %v2221_v44, 1  ;;  %1259 = vst [vmem:[#allocation2 + $0x64] sm:$0xf] %v1018_v23  ;;  %1262 = vst [vmem:[#allocation2 + $0x68] sm:$0x1] %v1261_v51  ;;  %v2228_v43 = vrot.slane %v2226_v50, 1  ;;  %v1704_v13 = vsel %vm1632_vm10, %v1699_v46, %v1703_v7 }
  0xa3   : > { %v1710_v53 = vrot.slane %v1708_v59, 1  ;;  %v2252_v41 = vrot.slane %v2250_v63, 1  ;;  %v2257_v15 = vshll.u32 %v7207_v22, 16  ;;  %v1715_v9 = vrot.slane %v1713_v5, 1 }
  0xa4   : > { %3134 = vmatmul.mubr.bf16.gmra.mrb[28].mxu1 %v7070_v27  ;;  %v2224_v57 = vor.u32 %v2223_v54, %v2219_v42  ;;  %v2247_v27 = vrot.slane %v2245_v58, 1  ;;  %v2255_v61 = vshrl.u32 %v7207_v22, 16  ;;  %v1718_v44 = vshrl.u32 %v7196_v8, 16  ;;  %v6396_v31 = vld [vmem:[#allocation2 + $0x8c] ss:$0 sps:$4 sm:$0x11]  }
  0xa5   : > { %3141 = vmatprep.mubr.bf16.mxu1 %v1692_v45  ;;  %5934 = vmatpush3.bf16.msra.mxu1 %v6322_v6  ;;  %v1711_v29 = vor.u32 %v1710_v53, %v1706_v1  ;;  %v1720_v6 = vshll.u32 %v7196_v8, 16  ;;  %v2259_v42 = vrot.slane %v2257_v15, 1  ;;  %v1725_v45 = vshll.u32 %v7210_v24, 16 }
  0xa6   : > { %5935 = vmatprep.subr.bf16.mxu1 %v6335_v3  ;;  %v2229_v60 = vsel %vm1632_vm10, %v2224_v57, %v2228_v43  ;;  %v2248_v17 = vor.u32 %v2247_v27, %v2243_v4  ;;  %v7223_v43 = vld [vmem:[#allocation2 + $0x84] sm:$0xff]   ;;  %v2274_v63 = vshll.u32 %v6396_v31, 16 }
  0xa7   : > { %2691 = vmatprep.mubr.bf16.mxu0 %v2229_v60  ;;  %v1716_v50 = vsel %vm1632_vm10, %v1711_v29, %v1715_v9  ;;  %v1722_v23 = vrot.slane %v1720_v6, 1  ;;  %v2260_v54 = vor.u32 %v2259_v42, %v2255_v61  ;;  %v2269_v58 = vshll.u32 %v7223_v43, 16  ;;  %v7241_v29 = vld [vmem:[#allocation2 + $0x74] ss:$0 sps:$4 sm:$0x11]   ;;  %v7250_v61 = vld [vmem:[%s7922_s5 + $0x200] sm:$0xff]  }
  0xa8   : > { %2692 = vmatmul.mubr.bf16.gmra.mrb[24].mxu0 %v7163_v19  ;;  %v1727_v57 = vrot.slane %v1725_v45, 1  ;;  %v2267_v4 = vshrl.u32 %v7223_v43, 16  ;;  %v2363_v45 = vrot.slane %v7032_v28, 1  ;;  %v6400_v28 = vld [vmem:[#allocation2 + $0xa4] ss:$0 sps:$4 sm:$0x11]  }
  0xa9   : > { %5936 = vmatpush3.bf16.msra.mxu1 %v6335_v3  ;;  %v7198_v10 = vld [vmem:[#allocation2 + $0x60] sm:$0xff]   ;;  %v7201_v14 = vld [vmem:[#allocation2 + $0x68] ss:$0 sps:$4 sm:$0x11]   ;;  %v2253_v3 = vsel %vm1632_vm10, %v2248_v17, %v2252_v41  ;;  %v1723_v46 = vor.u32 %v1722_v23, %v1718_v44  ;;  %v2271_v27 = vrot.slane %v2269_v58, 1  ;;  %v2364_v23 = vrot.slane %v7037_v49, 1 }
  0xaa   : > { %v2231_v37 = vshrl.u32 %v7198_v10, 16  ;;  %v2233_v2 = vshll.u32 %v7198_v10, 16  ;;  %v2238_v16 = vshll.u32 %v7201_v14, 16  ;;  %v7219_v51 = vld [vmem:[#allocation2 + $0x60] sm:$0xff]   ;;  %5969 = vmatprep.subr.bf16.mxu1 %v7250_v61  ;;  %v2366_v49 = vrot.slane %v7081_v11, 1 }
  0xab   : > { %v7226_v7 = vld [vmem:[#allocation2 + $0x68] ss:$0 sps:$4 sm:$0x11]   ;;  %v1732_v59 = vshll.u32 %v7219_v51, 16  ;;  %v1728_v1 = vsel %vm1632_vm10, %v1723_v46, %v1727_v57  ;;  %v1730_v5 = vshrl.u32 %v7219_v51, 16  ;;  %v2272_v15 = vor.u32 %v2271_v27, %v2267_v4 }
  0xac   : > { %3142 = vmatmul.mubr.bf16.gmra.mrb[32].mxu1 %v7114_v55  ;;  %v2235_v26 = vrot.slane %v2233_v2, 1  ;;  %v2240_v32 = vrot.slane %v2238_v16, 1  ;;  %v2262_v55 = vshll.u32 %v6394_v34, 16  ;;  %v1737_v53 = vshll.u32 %v7226_v7, 16  ;;  %v7238_v2 = vld [vmem:[#allocation2 + $0x90] sm:$0xff]  }
  0xad   : > { %3149 = vmatprep.mubr.bf16.mxu1 %v1704_v13  ;;  %v1734_v13 = vrot.slane %v1732_v59, 1  ;;  %v2281_v16 = vshll.u32 %v7238_v2, 16  ;;  %v6398_v17 = vld [vmem:[#allocation2 + $0x98] ss:$0 sps:$4 sm:$0x11]   ;;  %v2298_v46 = vshll.u32 %v6400_v28, 16  ;;  %v7268_v59 = vsel %vm1841_vm9, %v2363_v45, %v2364_v23 }
  0xae   : > { %v2236_v33 = vor.u32 %v2235_v26, %v2231_v37  ;;  %v2264_v0 = vrot.slane %v2262_v55, 1  ;;  %v7234_v37 = vld [vmem:[#allocation2 + $0x6c] sm:$0xff]   ;;  %v2286_v41 = vshll.u32 %v6398_v17, 16  ;;  %v2276_v26 = vrot.slane %v2274_v63, 1  ;;  %v7280_v17 = vld [vmem:[#allocation2 + $0x84] sm:$0xff]  }
  0xaf   : > { %v1735_v9 = vor.u32 %v1734_v13, %v1730_v5  ;;  %v1739_v6 = vrot.slane %v1737_v53, 1  ;;  %v2283_v34 = vrot.slane %v2281_v16, 1  ;;  %v1742_v44 = vshrl.u32 %v7234_v37, 16  ;;  %v7263_v57 = vld [vmem:[#allocation2 + $0x80] ss:$0 sps:$4 sm:$0x11]  }
  0xb0   : > { %v2241_v48 = vsel %vm1632_vm10, %v2236_v33, %v2240_v32  ;;  %v2265_v60 = vsel %vm1632_vm10, %v2260_v54, %v2264_v0  ;;  %v1744_v32 = vshll.u32 %v7234_v37, 16  ;;  %v7244_v33 = vld [vmem:[#allocation2 + $0x78] sm:$0xff]   ;;  %v2288_v55 = vrot.slane %v2286_v41, 1 }
  0xb1   : > { %2699 = vmatprep.mubr.bf16.mxu0 %v2241_v48  ;;  %v2277_v42 = vsel %vm1632_vm10, %v2272_v15, %v2276_v26  ;;  %v1740_v48 = vsel %vm1632_vm10, %v1735_v9, %v1739_v6  ;;  %v7259_v0 = vld [vmem:[#allocation2 + $0x9c] sm:$0xff]   ;;  %v2367_v4 = vrot.slane %v7088_v47, 1  ;;  %v2370_v13 = vrot.slane %v7133_v18, 1  ;;  %v7291_v18 = vld [vmem:[#allocation2 + $0x8c] ss:$0 sps:$4 sm:$0x11]  }
  0xb2   : > { %2700 = vmatmul.mubr.bf16.gmra.mrb[28].mxu0 %v7198_v10  ;;  %v2291_v54 = vshrl.u32 %v7259_v0, 16  ;;  %v2293_v58 = vshll.u32 %v7259_v0, 16  ;;  %v1754_v53 = vshrl.u32 %v7244_v33, 16  ;;  %v1761_v16 = vshll.u32 %v7263_v57, 16 }
  0xb3   : > { %2707 = vmatprep.mubr.bf16.mxu0 %v2253_v3  ;;  %v1746_v3 = vrot.slane %v1744_v32, 1  ;;  %v7275_v5 = vsel %vm1841_vm9, %v2366_v49, %v2367_v4  ;;  %v2372_v15 = vrot.slane %v7163_v19, 1  ;;  %v2373_v26 = vrot.slane %v7165_v30, 1  ;;  %v7316_v49 = vld [vmem:[#allocation2 + $0xb4] sm:$0xff]  }
  0xb4   : > { %3150 = vmatmul.mubr.bf16.gmra.mrb[36].mxu1 %v7149_v12  ;;  %v2375_v9 = vrot.slane %v7198_v10, 1  ;;  %v2376_v6 = vrot.slane %v7201_v14, 1  ;;  %v7305_v10 = vld [vmem:[#allocation2 + $0x90] sm:$0xff]   ;;  %v1773_v28 = vshll.u32 %v7291_v18, 16 }
  0xb5   : > { %3157 = vmatprep.mubr.bf16.mxu1 %v1716_v50  ;;  %v1749_v50 = vshll.u32 %v7241_v29, 16  ;;  %v1747_v31 = vor.u32 %v1746_v3, %v1742_v44  ;;  %v7299_v30 = vsel %vm1841_vm9, %v2372_v15, %v2373_v26  ;;  %v6402_v3 = vld [vmem:[#allocation2 + $0xb0] ss:$0 sps:$4 sm:$0x11]   ;;  %v1780_v4 = vshll.u32 %v7305_v10, 16 }
  0xb6   : > { %v7303_v44 = vsel %vm1841_vm9, %v2375_v9, %v2376_v6  ;;  %v1860_v9 = vrot.slane %v7170_v35, 1  ;;  %v1861_v6 = vrot.slane %v7188_v52, 1  ;;  %v7341_v52 = vld [vmem:[#allocation2 + $0xc0] sm:$0xff]  }
  0xb7   : > { %v1751_v63 = vrot.slane %v1749_v50, 1  ;;  %v2310_v50 = vshll.u32 %v6402_v3, 16 }
  0xba   : > { %2708 = vmatmul.mubr.bf16.gmra.mrb[32].mxu0 %v7185_v56  ;;  %v2279_v56 = vshrl.u32 %v7238_v2, 16 }
  0xbb   : > { %2715 = vmatprep.mubr.bf16.mxu0 %v2265_v60  ;;  %v1756_v60 = vshll.u32 %v7244_v33, 16 }
  0xbc   : > { %3158 = vmatmul.mubr.bf16.gmra.mrb[40].mxu1 %v7170_v35  ;;  %v2284_v27 = vor.u32 %v2283_v34, %v2279_v56  ;;  %v2300_v56 = vrot.slane %v2298_v46, 1  ;;  %v7295_v34 = vld [vmem:[#allocation2 + $0xa8] sm:$0xff]   ;;  %v7312_v46 = vld [vmem:[#allocation2 + $0x98] ss:$0 sps:$4 sm:$0x11]  }
  0xbd   : > { %3165 = vmatprep.mubr.bf16.mxu1 %v1728_v1  ;;  %v2295_v1 = vrot.slane %v2293_v58, 1  ;;  %v1758_v11 = vrot.slane %v1756_v60, 1  ;;  %v2305_v19 = vshll.u32 %v7295_v34, 16  ;;  %v2303_v45 = vshrl.u32 %v7295_v34, 16 }
  0xbe   : > { %v2289_v41 = vsel %vm1632_vm10, %v2284_v27, %v2288_v55  ;;  %v1763_v55 = vrot.slane %v1761_v16, 1  ;;  %v2317_v60 = vshll.u32 %v7316_v49, 16  ;;  %v2312_v27 = vrot.slane %v2310_v50, 1 }
  0xbf   : > { %v2296_v32 = vor.u32 %v2295_v1, %v2291_v54  ;;  %v1766_v54 = vshrl.u32 %v7280_v17, 16  ;;  %v1785_v15 = vshll.u32 %v7312_v46, 16  ;;  %v2327_v50 = vshrl.u32 %v7341_v52, 16 }
  0xc0   : > { %v2319_v16 = vrot.slane %v2317_v60, 1  ;;  %v6406_v60 = vld [vmem:[#allocation2 + $0xc8] ss:$0 sps:$4 sm:$0x11]  }
  0xc1   : > { %v2301_v14 = vsel %vm1632_vm10, %v2296_v32, %v2300_v56 }
  0xc2   : > { %2716 = vmatmul.mubr.bf16.gmra.mrb[36].mxu0 %v7207_v22  ;;  %v2369_v22 = vrot.slane %v7130_v39, 1  ;;  %v1752_v39 = vsel %vm1632_vm10, %v1747_v31, %v1751_v63  ;;  %v2315_v31 = vshrl.u32 %v7316_v49, 16 }
  0xc3   : > { %2723 = vmatprep.mubr.bf16.mxu0 %v2277_v42  ;;  %v1768_v42 = vshll.u32 %v7280_v17, 16 }
  0xc4   : > { %3166 = vmatmul.mubr.bf16.gmra.mrb[44].mxu1 %v7196_v8  ;;  %v7283_v47 = vsel %vm1841_vm9, %v2369_v22, %v2370_v13  ;;  %v6404_v22 = vld [vmem:[#allocation2 + $0xbc] ss:$0 sps:$4 sm:$0x11]   ;;  %v2320_v35 = vor.u32 %v2319_v16, %v2315_v31 }
  0xc5   : > { %3173 = vmatprep.mubr.bf16.mxu1 %v1740_v48  ;;  %v2307_v48 = vrot.slane %v2305_v19, 1  ;;  %v1770_v58 = vrot.slane %v1768_v42, 1  ;;  %v2322_v1 = vshll.u32 %v6404_v22, 16  ;;  %v1863_v19 = vrot.slane %v7196_v8, 1 }
  0xc6   : > { %v2329_v42 = vshll.u32 %v7341_v52, 16 }
  0xc7   : > { %v2308_v63 = vor.u32 %v2307_v48, %v2303_v45  ;;  %v1771_v13 = vor.u32 %v1770_v58, %v1766_v54  ;;  %v1787_v48 = vrot.slane %v1785_v15, 1  ;;  %v1870_v54 = vrot.slane %v7241_v29, 1 }
  0xc8   : > { %v1872_v29 = vrot.slane %v7244_v33, 1 }
  0xc9   : > { %v2313_v32 = vsel %vm1632_vm10, %v2308_v63, %v2312_v27  ;;  %v7354_v27 = vld [vmem:[#allocation2 + $0xa8] sm:$0xff]  }
  0xca   : > { %2724 = vmatmul.mubr.bf16.gmra.mrb[40].mxu0 %v7223_v43  ;;  %v1759_v43 = vor.u32 %v1758_v11, %v1754_v53  ;;  %v1775_v53 = vrot.slane %v1773_v28, 1  ;;  %v1858_v11 = vrot.slane %v7154_v62, 1  ;;  %v7335_v62 = vsel %vm1841_vm9, %v1860_v9, %v1861_v6 }
  0xcb   : > { %2731 = vmatprep.mubr.bf16.mxu0 %v2289_v41  ;;  %v1778_v41 = vshrl.u32 %v7305_v10, 16  ;;  %v2331_v28 = vrot.slane %v2329_v42, 1 }
  0xcc   : > { %3174 = vmatmul.mubr.bf16.gmra.mrb[48].mxu1 %v7219_v51  ;;  %v1764_v23 = vsel %vm1632_vm10, %v1759_v43, %v1763_v55  ;;  %v1776_v56 = vsel %vm1632_vm10, %v1771_v13, %v1775_v53  ;;  %v1864_v43 = vrot.slane %v7210_v24, 1  ;;  %v2324_v55 = vrot.slane %v2322_v1, 1 }
  0xcd   : > { %3181 = vmatprep.mubr.bf16.mxu1 %v1752_v39  ;;  %v1782_v39 = vrot.slane %v1780_v4, 1  ;;  %v1866_v24 = vrot.slane %v7219_v51, 1  ;;  %v2334_v4 = vshll.u32 %v6406_v60, 16  ;;  %v1873_v1 = vrot.slane %v7263_v57, 1 }
  0xce   : > { %v7345_v3 = vsel %vm1841_vm9, %v1863_v19, %v1864_v43  ;;  %v2325_v58 = vsel %vm1632_vm10, %v2320_v35, %v2324_v55  ;;  %v1875_v13 = vrot.slane %v7280_v17, 1  ;;  %v1876_v53 = vrot.slane %v7291_v18, 1 }
  0xcf   : > { %v1783_v45 = vor.u32 %v1782_v39, %v1778_v41  ;;  %v7371_v16 = vsel %vm1841_vm9, %v1872_v29, %v1873_v1  ;;  %v2332_v41 = vor.u32 %v2331_v28, %v2327_v50  ;;  %v1878_v57 = vrot.slane %v7305_v10, 1  ;;  %v6407_v50 = vld [vmem:[#allocation2 + $0xc] sm:$0xff]   ;;  %v6410_v1 = vld [vmem:[#allocation2 + $0x20] ss:$0 sps:$4 sm:$0x11]  }
  0xd0   : > { %v1879_v39 = vrot.slane %v7312_v46, 1  ;;  %v1802_v43 = vshrl.u32 %v7354_v27, 16 }
  0xd1   : > { %v1788_v51 = vsel %vm1632_vm10, %v1783_v45, %v1787_v48  ;;  %v1884_v45 = vrot.slane %v7354_v27, 1 }
  0xd2   : > { %2732 = vmatmul.mubr.bf16.gmra.mrb[44].mxu0 %v7238_v2  ;;  %v1857_v2 = vrot.slane %v7149_v12, 1  ;;  %v7332_v12 = vld [vmem:[#allocation2 + $0x9c] sm:$0xff]   ;;  %v7381_v9 = vsel %vm1841_vm9, %v1878_v57, %v1879_v39 }
  0xd3   : > { %2739 = vmatprep.mubr.bf16.mxu0 %v2301_v14  ;;  %v6326_v14 = vld [vmem:[#allocation2 + $0xa4] ss:$0 sps:$4 sm:$0x11]   ;;  %v1792_v8 = vshll.u32 %v7332_v12, 16 }
  0xd4   : > { %3182 = vmatmul.mubr.bf16.gmra.mrb[52].mxu1 %v7234_v37  ;;  %v7326_v26 = vsel %vm1841_vm9, %v1857_v2, %v1858_v11  ;;  %v1797_v63 = vshll.u32 %v6326_v14, 16  ;;  %v2336_v2 = vrot.slane %v2334_v4, 1  ;;  %v6332_v11 = vld [vmem:[#allocation2 + $0xb0] ss:$0 sps:$4 sm:$0x11]   ;;  %v1882_v6 = vrot.slane %v6326_v14, 1 }
  0xd5   : > { %3189 = vmatprep.mubr.bf16.mxu1 %v1764_v23  ;;  %v1869_v23 = vrot.slane %v7234_v37, 1  ;;  %v1794_v37 = vrot.slane %v1792_v8, 1  ;;  %v1809_v35 = vshll.u32 %v6332_v11, 16  ;;  %v1885_v48 = vrot.slane %v6332_v11, 1 }
  0xd6   : > { %v1799_v15 = vrot.slane %v1797_v63, 1  ;;  %v2337_v19 = vsel %vm1632_vm10, %v2332_v41, %v2336_v2  ;;  %v6412_v11 = vld [vmem:[#allocation2 + $0x2c] ss:$0 sps:$4 sm:$0x11]  }
  0xd7   : > { %v7362_v22 = vsel %vm1841_vm9, %v1869_v23, %v1870_v54  ;;  %v2354_v23 = vrot.slane %v6407_v50, 1  ;;  %v6408_v54 = vld [vmem:[#allocation2 + $0x14] ss:$0 sps:$4 sm:$0x11]   ;;  %v1811_v60 = vrot.slane %v1809_v35, 1  ;;  %v2361_v41 = vrot.slane %v6412_v11, 1 }
  0xd8   : > { %v6334_v50 = vld [vmem:[%s7922_s5 + $0x198] sm:$0xff]  }
  0xda   : > { %2740 = vmatmul.mubr.bf16.gmra.mrb[48].mxu0 %v7259_v0  ;;  %v1867_v0 = vrot.slane %v7226_v7, 1  ;;  %v1790_v7 = vshrl.u32 %v7332_v12, 16 }
  0xdb   : > { %2747 = vmatprep.mubr.bf16.mxu0 %v2313_v32  ;;  %v7383_v32 = vld [vmem:[#allocation2 + $0xb4] sm:$0xff]  }
  0xdc   : > { %3190 = vmatmul.mubr.bf16.gmra.mrb[56].mxu1 %v7244_v33  ;;  %v7357_v31 = vsel %vm1841_vm9, %v1866_v24, %v1867_v0  ;;  %v7374_v33 = vsel %vm1841_vm9, %v1875_v13, %v1876_v53  ;;  %v1795_v18 = vor.u32 %v1794_v37, %v1790_v7  ;;  %v1887_v8 = vrot.slane %v7383_v32, 1  ;;  %v6409_v37 = vld [vmem:[#allocation2 + $0x18] sm:$0xff]   ;;  %v6411_v53 = vld [vmem:[#allocation2 + $0x24] sm:$0xff]  }
  0xdd   : > { %3197 = vmatprep.mubr.bf16.mxu1 %v1776_v56  ;;  %v6339_v56 = vld [vmem:[#allocation2 + $0xbc] ss:$0 sps:$4 sm:$0x11]   ;;  %v7396_v24 = vsel %vm1841_vm9, %v1884_v45, %v1885_v48  ;;  %v1816_v4 = vshll.u32 %v7383_v32, 16  ;;  %v2357_v29 = vrot.slane %v6409_v37, 1  ;;  %v2358_v13 = vrot.slane %v6410_v1, 1 }
  0xde   : > { %v1800_v55 = vsel %vm1632_vm10, %v1795_v18, %v1799_v15  ;;  %v1888_v14 = vrot.slane %v6339_v56, 1  ;;  %v1821_v63 = vshll.u32 %v6339_v56, 16  ;;  %v2360_v2 = vrot.slane %v6411_v53, 1  ;;  %v6413_v56 = vld [vmem:[#allocation2] sm:$0xff]   ;;  %v553_v45 = vld [vmem:[#allocation2 + $0xcc] sm:$0x1] }
  0xdf   : > { %v1818_v7 = vrot.slane %v1816_v4, 1  ;;  %v2359_v18 = vsel %vm1841_vm9, %v2357_v29, %v2358_v13  ;;  %v6340_v37 = vld [vmem:[%s7922_s5 + $0x1e8] sm:$0xff]  }
  0xe0   : > { %v7399_v0 = vsel %vm1841_vm9, %v1887_v8, %v1888_v14  ;;  %v1823_v39 = vrot.slane %v1821_v63, 1  ;;  %v2362_v15 = vsel %vm1841_vm9, %v2360_v2, %v2361_v41  ;;  %v554_v8 = vsel %vm6625_vm3, 0, %v553_v45  ;;  %v609_v14 = vld [vmem:[#allocation2 + $0xd4] sm:$0x1]  ;;  %v7457_v13 = vld [vmem:[#allocation2 + $0x24] sm:$0xff]  }
  0xe1   : > { %555 = vst [vmem:[#allocation2 + $0xcc] sm:$0x1] %v554_v8  ;;  %v610_v4 = vsel %vm6634_vm5, 0, %v609_v14  ;;  %v6351_v53 = vld [vmem:[%s7922_s5 + $0x208] sm:$0xff]   ;;  %v3605_v25 = vshrl.u32 %v7457_v13, 16  ;;  %v6357_v14 = vld [vmem:[%s7922_s5 + $0x218] sm:$0xff]  }
  0xe2   : > { %2748 = vmatmul.mubr.bf16.gmra.mrb[52].mxu0 %v7295_v34  ;;  %v1804_v34 = vshll.u32 %v7354_v27, 16  ;;  %611 = vst [vmem:[#allocation2 + $0xd4] sm:$0x1] %v610_v4 }
  0xe3   : > { %2755 = vmatprep.mubr.bf16.mxu0 %v2325_v58  ;;  %v2355_v58 = vrot.slane %v6408_v54, 1 }
  0xe4   : > { %3198 = vmatmul.mubr.bf16.gmra.mrb[60].mxu1 %v7280_v17  ;;  %v1881_v17 = vrot.slane %v7332_v12, 1  ;;  %v1806_v42 = vrot.slane %v1804_v34, 1 }
  0xe5   : > { %3205 = vmatprep.mubr.bf16.mxu1 %v1788_v51  ;;  %v1814_v51 = vshrl.u32 %v7383_v32, 16 }
  0xe6   : > { %v7388_v46 = vsel %vm1841_vm9, %v1881_v17, %v1882_v6  ;;  %v1807_v28 = vor.u32 %v1806_v42, %v1802_v43  ;;  %v6328_v17 = vld [vmem:[%s7922_s5 + $0x188] sm:$0xff]   ;;  %v6329_v6 = vld [vmem:[%s7922_s5 + $0x1d0] sm:$0xff]   ;;  %v7429_v42 = vld [vmem:[#allocation2 + $0x18] sm:$0xff]  }
  0xe7   : > { %v1819_v57 = vor.u32 %v1818_v7, %v1814_v51  ;;  %v6414_v43 = vld [vmem:[#allocation2 + $0x8] ss:$0 sps:$4 sm:$0x11]   ;;  %v6337_v7 = vld [vmem:[%s7922_s5 + $0x1a0] sm:$0xff]   ;;  %v3593_v40 = vshrl.u32 %v7429_v42, 16 }
  0xe8   : > { %v1843_v35 = vrot.slane %v6414_v43, 1  ;;  %v1433_v2 = vld [vmem:[#allocation2 + $0xcc] sm:$0xf]  ;;  %v6354_v43 = vld [vmem:[%s7922_s5 + $0x210] sm:$0xff]  }
  0xe9   : > { %v1824_v34 = vsel %vm1632_vm10, %v1819_v57, %v1823_v39  ;;  %v1434_v41 = vsel %vm6693_vm8, %v6573_v20, %v1433_v2  ;;  %v6341_v57 = vld [vmem:[%s7922_s5 + $0x1a8] sm:$0xff]  }
  0xea   : > { %2756 = vmatmul.mubr.bf16.gmra.mrb[56].mxu0 %v7316_v49  ;;  %v2356_v49 = vsel %vm1841_vm9, %v2354_v23, %v2355_v58  ;;  %v6415_v23 = vld [vmem:[#allocation2 + $0xc] sm:$0xff]   ;;  %v6416_v58 = vld [vmem:[#allocation2 + $0x14] ss:$0 sps:$4 sm:$0x11]   ;;  %v6419_v39 = vld [vmem:[#allocation2 + $0x24] sm:$0xff]  }
  0xeb   : > { %2763 = vmatprep.mubr.bf16.mxu0 %v2337_v19  ;;  %v1842_v19 = vrot.slane %v6413_v56, 1  ;;  %v1845_v54 = vrot.slane %v6415_v23, 1  ;;  %1435 = vst [vmem:[#allocation2 + $0xcc] sm:$0xf] %v1434_v41 }
  0xec   : > { %3206 = vmatmul.mubr.bf16.gmra.mrb[64].mxu1 %v7305_v10  ;;  %v1812_v10 = vsel %vm1632_vm10, %v1807_v28, %v1811_v60  ;;  %v1846_v28 = vrot.slane %v6416_v58, 1  ;;  %v6336_v60 = vld [vmem:[%s7922_s5 + $0x1e0] sm:$0xff]   ;;  %v6422_v56 = vld [vmem:[#allocation2 + $0x38] ss:$0 sps:$4 sm:$0x11]  }
  0xed   : > { %3213 = vmatprep.mubr.bf16.mxu1 %v1800_v55  ;;  %v6333_v55 = vld [vmem:[%s7922_s5 + $0x1d8] sm:$0xff]   ;;  %v1844_v48 = vsel %vm1841_vm9, %v1842_v19, %v1843_v35  ;;  %v1855_v19 = vrot.slane %v6422_v56, 1 }
  0xee   : > { %v1847_v63 = vsel %vm1841_vm9, %v1845_v54, %v1846_v28  ;;  %v7505_v58 = vld [vmem:[#allocation2 + $0x38] ss:$0 sps:$4 sm:$0x11]  }
  0xef   : > { %v3624_v4 = vshll.u32 %v7505_v58, 16 }
  0xf2   : > { %2764 = vmatmul.mubr.bf16.gmra.mrb[60].mxu0 %v7341_v52  ;;  %v6324_v52 = vld [vmem:[%s7922_s5 + $0x180] sm:$0xff]  }
  0xf3   : > { %5889 = vmatprep.mubr.bf16.mxu0 %v2356_v49  ;;  %v6417_v49 = vld [vmem:[#allocation2 + $0x18] sm:$0xff]  }
  0xf4   : > { %3214 = vmatmul.mubr.bf16.gmra.mrb[68].mxu1 %v7332_v12  ;;  %v6327_v12 = vld [vmem:[%s7922_s5 + $0x1c8] sm:$0xff]  }
  0xf5   : > { %3221 = vmatprep.mubr.bf16.mxu1 %v1812_v10  ;;  %v6418_v10 = vld [vmem:[#allocation2 + $0x20] ss:$0 sps:$4 sm:$0x11]  }
  0xf6   : > { %v1849_v51 = vrot.slane %v6418_v10, 1 }
  0xfa   : > { %5890 = vmatmul.mubr.bf16.vlgmr.msra.gmra.mrb[64].mxu0 %v2359_v18  ;;  %v1851_v18 = vrot.slane %v6419_v39, 1  ;;  %v7532_v39 = vld [vmem:[#allocation2 + $0x48] sm:$0xff]  }
  0xfb   : > { %5738 = vmatpush3.bf16.msra.mxu0 %v6324_v52  ;;  %5893 = vmatprep.mubr.bf16.mxu0 %v2362_v15  ;;  %v6420_v52 = vld [vmem:[#allocation2 + $0x2c] ss:$0 sps:$4 sm:$0x11]  }
  0xfc   : > { %3222 = vmatmul.mubr.bf16.gmra.mrb[72].mxu1 %v7354_v27  ;;  %5739 = vmatprep.subr.bf16.mxu0 %v6327_v12  ;;  %v6330_v27 = vld [vmem:[%s7922_s5 + $0x190] sm:$0xff]   ;;  %v1852_v12 = vrot.slane %v6420_v52, 1  ;;  %v7471_v15 = vld [vmem:[#allocation2 + $0x2c] ss:$0 sps:$4 sm:$0x11]   ;;  %v6369_v52 = vld [vmem:[%s7922_s5 + $0x238] sm:$0xff]  }
  0xfd   : > { %3229 = vmatprep.mubr.bf16.mxu1 %v1824_v34  ;;  %v3607_v34 = vshll.u32 %v7457_v13, 16  ;;  %v3612_v36 = vshll.u32 %v7471_v15, 16 }
  0xff   : > { %5740 = vmatpush3.bf16.msra.mxu0 %v6328_v17  ;;  %v1437_v17 = vld [vmem:[#allocation2 + $0xd4] sm:$0x1]  ;;  %v3614_v54 = vrot.slane %v3612_v36, 1 }
 0x100   : > { %5741 = vmatprep.subr.bf16.mxu0 %v6329_v6  ;;  %v1438_v35 = vsel %vm6625_vm3, %v1370_v21, %v1437_v17  ;;  %v7495_v21 = vld [vmem:[#allocation2 + $0x30] sm:$0xff]  }
 0x101   : > { %1439 = vst [vmem:[#allocation2 + $0xd4] sm:$0x1] %v1438_v35  ;;  %v3619_v28 = vshll.u32 %v7495_v21, 16 }
 0x102   : > { %5894 = vmatmul.mubr.bf16.gmra.mrb[68].mxu0 %v7268_v59  ;;  %v7443_v59 = vld [vmem:[#allocation2 + $0x20] ss:$0 sps:$4 sm:$0x11]  }
 0x103   : > { %5742 = vmatpush3.bf16.msra.mxu0 %v6330_v27  ;;  %5897 = vmatprep.mubr.bf16.mxu0 %v7275_v5  ;;  %v1848_v5 = vrot.slane %v6417_v49, 1  ;;  %v3600_v1 = vshll.u32 %v7443_v59, 16  ;;  %v1853_v27 = vsel %vm1841_vm9, %v1851_v18, %v1852_v12  ;;  %v7511_v49 = vld [vmem:[#allocation2 + $0x3c] sm:$0xff]   ;;  %v6366_v18 = vld [vmem:[%s7922_s5 + $0x230] sm:$0xff]  }
 0x104   : > { %3230 = vmatmul.mubr.bf16.gmra.mrb[76].mxu1 %v7383_v32  ;;  %5743 = vmatprep.subr.bf16.mxu0 %v6333_v55  ;;  %v3595_v32 = vshll.u32 %v7429_v42, 16  ;;  %v6344_v55 = vld [vmem:[%s7922_s5 + $0x1f8] sm:$0xff]   ;;  %v3629_v41 = vshrl.u32 %v7511_v49, 16 }
 0x105   : > { %5937 = vmatprep.mubr.bf16.mxu1 %v1844_v48  ;;  %v1850_v11 = vsel %vm1841_vm9, %v1848_v5, %v1849_v51  ;;  %v3609_v48 = vrot.slane %v3607_v34, 1  ;;  %v6360_v5 = vld [vmem:[%s7922_s5 + $0x220] sm:$0xff]   ;;  %v6363_v51 = vld [vmem:[%s7922_s5 + $0x228] sm:$0xff]  }
 0x106   : > { %v3597_v29 = vrot.slane %v3595_v32, 1  ;;  %v3621_v32 = vrot.slane %v3619_v28, 1 }
 0x107   : > { %5744 = vmatpush3.bf16.msra.mxu0 %v6334_v50  ;;  %v6345_v50 = vld [vmem:[%s7922_s5 + $0x1b8] sm:$0xff]   ;;  %v3610_v23 = vor.u32 %v3609_v48, %v3605_v25  ;;  %v7560_v48 = vld [vmem:[#allocation2 + $0x60] sm:$0xff]  }
 0x108   : > { %5745 = vmatprep.subr.bf16.mxu0 %v6336_v60  ;;  %v3598_v20 = vor.u32 %v3597_v29, %v3593_v40  ;;  %v3617_v60 = vshrl.u32 %v7495_v21, 16  ;;  %v3626_v29 = vrot.slane %v3624_v4, 1  ;;  %v7575_v4 = vld [vmem:[#allocation2 + $0x6c] sm:$0xff]  }
 0x10a   : > { %5898 = vmatmul.mubr.bf16.gmra.mrb[72].mxu0 %v7283_v47  ;;  %v3602_v47 = vrot.slane %v3600_v1, 1  ;;  %v3622_v40 = vor.u32 %v3621_v32, %v3617_v60  ;;  %v7524_v1 = vld [vmem:[#allocation2 + $0x44] ss:$0 sps:$4 sm:$0x11]   ;;  %v3665_v60 = vshrl.u32 %v7560_v48, 16 }
 0x10b   : > { %5746 = vmatpush3.bf16.msra.mxu0 %v6337_v7  ;;  %5901 = vmatprep.mubr.bf16.mxu0 %v7299_v30  ;;  %v6421_v30 = vld [vmem:[#allocation2 + $0x30] sm:$0xff]  }
 0x10c   : > { %5938 = vmatmul.mubr.bf16.vlgmr.msra.gmra.mrb[80].mxu1 %v1847_v63  ;;  %5747 = vmatprep.subr.bf16.mxu0 %v6340_v37  ;;  %v1854_v6 = vrot.slane %v6421_v30, 1  ;;  %v3603_v45 = vsel %vm1632_vm10, %v3598_v20, %v3602_v47  ;;  %v7543_v20 = vld [vmem:[#allocation2 + $0x50] ss:$0 sps:$4 sm:$0x11]   ;;  %v3643_v47 = vshll.u32 %v7532_v39, 16 }
 0x10d   : > { %5970 = vmatpush3.bf16.msra.mxu1 %v7250_v61  ;;  %5941 = vmatprep.mubr.bf16.mxu1 %v1850_v11  ;;  %v6343_v61 = vld [vmem:[%s7922_s5 + $0x1b0] sm:$0xff]   ;;  %v3627_v11 = vsel %vm1632_vm10, %v3622_v40, %v3626_v29  ;;  %v3648_v30 = vshll.u32 %v7543_v20, 16  ;;  %v3677_v29 = vshrl.u32 %v7575_v4, 16 }
 0x10e   : > { %5971 = vmatprep.subr.bf16.mxu1 %v6351_v53  ;;  %v1856_v8 = vsel %vm1841_vm9, %v1854_v6, %v1855_v19  ;;  %v3645_v17 = vrot.slane %v3643_v47, 1  ;;  %v7549_v6 = vld [vmem:[#allocation2 + $0x54] sm:$0xff]   ;;  %v7554_v19 = vld [vmem:[#allocation2 + $0x5c] ss:$0 sps:$4 sm:$0x11]  }
 0x10f   : > { %5748 = vmatpush3.bf16.msra.mxu0 %v6341_v57  ;;  %v3636_v57 = vshll.u32 %v7524_v1, 16  ;;  %v3650_v56 = vrot.slane %v3648_v30, 1  ;;  %v3660_v25 = vshll.u32 %v7554_v19, 16  ;;  %v7607_v30 = vld [vmem:[#allocation2 + $0x84] sm:$0xff]  }
 0x110   : > { %5749 = vmatprep.subr.bf16.mxu0 %v6342_v38 }
 0x111   : > { %5972 = vmatpush3.bf16.msra.mxu1 %v6351_v53  ;;  %v3631_v53 = vshll.u32 %v7511_v49, 16  ;;  %v3638_v38 = vrot.slane %v3636_v57, 1  ;;  %v3806_v57 = vrot.slane %v7495_v21, 1 }
 0x112   : > { %5973 = vmatprep.subr.bf16.mxu1 %v6354_v43  ;;  %5902 = vmatmul.mubr.bf16.gmra.mrb[76].mxu0 %v7303_v44  ;;  %v3615_v44 = vsel %vm1632_vm10, %v3610_v23, %v3614_v54  ;;  %v3662_v23 = vrot.slane %v3660_v25, 1  ;;  %v3667_v54 = vshll.u32 %v7560_v48, 16 }
 0x113   : > { %5750 = vmatpush3.bf16.msra.mxu0 %v6343_v61  ;;  %4089 = vmatprep.mubr.bf16.mxu0 %v3603_v45  ;;  %v3653_v61 = vshrl.u32 %v7549_v6, 16 }
 0x114   : > { %5942 = vmatmul.mubr.bf16.gmra.mrb[84].mxu1 %v1853_v27  ;;  %5751 = vmatprep.subr.bf16.mxu0 %v6344_v55  ;;  %v3669_v32 = vrot.slane %v3667_v54, 1  ;;  %v3816_v54 = vrot.slane %v7554_v19, 1 }
 0x115   : > { %5945 = vmatprep.mubr.bf16.mxu1 %v1856_v8  ;;  %5974 = vmatpush3.bf16.msra.mxu1 %v6354_v43  ;;  %v3655_v43 = vshll.u32 %v7549_v6, 16 }
 0x116   : > { %5975 = vmatprep.subr.bf16.mxu1 %v6357_v14 }
 0x117   : > { %5752 = vmatpush3.bf16.msra.mxu0 %v6345_v50  ;;  %v3657_v45 = vrot.slane %v3655_v43, 1  ;;  %v7614_v43 = vld [vmem:[#allocation2 + $0x8c] ss:$0 sps:$4 sm:$0x11]  }
 0x119   : > { %5976 = vmatpush3.bf16.msra.mxu1 %v6357_v14  ;;  %v7569_v14 = vld [vmem:[#allocation2 + $0x68] ss:$0 sps:$4 sm:$0x11]   ;;  %v3658_v50 = vor.u32 %v3657_v45, %v3653_v61  ;;  %v3813_v45 = vrot.slane %v7543_v20, 1  ;;  %v3815_v20 = vrot.slane %v7549_v6, 1 }
 0x11a   : > { %4090 = vmatmul.mubr.bf16.vlgmr.msra.gmra.mrb[80].mxu0 %v7429_v42  ;;  %5977 = vmatprep.subr.bf16.mxu1 %v6360_v5  ;;  %v3672_v28 = vshll.u32 %v7569_v14, 16 }
 0x11b   : > { %4097 = vmatprep.mubr.bf16.mxu0 %v3615_v44  ;;  %v3663_v44 = vsel %vm1632_vm10, %v3658_v50, %v3662_v23  ;;  %v7624_v23 = vld [vmem:[#allocation2 + $0x90] sm:$0xff]  }
 0x11c   : > { %v5481_v10 = vpop.f32.mrb[0].mxu0  ;;  %5946 = vmatmul.mubr.bf16.gmra.mrb[88].mxu1 %v7326_v26 }
 0x11d   : > { %v5482_v7 = vpop.f32.mrb[1].mxu0  ;;  %5949 = vmatprep.mubr.bf16.mxu1 %v7335_v62  ;;  %5978 = vmatpush3.bf16.msra.mxu1 %v6360_v5  ;;  %v3633_v62 = vrot.slane %v3631_v53, 1  ;;  %v3670_v5 = vor.u32 %v3669_v32, %v3665_v60  ;;  %v3715_v60 = vshll.u32 %v7624_v23, 16  ;;  %v3818_v32 = vrot.slane %v7560_v48, 1 }
 0x11e   : > { %v7522_v63 = vadd.f32 %v5482_v7, %v5481_v10  ;;  %v5484_v37 = vpop.f32.mrb[2].mxu0  ;;  %5979 = vmatprep.subr.bf16.mxu1 %v6363_v51  ;;  %v3679_v10 = vshll.u32 %v7575_v4, 16  ;;  %v3801_v7 = vrot.slane %v7443_v59, 1  ;;  %v3804_v59 = vrot.slane %v7471_v15, 1 }
 0x11f   : > { %v5485_v2 = vpop.f32.mrb[3].mxu0  ;;  %v3634_v12 = vor.u32 %v3633_v62, %v3629_v41  ;;  %v3717_v19 = vrot.slane %v3715_v60, 1 }
 0x120   : > { %v7527_v26 = vadd.f32 %v5485_v2, %v5484_v37  ;;  %v7589_v2 = vld [vmem:[#allocation2 + $0x78] sm:$0xff]  }
 0x121   : > { %5980 = vmatpush3.bf16.msra.mxu1 %v6363_v51  ;;  %v3639_v34 = vsel %vm1632_vm10, %v3634_v12, %v3638_v38  ;;  %v3800_v51 = vrot.slane %v7429_v42, 1  ;;  %v3803_v42 = vrot.slane %v7457_v13, 1  ;;  %v3691_v62 = vshll.u32 %v7589_v2, 16 }
 0x122   : > { %4098 = vmatmul.mubr.bf16.gmra.mrb[84].mxu0 %v7457_v13  ;;  %5981 = vmatprep.subr.bf16.mxu1 %v6366_v18 }
 0x123   : > { %4105 = vmatprep.mubr.bf16.mxu0 %v3627_v11  ;;  %v3802_v53 = vsel %vm1841_vm9, %v3800_v51, %v3801_v7  ;;  %v7595_v11 = vld [vmem:[#allocation2 + $0x80] ss:$0 sps:$4 sm:$0x11]   ;;  %v3805_v12 = vsel %vm1841_vm9, %v3803_v42, %v3804_v59  ;;  %v3693_v15 = vrot.slane %v3691_v62, 1  ;;  %v3824_v62 = vrot.slane %v7589_v2, 1 }
 0x124   : > { %5950 = vmatmul.mubr.bf16.gmra.mrb[92].mxu1 %v7345_v3  ;;  %v3641_v3 = vshrl.u32 %v7532_v39, 16  ;;  %v3696_v38 = vshll.u32 %v7595_v11, 16  ;;  %v7636_v51 = vld [vmem:[#allocation2 + $0x9c] sm:$0xff]  }
 0x125   : > { %5953 = vmatprep.mubr.bf16.mxu1 %v7357_v31  ;;  %5982 = vmatpush3.bf16.msra.mxu1 %v6366_v18  ;;  %v3807_v18 = vrot.slane %v7505_v58, 1 }
 0x126   : > { %5983 = vmatprep.subr.bf16.mxu1 %v6369_v52  ;;  %v3646_v31 = vor.u32 %v3645_v17, %v3641_v3 }
 0x128   : > { %v3651_v55 = vsel %vm1632_vm10, %v3646_v31, %v3650_v56  ;;  %v3809_v31 = vrot.slane %v7511_v49, 1  ;;  %v3810_v56 = vrot.slane %v7524_v1, 1 }
 0x129   : > { %5984 = vmatpush3.bf16.msra.mxu1 %v6369_v52 }
 0x12a   : > { %4106 = vmatmul.mubr.bf16.gmra.mrb[88].mxu0 %v7495_v21  ;;  %v3811_v25 = vsel %vm1841_vm9, %v3809_v31, %v3810_v56  ;;  %v3827_v56 = vrot.slane %v7607_v30, 1 }
 0x12b   : > { %4113 = vmatprep.mubr.bf16.mxu0 %v3639_v34  ;;  %v3808_v34 = vsel %vm1841_vm9, %v3806_v57, %v3807_v18  ;;  %v3825_v57 = vrot.slane %v7595_v11, 1 }
 0x12c   : > { %5954 = vmatmul.mubr.bf16.gmra.mrb[0].mxu1 %v7362_v22 }
 0x12d   : > { %5957 = vmatprep.mubr.bf16.mxu1 %v7371_v16  ;;  %v3826_v11 = vsel %vm1841_vm9, %v3824_v62, %v3825_v57 }
 0x130   : > { %v5487_v35 = vpop.f32.mrb[4].mxu0 }
 0x131   : > { %v5488_v27 = vpop.f32.mrb[5].mxu0 }
 0x132   : > { %v7562_v22 = vadd.f32 %v5488_v27, %v5487_v35  ;;  %v5490_v16 = vpop.f32.mrb[6].mxu0  ;;  %4114 = vmatmul.mubr.bf16.gmra.mrb[92].mxu0 %v7511_v49  ;;  %v3812_v35 = vrot.slane %v7532_v39, 1  ;;  %v3698_v27 = vrot.slane %v3696_v38, 1  ;;  %v3701_v49 = vshrl.u32 %v7607_v30, 16 }
 0x133   : > { %v5491_v36 = vpop.f32.mrb[7].mxu0  ;;  %4121 = vmatprep.mubr.bf16.mxu0 %v3651_v55  ;;  %v3703_v55 = vshll.u32 %v7607_v30, 16 }
 0x134   : > { %5958 = vmatmul.mubr.bf16.gmra.mrb[4].mxu1 %v7374_v33  ;;  %v7566_v8 = vadd.f32 %v5491_v36, %v5490_v16  ;;  %v3674_v33 = vrot.slane %v3672_v28, 1  ;;  %v3708_v16 = vshll.u32 %v7614_v43, 16  ;;  %v3814_v1 = vsel %vm1841_vm9, %v3812_v35, %v3813_v45  ;;  %v7629_v28 = vld [vmem:[#allocation2 + $0x98] ss:$0 sps:$4 sm:$0x11]  }
 0x135   : > { %5961 = vmatprep.mubr.bf16.mxu1 %v7381_v9  ;;  %v7580_v9 = vld [vmem:[#allocation2 + $0x74] ss:$0 sps:$4 sm:$0x11]   ;;  %v3705_v50 = vrot.slane %v3703_v55, 1  ;;  %v3828_v35 = vrot.slane %v7614_v43, 1  ;;  %v3830_v45 = vrot.slane %v7624_v23, 1 }
 0x136   : > { %v3684_v37 = vshll.u32 %v7580_v9, 16  ;;  %v3675_v40 = vsel %vm1632_vm10, %v3670_v5, %v3674_v33  ;;  %v3819_v33 = vrot.slane %v7569_v14, 1  ;;  %v3817_v5 = vsel %vm1841_vm9, %v3815_v20, %v3816_v54 }
 0x137   : > { %v3829_v43 = vsel %vm1841_vm9, %v3827_v56, %v3828_v35 }
 0x13a   : > { %4122 = vmatmul.mubr.bf16.gmra.mrb[96].mxu0 %v7532_v39  ;;  %v3710_v39 = vrot.slane %v3708_v16, 1 }
 0x13b   : > { %4129 = vmatprep.mubr.bf16.mxu0 %v3663_v44  ;;  %v3706_v44 = vor.u32 %v3705_v50, %v3701_v49 }
 0x13c   : > { %5962 = vmatmul.mubr.bf16.gmra.mrb[8].mxu1 %v7388_v46  ;;  %v3681_v46 = vrot.slane %v3679_v10, 1  ;;  %v3720_v10 = vshll.u32 %v7629_v28, 16 }
 0x13d   : > { %5965 = vmatprep.mubr.bf16.mxu1 %v7396_v24  ;;  %v3686_v24 = vrot.slane %v3684_v37, 1  ;;  %v3711_v7 = vsel %vm1632_vm10, %v3706_v44, %v3710_v39  ;;  %v3820_v37 = vsel %vm1841_vm9, %v3818_v32, %v3819_v33  ;;  %v7676_v44 = vld [vmem:[#allocation2 + $0xb4] sm:$0xff]  }
 0x13e   : > { %v3682_v41 = vor.u32 %v3681_v46, %v3677_v29  ;;  %v3722_v29 = vrot.slane %v3720_v10, 1  ;;  %v3821_v46 = vrot.slane %v7575_v4, 1  ;;  %v3749_v62 = vshrl.u32 %v7676_v44, 16 }
 0x140   : > { %v3687_v13 = vsel %vm1632_vm10, %v3682_v41, %v3686_v24  ;;  %v3727_v24 = vshll.u32 %v7636_v51, 16 }
 0x142   : > { %4130 = vmatmul.mubr.bf16.gmra.mrb[100].mxu0 %v7549_v6  ;;  %v3713_v6 = vshrl.u32 %v7624_v23, 16 }
 0x143   : > { %4137 = vmatprep.mubr.bf16.mxu0 %v3675_v40 }
 0x144   : > { %5966 = vmatmul.mubr.bf16.gmra.mrb[12].mxu1 %v7399_v0  ;;  %v3689_v0 = vshrl.u32 %v7589_v2, 16  ;;  %v3718_v41 = vor.u32 %v3717_v19, %v3713_v6  ;;  %v3833_v19 = vrot.slane %v7636_v51, 1 }
 0x145   : > { %5985 = vmatprep.mubr.bf16.mxu1 %v3802_v53  ;;  %v3822_v53 = vrot.slane %v7580_v9, 1 }
 0x146   : > { %v3694_v61 = vor.u32 %v3693_v15, %v3689_v0 }
 0x147   : > { %v3823_v9 = vsel %vm1841_vm9, %v3821_v46, %v3822_v53 }
 0x148   : > { %v5493_v52 = vpop.f32.mrb[8].mxu0  ;;  %v3699_v36 = vsel %vm1632_vm10, %v3694_v61, %v3698_v27  ;;  %v6379_v27 = vld [vmem:[#allocation2 + $0xb0] ss:$0 sps:$4 sm:$0x11]  }
 0x149   : > { %v5494_v47 = vpop.f32.mrb[9].mxu0 }
 0x14a   : > { %v7605_v3 = vadd.f32 %v5494_v47, %v5493_v52  ;;  %v5496_v17 = vpop.f32.mrb[10].mxu0  ;;  %4138 = vmatmul.mubr.bf16.gmra.mrb[104].mxu0 %v7560_v48  ;;  %v7642_v48 = vld [vmem:[#allocation2 + $0xa4] ss:$0 sps:$4 sm:$0x11]  }
 0x14b   : > { %v5497_v21 = vpop.f32.mrb[11].mxu0  ;;  %4145 = vmatprep.mubr.bf16.mxu0 %v3687_v13  ;;  %v3732_v47 = vshll.u32 %v7642_v48, 16  ;;  %v3723_v13 = vsel %vm1632_vm10, %v3718_v41, %v3722_v29 }
 0x14c   : > { %5986 = vmatmul.mubr.bf16.vlgmr.msra.gmra.mrb[80].mxu1 %v3805_v12  ;;  %v7610_v58 = vadd.f32 %v5497_v21, %v5496_v17  ;;  %v7660_v17 = vld [vmem:[#allocation2 + $0xa8] sm:$0xff]  }
 0x14d   : > { %5989 = vmatprep.mubr.bf16.mxu1 %v3808_v34  ;;  %v3725_v34 = vshrl.u32 %v7636_v51, 16  ;;  %v3734_v31 = vrot.slane %v3732_v47, 1  ;;  %v3739_v55 = vshll.u32 %v7660_v17, 16  ;;  %v3737_v54 = vshrl.u32 %v7660_v17, 16 }
 0x14e   : > { %v3836_v53 = vrot.slane %v7660_v17, 1 }
 0x14f   : > { %v3741_v33 = vrot.slane %v3739_v55, 1 }
 0x151   : > { %v3742_v29 = vor.u32 %v3741_v33, %v3737_v54  ;;  %v7711_v54 = vld [vmem:[#allocation2 + $0xcc] sm:$0xff]  }
 0x152   : > { %4146 = vmatmul.mubr.bf16.gmra.mrb[108].mxu0 %v7575_v4 }
 0x153   : > { %4153 = vmatprep.mubr.bf16.mxu0 %v3699_v36 }
 0x154   : > { %5990 = vmatmul.mubr.bf16.gmra.mrb[84].mxu1 %v3811_v25  ;;  %v3831_v25 = vrot.slane %v7629_v28, 1 }
 0x155   : > { %5993 = vmatprep.mubr.bf16.mxu1 %v3814_v1 }
 0x156   : > { %v3832_v10 = vsel %vm1841_vm9, %v3830_v45, %v3831_v25 }
 0x15a   : > { %4154 = vmatmul.mubr.bf16.gmra.mrb[112].mxu0 %v7589_v2  ;;  %v3729_v2 = vrot.slane %v3727_v24, 1  ;;  %v3837_v24 = vrot.slane %v6379_v27, 1 }
 0x15b   : > { %v5499_v40 = vpop.f32.mrb[12].mxu0  ;;  %4161 = vmatprep.mubr.bf16.mxu0 %v3711_v7 }
 0x15c   : > { %5994 = vmatmul.mubr.bf16.gmra.mrb[88].mxu1 %v3817_v5  ;;  %v5500_v14 = vpop.f32.mrb[13].mxu0  ;;  %v3730_v61 = vor.u32 %v3729_v2, %v3725_v34  ;;  %v3744_v5 = vshll.u32 %v6379_v27, 16  ;;  %v3838_v47 = vsel %vm1841_vm9, %v3836_v53, %v3837_v24  ;;  %v3839_v27 = vrot.slane %v7676_v44, 1 }
 0x15d   : > { %5997 = vmatprep.mubr.bf16.mxu1 %v3820_v37  ;;  %v7647_v42 = vadd.f32 %v5500_v14, %v5499_v40  ;;  %v5502_v59 = vpop.f32.mrb[14].mxu0  ;;  %v3834_v37 = vrot.slane %v7642_v48, 1  ;;  %v6381_v40 = vld [vmem:[#allocation2 + $0xbc] ss:$0 sps:$4 sm:$0x11]   ;;  %v3751_v14 = vshll.u32 %v7676_v44, 16 }
 0x15e   : > { %v5503_v18 = vpop.f32.mrb[15].mxu0  ;;  %v3735_v32 = vsel %vm1632_vm10, %v3730_v61, %v3734_v31  ;;  %v3746_v46 = vrot.slane %v3744_v5, 1  ;;  %v6383_v31 = vld [vmem:[#allocation2 + $0xc8] ss:$0 sps:$4 sm:$0x11]   ;;  %v3840_v55 = vrot.slane %v6381_v40, 1 }
 0x15f   : > { %v5617_v52 = vpop.f32.mrb[16].mxu1  ;;  %v7651_v12 = vadd.f32 %v5503_v18, %v5502_v59  ;;  %v3835_v18 = vsel %vm1841_vm9, %v3833_v19, %v3834_v37  ;;  %v3768_v5 = vshll.u32 %v6383_v31, 16 }
 0x160   : > { %v5618_v0 = vpop.f32.mrb[17].mxu1 }
 0x161   : > { %v7653_v38 = vadd.f32 %v5618_v0, %v5617_v52  ;;  %v5620_v4 = vpop.f32.mrb[18].mxu1  ;;  %v3753_v52 = vrot.slane %v3751_v14, 1  ;;  %v3756_v0 = vshll.u32 %v6381_v40, 16  ;;  %v3845_v14 = vrot.slane %v7711_v54, 1 }
 0x162   : > { %v5621_v15 = vpop.f32.mrb[19].mxu1  ;;  %4162 = vmatmul.mubr.bf16.gmra.mrb[116].mxu0 %v7607_v30 }
 0x163   : > { %v7662_v21 = vadd.f32 %v5621_v15, %v5620_v4  ;;  %4169 = vmatprep.mubr.bf16.mxu0 %v3723_v13  ;;  %v3747_v4 = vsel %vm1632_vm10, %v3742_v29, %v3746_v46  ;;  %v7695_v13 = vld [vmem:[#allocation2 + $0xc0] sm:$0xff]   ;;  %v3754_v35 = vor.u32 %v3753_v52, %v3749_v62  ;;  %v3758_v61 = vrot.slane %v3756_v0, 1 }
 0x164   : > { %5998 = vmatmul.mubr.bf16.gmra.mrb[92].mxu1 %v3823_v9  ;;  %v3763_v25 = vshll.u32 %v7695_v13, 16 }
 0x165   : > { %6001 = vmatprep.mubr.bf16.mxu1 %v3826_v11 }
 0x166   : > { %v3765_v33 = vrot.slane %v3763_v25, 1 }
 0x167   : > { %v5505_v16 = vpop.f32.mrb[16].mxu0  ;;  %v5623_v36 = vpop.f32.mrb[20].mxu1 }
 0x168   : > { %v5506_v49 = vpop.f32.mrb[17].mxu0  ;;  %v5624_v50 = vpop.f32.mrb[21].mxu1 }
 0x169   : > { %v7670_v1 = vadd.f32 %v5506_v49, %v5505_v16  ;;  %v5508_v39 = vpop.f32.mrb[18].mxu0  ;;  %v7672_v20 = vadd.f32 %v5624_v50, %v5623_v36  ;;  %v5626_v30 = vpop.f32.mrb[22].mxu1  ;;  %v3842_v16 = vrot.slane %v7695_v13, 1 }
 0x16a   : > { %v5509_v60 = vpop.f32.mrb[19].mxu0  ;;  %v5627_v28 = vpop.f32.mrb[23].mxu1  ;;  %4170 = vmatmul.mubr.bf16.gmra.mrb[120].mxu0 %v7624_v23 }
 0x16b   : > { %v7680_v7 = vadd.f32 %v5509_v60, %v5508_v39  ;;  %v7682_v6 = vadd.f32 %v5627_v28, %v5626_v30  ;;  %4177 = vmatprep.mubr.bf16.mxu0 %v3735_v32  ;;  %v3841_v30 = vsel %vm1841_vm9, %v3839_v27, %v3840_v55  ;;  %v6385_v60 = vld [vmem:[#allocation2 + $0xd4] ss:$0 sps:$4 sm:$0x11]   ;;  %v3759_v32 = vsel %vm1632_vm10, %v3754_v35, %v3758_v61 }
 0x16c   : > { %6002 = vmatmul.mubr.bf16.gmra.mrb[0].mxu1 %v3829_v43  ;;  %v3761_v43 = vshrl.u32 %v7695_v13, 16  ;;  %v3846_v29 = vrot.slane %v6385_v60, 1 }
 0x16d   : > { %6005 = vmatprep.mubr.bf16.mxu1 %v3832_v10 }
 0x16e   : > { %v3766_v24 = vor.u32 %v3765_v33, %v3761_v43 }
 0x16f   : > { %v5629_v59 = vpop.f32.mrb[24].mxu1 }
 0x170   : > { %v5630_v41 = vpop.f32.mrb[25].mxu1 }
 0x171   : > { %v7690_v23 = vadd.f32 %v5630_v41, %v5629_v59  ;;  %v5632_v57 = vpop.f32.mrb[26].mxu1  ;;  %v3770_v59 = vrot.slane %v3768_v5, 1  ;;  %v3775_v41 = vshll.u32 %v7711_v54, 16 }
 0x172   : > { %v5511_v48 = vpop.f32.mrb[20].mxu0  ;;  %v5633_v9 = vpop.f32.mrb[27].mxu1  ;;  %4178 = vmatmul.mubr.bf16.gmra.mrb[124].mxu0 %v7636_v51  ;;  %v3843_v51 = vrot.slane %v6383_v31, 1 }
 0x173   : > { %v5512_v15 = vpop.f32.mrb[21].mxu0  ;;  %v7697_v34 = vadd.f32 %v5633_v9, %v5632_v57  ;;  %4185 = vmatprep.mubr.bf16.mxu0 %v3747_v4  ;;  %v3771_v4 = vsel %vm1632_vm10, %v3766_v24, %v3770_v59 }
 0x174   : > { %v7700_v2 = vadd.f32 %v5512_v15, %v5511_v48  ;;  %v5514_v11 = vpop.f32.mrb[22].mxu0  ;;  %6006 = vmatmul.mubr.bf16.gmra.mrb[4].mxu1 %v3835_v18  ;;  %v3844_v10 = vsel %vm1841_vm9, %v3842_v16, %v3843_v51  ;;  %v3847_v48 = vsel %vm1841_vm9, %v3845_v14, %v3846_v29  ;;  %v3777_v15 = vrot.slane %v3775_v41, 1 }
 0x175   : > { %v5515_v56 = vpop.f32.mrb[23].mxu0  ;;  %6009 = vmatprep.mubr.bf16.mxu1 %v3838_v47  ;;  %v3773_v47 = vshrl.u32 %v7711_v54, 16 }
 0x176   : > { %v7703_v45 = vadd.f32 %v5515_v56, %v5514_v11  ;;  %v3780_v11 = vshll.u32 %v6385_v60, 16 }
 0x177   : > { %v5635_v36 = vpop.f32.mrb[28].mxu1  ;;  %v3778_v56 = vor.u32 %v3777_v15, %v3773_v47 }
 0x178   : > { %v5636_v49 = vpop.f32.mrb[29].mxu1  ;;  %v3782_v35 = vrot.slane %v3780_v11, 1 }
 0x179   : > { %v7707_v50 = vadd.f32 %v5636_v49, %v5635_v36  ;;  %v5638_v39 = vpop.f32.mrb[30].mxu1 }
 0x17a   : > { %v5639_v28 = vpop.f32.mrb[31].mxu1  ;;  %4186 = vmatmul.mubr.bf16.gmra.mrb[128].mxu0 %v7660_v17 }
 0x17b   : > { %v7715_v19 = vadd.f32 %v5639_v28, %v5638_v39  ;;  %v5517_v37 = vpop.f32.mrb[24].mxu0  ;;  %4193 = vmatprep.mubr.bf16.mxu0 %v3759_v32 }
 0x17c   : > { %6010 = vmatmul.mubr.bf16.gmra.mrb[8].mxu1 %v3841_v30  ;;  %v5518_v40 = vpop.f32.mrb[25].mxu0  ;;  %v3783_v30 = vsel %vm1632_vm10, %v3778_v56, %v3782_v35 }
 0x17d   : > { %6013 = vmatprep.mubr.bf16.mxu1 %v3844_v10  ;;  %v7719_v46 = vadd.f32 %v5518_v40, %v5517_v37  ;;  %v5520_v53 = vpop.f32.mrb[26].mxu0 }
 0x17e   : > { %v5521_v62 = vpop.f32.mrb[27].mxu0 }
 0x17f   : > { %v5641_v57 = vpop.f32.mrb[32].mxu1  ;;  %v7722_v18 = vadd.f32 %v5521_v62, %v5520_v53 }
 0x180   : > { %v5642_v17 = vpop.f32.mrb[33].mxu1 }
 0x181   : > { %v7724_v52 = vadd.f32 %v5642_v17, %v5641_v57  ;;  %v5644_v0 = vpop.f32.mrb[34].mxu1 }
 0x182   : > { %v5645_v9 = vpop.f32.mrb[35].mxu1  ;;  %4194 = vmatmul.mubr.bf16.gmra.mrb[132].mxu0 %v7676_v44 }
 0x183   : > { %v7729_v31 = vadd.f32 %v5645_v9, %v5644_v0  ;;  %4201 = vmatprep.mubr.bf16.mxu0 %v3771_v4 }
 0x184   : > { %6014 = vmatmul.mubr.bf16.gmra.mrb[12].mxu1 %v3847_v48 }
 0x185   : > { %v5523_v61 = vpop.f32.mrb[28].mxu0 }
 0x186   : > { %v5524_v55 = vpop.f32.mrb[29].mxu0 }
 0x187   : > { %v5647_v27 = vpop.f32.mrb[36].mxu1  ;;  %v7732_v16 = vadd.f32 %v5524_v55, %v5523_v61  ;;  %v5526_v51 = vpop.f32.mrb[30].mxu0 }
 0x188   : > { %v5648_v25 = vpop.f32.mrb[37].mxu1  ;;  %v5527_v39 = vpop.f32.mrb[31].mxu0 }
 0x189   : > { %v7734_v36 = vadd.f32 %v5648_v25, %v5647_v27  ;;  %v5650_v49 = vpop.f32.mrb[38].mxu1  ;;  %v7737_v60 = vadd.f32 %v5527_v39, %v5526_v51 }
 0x18a   : > { %v5651_v43 = vpop.f32.mrb[39].mxu1  ;;  %4202 = vmatmul.mubr.bf16.gmra.mrb[136].mxu0 %v7695_v13 }
 0x18b   : > { %v7739_v44 = vadd.f32 %v5651_v43, %v5650_v49  ;;  %4209 = vmatprep.mubr.bf16.mxu0 %v3783_v30 }
 0x18d   : > { %v5529_v32 = vpop.f32.mrb[32].mxu0 }
 0x18e   : > { %v5530_v33 = vpop.f32.mrb[33].mxu0 }
 0x18f   : > { %v5653_v28 = vpop.f32.mrb[40].mxu1  ;;  %v5531_v10 = vadd.f32 %v5530_v33, %v5529_v32  ;;  %v5532_v37 = vpop.f32.mrb[34].mxu0 }
 0x190   : > { %v5654_v5 = vpop.f32.mrb[41].mxu1  ;;  %v5533_v29 = vpop.f32.mrb[35].mxu0 }
 0x191   : > { %v7742_v40 = vadd.f32 %v5654_v5, %v5653_v28  ;;  %v5656_v14 = vpop.f32.mrb[42].mxu1  ;;  %v5534_v24 = vadd.f32 %v5533_v29, %v5532_v37 }
 0x192   : > { %v5657_v53 = vpop.f32.mrb[43].mxu1  ;;  %4210 = vmatmul.mubr.bf16.gmra.mrb[140].mxu0 %v7711_v54 }
 0x193   : > { %v7744_v59 = vadd.f32 %v5657_v53, %v5656_v14 }
 0x195   : > { %v5535_v41 = vpop.f32.mrb[36].mxu0 }
 0x196   : > { %v5536_v13 = vpop.f32.mrb[37].mxu0 }
 0x197   : > { %v5659_v62 = vpop.f32.mrb[44].mxu1  ;;  %v5537_v17 = vadd.f32 %v5536_v13, %v5535_v41  ;;  %v5538_v0 = vpop.f32.mrb[38].mxu0 }
 0x198   : > { %v5660_v57 = vpop.f32.mrb[45].mxu1  ;;  %v5539_v9 = vpop.f32.mrb[39].mxu0 }
 0x199   : > { %v7747_v48 = vadd.f32 %v5660_v57, %v5659_v62  ;;  %v5662_v4 = vpop.f32.mrb[46].mxu1  ;;  %v5540_v15 = vadd.f32 %v5539_v9, %v5538_v0 }
 0x19a   : > { %v5663_v47 = vpop.f32.mrb[47].mxu1 }
 0x19b   : > { %v7749_v11 = vadd.f32 %v5663_v47, %v5662_v4 }
 0x19d   : > { %v5541_v56 = vpop.f32.mrb[40].mxu0 }
 0x19e   : > { %v5542_v61 = vpop.f32.mrb[41].mxu0 }
 0x19f   : > { %v5665_v35 = vpop.f32.mrb[48].mxu1  ;;  %v5543_v55 = vadd.f32 %v5542_v61, %v5541_v56  ;;  %v5544_v54 = vpop.f32.mrb[42].mxu0 }
 0x1a0   : > { %v5666_v27 = vpop.f32.mrb[49].mxu1  ;;  %v5545_v49 = vpop.f32.mrb[43].mxu0 }
 0x1a1   : > { %v5667_v25 = vadd.f32 %v5666_v27, %v5665_v35  ;;  %v5668_v51 = vpop.f32.mrb[50].mxu1  ;;  %v5546_v30 = vadd.f32 %v5545_v49, %v5544_v54 }
 0x1a2   : > { %v5669_v39 = vpop.f32.mrb[51].mxu1 }
 0x1a3   : > { %v7751_v43 = vadd.f32 %v5667_v25, %v5531_v10  ;;  %v5670_v32 = vadd.f32 %v5669_v39, %v5668_v51 }
 0x1a5   : > { %v7753_v28 = vadd.f32 %v5670_v32, %v5534_v24  ;;  %v5547_v33 = vpop.f32.mrb[44].mxu0 }
 0x1a6   : > { %v5548_v37 = vpop.f32.mrb[45].mxu0 }
 0x1a7   : > { %v5671_v5 = vpop.f32.mrb[52].mxu1  ;;  %v5549_v29 = vadd.f32 %v5548_v37, %v5547_v33  ;;  %v5550_v53 = vpop.f32.mrb[46].mxu0 }
 0x1a8   : > { %v5672_v14 = vpop.f32.mrb[53].mxu1  ;;  %v5551_v13 = vpop.f32.mrb[47].mxu0 }
 0x1a9   : > { %v5673_v41 = vadd.f32 %v5672_v14, %v5671_v5  ;;  %v5674_v62 = vpop.f32.mrb[54].mxu1  ;;  %v5552_v0 = vadd.f32 %v5551_v13, %v5550_v53 }
 0x1aa   : > { %v5675_v57 = vpop.f32.mrb[55].mxu1 }
 0x1ab   : > { %v7755_v4 = vadd.f32 %v5673_v41, %v5537_v17  ;;  %v5676_v9 = vadd.f32 %v5675_v57, %v5674_v62 }
 0x1ad   : > { %v7757_v47 = vadd.f32 %v5676_v9, %v5540_v15  ;;  %v5553_v10 = vpop.f32.mrb[48].mxu0 }
 0x1ae   : > { %v5554_v24 = vpop.f32.mrb[49].mxu0 }
 0x1af   : > { %v5677_v56 = vpop.f32.mrb[56].mxu1  ;;  %v5555_v61 = vadd.f32 %v5554_v24, %v5553_v10  ;;  %v5556_v27 = vpop.f32.mrb[50].mxu0 }
 0x1b0   : > { %v5678_v35 = vpop.f32.mrb[57].mxu1  ;;  %v5557_v51 = vpop.f32.mrb[51].mxu0 }
 0x1b1   : > { %v5679_v54 = vadd.f32 %v5678_v35, %v5677_v56  ;;  %v5680_v25 = vpop.f32.mrb[58].mxu1  ;;  %v5558_v39 = vadd.f32 %v5557_v51, %v5556_v27 }
 0x1b2   : > { %v5681_v49 = vpop.f32.mrb[59].mxu1 }
 0x1b3   : > { %v7759_v32 = vadd.f32 %v5679_v54, %v5543_v55  ;;  %v5682_v33 = vadd.f32 %v5681_v49, %v5680_v25 }
 0x1b5   : > { %v7761_v5 = vadd.f32 %v5682_v33, %v5546_v30  ;;  %v5559_v17 = vpop.f32.mrb[52].mxu0 }
 0x1b6   : > { %v5560_v15 = vpop.f32.mrb[53].mxu0 }
 0x1b7   : > { %7934 = vst [vmem:[#allocation3_spill] sm:$0xff] %v7761_v5  ;;  %v5683_v37 = vpop.f32.mrb[60].mxu1  ;;  %v5561_v53 = vadd.f32 %v5560_v15, %v5559_v17  ;;  %v5562_v41 = vpop.f32.mrb[54].mxu0 }
 0x1b8   : > { %v5684_v14 = vpop.f32.mrb[61].mxu1  ;;  %v5563_v57 = vpop.f32.mrb[55].mxu0 }
 0x1b9   : > { %v5685_v62 = vadd.f32 %v5684_v14, %v5683_v37  ;;  %v5686_v13 = vpop.f32.mrb[62].mxu1  ;;  %v5564_v10 = vadd.f32 %v5563_v57, %v5562_v41 }
 0x1ba   : > { %v5687_v9 = vpop.f32.mrb[63].mxu1 }
 0x1bb   : > { %v7763_v56 = vadd.f32 %v5685_v62, %v5549_v29  ;;  %v5688_v24 = vadd.f32 %v5687_v9, %v5686_v13 }
 0x1bd   : > { %7935 = vst [vmem:[#allocation4_spill] sm:$0xff] %v7763_v56  ;;  %v7765_v35 = vadd.f32 %v5688_v24, %v5552_v0  ;;  %v5565_v55 = vpop.f32.mrb[56].mxu0 }
 0x1be   : > { %v5566_v30 = vpop.f32.mrb[57].mxu0 }
 0x1bf   : > { %7936 = vst [vmem:[#allocation5_spill] sm:$0xff] %v7765_v35  ;;  %v5689_v27 = vpop.f32.mrb[64].mxu1  ;;  %v5567_v25 = vadd.f32 %v5566_v30, %v5565_v55  ;;  %v5568_v51 = vpop.f32.mrb[58].mxu0 }
 0x1c0   : > { %v5690_v54 = vpop.f32.mrb[65].mxu1  ;;  %v5569_v17 = vpop.f32.mrb[59].mxu0 }
 0x1c1   : > { %v5691_v49 = vadd.f32 %v5690_v54, %v5689_v27  ;;  %v5692_v33 = vpop.f32.mrb[66].mxu1  ;;  %v5570_v37 = vadd.f32 %v5569_v17, %v5568_v51 }
 0x1c2   : > { %v5693_v15 = vpop.f32.mrb[67].mxu1 }
 0x1c3   : > { %v7767_v14 = vadd.f32 %v5691_v49, %v5555_v61  ;;  %v5694_v5 = vadd.f32 %v5693_v15, %v5692_v33 }
 0x1c5   : > { %v7769_v41 = vadd.f32 %v5694_v5, %v5558_v39  ;;  %v5571_v29 = vpop.f32.mrb[60].mxu0 }
 0x1c6   : > { %v5572_v0 = vpop.f32.mrb[61].mxu0 }
 0x1c7   : > { %v5695_v62 = vpop.f32.mrb[68].mxu1  ;;  %v5573_v57 = vadd.f32 %v5572_v0, %v5571_v29  ;;  %v5574_v9 = vpop.f32.mrb[62].mxu0 }
 0x1c8   : > { %v5696_v13 = vpop.f32.mrb[69].mxu1  ;;  %v5575_v55 = vpop.f32.mrb[63].mxu0 }
 0x1c9   : > { %v5697_v24 = vadd.f32 %v5696_v13, %v5695_v62  ;;  %v5698_v35 = vpop.f32.mrb[70].mxu1  ;;  %v5576_v27 = vadd.f32 %v5575_v55, %v5574_v9 }
 0x1ca   : > { %v5699_v30 = vpop.f32.mrb[71].mxu1 }
 0x1cb   : > { %v7771_v54 = vadd.f32 %v5697_v24, %v5561_v53  ;;  %v5700_v56 = vadd.f32 %v5699_v30, %v5698_v35 }
 0x1cd   : > { %v7773_v51 = vadd.f32 %v5700_v56, %v5564_v10  ;;  %v5891_v61 = vpop.f32.mrb[64].mxu0 }
 0x1ce   : > { %v2815_v39 = vadd.f32 %v5891_v61, %v7562_v22  ;;  %v2806_v5 = vpop.f32.mrb[65].mxu0 }
 0x1cf   : > { %v5701_v49 = vpop.f32.mrb[72].mxu1  ;;  %v2807_v17 = vadd.f32 %v7522_v63, %v2806_v5  ;;  %v5892_v15 = vpop.f32.mrb[66].mxu0 }
 0x1d0   : > { %v5702_v33 = vpop.f32.mrb[73].mxu1  ;;  %v7778_v0 = vadd.f32 %v7672_v20, %v2815_v39  ;;  %v2818_v53 = vadd.f32 %v5892_v15, %v7566_v8  ;;  %v2809_v13 = vpop.f32.mrb[67].mxu0 }
 0x1d1   : > { %v5703_v29 = vadd.f32 %v5702_v33, %v5701_v49  ;;  %v5704_v62 = vpop.f32.mrb[74].mxu1  ;;  %v3112_v10 = vadd.f32 %v7653_v38, %v2807_v17  ;;  %v2810_v56 = vadd.f32 %v7527_v26, %v2809_v13 }
 0x1d2   : > { %v5705_v35 = vpop.f32.mrb[75].mxu1  ;;  %v3123_v24 = vadd.f32 %v7682_v6, %v2818_v53 }
 0x1d3   : > { %v7783_v9 = vadd.f32 %v5703_v29, %v5567_v25  ;;  %v5706_v22 = vadd.f32 %v5705_v35, %v5704_v62  ;;  %v3115_v63 = vadd.f32 %v7662_v21, %v2810_v56 }
 0x1d5   : > { %v7787_v55 = vadd.f32 %v5706_v22, %v5570_v37  ;;  %v5895_v30 = vpop.f32.mrb[68].mxu0 }
 0x1d6   : > { %v2831_v61 = vadd.f32 %v5895_v30, %v7647_v42  ;;  %v2822_v8 = vpop.f32.mrb[69].mxu0 }
 0x1d7   : > { %v5707_v20 = vpop.f32.mrb[76].mxu1  ;;  %v2823_v39 = vadd.f32 %v7605_v3, %v2822_v8  ;;  %v5896_v38 = vpop.f32.mrb[70].mxu0 }
 0x1d8   : > { %v5708_v49 = vpop.f32.mrb[77].mxu1  ;;  %v7792_v25 = vadd.f32 %v7707_v50, %v2831_v61  ;;  %v2834_v6 = vadd.f32 %v5896_v38, %v7651_v12  ;;  %v2825_v33 = vpop.f32.mrb[71].mxu0 }
 0x1d9   : > { %v5709_v5 = vadd.f32 %v5708_v49, %v5707_v20  ;;  %v5710_v26 = vpop.f32.mrb[78].mxu1  ;;  %v3128_v37 = vadd.f32 %v7690_v23, %v2823_v39  ;;  %v2826_v17 = vadd.f32 %v7610_v58, %v2825_v33 }
 0x1da   : > { %v5711_v21 = vpop.f32.mrb[79].mxu1  ;;  %v3139_v29 = vadd.f32 %v7715_v19, %v2834_v6 }
 0x1db   : > { %v7797_v15 = vadd.f32 %v5709_v5, %v5573_v57  ;;  %v5712_v42 = vadd.f32 %v5711_v21, %v5710_v26  ;;  %v3131_v3 = vadd.f32 %v7697_v34, %v2826_v17 }
 0x1dd   : > { %v7801_v62 = vadd.f32 %v5712_v42, %v5576_v27  ;;  %v5899_v53 = vpop.f32.mrb[72].mxu0 }
 0x1de   : > { %v2847_v50 = vadd.f32 %v5899_v53, %v7700_v2  ;;  %v2838_v13 = vpop.f32.mrb[73].mxu0 }
 0x1df   : > { %v2839_v12 = vadd.f32 %v7670_v1, %v2838_v13  ;;  %v5900_v35 = vpop.f32.mrb[74].mxu0 }
 0x1e0   : > { %v7806_v23 = vadd.f32 %v7734_v36, %v2847_v50  ;;  %v2850_v58 = vadd.f32 %v5900_v35, %v7703_v45  ;;  %v2841_v57 = vpop.f32.mrb[75].mxu0 }
 0x1e1   : > { %v3144_v56 = vadd.f32 %v7724_v52, %v2839_v12  ;;  %v2842_v19 = vadd.f32 %v7680_v7, %v2841_v57 }
 0x1e2   : > { %v7812_v34 = vadd.f32 %v7739_v44, %v2850_v58 }
 0x1e3   : > { %v3147_v27 = vadd.f32 %v7729_v31, %v2842_v19 }
 0x1e5   : > { %v5903_v2 = vpop.f32.mrb[76].mxu0 }
 0x1e6   : > { %v2863_v22 = vadd.f32 %v5903_v2, %v7732_v16  ;;  %v2854_v1 = vpop.f32.mrb[77].mxu0 }
 0x1e7   : > { %v2855_v30 = vadd.f32 %v7719_v46, %v2854_v1  ;;  %v5904_v36 = vpop.f32.mrb[78].mxu0 }
 0x1e8   : > { %v7818_v20 = vadd.f32 %v7747_v48, %v2863_v22  ;;  %v2866_v45 = vadd.f32 %v5904_v36, %v7737_v60  ;;  %v2857_v52 = vpop.f32.mrb[79].mxu0 }
 0x1e9   : > { %v7822_v7 = vadd.f32 %v7742_v40, %v2855_v30  ;;  %v2858_v44 = vadd.f32 %v7722_v18, %v2857_v52 }
 0x1ea   : > { %v7826_v31 = vadd.f32 %v7749_v11, %v2866_v45 }
 0x1eb   : > { %v7829_v16 = vadd.f32 %v7744_v59, %v2858_v44 }
 0x1ed   : > { %v5753_v61 = vpop.f32.mrb[80].mxu0 }
 0x1ee   : > { %v5754_v46 = vpop.f32.mrb[81].mxu0 }
 0x1ef   : > { %v5755_v8 = vadd.f32 %v5754_v46, %v5753_v61  ;;  %v5756_v49 = vpop.f32.mrb[82].mxu0 }
 0x1f0   : > { %v5757_v48 = vpop.f32.mrb[83].mxu0 }
 0x1f1   : > { %v5758_v39 = vadd.f32 %v5757_v48, %v5756_v49  ;;  %v6039_v38 = vadd.f32 %v5755_v8, %v3112_v10 }
 0x1f3   : > { %v6047_v60 = vadd.f32 %v5758_v39, %v3115_v63 }
 0x1f5   : > { %v5759_v5 = vpop.f32.mrb[84].mxu0 }
 0x1f6   : > { %v5760_v26 = vpop.f32.mrb[85].mxu0 }
 0x1f7   : > { %v5761_v40 = vadd.f32 %v5760_v26, %v5759_v5  ;;  %v5762_v6 = vpop.f32.mrb[86].mxu0 }
 0x1f8   : > { %v5763_v33 = vpop.f32.mrb[87].mxu0 }
 0x1f9   : > { %v5764_v18 = vadd.f32 %v5763_v33, %v5762_v6  ;;  %v6035_v11 = vadd.f32 %v5761_v40, %v7778_v0 }
 0x1fb   : > { %v6043_v21 = vadd.f32 %v5764_v18, %v3123_v24 }
 0x1fd   : > { %v5765_v17 = vpop.f32.mrb[88].mxu0 }
 0x1fe   : > { %v5766_v59 = vpop.f32.mrb[89].mxu0 }
 0x1ff   : > { %v5767_v42 = vadd.f32 %v5766_v59, %v5765_v17  ;;  %v5768_v53 = vpop.f32.mrb[90].mxu0 }
 0x200   : > { %v5769_v50 = vpop.f32.mrb[91].mxu0 }
 0x201   : > { %v5770_v13 = vadd.f32 %v5769_v50, %v5768_v53  ;;  %v7832_v12 = vadd.f32 %v5767_v42, %v3128_v37 }
 0x203   : > { %v7834_v35 = vadd.f32 %v5770_v13, %v3131_v3 }
 0x205   : > { %v5771_v10 = vpop.f32.mrb[92].mxu0 }
 0x206   : > { %v5772_v63 = vpop.f32.mrb[93].mxu0 }
 0x207   : > { %v5773_v58 = vadd.f32 %v5772_v63, %v5771_v10  ;;  %v5774_v57 = vpop.f32.mrb[94].mxu0 }
 0x208   : > { %v5775_v19 = vpop.f32.mrb[95].mxu0 }
 0x209   : > { %v5776_v2 = vadd.f32 %v5775_v19, %v5774_v57  ;;  %v6051_v0 = vadd.f32 %v5773_v58, %v7792_v25 }
 0x20b   : > { %v6059_v24 = vadd.f32 %v5776_v2, %v3139_v29 }
 0x20d   : > { %v5777_v22 = vpop.f32.mrb[96].mxu0 }
 0x20e   : > { %v5778_v1 = vpop.f32.mrb[97].mxu0 }
 0x20f   : > { %v5779_v30 = vadd.f32 %v5778_v1, %v5777_v22  ;;  %v5780_v36 = vpop.f32.mrb[98].mxu0 }
 0x210   : > { %v5781_v45 = vpop.f32.mrb[99].mxu0 }
 0x211   : > { %v5782_v52 = vadd.f32 %v5781_v45, %v5780_v36  ;;  %v7837_v37 = vadd.f32 %v5779_v30, %v3144_v56 }
 0x213   : > { %v7840_v3 = vadd.f32 %v5782_v52, %v3147_v27 }
 0x215   : > { %v5783_v44 = vpop.f32.mrb[100].mxu0 }
 0x216   : > { %v5784_v61 = vpop.f32.mrb[101].mxu0 }
 0x217   : > { %v5785_v46 = vadd.f32 %v5784_v61, %v5783_v44  ;;  %v5786_v8 = vpop.f32.mrb[102].mxu0 }
 0x218   : > { %v5787_v49 = vpop.f32.mrb[103].mxu0 }
 0x219   : > { %v5788_v48 = vadd.f32 %v5787_v49, %v5786_v8  ;;  %v7843_v25 = vadd.f32 %v5785_v46, %v7806_v23 }
 0x21b   : > { %v7846_v29 = vadd.f32 %v5788_v48, %v7812_v34 }
 0x21d   : > { %v5789_v39 = vpop.f32.mrb[104].mxu0 }
 0x21e   : > { %v5790_v5 = vpop.f32.mrb[105].mxu0 }
 0x21f   : > { %v5987_v56 = vpop.f32.mrb[80].mxu1  ;;  %v5791_v40 = vadd.f32 %v5790_v5, %v5789_v39  ;;  %v5792_v6 = vpop.f32.mrb[106].mxu0 }
 0x220   : > { %v6036_v26 = vadd.f32 %v6035_v11, %v5987_v56  ;;  %v4252_v27 = vpop.f32.mrb[81].mxu1  ;;  %v5793_v17 = vpop.f32.mrb[107].mxu0 }
 0x221   : > { %v6040_v33 = vadd.f32 %v6039_v38, %v4252_v27  ;;  %v5988_v18 = vpop.f32.mrb[82].mxu1  ;;  %v5794_v53 = vadd.f32 %v5793_v17, %v5792_v6  ;;  %v7854_v34 = vadd.f32 %v5791_v40, %v7822_v7 }
 0x222   : > { %v6044_v59 = vadd.f32 %v6043_v21, %v5988_v18  ;;  %v4255_v42 = vpop.f32.mrb[83].mxu1  ;;  %v4611_v58 = vmul.f32 %v6036_v26, %v6036_v26 }
 0x223   : > { %v6048_v23 = vadd.f32 %v6047_v60, %v4255_v42  ;;  %v4609_v11 = vmul.f32 %v6040_v33, %v6040_v33  ;;  %v7857_v21 = vadd.f32 %v5794_v53, %v7829_v16 }
 0x224   : > { %v5363_v50 = vpack.c.bf16 %v6044_v59, %v6036_v26  ;;  %v4612_v60 = vmul.f32 %v6044_v59, %v6044_v59 }
 0x225   : > { %v5358_v13 = vpack.c.bf16 %v6048_v23, %v6040_v33  ;;  %v4571_v38 = vadd.f32 %v6048_v23, %v6040_v33  ;;  %v4610_v10 = vmul.f32 %v6048_v23, %v6048_v23  ;;  %v5795_v63 = vpop.f32.mrb[108].mxu0 }
 0x226   : > { %5450 = vst [vmem:[%s7851_s22 + $0x8] sm:$0xff] %v5363_v50   ;;  %v5796_v22 = vpop.f32.mrb[109].mxu0 }
 0x227   : > { %5359 = vst [vmem:[%s7851_s22] sm:$0xff] %v5358_v13   ;;  %v4572_v57 = vadd.f32 %v6036_v26, %v4571_v38  ;;  %v4641_v19 = vadd.f32 %v4610_v10, %v4609_v11  ;;  %v5991_v2 = vpop.f32.mrb[84].mxu1  ;;  %v5797_v30 = vadd.f32 %v5796_v22, %v5795_v63  ;;  %v5798_v36 = vpop.f32.mrb[110].mxu0 }
 0x228   : > { %v6052_v1 = vadd.f32 %v6051_v0, %v5991_v2  ;;  %v4268_v7 = vpop.f32.mrb[85].mxu1  ;;  %v5799_v61 = vpop.f32.mrb[111].mxu0 }
 0x229   : > { %v4642_v45 = vadd.f32 %v4641_v19, %v4611_v58  ;;  %v6056_v52 = vadd.f32 %v7832_v12, %v4268_v7  ;;  %v4573_v44 = vadd.f32 %v6044_v59, %v4572_v57  ;;  %v5992_v16 = vpop.f32.mrb[86].mxu1  ;;  %v5800_v49 = vadd.f32 %v5799_v61, %v5798_v36 }
 0x22a   : > { %v6060_v46 = vadd.f32 %v6059_v24, %v5992_v16  ;;  %v4271_v8 = vpop.f32.mrb[87].mxu1  ;;  %v6083_v26 = vadd.f32 %v5797_v30, %v7818_v20  ;;  %v4615_v59 = vmul.f32 %v6052_v1, %v6052_v1 }
 0x22b   : > { %v4574_v48 = vadd.f32 %v6056_v52, %v4573_v44  ;;  %v4613_v39 = vmul.f32 %v6056_v52, %v6056_v52  ;;  %v4643_v56 = vadd.f32 %v4642_v45, %v4612_v60  ;;  %v6064_v0 = vadd.f32 %v7834_v35, %v4271_v8 }
 0x22c   : > { %v5373_v5 = vpack.c.bf16 %v6060_v46, %v6052_v1  ;;  %v6091_v40 = vadd.f32 %v5800_v49, %v7826_v31  ;;  %v4616_v38 = vmul.f32 %v6060_v46, %v6060_v46 }
 0x22d   : > { %v4644_v27 = vadd.f32 %v4643_v56, %v4613_v39  ;;  %v5368_v12 = vpack.c.bf16 %v6064_v0, %v6056_v52  ;;  %v4575_v6 = vadd.f32 %v6064_v0, %v4574_v48  ;;  %v4614_v33 = vmul.f32 %v6064_v0, %v6064_v0  ;;  %v5801_v18 = vpop.f32.mrb[112].mxu0 }
 0x22e   : > { %5452 = vst [vmem:[%s7851_s22 + $0x18] sm:$0xff] %v5373_v5   ;;  %v5802_v17 = vpop.f32.mrb[113].mxu0 }
 0x22f   : > { %v5995_v24 = vpop.f32.mrb[88].mxu1  ;;  %5451 = vst [vmem:[%s7851_s22 + $0x10] sm:$0xff] %v5368_v12   ;;  %v4576_v42 = vadd.f32 %v6052_v1, %v4575_v6  ;;  %v4645_v53 = vadd.f32 %v4644_v27, %v4614_v33  ;;  %v5803_v35 = vadd.f32 %v5802_v17, %v5801_v18  ;;  %v5804_v50 = vpop.f32.mrb[114].mxu0 }
 0x230   : > { %v6068_v23 = vadd.f32 %v7843_v25, %v5995_v24  ;;  %v4284_v11 = vpop.f32.mrb[89].mxu1  ;;  %v5805_v31 = vpop.f32.mrb[115].mxu0 }
 0x231   : > { %v6072_v20 = vadd.f32 %v7837_v37, %v4284_v11  ;;  %v5996_v13 = vpop.f32.mrb[90].mxu1  ;;  %v4646_v10 = vadd.f32 %v4645_v53, %v4615_v59  ;;  %v4577_v63 = vadd.f32 %v6060_v46, %v4576_v42  ;;  %v5806_v19 = vadd.f32 %v5805_v31, %v5804_v50 }
 0x232   : > { %v6076_v58 = vadd.f32 %v7846_v29, %v5996_v13  ;;  %v4287_v57 = vpop.f32.mrb[91].mxu1  ;;  %v6101_v25 = vadd.f32 %v7751_v43, %v5803_v35  ;;  %v4619_v61 = vmul.f32 %v6068_v23, %v6068_v23 }
 0x233   : > { %v4617_v2 = vmul.f32 %v6072_v20, %v6072_v20  ;;  %v6080_v22 = vadd.f32 %v7840_v3, %v4287_v57  ;;  %v4578_v60 = vadd.f32 %v6072_v20, %v4577_v63  ;;  %v4647_v1 = vadd.f32 %v4646_v10, %v4616_v38 }
 0x234   : > { %v5383_v7 = vpack.c.bf16 %v6076_v58, %v6068_v23  ;;  %v6107_v36 = vadd.f32 %v7753_v28, %v5806_v19  ;;  %v4620_v0 = vmul.f32 %v6076_v58, %v6076_v58 }
 0x235   : > { %v5378_v37 = vpack.c.bf16 %v6080_v22, %v6072_v20  ;;  %v4618_v30 = vmul.f32 %v6080_v22, %v6080_v22  ;;  %v4648_v45 = vadd.f32 %v4647_v1, %v4617_v2  ;;  %v4579_v52 = vadd.f32 %v6080_v22, %v4578_v60  ;;  %v5807_v44 = vpop.f32.mrb[116].mxu0 }
 0x236   : > { %5454 = vst [vmem:[%s7851_s22 + $0x28] sm:$0xff] %v5383_v7   ;;  %v5808_v16 = vpop.f32.mrb[117].mxu0 }
 0x237   : > { %5453 = vst [vmem:[%s7851_s22 + $0x20] sm:$0xff] %v5378_v37   ;;  %v5999_v29 = vpop.f32.mrb[92].mxu1  ;;  %v4580_v46 = vadd.f32 %v6068_v23, %v4579_v52  ;;  %v4649_v8 = vadd.f32 %v4648_v45, %v4618_v30  ;;  %v5809_v43 = vadd.f32 %v5808_v16, %v5807_v44  ;;  %v5810_v48 = vpop.f32.mrb[118].mxu0 }
 0x238   : > { %v6084_v3 = vadd.f32 %v6083_v26, %v5999_v29  ;;  %v4300_v49 = vpop.f32.mrb[93].mxu1  ;;  %v5811_v5 = vpop.f32.mrb[119].mxu0 }
 0x239   : > { %v6088_v39 = vadd.f32 %v7854_v34, %v4300_v49  ;;  %v6000_v56 = vpop.f32.mrb[94].mxu1  ;;  %v4650_v28 = vadd.f32 %v4649_v8, %v4619_v61  ;;  %v4581_v27 = vadd.f32 %v6076_v58, %v4580_v46  ;;  %v5812_v33 = vadd.f32 %v5811_v5, %v5810_v48 }
 0x23a   : > { %v6092_v12 = vadd.f32 %v6091_v40, %v6000_v56  ;;  %v4303_v6 = vpop.f32.mrb[95].mxu1  ;;  %v6098_v26 = vadd.f32 %v7755_v4, %v5809_v43  ;;  %v4623_v13 = vmul.f32 %v6084_v3, %v6084_v3 }
 0x23b   : > { %v4621_v18 = vmul.f32 %v6088_v39, %v6088_v39  ;;  %v6096_v24 = vadd.f32 %v7857_v21, %v4303_v6  ;;  %v4582_v17 = vadd.f32 %v6088_v39, %v4581_v27  ;;  %v4651_v59 = vadd.f32 %v4650_v28, %v4620_v0 }
 0x23c   : > { %v5393_v42 = vpack.c.bf16 %v6092_v12, %v6084_v3  ;;  %v6104_v23 = vadd.f32 %v7757_v47, %v5812_v33  ;;  %v4624_v2 = vmul.f32 %v6092_v12, %v6092_v12 }
 0x23d   : > { %v5388_v53 = vpack.c.bf16 %v6096_v24, %v6088_v39  ;;  %v4622_v34 = vmul.f32 %v6096_v24, %v6096_v24  ;;  %v4652_v11 = vadd.f32 %v4651_v59, %v4621_v18  ;;  %v4583_v35 = vadd.f32 %v6096_v24, %v4582_v17  ;;  %v5813_v50 = vpop.f32.mrb[120].mxu0  ;;  %v7938_v17 = vld [vmem:[#allocation4_spill] sm:$0xff] }
 0x23e   : > { %5456 = vst [vmem:[%s7851_s22 + $0x38] sm:$0xff] %v5393_v42   ;;  %v5814_v20 = vpop.f32.mrb[121].mxu0 }
 0x23f   : > { %5455 = vst [vmem:[%s7851_s22 + $0x30] sm:$0xff] %v5388_v53   ;;  %v6003_v40 = vpop.f32.mrb[0].mxu1  ;;  %v4584_v31 = vadd.f32 %v6084_v3, %v4583_v35  ;;  %v4653_v38 = vadd.f32 %v4652_v11, %v4622_v34  ;;  %v5815_v4 = vadd.f32 %v5814_v20, %v5813_v50  ;;  %v5816_v63 = vpop.f32.mrb[122].mxu0  ;;  %v7939_v35 = vld [vmem:[#allocation5_spill] sm:$0xff] }
 0x240   : > { %v6099_v21 = vadd.f32 %v6098_v26, %v6003_v40  ;;  %v4316_v10 = vpop.f32.mrb[1].mxu1  ;;  %v5817_v19 = vpop.f32.mrb[123].mxu0 }
 0x241   : > { %v6102_v58 = vadd.f32 %v6101_v25, %v4316_v10  ;;  %v6004_v57 = vpop.f32.mrb[2].mxu1  ;;  %v4654_v47 = vadd.f32 %v4653_v38, %v4623_v13  ;;  %v4585_v22 = vadd.f32 %v6092_v12, %v4584_v31  ;;  %v5818_v7 = vadd.f32 %v5817_v19, %v5816_v63  ;;  %v7937_v25 = vld [vmem:[#allocation3_spill] sm:$0xff] }
 0x242   : > { %v6105_v60 = vadd.f32 %v6104_v23, %v6004_v57  ;;  %v4319_v1 = vpop.f32.mrb[3].mxu1  ;;  %v6113_v45 = vadd.f32 %v7759_v32, %v5815_v4  ;;  %v4627_v39 = vmul.f32 %v6099_v21, %v6099_v21 }
 0x243   : > { %v4625_v37 = vmul.f32 %v6102_v58, %v6102_v58  ;;  %v6108_v30 = vadd.f32 %v6107_v36, %v4319_v1  ;;  %v4586_v52 = vadd.f32 %v6102_v58, %v4585_v22  ;;  %v4655_v44 = vadd.f32 %v4654_v47, %v4624_v2 }
 0x244   : > { %v5403_v29 = vpack.c.bf16 %v6105_v60, %v6099_v21  ;;  %v6119_v46 = vadd.f32 %v7937_v25, %v5818_v7  ;;  %v4628_v6 = vmul.f32 %v6105_v60, %v6105_v60 }
 0x245   : > { %v5398_v16 = vpack.c.bf16 %v6108_v30, %v6102_v58  ;;  %v4626_v61 = vmul.f32 %v6108_v30, %v6108_v30  ;;  %v4656_v8 = vadd.f32 %v4655_v44, %v4625_v37  ;;  %v4587_v3 = vadd.f32 %v6108_v30, %v4586_v52  ;;  %v5819_v49 = vpop.f32.mrb[124].mxu0 }
 0x246   : > { %5458 = vst [vmem:[%s7851_s22 + $0x48] sm:$0xff] %v5403_v29   ;;  %v5820_v48 = vpop.f32.mrb[125].mxu0 }
 0x247   : > { %5457 = vst [vmem:[%s7851_s22 + $0x40] sm:$0xff] %v5398_v16   ;;  %v6007_v43 = vpop.f32.mrb[4].mxu1  ;;  %v4588_v56 = vadd.f32 %v6099_v21, %v4587_v3  ;;  %v4657_v5 = vadd.f32 %v4656_v8, %v4626_v61  ;;  %v5821_v0 = vadd.f32 %v5820_v48, %v5819_v49  ;;  %v5822_v32 = vpop.f32.mrb[126].mxu0 }
 0x248   : > { %v4332_v36 = vpop.f32.mrb[5].mxu1  ;;  %v5823_v12 = vpop.f32.mrb[127].mxu0 }
 0x249   : > { %v6114_v28 = vadd.f32 %v6113_v45, %v4332_v36  ;;  %v6008_v27 = vpop.f32.mrb[6].mxu1  ;;  %v4658_v33 = vadd.f32 %v4657_v5, %v4627_v39  ;;  %v4589_v18 = vadd.f32 %v6105_v60, %v4588_v56  ;;  %v5824_v26 = vadd.f32 %v5823_v12, %v5822_v32 }
 0x24a   : > { %v4335_v24 = vpop.f32.mrb[7].mxu1  ;;  %v6110_v59 = vadd.f32 %v7938_v17, %v5821_v0 }
 0x24b   : > { %v4629_v42 = vmul.f32 %v6114_v28, %v6114_v28  ;;  %v6120_v53 = vadd.f32 %v6119_v46, %v4335_v24  ;;  %v4590_v34 = vadd.f32 %v6114_v28, %v4589_v18  ;;  %v4659_v23 = vadd.f32 %v4658_v33, %v4628_v6 }
 0x24c   : > { %v6111_v11 = vadd.f32 %v6110_v59, %v6007_v43  ;;  %v6116_v50 = vadd.f32 %v7939_v35, %v5824_v26 }
 0x24d   : > { %v5408_v40 = vpack.c.bf16 %v6120_v53, %v6114_v28  ;;  %v4630_v20 = vmul.f32 %v6120_v53, %v6120_v53  ;;  %v4660_v13 = vadd.f32 %v4659_v23, %v4629_v42  ;;  %v4591_v31 = vadd.f32 %v6120_v53, %v4590_v34  ;;  %v5825_v38 = vpop.f32.mrb[128].mxu0 }
 0x24e   : > { %v6117_v21 = vadd.f32 %v6116_v50, %v6008_v27  ;;  %v5826_v4 = vpop.f32.mrb[129].mxu0  ;;  %v4631_v63 = vmul.f32 %v6111_v11, %v6111_v11 }
 0x24f   : > { %5459 = vst [vmem:[%s7851_s22 + $0x50] sm:$0xff] %v5408_v40   ;;  %v6011_v10 = vpop.f32.mrb[8].mxu1  ;;  %v4592_v58 = vadd.f32 %v6111_v11, %v4591_v31  ;;  %v4661_v57 = vadd.f32 %v4660_v13, %v4630_v20  ;;  %v5827_v2 = vadd.f32 %v5826_v4, %v5825_v38  ;;  %v5828_v47 = vpop.f32.mrb[130].mxu0 }
 0x250   : > { %v4348_v19 = vpop.f32.mrb[9].mxu1  ;;  %v5413_v22 = vpack.c.bf16 %v6117_v21, %v6111_v11  ;;  %v5829_v1 = vpop.f32.mrb[131].mxu0  ;;  %v4632_v7 = vmul.f32 %v6117_v21, %v6117_v21 }
 0x251   : > { %v6012_v60 = vpop.f32.mrb[10].mxu1  ;;  %v4662_v37 = vadd.f32 %v4661_v57, %v4631_v63  ;;  %v4593_v30 = vadd.f32 %v6117_v21, %v4592_v58  ;;  %v5830_v52 = vadd.f32 %v5829_v1, %v5828_v47  ;;  %v6125_v44 = vadd.f32 %v7767_v14, %v5827_v2 }
 0x252   : > { %v4351_v45 = vpop.f32.mrb[11].mxu1  ;;  %5460 = vst [vmem:[%s7851_s22 + $0x58] sm:$0xff] %v5413_v22  }
 0x253   : > { %v4663_v29 = vadd.f32 %v4662_v37, %v4632_v7  ;;  %v6126_v16 = vadd.f32 %v6125_v44, %v4348_v19  ;;  %v6131_v61 = vadd.f32 %v7769_v41, %v5830_v52 }
 0x255   : > { %v5831_v25 = vpop.f32.mrb[132].mxu0  ;;  %v4594_v46 = vadd.f32 %v6126_v16, %v4593_v30  ;;  %v4633_v8 = vmul.f32 %v6126_v16, %v6126_v16  ;;  %v6132_v3 = vadd.f32 %v6131_v61, %v4351_v45 }
 0x256   : > { %v5832_v43 = vpop.f32.mrb[133].mxu0 }
 0x257   : > { %v6015_v49 = vpop.f32.mrb[12].mxu1  ;;  %v5833_v39 = vadd.f32 %v5832_v43, %v5831_v25  ;;  %v5834_v56 = vpop.f32.mrb[134].mxu0  ;;  %v4664_v5 = vadd.f32 %v4663_v29, %v4633_v8  ;;  %v5418_v36 = vpack.c.bf16 %v6132_v3, %v6126_v16  ;;  %v4595_v0 = vadd.f32 %v6132_v3, %v4594_v46 }
 0x258   : > { %v4364_v48 = vpop.f32.mrb[13].mxu1  ;;  %v5835_v28 = vpop.f32.mrb[135].mxu0  ;;  %v4634_v14 = vmul.f32 %v6132_v3, %v6132_v3 }
 0x259   : > { %v6016_v32 = vpop.f32.mrb[14].mxu1  ;;  %v5836_v12 = vadd.f32 %v5835_v28, %v5834_v56  ;;  %v6122_v41 = vadd.f32 %v7771_v54, %v5833_v39  ;;  %5461 = vst [vmem:[%s7851_s22 + $0x60] sm:$0xff] %v5418_v36  }
 0x25a   : > { %v4367_v27 = vpop.f32.mrb[15].mxu1  ;;  %v4665_v6 = vadd.f32 %v4664_v5, %v4634_v14 }
 0x25b   : > { %v6123_v33 = vadd.f32 %v6122_v41, %v6011_v10  ;;  %v6128_v18 = vadd.f32 %v7773_v51, %v5836_v12 }
 0x25d   : > { %v4635_v24 = vmul.f32 %v6123_v33, %v6123_v33  ;;  %v6129_v26 = vadd.f32 %v6128_v18, %v6012_v60  ;;  %v4596_v17 = vadd.f32 %v6123_v33, %v4595_v0  ;;  %v5837_v59 = vpop.f32.mrb[136].mxu0 }
 0x25e   : > { %v5838_v42 = vpop.f32.mrb[137].mxu0 }
 0x25f   : > { %v5423_v53 = vpack.c.bf16 %v6129_v26, %v6123_v33  ;;  %v4636_v34 = vmul.f32 %v6129_v26, %v6129_v26  ;;  %v4666_v23 = vadd.f32 %v4665_v6, %v4635_v24  ;;  %v5839_v11 = vadd.f32 %v5838_v42, %v5837_v59  ;;  %v5840_v35 = vpop.f32.mrb[138].mxu0 }
 0x260   : > { %v5841_v50 = vpop.f32.mrb[139].mxu0  ;;  %v4597_v40 = vadd.f32 %v6129_v26, %v4596_v17 }
 0x261   : > { %5462 = vst [vmem:[%s7851_s22 + $0x68] sm:$0xff] %v5423_v53   ;;  %v5842_v54 = vadd.f32 %v5841_v50, %v5840_v35  ;;  %v6137_v20 = vadd.f32 %v7783_v9, %v5839_v11  ;;  %v4667_v13 = vadd.f32 %v4666_v23, %v4636_v34 }
 0x263   : > { %v6138_v31 = vadd.f32 %v6137_v20, %v4364_v48  ;;  %v6143_v51 = vadd.f32 %v7787_v55, %v5842_v54 }
 0x265   : > { %v4598_v38 = vadd.f32 %v6138_v31, %v4597_v40  ;;  %v4637_v21 = vmul.f32 %v6138_v31, %v6138_v31  ;;  %v6144_v10 = vadd.f32 %v6143_v51, %v4367_v27  ;;  %v5843_v4 = vpop.f32.mrb[140].mxu0 }
 0x266   : > { %v5844_v63 = vpop.f32.mrb[141].mxu0 }
 0x267   : > { %v4668_v58 = vadd.f32 %v4667_v13, %v4637_v21  ;;  %v5428_v57 = vpack.c.bf16 %v6144_v10, %v6138_v31  ;;  %v4599_v19 = vadd.f32 %v6144_v10, %v4598_v38  ;;  %v4638_v2 = vmul.f32 %v6144_v10, %v6144_v10  ;;  %v5846_v47 = vpop.f32.mrb[142].mxu0 }
 0x268   : > { %v5845_v22 = vadd.f32 %v5844_v63, %v5843_v4  ;;  %v5847_v60 = vpop.f32.mrb[143].mxu0 }
 0x269   : > { %5463 = vst [vmem:[%s7851_s22 + $0x70] sm:$0xff] %v5428_v57   ;;  %v4669_v9 = vadd.f32 %v4668_v58, %v4638_v2  ;;  %v5848_v1 = vadd.f32 %v5847_v60, %v5846_v47 }
 0x26a   : > { %v6134_v7 = vadd.f32 %v7797_v15, %v5845_v22 }
 0x26b   : > { %v6140_v55 = vadd.f32 %v7801_v62, %v5848_v1 }
 0x26c   : > { %v6135_v37 = vadd.f32 %v6134_v7, %v6015_v49 }
 0x26d   : > { %v6141_v30 = vadd.f32 %v6140_v55, %v6016_v32 }
 0x26e   : > { %v4600_v45 = vadd.f32 %v6135_v37, %v4599_v19  ;;  %v4639_v52 = vmul.f32 %v6135_v37, %v6135_v37 }
 0x26f   : > { %v5433_v44 = vpack.c.bf16 %v6141_v30, %v6135_v37  ;;  %v4640_v29 = vmul.f32 %v6141_v30, %v6141_v30 }
 0x270   : > { %v4670_v16 = vadd.f32 %v4669_v9, %v4639_v52  ;;  %v4601_v61 = vadd.f32 %v6141_v30, %v4600_v45 }
 0x271   : > { %5464 = vst [vmem:[%s7851_s22 + $0x78] sm:$0xff] %v5433_v44  }
 0x272   : > { %v4602_v25 = vrot.slane %v4601_v61, 4  ;;  %v4671_v46 = vadd.f32 %v4670_v16, %v4640_v29 }
 0x274   : > { %v4603_v8 = vadd.f32 %v4602_v25, %v4601_v61  ;;  %v4672_v3 = vrot.slane %v4671_v46, 4 }
 0x276   : > { %v4604_v43 = vrot.slane %v4603_v8, 2  ;;  %v4673_v48 = vadd.f32 %v4672_v3, %v4671_v46 }
 0x278   : > { %v4605_v15 = vadd.f32 %v4604_v43, %v4603_v8  ;;  %v4674_v39 = vrot.slane %v4673_v48, 2 }
 0x27a   : > { %v4606_v62 = vrot.slane %v4605_v15, 1  ;;  %v4675_v56 = vadd.f32 %v4674_v39, %v4673_v48 }
 0x27c   : > { %v4607_v49 = vadd.f32 %v4606_v62, %v4605_v15  ;;  %v4676_v5 = vrot.slane %v4675_v56, 1 }
 0x27e   : > { %v4677_v36 = vadd.f32 %v4676_v5, %v4675_v56  ;;  %4679 = vst [vmem:[%s490_s26] sm:$0xff] %v4607_v49 }
 0x280   : > { %4680 = vst [vmem:[%s496_s9] sm:$0xff] %v4677_v36 }
 0x281 PF: > { %s19_s3 = sadd.s32 1, %s6445_s3   ;;  %s7940_s27 = smov %s6441_s28 }
 0x282   : > { %p16_p6 = scmp.ge.s32.totalorder %s19_s3, 4   ;;  %s7941_s28 = smov %s7943_s4 }
 0x284   :  { %18 = sbr.rel (!%p16_p6) target bundleno = 2 (0x2), region = 109 }

// kernel: double_conv_forward.3
= control target key start
LH: loop header
LB: loop body
LE: loop exit
PB: predicated region body
PF: predicated region fallthrough
CT: control target
= control target key end

     0   :  { %s7566_s21 = smov 0   ;;  %s7568_s22 = smov 0   ;;  %s9639_s0 = inlined_call_operand.vmem [shape: f32[2,16,16,4], index: 0, kind: input, shape index: {}, may-alias: {0,1,2}]   ;;  %s9640_s1 = inlined_call_operand.vmem [shape: f32[2,16,16,4], index: 1, kind: input, shape index: {}, may-alias: {0,1,2}]   ;;  %s9641_s2 = inlined_call_operand.vmem [shape: f32[2,16,16,4], index: 2, kind: input, shape index: {}, may-alias: {0,1,2}]   ;;  %s9642_s3 = inlined_call_operand.vmem [shape: bf16[9,4,128], index: 3, kind: input, shape index: {}]   ;;  %s9643_s4 = inlined_call_operand.vmem [shape: bf16[512,128], index: 4, kind: output, shape index: {0}]   ;;  %s9644_s5 = inlined_call_operand.vmem [shape: f32[16,128], index: 5, kind: output, shape index: {1}]   ;;  %s9645_s6 = inlined_call_operand.vmem [shape: f32[16,128], index: 6, kind: output, shape index: {2}]  }
   0x1   :  { %s7570_s1 = smov 0  }
   0x2 LB: > { %s29_s2 = sadd.s32 1, %s7524_s22  ;;  %p6028_p0 = scmp.ge.s32.totalorder %s7528_s1, 1  ;;  %s7528_s1 = sphi %s7570_s1, %s17_s1   ;;  %s7524_s22 = sphi %s7568_s22, %s9782_s22   ;;  %s7520_s21 = sphi %s7566_s21, %s9781_s21  }
   0x3   : > { %p31_p1 = scmp.ge.s32.totalorder %s29_s2, 2  ;;  %p307_p2 = scmp.lt.s32.totalorder %s7528_s1, 3 }
   0x5   : > { %s9784_s2 = smov (%p31_p1, %s29_s2), 0  ;;  %p308_p3 = pnand %p6028_p0, %p307_p2 }
   0x7   : > { %311 = sbr.rel (%p308_p3) target bundleno = 686 (0x2ae), region = 36 }
   0xe   : > { %v6075_v0 = vld [vmem:[%s9642_s3 + $0x2] sm:$0x3]  ;;  %vm1736_vm0 = vcmask 1041408   ;;  %v6222_v1 = vld [vmem:[%s9642_s3 + $0x8] sm:$0x3]  ;;  %vm445_vm1 = vcmask 24576  }
   0xf   : > { %7333 = vmatprep.subr.msk.bf16.mxu1 %vm1736_vm0, %v6075_v0  ;;  %7337 = vmatprep.subr.msk.bf16.mxu0 %vm1736_vm0, %v6222_v1  ;;  %v1738_v2 = vsel %vm1736_vm0, %v6075_v0, 0  ;;  %v7596_v3 = vsel %vm1736_vm0, %v6222_v1, 0  ;;  %vm446_vm2 = vsmask.f32 256  ;;  %v448_v4 = vld [vmem:[#allocation2] sm:$0x1] }
  0x10   : > { %9670 = vst [vmem:[#allocation3_spill] sm:$0xff] %v7596_v3  ;;  %6770 = vmatpush3.bf16.msra.mxu1 %v1738_v2  ;;  %6906 = vmatpush3.bf16.msra.mxu0 %v7596_v3  ;;  %vm7600_vm3 = vmand %vm445_vm1, %vm446_vm2  ;;  %v9671_v5 = vmov 0  ;;  %vm502_vm4 = vsmask.f32 7938  ;;  %v504_v6 = vld [vmem:[#allocation2 + $0x8] sm:$0x1] }
  0x11   : > { %v9672_v5 = vsel %vm7600_vm3, 4294967295, %v9671_v5  ;;  %v449_v7 = vsel %vm7600_vm3, 0, %v448_v4  ;;  %vm7607_vm5 = vmand %vm445_vm1, %vm502_vm4  ;;  %v9674_v8 = vmov 0  ;;  %p380_p4 = scmp.lt.s32.totalorder %s7520_s21, 1  ;;  %vm686_vm6 = vsmask.f32 4368 }
  0x12   : > { %9673 = vst [vmem:[#allocation4_spill] sm:$0xff] %v9672_v5  ;;  %v9675_v8 = vsel %vm7607_vm5, 4294967295, %v9674_v8  ;;  %450 = vst [vmem:[#allocation2] sm:$0x1] %v449_v7  ;;  %v505_v9 = vsel %vm7607_vm5, 0, %v504_v6  ;;  %v7530_v10 = vmov 0  }
  0x13   : > { %9676 = vst [vmem:[#allocation5_spill] sm:$0xff] %v9675_v8  ;;  %v6071_v11 = vcombine.low %v7530_v10, %v7530_v10  ;;  %v6072_v12 = vcombine.high %v7530_v10, %v7530_v10  ;;  %v451_v13 = vld [vmem:[#allocation2 + $0xc] sm:$0x1]  ;;  %506 = vst [vmem:[#allocation2 + $0x8] sm:$0x1] %v505_v9  ;;  %vm1009_vm7 = vcmask 27648  }
  0x14   : > { %s7615_s27 = scalar_select %p380_p4, %s7520_s21, 1  ;;  %v452_v14 = vsel %vm7600_vm3, 0, %v451_v13  ;;  %v507_v15 = vld [vmem:[#allocation2 + $0x14] sm:$0x1]  ;;  %v7622_v20 = vld [vmem:[%s9642_s3] sm:$0x3]  ;;  %vm7626_vm8 = vmor %vm446_vm2, %vm686_vm6 }
  0x15   : > { %v1138_v16 = vshrl.u32 %v6071_v11, 16  ;;  %v1141_v17 = vshll.u32 %v6071_v11, 16  ;;  %v1146_v18 = vshrl.u32 %v6072_v12, 16  ;;  %v1149_v19 = vshll.u32 %v6072_v12, 16  ;;  %453 = vst [vmem:[#allocation2 + $0xc] sm:$0x1] %v452_v14  ;;  %7334 = vmatprep.subr.msk.bf16.mxu1 %vm1736_vm0, %v7622_v20  ;;  %vm7642_vm9 = vmand %vm1009_vm7, %vm502_vm4 }
  0x16   : > { %s6453_s30 = sshll.u32 %s7615_s27, 8  ;;  %v508_v22 = vsel %vm7607_vm5, 0, %v507_v15  ;;  %v7638_v23 = vld [vmem:[%s9642_s3 + $0xa] sm:$0x3]  ;;  %v454_v27 = vld [vmem:[#allocation2 + $0x18] sm:$0x1] }
  0x17   : > { %v1140_v25 = vrot.slane %v1138_v16, 7  ;;  %v7646_v26 = vrot.slane %v1146_v18, 7  ;;  %s7651_s11 = scalar_lea.vmem %s9639_s0, %s6453_s30  ;;  %509 = vst [vmem:[#allocation2 + $0x14] sm:$0x1] %v508_v22  ;;  %7339 = vmatprep.subr.msk.bf16.mxu0 %vm1736_vm0, %v7638_v23  ;;  %v510_v28 = vld [vmem:[#allocation2 + $0x20] sm:$0x1] }
  0x18   : > { %v558_v29 = vld [vmem:[%s7651_s11] sm:$0xff]  ;;  %v559_v30 = vld [vmem:[%s7651_s11 + $0x8] sm:$0xff]  ;;  %v455_v31 = vsel %vm7600_vm3, 0, %v454_v27  ;;  %v511_v32 = vsel %vm7607_vm5, 0, %v510_v28  ;;  %v560_v33 = vld [vmem:[%s7651_s11 + $0x10] sm:$0xff]  ;;  %vm1687_vm12 = vcmask 31744  }
  0x19   : > { %9681 = vst [vmem:[#allocation6_spill] sm:$0xff] %v7646_v26  ;;  %v7662_v34 = vor.u32 %v1141_v17, %v1140_v25  ;;  %v1144_v35 = vrot.slane %v1140_v25, 4  ;;  %v1151_v36 = vor.u32 %v1149_v19, %v7646_v26  ;;  %v9646_v37 = vrot.slane %v7646_v26, 4  ;;  %456 = vst [vmem:[#allocation2 + $0x18] sm:$0x1] %v455_v31  ;;  %v561_v38 = vld [vmem:[%s7651_s11 + $0x18] sm:$0xff] }
  0x1a   : > { %512 = vst [vmem:[#allocation2 + $0x20] sm:$0x1] %v511_v32  ;;  %v457_v39 = vld [vmem:[#allocation2 + $0x24] sm:$0x1]  ;;  %v1157_v40 = vld [vmem:[#allocation2] sm:$0xf]  ;;  %v6457_v41 = vpack.c.bf16 %v558_v29, %v558_v29  ;;  %v6458_v42 = vpack.c.bf16 %v559_v30, %v559_v30  ;;  %v6459_v43 = vpack.c.bf16 %v560_v33, %v560_v33  ;;  %v6460_v44 = vpack.c.bf16 %v561_v38, %v561_v38 }
  0x1b   : > { %9682 = vst [vmem:[#allocation7_spill] sm:$0xff] %v7662_v34  ;;  %v513_v45 = vld [vmem:[#allocation2 + $0x2c] sm:$0x1]  ;;  %v1152_v46 = vsel %vm7626_vm8, %v1144_v35, %v1151_v36  ;;  %v1158_v47 = vsel %vm7642_vm9, %v7662_v34, %v1157_v40  ;;  %v1161_v48 = vld [vmem:[#allocation2 + $0x8] sm:$0x1]  ;;  %v458_v49 = vsel %vm7600_vm3, 0, %v457_v39 }
  0x1c   : > { %v514_v50 = vsel %vm7607_vm5, 0, %v513_v45  ;;  %v562_v51 = vld [vmem:[%s7651_s11 + $0x20] sm:$0xff]  ;;  %1159 = vst [vmem:[#allocation2] sm:$0xf] %v1158_v47  ;;  %1160 = vst.msk [vmem:[#allocation2 + $0x4] sm:$0xf] %vm1009_vm7, %v1152_v46  ;;  %v1162_v52 = vsel %vm7600_vm3, %v9646_v37, %v1161_v48 }
  0x1d   : > { %1197 = vst.msk [vmem:[#allocation2 + $0xd0] sm:$0xf] %vm1009_vm7, %v1152_v46  ;;  %v689_v53 = vshrl.u32 %v6457_v41, 16  ;;  %v692_v54 = vshll.u32 %v6457_v41, 16  ;;  %v697_v55 = vshrl.u32 %v6458_v42, 16  ;;  %v563_v56 = vld [vmem:[%s7651_s11 + $0x28] sm:$0xff]  ;;  %v6461_v2 = vpack.c.bf16 %v562_v51, %v562_v51 }
  0x1e   : > { %459 = vst [vmem:[#allocation2 + $0x24] sm:$0x1] %v458_v49  ;;  %515 = vst [vmem:[#allocation2 + $0x2c] sm:$0x1] %v514_v50  ;;  %v460_v57 = vld [vmem:[#allocation2 + $0x30] sm:$0x1]  ;;  %v7684_v9 = vpack.c.bf16 %v563_v56, %v563_v56 }
  0x1f   : > { %1163 = vst [vmem:[#allocation2 + $0x8] sm:$0x1] %v1162_v52  ;;  %v700_v58 = vshll.u32 %v6458_v42, 16  ;;  %v706_v59 = vshrl.u32 %v6459_v43, 16  ;;  %v709_v60 = vshll.u32 %v6459_v43, 16  ;;  %v714_v61 = vshrl.u32 %v6460_v44, 16 }
  0x20   : > { %vm1250_vm10 = vsmask.f32 3328  ;;  %vm1251_vm11 = vsmask.f32 7440  ;;  %v691_v62 = vrot.slane %v689_v53, 7  ;;  %v699_v63 = vrot.slane %v697_v55, 7 }
  0x21   : > { %v1011_v0 = vld [vmem:[#allocation2 + $0xc] sm:$0xf]  ;;  %v717_v1 = vshll.u32 %v6460_v44, 16  ;;  %v1016_v4 = vld [vmem:[#allocation2 + $0x14] sm:$0x1]  ;;  %v708_v6 = vrot.slane %v706_v59, 7  ;;  %vm7720_vm13 = vmor %vm1250_vm10, %vm1251_vm11 }
  0x22   : > { %v716_v7 = vrot.slane %v714_v61, 7  ;;  %v461_v10 = vsel %vm7600_vm3, 0, %v460_v57  ;;  %v694_v11 = vor.u32 %v692_v54, %v691_v62  ;;  %v695_v12 = vrot.slane %v691_v62, 4  ;;  %v1019_v15 = vld [vmem:[#allocation2 + $0x18] sm:$0xf]  ;;  %s6035_s29 = sshll.u32 %s7520_s21, 5 }
  0x23   : > { %v702_v13 = vor.u32 %v700_v58, %v699_v63  ;;  %v704_v14 = vrot.slane %v699_v63, 4  ;;  %v1023_v16 = vld [vmem:[#allocation2 + $0x20] sm:$0x1]  ;;  %462 = vst [vmem:[#allocation2 + $0x30] sm:$0x1] %v461_v10  ;;  %v711_v17 = vor.u32 %v709_v60, %v708_v6  ;;  %v712_v18 = vrot.slane %v708_v6, 4 }
  0x24   : > { %v719_v19 = vor.u32 %v717_v1, %v716_v7  ;;  %v721_v22 = vrot.slane %v716_v7, 4  ;;  %v1012_v27 = vsel %vm7642_vm9, %v694_v11, %v1011_v0  ;;  %v723_v29 = vshrl.u32 %v6461_v2, 16  ;;  %v1201_v30 = vld [vmem:[#allocation2] sm:$0xf]  ;;  %v1202_v31 = vld [vmem:[#allocation2 + $0x4] sm:$0xf] }
  0x25   : > { %v703_v25 = vsel %vm7626_vm8, %v695_v12, %v702_v13  ;;  %v1017_v28 = vsel %vm7600_vm3, %v704_v14, %v1016_v4  ;;  %1013 = vst [vmem:[#allocation2 + $0xc] sm:$0xf] %v1012_v27  ;;  %v1020_v33 = vsel %vm7642_vm9, %v711_v17, %v1019_v15  ;;  %v726_v36 = vshll.u32 %v6461_v2, 16  ;;  %v516_v46 = vld [vmem:[#allocation2 + $0x38] sm:$0x1]  ;;  %v564_v63 = vld [vmem:[%s7651_s11 + $0x30] sm:$0xff] }
  0x26   : > { %1015 = vst.msk [vmem:[#allocation2 + $0x10] sm:$0xf] %vm1009_vm7, %v703_v25  ;;  %1018 = vst [vmem:[#allocation2 + $0x14] sm:$0x1] %v1017_v28  ;;  %v720_v32 = vsel %vm7626_vm8, %v712_v18, %v719_v19  ;;  %v1024_v35 = vsel %vm7600_vm3, %v721_v22, %v1023_v16  ;;  %v1203_v38 = vld [vmem:[#allocation2 + $0x8] sm:$0x1]  ;;  %v7737_v18 = vpack.c.bf16 %v564_v63, %v564_v63 }
  0x27   : > { %v1254_v39 = vshrl.u32 %v1201_v30, 16  ;;  %v1257_v40 = vshll.u32 %v1201_v30, 16  ;;  %v1263_v41 = vshll.u32 %v1202_v31, 16  ;;  %v1267_v42 = vshrl.u32 %v1202_v31, 16  ;;  %1021 = vst [vmem:[#allocation2 + $0x18] sm:$0xf] %v1020_v33 }
  0x28   : > { %1022 = vst.msk [vmem:[#allocation2 + $0x1c] sm:$0xf] %vm1009_vm7, %v720_v32  ;;  %1025 = vst [vmem:[#allocation2 + $0x20] sm:$0x1] %v1024_v35  ;;  %v1273_v43 = vshll.u32 %v1203_v38, 16  ;;  %v7702_v44 = vrot.slane %v723_v29, 7 }
  0x29   : > { %v731_v45 = vshrl.u32 %v7684_v9, 16  ;;  %v1256_v47 = vrot.slane %v1254_v39, 4  ;;  %v1259_v48 = vrot.slane %v1257_v40, 5  ;;  %v1265_v49 = vrot.slane %v1263_v41, 5  ;;  %v1026_v51 = vld [vmem:[#allocation2 + $0x24] sm:$0xf] }
  0x2a   : > { %v1269_v50 = vrot.slane %v1267_v42, 4  ;;  %v7707_v52 = vsel %vm1736_vm0, %v7622_v20, 0  ;;  %v7711_v53 = vsel %vm1736_vm0, %v7638_v23, 0  ;;  %v728_v54 = vor.u32 %v726_v36, %v7702_v44  ;;  %v565_v0 = vld [vmem:[%s7651_s11 + $0x38] sm:$0xff]  ;;  %v566_v63 = vld [vmem:[%s7651_s11 + $0x40] sm:$0xff]  ;;  %p426_p5 = scmp.lt.s32.totalorder %s6035_s29, 63 }
  0x2b   : > { %v7714_v55 = vrot.slane %v731_v45, 7  ;;  %v1260_v56 = vor.u32 %v1259_v48, %v1256_v47  ;;  %v1275_v58 = vrot.slane %v1273_v43, 5  ;;  %v517_v59 = vsel %vm7607_vm5, 0, %v516_v46  ;;  %s6037_s9 = sshll.u32 %s7615_s27, 3 }
  0x2c   : > { %v1270_v57 = vor.u32 %v1269_v50, %v1265_v49  ;;  %v729_v20 = vrot.slane %v7702_v44, 4  ;;  %v734_v23 = vshll.u32 %v7684_v9, 16  ;;  %v1027_v62 = vsel %vm7642_vm9, %v728_v54, %v1026_v51  ;;  %518 = vst [vmem:[#allocation2 + $0x38] sm:$0x1] %v517_v59  ;;  %v1204_v4 = vld [vmem:[#allocation2 + $0xc] sm:$0xf]  ;;  %s436_s12 = scalar_lea.vmem %s9644_s5, %s6037_s9  ;;  %s442_s15 = scalar_lea.vmem %s9645_s6, %s6037_s9 }
  0x2d   : > { %v738_v61 = vrot.slane %v7714_v55, 4  ;;  %v1261_v1 = vrot.slane %v1260_v56, 4  ;;  %v1205_v6 = vld [vmem:[#allocation2 + $0x10] sm:$0xf]  ;;  %1028 = vst [vmem:[#allocation2 + $0x24] sm:$0xf] %v1027_v62  ;;  %v7745_v32 = vpack.c.bf16 %v565_v0, %v565_v0 }
  0x2e   : > { %v1271_v2 = vrot.slane %v1270_v57, 4  ;;  %v1206_v7 = vld [vmem:[#allocation2 + $0x14] sm:$0x1]  ;;  %v1278_v10 = vshrl.u32 %v1204_v4, 16  ;;  %v1281_v11 = vshll.u32 %v1204_v4, 16  ;;  %v1287_v12 = vshll.u32 %v1205_v6, 16 }
  0x2f   : > { %v1291_v13 = vshrl.u32 %v1205_v6, 16  ;;  %v1266_v9 = vsel %vm7720_vm13, %v1261_v1, %v1265_v49  ;;  %v1297_v15 = vshll.u32 %v1206_v7, 16  ;;  %v7735_v16 = vld [vmem:[#allocation2 + $0xc] sm:$0xf]  ;;  %v2619_v17 = vld [vmem:[#allocation2 + $0x10] sm:$0xf]  ;;  %v7743_v31 = vor.u32 %v734_v23, %v7714_v55 }
  0x30   : > { %v1276_v14 = vsel %vm7720_vm13, %v1271_v2, %v1275_v58  ;;  %v1280_v22 = vrot.slane %v1278_v10, 4  ;;  %v1283_v25 = vrot.slane %v1281_v11, 5  ;;  %v1289_v27 = vrot.slane %v1287_v12, 5  ;;  %v7739_v28 = vld [vmem:[#allocation2 + $0x14] sm:$0x1]  ;;  %s9786_s29 = smov (!%p426_p5, %s6035_s29), 63 }
  0x31   : > { %v6076_v19 = vcombine.low %v1266_v9, %v1276_v14  ;;  %v1293_v29 = vrot.slane %v1291_v13, 4  ;;  %v2993_v30 = vshrl.u32 %v7735_v16, 16  ;;  %v2996_v35 = vshll.u32 %v7735_v16, 16  ;;  %v7749_v39 = vld [vmem:[#allocation2 + $0x18] sm:$0xf]  ;;  %s6036_s30 = sshll.u32 %s9786_s29, 2 }
  0x32   : > { %v1284_v33 = vor.u32 %v1283_v25, %v1280_v22  ;;  %v3002_v36 = vshll.u32 %v2619_v17, 16  ;;  %v3006_v38 = vshrl.u32 %v2619_v17, 16  ;;  %v1299_v41 = vrot.slane %v1297_v15, 5  ;;  %v7752_v45 = vld [vmem:[#allocation2 + $0x1c] sm:$0xf]  ;;  %s9600_s8 = scalar_lea.vmem %s9643_s4, %s6036_s30 }
  0x33   : > { %6771 = vmatprep.mubr.msk.bf16.mxu1 %vm1687_vm12, %v6076_v19  ;;  %v1294_v40 = vor.u32 %v1293_v29, %v1289_v27  ;;  %v2995_v42 = vrot.slane %v2993_v30, 4  ;;  %v3012_v43 = vshll.u32 %v7739_v28, 16  ;;  %v2998_v47 = vrot.slane %v2996_v35, 5  ;;  %v7758_v23 = vld [vmem:[#allocation2 + $0x20] sm:$0x1] }
  0x34   : > { %v1285_v46 = vrot.slane %v1284_v33, 4  ;;  %v3004_v48 = vrot.slane %v3002_v36, 5  ;;  %v3008_v49 = vrot.slane %v3006_v38, 4  ;;  %v3017_v54 = vshrl.u32 %v7749_v39, 16  ;;  %v1207_v6 = vld [vmem:[#allocation2 + $0x18] sm:$0xf] }
  0x35   : > { %v1295_v50 = vrot.slane %v1294_v40, 4  ;;  %v3014_v51 = vrot.slane %v3012_v43, 5  ;;  %v3020_v56 = vshll.u32 %v7749_v39, 16  ;;  %v2999_v58 = vor.u32 %v2998_v47, %v2995_v42  ;;  %v1208_v15 = vld [vmem:[#allocation2 + $0x1c] sm:$0xf] }
  0x36   : > { %v1290_v57 = vsel %vm7720_vm13, %v1285_v46, %v1289_v27  ;;  %v3009_v59 = vor.u32 %v3008_v49, %v3004_v48  ;;  %v3026_v62 = vshll.u32 %v7752_v45, 16  ;;  %v3019_v1 = vrot.slane %v3017_v54, 4  ;;  %v1209_v27 = vld [vmem:[#allocation2 + $0x20] sm:$0x1]  ;;  %v1030_v38 = vld [vmem:[#allocation2 + $0x2c] sm:$0x1] }
  0x37   : > { %v1300_v0 = vsel %vm7720_vm13, %v1295_v50, %v1299_v41  ;;  %v3022_v2 = vrot.slane %v3020_v56, 5  ;;  %v3030_v4 = vshrl.u32 %v7752_v45, 16  ;;  %v3000_v10 = vrot.slane %v2999_v58, 4  ;;  %v1210_v46 = vld [vmem:[#allocation2 + $0x24] sm:$0xf] }
  0x38   : > { %v6077_v7 = vcombine.low %v1290_v57, %v1300_v0  ;;  %v3010_v11 = vrot.slane %v3009_v59, 4  ;;  %v3028_v12 = vrot.slane %v3026_v62, 5  ;;  %v3036_v14 = vshll.u32 %v7758_v23, 16  ;;  %v2624_v50 = vld [vmem:[#allocation2 + $0x24] sm:$0xf] }
  0x39   : > { %v3023_v13 = vor.u32 %v3022_v2, %v3019_v1  ;;  %v3032_v9 = vrot.slane %v3030_v4, 4  ;;  %v7766_v17 = vpack.c.bf16 %v566_v63, %v566_v63  ;;  %v3005_v19 = vsel %vm7720_vm13, %v3000_v10, %v3004_v48  ;;  %v463_v1 = vld [vmem:[#allocation2 + $0x3c] sm:$0x1] }
  0x3a   : > { %6772 = vmatmul.mubr.msk.bf16.vlgmr.msra.gmra.mrb[0].mxu1 %vm1687_vm12, %v6077_v7  ;;  %v3015_v22 = vsel %vm7720_vm13, %v3010_v11, %v3014_v51  ;;  %v1302_v29 = vshrl.u32 %v1207_v6, 16  ;;  %v3038_v36 = vrot.slane %v3036_v14, 5  ;;  %v1305_v41 = vshll.u32 %v1207_v6, 16 }
  0x3b   : > { %v6223_v30 = vcombine.low %v3005_v19, %v3015_v22  ;;  %6804 = vmatpush3.bf16.msra.mxu1 %v7707_v52  ;;  %v3024_v33 = vrot.slane %v3023_v13, 4  ;;  %v3033_v35 = vor.u32 %v3032_v9, %v3028_v12  ;;  %v1311_v42 = vshll.u32 %v1208_v15, 16  ;;  %v567_v19 = vld [vmem:[%s7651_s11 + $0x48] sm:$0xff]  ;;  %v568_v22 = vld [vmem:[%s7651_s11 + $0x50] sm:$0xff] }
  0x3c   : > { %v1304_v40 = vrot.slane %v1302_v29, 4  ;;  %v1315_v43 = vshrl.u32 %v1208_v15, 16  ;;  %v1321_v49 = vshll.u32 %v1209_v27, 16  ;;  %v737_v52 = vsel %vm7626_vm8, %v729_v20, %v7743_v31 }
  0x3d   : > { %6907 = vmatprep.mubr.msk.bf16.mxu0 %vm1687_vm12, %v6223_v30  ;;  %v3029_v47 = vsel %vm7720_vm13, %v3024_v33, %v3028_v12  ;;  %v3034_v48 = vrot.slane %v3033_v35, 4  ;;  %v1307_v51 = vrot.slane %v1305_v41, 5  ;;  %v1313_v54 = vrot.slane %v1311_v42, 5  ;;  %1029 = vst.msk [vmem:[#allocation2 + $0x28] sm:$0xf] %vm1009_vm7, %v737_v52 }
  0x3e   : > { %v1317_v56 = vrot.slane %v1315_v43, 4  ;;  %v1031_v57 = vsel %vm7600_vm3, %v738_v61, %v1030_v38  ;;  %v1323_v59 = vrot.slane %v1321_v49, 5  ;;  %v1326_v44 = vshrl.u32 %v1210_v46, 16  ;;  %v7794_v61 = vld [vmem:[%s9642_s3 + $0xc] sm:$0x3] }
  0x3f   : > { %v3039_v58 = vsel %vm7720_vm13, %v3034_v48, %v3038_v36  ;;  %1032 = vst [vmem:[#allocation2 + $0x2c] sm:$0x1] %v1031_v57  ;;  %v1329_v62 = vshll.u32 %v1210_v46, 16  ;;  %v1308_v20 = vor.u32 %v1307_v51, %v1304_v40  ;;  %v3041_v0 = vshrl.u32 %v2624_v50, 16  ;;  %v1033_v51 = vld [vmem:[#allocation2 + $0x30] sm:$0xf] }
  0x40   : > { %v6224_v63 = vcombine.low %v3029_v47, %v3039_v58  ;;  %v1318_v31 = vor.u32 %v1317_v56, %v1313_v54  ;;  %v1328_v2 = vrot.slane %v1326_v44, 4  ;;  %v3044_v55 = vshll.u32 %v2624_v50, 16 }
  0x41   : > { %v1331_v4 = vrot.slane %v1329_v62, 5  ;;  %v740_v6 = vshrl.u32 %v7737_v18, 16  ;;  %v1309_v7 = vrot.slane %v1308_v20, 4  ;;  %v3043_v11 = vrot.slane %v3041_v0, 4  ;;  %v519_v20 = vld [vmem:[#allocation2 + $0x44] sm:$0x1] }
  0x42   : > { %6908 = vmatmul.mubr.msk.bf16.vlgmr.msra.gmra.mrb[0].mxu0 %vm1687_vm12, %v6224_v63  ;;  %v1319_v10 = vrot.slane %v1318_v31, 4  ;;  %v743_v12 = vshll.u32 %v7737_v18, 16  ;;  %v3046_v9 = vrot.slane %v3044_v55, 5  ;;  %v748_v15 = vshrl.u32 %v7745_v32, 16 }
  0x43   : > { %6940 = vmatpush3.bf16.msra.mxu0 %v7711_v53  ;;  %v1332_v13 = vor.u32 %v1331_v4, %v1328_v2  ;;  %v742_v14 = vrot.slane %v740_v6, 7  ;;  %v1314_v27 = vsel %vm7720_vm13, %v1309_v7, %v1313_v54  ;;  %v751_v30 = vshll.u32 %v7745_v32, 16  ;;  %v1037_v4 = vld [vmem:[#allocation2 + $0x38] sm:$0x1] }
  0x44   : > { %v1324_v29 = vsel %vm7720_vm13, %v1319_v10, %v1323_v59  ;;  %v464_v18 = vsel %vm7600_vm3, 0, %v463_v1  ;;  %7340 = vmatprep.subr.msk.bf16.mxu0 %vm1736_vm0, %v7794_v61  ;;  %v1211_v33 = vld [vmem:[#allocation2 + $0x28] sm:$0xf]  ;;  %v3047_v38 = vor.u32 %v3046_v9, %v3043_v11  ;;  %v6466_v32 = vpack.c.bf16 %v567_v19, %v567_v19 }
  0x45   : > { %v6078_v53 = vcombine.low %v1314_v27, %v1324_v29  ;;  %v1333_v35 = vrot.slane %v1332_v13, 4  ;;  %v7811_v36 = vld [vmem:[#allocation2 + $0x28] sm:$0xf]  ;;  %v745_v40 = vor.u32 %v743_v12, %v742_v14  ;;  %465 = vst [vmem:[#allocation2 + $0x3c] sm:$0x1] %v464_v18  ;;  %v1335_v42 = vshll.u32 %v1211_v33, 16 }
  0x46   : > { %v1212_v41 = vld [vmem:[#allocation2 + $0x2c] sm:$0x1]  ;;  %v1339_v43 = vshrl.u32 %v1211_v33, 16  ;;  %v7815_v47 = vpack.c.bf16 %v568_v22, %v568_v22  ;;  %v3048_v49 = vrot.slane %v3047_v38, 4  ;;  %v3050_v52 = vshll.u32 %v7811_v36, 16 }
  0x47   : > { %v7813_v46 = vld [vmem:[#allocation2 + $0x2c] sm:$0x1]  ;;  %6775 = vmatprep.mubr.msk.bf16.mxu1 %vm1687_vm12, %v6078_v53  ;;  %v1345_v48 = vshll.u32 %v1212_v41, 16  ;;  %v3054_v50 = vshrl.u32 %v7811_v36, 16  ;;  %v1337_v54 = vrot.slane %v1335_v42, 5  ;;  %v746_v58 = vrot.slane %v742_v14, 4 }
  0x48   : > { %v1341_v56 = vrot.slane %v1339_v43, 4  ;;  %v3060_v57 = vshll.u32 %v7813_v46, 16  ;;  %v3052_v44 = vrot.slane %v3050_v52, 5  ;;  %v750_v63 = vrot.slane %v748_v15, 7  ;;  %v466_v11 = vld [vmem:[#allocation2 + $0x48] sm:$0x1] }
  0x49   : > { %v1347_v59 = vrot.slane %v1345_v48, 5  ;;  %v3056_v62 = vrot.slane %v3054_v50, 4  ;;  %v1338_v31 = vsel %vm7720_vm13, %v1333_v35, %v1337_v54  ;;  %v1034_v2 = vsel %vm7642_vm9, %v745_v40, %v1033_v51  ;;  %v522_v15 = vld [vmem:[#allocation2 + $0x50] sm:$0x1]  ;;  %v570_v43 = vld [vmem:[%s7651_s11 + $0x60] sm:$0xff] }
  0x4a   : > { %v1342_v0 = vor.u32 %v1341_v56, %v1337_v54  ;;  %v3062_v1 = vrot.slane %v3060_v57, 5  ;;  %v3053_v55 = vsel %vm7720_vm13, %v3048_v49, %v3052_v44  ;;  %v753_v7 = vor.u32 %v751_v30, %v750_v63  ;;  %1035 = vst [vmem:[#allocation2 + $0x30] sm:$0xf] %v1034_v2  ;;  %v569_v30 = vld [vmem:[%s7651_s11 + $0x58] sm:$0xff]  ;;  %v469_v57 = vld [vmem:[#allocation2 + $0x54] sm:$0x1] }
  0x4b   : > { %v3057_v6 = vor.u32 %v3056_v62, %v3052_v44  ;;  %v755_v10 = vrot.slane %v750_v63, 4  ;;  %v520_v13 = vsel %vm7607_vm5, 0, %v519_v20  ;;  %v757_v9 = vshrl.u32 %v7766_v17, 16 }
  0x4c   : > { %v1343_v12 = vrot.slane %v1342_v0, 4  ;;  %v760_v14 = vshll.u32 %v7766_v17, 16  ;;  %v754_v22 = vsel %vm7626_vm8, %v746_v58, %v753_v7  ;;  %521 = vst [vmem:[#allocation2 + $0x44] sm:$0x1] %v520_v13  ;;  %v765_v29 = vshrl.u32 %v6466_v32, 16  ;;  %v571_v58 = vld [vmem:[%s7651_s11 + $0x68] sm:$0xff] }
  0x4d   : > { %v3058_v19 = vrot.slane %v3057_v6, 4  ;;  %v1038_v27 = vsel %vm7600_vm3, %v755_v10, %v1037_v4  ;;  %1036 = vst.msk [vmem:[#allocation2 + $0x34] sm:$0xf] %vm1009_vm7, %v754_v22  ;;  %v759_v53 = vrot.slane %v757_v9, 7  ;;  %v768_v17 = vshll.u32 %v6466_v32, 16 }
  0x4e   : > { %v1348_v18 = vsel %vm7720_vm13, %v1343_v12, %v1347_v59  ;;  %1039 = vst [vmem:[#allocation2 + $0x38] sm:$0x1] %v1038_v27  ;;  %v467_v33 = vsel %vm7600_vm3, 0, %v466_v11  ;;  %v767_v40 = vrot.slane %v765_v29, 7  ;;  %v1040_v41 = vld [vmem:[#allocation2 + $0x3c] sm:$0xf]  ;;  %v7846_v32 = vpack.c.bf16 %v569_v30, %v569_v30 }
  0x4f   : > { %v6079_v35 = vcombine.low %v1338_v31, %v1348_v18  ;;  %v3063_v38 = vsel %vm7720_vm13, %v3058_v19, %v3062_v1  ;;  %468 = vst [vmem:[#allocation2 + $0x48] sm:$0x1] %v467_v33  ;;  %v523_v42 = vsel %vm7607_vm5, 0, %v522_v15  ;;  %v762_v49 = vor.u32 %v760_v14, %v759_v53 }
  0x50   : > { %v6225_v48 = vcombine.low %v3053_v55, %v3063_v38  ;;  %v763_v52 = vrot.slane %v759_v53, 4  ;;  %524 = vst [vmem:[#allocation2 + $0x50] sm:$0x1] %v523_v42  ;;  %v770_v50 = vor.u32 %v768_v17, %v767_v40  ;;  %v772_v51 = vrot.slane %v767_v40, 4 }
  0x51   : > { %6776 = vmatmul.mubr.msk.bf16.gmra.mrb[4].mxu1 %vm1687_vm12, %v6079_v35  ;;  %v774_v54 = vshrl.u32 %v7815_v47, 16  ;;  %v777_v56 = vshll.u32 %v7815_v47, 16  ;;  %v7853_v59 = vld [vmem:[#allocation2 + $0x30] sm:$0xf]  ;;  %v1041_v62 = vsel %vm7642_vm9, %v762_v49, %v1040_v41  ;;  %v782_v63 = vshrl.u32 %v7846_v32, 16 }
  0x52   : > { %6911 = vmatprep.mubr.msk.bf16.mxu0 %vm1687_vm12, %v6225_v48  ;;  %v1213_v44 = vld [vmem:[#allocation2 + $0x30] sm:$0xf]  ;;  %v785_v20 = vshll.u32 %v7846_v32, 16  ;;  %v7859_v31 = vpack.c.bf16 %v570_v43, %v570_v43  ;;  %v3065_v0 = vshrl.u32 %v7853_v59, 16  ;;  %v3068_v47 = vshll.u32 %v7853_v59, 16 }
  0x53   : > { %v1350_v1 = vshrl.u32 %v1213_v44, 16  ;;  %v1353_v2 = vshll.u32 %v1213_v44, 16  ;;  %1042 = vst [vmem:[#allocation2 + $0x3c] sm:$0xf] %v1041_v62  ;;  %v771_v4 = vsel %vm7626_vm8, %v763_v52, %v770_v50  ;;  %v1044_v55 = vld [vmem:[#allocation2 + $0x44] sm:$0x1]  ;;  %v7878_v15 = vpack.c.bf16 %v571_v58, %v571_v58 }
  0x54   : > { %v7865_v6 = vrot.slane %v774_v54, 7  ;;  %v7867_v7 = vrot.slane %v782_v63, 7  ;;  %v470_v10 = vsel %vm7600_vm3, 0, %v469_v57  ;;  %v7871_v11 = vld [vmem:[#allocation2 + $0x34] sm:$0xf]  ;;  %v3067_v13 = vrot.slane %v3065_v0, 4 }
  0x55   : > { %v7873_v12 = vld [vmem:[#allocation2 + $0x38] sm:$0x1]  ;;  %v3070_v9 = vrot.slane %v3068_v47, 5  ;;  %1043 = vst.msk [vmem:[#allocation2 + $0x40] sm:$0xf] %vm1009_vm7, %v771_v4  ;;  %v1045_v14 = vsel %vm7600_vm3, %v772_v51, %v1044_v55  ;;  %v3074_v19 = vshll.u32 %v7871_v11, 16 }
  0x56   : > { %471 = vst [vmem:[#allocation2 + $0x54] sm:$0x1] %v470_v10  ;;  %v3078_v22 = vshrl.u32 %v7871_v11, 16  ;;  %v3084_v27 = vshll.u32 %v7873_v12, 16  ;;  %v1214_v29 = vld [vmem:[#allocation2 + $0x34] sm:$0xf]  ;;  %v779_v57 = vor.u32 %v777_v56, %v7865_v6  ;;  %v787_v55 = vor.u32 %v785_v20, %v7867_v7 }
  0x57   : > { %v1352_v30 = vrot.slane %v1350_v1, 4  ;;  %1046 = vst [vmem:[#allocation2 + $0x44] sm:$0x1] %v1045_v14  ;;  %v3071_v18 = vor.u32 %v3070_v9, %v3067_v13  ;;  %v1215_v53 = vld [vmem:[#allocation2 + $0x38] sm:$0x1]  ;;  %v1355_v17 = vrot.slane %v1353_v2, 5 }
  0x58   : > { %v1359_v33 = vshll.u32 %v1214_v29, 16  ;;  %v1363_v35 = vshrl.u32 %v1214_v29, 16  ;;  %v3076_v38 = vrot.slane %v3074_v19, 5  ;;  %v3080_v40 = vrot.slane %v3078_v22, 4  ;;  %v1047_v32 = vld [vmem:[#allocation2 + $0x48] sm:$0xf] }
  0x59   : > { %v3086_v41 = vrot.slane %v3084_v27, 5  ;;  %v1369_v42 = vshll.u32 %v1215_v53, 16  ;;  %v3072_v43 = vrot.slane %v3071_v18, 4  ;;  %v1356_v48 = vor.u32 %v1355_v17, %v1352_v30 }
  0x5a   : > { %v1361_v49 = vrot.slane %v1359_v33, 5  ;;  %v1365_v52 = vrot.slane %v1363_v35, 4  ;;  %v3081_v50 = vor.u32 %v3080_v40, %v3076_v38  ;;  %v1216_v54 = vld [vmem:[#allocation2 + $0x3c] sm:$0xf]  ;;  %v780_v58 = vrot.slane %v7865_v6, 4 }
  0x5b   : > { %v1371_v51 = vrot.slane %v1369_v42, 5  ;;  %v3077_v44 = vsel %vm7720_vm13, %v3072_v43, %v3076_v38  ;;  %v1357_v62 = vrot.slane %v1356_v48, 4  ;;  %v1374_v0 = vshrl.u32 %v1216_v54, 16  ;;  %v7887_v4 = vld [vmem:[#allocation2 + $0x3c] sm:$0xf] }
  0x5c   : > { %v1366_v63 = vor.u32 %v1365_v52, %v1361_v49  ;;  %v3082_v47 = vrot.slane %v3081_v50, 4  ;;  %v1217_v1 = vld [vmem:[#allocation2 + $0x40] sm:$0xf]  ;;  %v1377_v2 = vshll.u32 %v1216_v54, 16  ;;  %v1048_v10 = vsel %vm7642_vm9, %v779_v57, %v1047_v32  ;;  %v572_v52 = vld [vmem:[%s7651_s11 + $0x70] sm:$0xff] }
  0x5d   : > { %v1362_v56 = vsel %vm7720_vm13, %v1357_v62, %v1361_v49  ;;  %v1376_v9 = vrot.slane %v1374_v0, 4  ;;  %v1383_v14 = vshll.u32 %v1217_v1, 16  ;;  %1049 = vst [vmem:[#allocation2 + $0x48] sm:$0xf] %v1048_v10  ;;  %v1387_v27 = vshrl.u32 %v1217_v1, 16 }
  0x5e   : > { %v1367_v6 = vrot.slane %v1366_v63, 4  ;;  %v1218_v13 = vld [vmem:[#allocation2 + $0x44] sm:$0x1]  ;;  %v3087_v19 = vsel %vm7720_vm13, %v3082_v47, %v3086_v41  ;;  %v1379_v22 = vrot.slane %v1377_v2, 5  ;;  %v7896_v30 = vld [vmem:[#allocation2 + $0x40] sm:$0xf]  ;;  %v788_v54 = vsel %vm7626_vm8, %v780_v58, %v787_v55 }
  0x5f   : > { %v1393_v29 = vshll.u32 %v1218_v13, 16  ;;  %v6226_v20 = vcombine.low %v3077_v44, %v3087_v19  ;;  %v1385_v53 = vrot.slane %v1383_v14, 5  ;;  %v7900_v17 = vld [vmem:[#allocation2 + $0x44] sm:$0x1]  ;;  %v3089_v33 = vshrl.u32 %v7887_v4, 16 }
  0x60   : > { %v1372_v18 = vsel %vm7720_vm13, %v1367_v6, %v1371_v51  ;;  %v1380_v38 = vor.u32 %v1379_v22, %v1376_v9  ;;  %v1389_v40 = vrot.slane %v1387_v27, 4  ;;  %v3092_v43 = vshll.u32 %v7887_v4, 16  ;;  %v1051_v57 = vld [vmem:[#allocation2 + $0x50] sm:$0x1]  ;;  %1050 = vst.msk [vmem:[#allocation2 + $0x4c] sm:$0xf] %vm1009_vm7, %v788_v54 }
  0x61   : > { %v6080_v35 = vcombine.low %v1362_v56, %v1372_v18  ;;  %v1395_v42 = vrot.slane %v1393_v29, 5  ;;  %6912 = vmatmul.mubr.msk.bf16.gmra.mrb[4].mxu0 %vm1687_vm12, %v6226_v20  ;;  %v3091_v41 = vrot.slane %v3089_v33, 4  ;;  %v3098_v48 = vshll.u32 %v7896_v30, 16  ;;  %v6156_v14 = vld [vmem:[%s9642_s3 + $0x4] sm:$0x3] }
  0x62   : > { %v3102_v49 = vshrl.u32 %v7896_v30, 16  ;;  %v1381_v32 = vrot.slane %v1380_v38, 4  ;;  %v1390_v50 = vor.u32 %v1389_v40, %v1385_v53  ;;  %v3108_v51 = vshll.u32 %v7900_v17, 16  ;;  %7335 = vmatprep.subr.msk.bf16.mxu1 %vm1736_vm0, %v6156_v14 }
  0x63   : > { %6779 = vmatprep.mubr.msk.bf16.mxu1 %vm1687_vm12, %v6080_v35  ;;  %v3094_v44 = vrot.slane %v3092_v43, 5  ;;  %v3100_v62 = vrot.slane %v3098_v48, 5  ;;  %v789_v0 = vrot.slane %v7867_v7, 4  ;;  %v7918_v6 = vpack.c.bf16 %v572_v52, %v572_v52  ;;  %v525_v7 = vld [vmem:[#allocation2 + $0x5c] sm:$0x1] }
  0x64   : > { %v3104_v63 = vrot.slane %v3102_v49, 4  ;;  %v1386_v47 = vsel %vm7720_vm13, %v1381_v32, %v1385_v53  ;;  %v1391_v1 = vrot.slane %v1390_v50, 4  ;;  %v3110_v2 = vrot.slane %v3108_v51, 5  ;;  %v7916_v10 = vld [vmem:[#allocation2 + $0x48] sm:$0xf]  ;;  %v573_v52 = vld [vmem:[%s7651_s11 + $0x78] sm:$0xff] }
  0x65   : > { %v1219_v56 = vld [vmem:[#allocation2 + $0x48] sm:$0xf]  ;;  %v3095_v13 = vor.u32 %v3094_v44, %v3091_v41  ;;  %v1052_v55 = vsel %vm7600_vm3, %v789_v0, %v1051_v57  ;;  %v3113_v9 = vshrl.u32 %v7916_v10, 16  ;;  %v3116_v22 = vshll.u32 %v7916_v10, 16 }
  0x66   : > { %v3105_v58 = vor.u32 %v3104_v63, %v3100_v62  ;;  %v1396_v19 = vsel %vm7720_vm13, %v1391_v1, %v1395_v42  ;;  %1053 = vst [vmem:[#allocation2 + $0x50] sm:$0x1] %v1052_v55  ;;  %v1398_v27 = vshrl.u32 %v1219_v56, 16  ;;  %v1401_v29 = vshll.u32 %v1219_v56, 16  ;;  %v574_v63 = vld [vmem:[%s7651_s11 + $0x80] sm:$0xff] }
  0x67   : > { %v6081_v20 = vcombine.low %v1386_v47, %v1396_v19  ;;  %v3096_v18 = vrot.slane %v3095_v13, 4  ;;  %v3115_v33 = vrot.slane %v3113_v9, 4  ;;  %v3118_v35 = vrot.slane %v3116_v22, 5  ;;  %v7940_v50 = vld [vmem:[#allocation2 + $0x4c] sm:$0xf] }
  0x68   : > { %v3106_v53 = vrot.slane %v3105_v58, 4  ;;  %v1400_v38 = vrot.slane %v1398_v27, 4  ;;  %v1403_v40 = vrot.slane %v1401_v29, 5  ;;  %v526_v41 = vsel %vm7607_vm5, 0, %v525_v7  ;;  %v1220_v54 = vld [vmem:[#allocation2 + $0x4c] sm:$0xf] }
  0x69   : > { %6780 = vmatmul.mubr.msk.bf16.gmra.mrb[8].mxu1 %vm1687_vm12, %v6081_v20  ;;  %v3101_v42 = vsel %vm7720_vm13, %v3096_v18, %v3100_v62  ;;  %527 = vst [vmem:[#allocation2 + $0x5c] sm:$0x1] %v526_v41  ;;  %v791_v48 = vshrl.u32 %v7859_v31, 16  ;;  %v794_v49 = vshll.u32 %v7859_v31, 16  ;;  %v3119_v51 = vor.u32 %v3118_v35, %v3115_v33  ;;  %v1054_v18 = vld [vmem:[#allocation2 + $0x54] sm:$0xf] }
  0x6a   : > { %v3111_v43 = vsel %vm7720_vm13, %v3106_v53, %v3110_v2  ;;  %v1404_v57 = vor.u32 %v1403_v40, %v1400_v38  ;;  %v799_v44 = vshrl.u32 %v7878_v15, 16  ;;  %v3122_v62 = vshll.u32 %v7940_v50, 16  ;;  %v472_v40 = vld [vmem:[#allocation2 + $0x60] sm:$0x1]  ;;  %v528_v41 = vld [vmem:[#allocation2 + $0x68] sm:$0x1] }
  0x6b   : > { %v6227_v32 = vcombine.low %v3101_v42, %v3111_v43  ;;  %v3126_v0 = vshrl.u32 %v7940_v50, 16  ;;  %v1407_v47 = vshll.u32 %v1220_v54, 16  ;;  %v1411_v1 = vshrl.u32 %v1220_v54, 16 }
  0x6c   : > { %v3120_v2 = vrot.slane %v3119_v51, 4  ;;  %v1405_v31 = vrot.slane %v1404_v57, 4  ;;  %v793_v56 = vrot.slane %v791_v48, 7  ;;  %v801_v13 = vrot.slane %v799_v44, 7 }
  0x6d   : > { %6915 = vmatprep.mubr.msk.bf16.mxu0 %vm1687_vm12, %v6227_v32  ;;  %v7947_v58 = vld [vmem:[#allocation2 + $0x50] sm:$0x1]  ;;  %v3124_v55 = vrot.slane %v3122_v62, 5  ;;  %v3128_v9 = vrot.slane %v3126_v0, 4  ;;  %v6472_v14 = vpack.c.bf16 %v573_v52, %v573_v52  ;;  %v7949_v19 = vpack.c.bf16 %v574_v63, %v574_v63 }
  0x6e   : > { %v1221_v7 = vld [vmem:[#allocation2 + $0x50] sm:$0x1]  ;;  %v3132_v22 = vshll.u32 %v7947_v58, 16  ;;  %v1409_v27 = vrot.slane %v1407_v47, 5  ;;  %v1413_v29 = vrot.slane %v1411_v1, 4  ;;  %v796_v35 = vor.u32 %v794_v49, %v793_v56 }
  0x6f   : > { %v1417_v20 = vshll.u32 %v1221_v7, 16  ;;  %v3125_v53 = vsel %vm7720_vm13, %v3120_v2, %v3124_v55  ;;  %v3129_v33 = vor.u32 %v3128_v9, %v3124_v55  ;;  %v797_v38 = vrot.slane %v793_v56, 4  ;;  %v475_v47 = vld [vmem:[#allocation2 + $0x6c] sm:$0x1]  ;;  %v531_v56 = vld [vmem:[#allocation2 + $0x74] sm:$0x1] }
  0x70   : > { %v3134_v42 = vrot.slane %v3132_v22, 5  ;;  %v1410_v43 = vsel %vm7720_vm13, %v1405_v31, %v1409_v27  ;;  %v1414_v48 = vor.u32 %v1413_v29, %v1409_v27  ;;  %v1058_v32 = vld [vmem:[#allocation2 + $0x5c] sm:$0x1]  ;;  %v802_v54 = vshll.u32 %v7878_v15, 16  ;;  %v575_v27 = vld [vmem:[%s7651_s11 + $0x88] sm:$0xff] }
  0x71   : > { %v1419_v52 = vrot.slane %v1417_v20, 5  ;;  %v3130_v51 = vrot.slane %v3129_v33, 4  ;;  %v806_v57 = vrot.slane %v801_v13, 4  ;;  %v1055_v44 = vsel %vm7642_vm9, %v796_v35, %v1054_v18 }
  0x72   : > { %v1415_v63 = vrot.slane %v1414_v48, 4  ;;  %1056 = vst [vmem:[#allocation2 + $0x54] sm:$0xf] %v1055_v44  ;;  %v473_v49 = vsel %vm7600_vm3, 0, %v472_v40  ;;  %v529_v62 = vsel %vm7607_vm5, 0, %v528_v41  ;;  %v808_v0 = vshrl.u32 %v7918_v6, 16 }
  0x73   : > { %v3135_v1 = vsel %vm7720_vm13, %v3130_v51, %v3134_v42  ;;  %v804_v15 = vor.u32 %v802_v54, %v801_v13  ;;  %v1059_v2 = vsel %vm7600_vm3, %v806_v57, %v1058_v32  ;;  %474 = vst [vmem:[#allocation2 + $0x60] sm:$0x1] %v473_v49  ;;  %530 = vst [vmem:[#allocation2 + $0x68] sm:$0x1] %v529_v62  ;;  %v811_v31 = vshll.u32 %v7918_v6, 16  ;;  %v576_v40 = vld [vmem:[%s7651_s11 + $0x90] sm:$0xff] }
  0x74   : > { %v6228_v55 = vcombine.low %v3125_v53, %v3135_v1  ;;  %v1420_v9 = vsel %vm7720_vm13, %v1415_v63, %v1419_v52  ;;  %1060 = vst [vmem:[#allocation2 + $0x5c] sm:$0x1] %v1059_v2  ;;  %v810_v7 = vrot.slane %v808_v0, 7  ;;  %v816_v22 = vshrl.u32 %v6472_v14, 16  ;;  %v578_v54 = vld [vmem:[%s7651_s11 + $0xa0] sm:$0xff]  ;;  %v579_v57 = vld [vmem:[%s7651_s11 + $0xa8] sm:$0xff] }
  0x75   : > { %v6082_v29 = vcombine.low %v1410_v43, %v1420_v9  ;;  %v805_v13 = vsel %vm7626_vm8, %v797_v38, %v804_v15  ;;  %v819_v20 = vshll.u32 %v6472_v14, 16  ;;  %v476_v18 = vsel %vm7600_vm3, 0, %v475_v47  ;;  %v577_v38 = vld [vmem:[%s7651_s11 + $0x98] sm:$0xff] }
  0x76   : > { %6916 = vmatmul.mubr.msk.bf16.gmra.mrb[8].mxu0 %vm1687_vm12, %v6228_v55  ;;  %1057 = vst.msk [vmem:[#allocation2 + $0x58] sm:$0xf] %vm1009_vm7, %v805_v13  ;;  %v813_v53 = vor.u32 %v811_v31, %v810_v7  ;;  %v818_v33 = vrot.slane %v816_v22, 7  ;;  %477 = vst [vmem:[#allocation2 + $0x6c] sm:$0x1] %v476_v18  ;;  %v532_v35 = vsel %vm7607_vm5, 0, %v531_v56  ;;  %v7984_v41 = vpack.c.bf16 %v575_v27, %v575_v27 }
  0x77   : > { %6783 = vmatprep.mubr.msk.bf16.mxu1 %vm1687_vm12, %v6082_v29  ;;  %v814_v14 = vrot.slane %v810_v7, 4  ;;  %533 = vst [vmem:[#allocation2 + $0x74] sm:$0x1] %v532_v35  ;;  %v825_v42 = vshrl.u32 %v7949_v19, 16  ;;  %v828_v43 = vshll.u32 %v7949_v19, 16  ;;  %v7997_v0 = vpack.c.bf16 %v576_v40, %v576_v40 }
  0x78   : > { %v821_v52 = vor.u32 %v819_v20, %v818_v33  ;;  %v823_v32 = vrot.slane %v818_v33, 4  ;;  %v833_v62 = vshrl.u32 %v7984_v41, 16  ;;  %v7999_v47 = vpack.c.bf16 %v577_v38, %v577_v38 }
  0x79   : > { %v1222_v44 = vld [vmem:[#allocation2 + $0x54] sm:$0xf]  ;;  %v7994_v49 = vrot.slane %v825_v42, 7  ;;  %v8010_v29 = vpack.c.bf16 %v578_v54, %v578_v54  ;;  %v8018_v42 = vpack.c.bf16 %v579_v57, %v579_v57  ;;  %vm2209_vm14 = vcmask 1042432  }
  0x7a   : > { %v7992_v63 = vld [vmem:[#allocation2 + $0x54] sm:$0xf]  ;;  %v1422_v19 = vshrl.u32 %v1222_v44, 16  ;;  %v1425_v1 = vshll.u32 %v1222_v44, 16  ;;  %v1061_v31 = vld [vmem:[#allocation2 + $0x60] sm:$0xf]  ;;  %v822_v9 = vsel %vm7626_vm8, %v814_v14, %v821_v52 }
  0x7b   : > { %v3137_v15 = vshrl.u32 %v7992_v63, 16  ;;  %v3140_v2 = vshll.u32 %v7992_v63, 16  ;;  %v1224_v56 = vld [vmem:[#allocation2 + $0x5c] sm:$0x1]  ;;  %v1062_v7 = vsel %vm7642_vm9, %v813_v53, %v1061_v31  ;;  %v1065_v22 = vld [vmem:[#allocation2 + $0x68] sm:$0x1]  ;;  %v830_v27 = vor.u32 %v828_v43, %v7994_v49 }
  0x7c   : > { %v8003_v55 = vld [vmem:[#allocation2 + $0x5c] sm:$0x1]  ;;  %v1424_v13 = vrot.slane %v1422_v19, 4  ;;  %v1427_v20 = vrot.slane %v1425_v1, 5  ;;  %v1441_v18 = vshll.u32 %v1224_v56, 16  ;;  %v1066_v53 = vsel %vm7600_vm3, %v823_v32, %v1065_v22 }
  0x7d   : > { %v3139_v33 = vrot.slane %v3137_v15, 4  ;;  %1063 = vst [vmem:[#allocation2 + $0x60] sm:$0xf] %v1062_v7  ;;  %1064 = vst.msk [vmem:[#allocation2 + $0x64] sm:$0xf] %vm1009_vm7, %v822_v9  ;;  %v3142_v38 = vrot.slane %v3140_v2, 5 }
  0x7e   : > { %v1223_v35 = vld [vmem:[#allocation2 + $0x58] sm:$0xf]  ;;  %v3156_v14 = vshll.u32 %v8003_v55, 16  ;;  %v1428_v43 = vor.u32 %v1427_v20, %v1424_v13  ;;  %v1443_v44 = vrot.slane %v1441_v18, 5  ;;  %1067 = vst [vmem:[#allocation2 + $0x68] sm:$0x1] %v1066_v53 }
  0x7f   : > { %v8013_v40 = vld [vmem:[#allocation2 + $0x58] sm:$0xf]  ;;  %v1431_v52 = vshll.u32 %v1223_v35, 16  ;;  %v1435_v54 = vshrl.u32 %v1223_v35, 16  ;;  %v3143_v19 = vor.u32 %v3142_v38, %v3139_v33  ;;  %v1068_v31 = vld [vmem:[#allocation2 + $0x6c] sm:$0xf] }
  0x80   : > { %v3146_v1 = vshll.u32 %v8013_v40, 16  ;;  %v3150_v15 = vshrl.u32 %v8013_v40, 16  ;;  %v3158_v2 = vrot.slane %v3156_v14, 5  ;;  %v1429_v56 = vrot.slane %v1428_v43, 4  ;;  %v580_v7 = vld [vmem:[%s7651_s11 + $0xb0] sm:$0xff]  ;;  %v581_v22 = vld [vmem:[%s7651_s11 + $0xb8] sm:$0xff] }
  0x81   : > { %v1433_v9 = vrot.slane %v1431_v52, 5  ;;  %v1437_v32 = vrot.slane %v1435_v54, 4  ;;  %v831_v57 = vrot.slane %v7994_v49, 4  ;;  %v3144_v13 = vrot.slane %v3143_v19, 4  ;;  %v582_v43 = vld [vmem:[%s7651_s11 + $0xc0] sm:$0xff] }
  0x82   : > { %v3148_v20 = vrot.slane %v3146_v1, 5  ;;  %v3152_v35 = vrot.slane %v3150_v15, 4  ;;  %v8025_v18 = vrot.slane %v833_v62, 7  ;;  %v836_v14 = vshll.u32 %v7984_v41, 16 }
  0x83   : > { %v1434_v33 = vsel %vm7720_vm13, %v1429_v56, %v1433_v9  ;;  %v1438_v38 = vor.u32 %v1437_v32, %v1433_v9  ;;  %v1069_v53 = vsel %vm7642_vm9, %v830_v27, %v1068_v31  ;;  %vm2210_vm15 = vcmask 1046532  }
  0x84   : > { %v3149_v49 = vsel %vm7720_vm13, %v3144_v13, %v3148_v20  ;;  %v3153_v52 = vor.u32 %v3152_v35, %v3148_v20  ;;  %v8035_v54 = vld [vmem:[#allocation2 + $0x60] sm:$0xf]  ;;  %v8037_v62 = vld [vmem:[#allocation2 + $0x64] sm:$0xf]  ;;  %1070 = vst [vmem:[#allocation2 + $0x6c] sm:$0xf] %v1069_v53  ;;  %v8039_v19 = vpack.c.bf16 %v580_v7, %v580_v7  ;;  %v8041_v1 = vpack.c.bf16 %v581_v22, %v581_v22  ;;  %vm8069_vm1 = vmor %vm2209_vm14, %vm2210_vm15 }
  0x85   : > { %v1439_v41 = vrot.slane %v1438_v38, 4  ;;  %v3161_v15 = vshrl.u32 %v8035_v54, 16  ;;  %v3164_v27 = vshll.u32 %v8035_v54, 16  ;;  %v3170_v31 = vshll.u32 %v8037_v62, 16  ;;  %v8046_v9 = vld [vmem:[#allocation2 + $0x68] sm:$0x1] }
  0x86   : > { %v3154_v56 = vrot.slane %v3153_v52, 4  ;;  %9685 = vst [vmem:[#allocation8_spill] sm:$0xff] %v8046_v9  ;;  %v3174_v32 = vshrl.u32 %v8037_v62, 16  ;;  %v1225_v13 = vld [vmem:[#allocation2 + $0x60] sm:$0xf]  ;;  %v838_v20 = vor.u32 %v836_v14, %v8025_v18  ;;  %v8050_v35 = vpack.c.bf16 %v582_v43, %v582_v43 }
  0x87   : > { %v1444_v7 = vsel %vm7720_vm13, %v1439_v41, %v1443_v44  ;;  %v3163_v22 = vrot.slane %v3161_v15, 4  ;;  %v3166_v38 = vrot.slane %v3164_v27, 5  ;;  %v3172_v53 = vrot.slane %v3170_v31, 5  ;;  %v1226_v37 = vld [vmem:[#allocation2 + $0x64] sm:$0xf] }
  0x88   : > { %v6083_v48 = vcombine.low %v1434_v33, %v1444_v7  ;;  %v3159_v52 = vsel %vm7720_vm13, %v3154_v56, %v3158_v2  ;;  %v3176_v25 = vrot.slane %v3174_v32, 4  ;;  %v3180_v6 = vshll.u32 %v8046_v9, 16  ;;  %v1227_v51 = vld [vmem:[#allocation2 + $0x68] sm:$0x1] }
  0x89   : > { %v6229_v3 = vcombine.low %v3149_v49, %v3159_v52  ;;  %v3167_v26 = vor.u32 %v3166_v38, %v3163_v22  ;;  %v1446_v14 = vshrl.u32 %v1225_v13, 16  ;;  %v1449_v43 = vshll.u32 %v1225_v13, 16  ;;  %v1072_v13 = vld [vmem:[#allocation2 + $0x74] sm:$0x1] }
  0x8a   : > { %6784 = vmatmul.mubr.msk.bf16.gmra.mrb[12].mxu1 %vm1687_vm12, %v6083_v48  ;;  %v3177_v34 = vor.u32 %v3176_v25, %v3172_v53  ;;  %v3182_v44 = vrot.slane %v3180_v6, 5  ;;  %v1455_v41 = vshll.u32 %v1226_v37, 16  ;;  %v1459_v15 = vshrl.u32 %v1226_v37, 16 }
  0x8b   : > { %6919 = vmatprep.mubr.msk.bf16.mxu0 %vm1687_vm12, %v6229_v3  ;;  %v3168_v33 = vrot.slane %v3167_v26, 4  ;;  %v1448_v27 = vrot.slane %v1446_v14, 4  ;;  %v1451_v31 = vrot.slane %v1449_v43, 5  ;;  %v1465_v2 = vshll.u32 %v1227_v51, 16  ;;  %v1228_v56 = vld [vmem:[#allocation2 + $0x6c] sm:$0xf] }
  0x8c   : > { %v3178_v32 = vrot.slane %v3177_v34, 4  ;;  %v1457_v7 = vrot.slane %v1455_v41, 5  ;;  %v1461_v9 = vrot.slane %v1459_v15, 4  ;;  %v839_v49 = vsel %vm7626_vm8, %v831_v57, %v838_v20 }
  0x8d   : > { %v3173_v25 = vsel %vm7720_vm13, %v3168_v33, %v3172_v53  ;;  %v1452_v6 = vor.u32 %v1451_v31, %v1448_v27  ;;  %v1467_v48 = vrot.slane %v1465_v2, 5  ;;  %v840_v37 = vrot.slane %v8025_v18, 4  ;;  %1071 = vst.msk [vmem:[#allocation2 + $0x70] sm:$0xf] %vm1009_vm7, %v839_v49  ;;  %v7385_v18 = vld [vmem:[#allocation2 + $0x10] sm:$0xf] }
  0x8e   : > { %v3183_v3 = vsel %vm7720_vm13, %v3178_v32, %v3182_v44  ;;  %v1462_v26 = vor.u32 %v1461_v9, %v1457_v7  ;;  %v1470_v34 = vshrl.u32 %v1228_v56, 16  ;;  %v1473_v51 = vshll.u32 %v1228_v56, 16  ;;  %v478_v44 = vld [vmem:[#allocation2 + $0x78] sm:$0x1]  ;;  %v534_v56 = vld [vmem:[#allocation2 + $0x80] sm:$0x1] }
  0x8f   : > { %v6230_v20 = vcombine.low %v3173_v25, %v3183_v3  ;;  %v1453_v22 = vrot.slane %v1452_v6, 4  ;;  %v1073_v38 = vsel %vm7600_vm3, %v840_v37, %v1072_v13  ;;  %v3688_v53 = vrot.slane %v7385_v18, 5  ;;  %v481_v3 = vld [vmem:[#allocation2 + $0x84] sm:$0x1] }
  0x90   : > { %v1463_v52 = vrot.slane %v1462_v26, 4  ;;  %1074 = vst [vmem:[#allocation2 + $0x74] sm:$0x1] %v1073_v38  ;;  %v1472_v14 = vrot.slane %v1470_v34, 4  ;;  %v1475_v43 = vrot.slane %v1473_v51, 5  ;;  %v6256_v9 = vrot.slane %v7749_v39, 9 }
  0x91   : > { %6920 = vmatmul.mubr.msk.bf16.gmra.mrb[12].mxu0 %vm1687_vm12, %v6230_v20  ;;  %v1458_v41 = vsel %vm7720_vm13, %v1453_v22, %v1457_v7  ;;  %v9688_v15 = vrot.slane %v7735_v16, 9  ;;  %v3690_v27 = vrot.slane %v3688_v53, 4  ;;  %v9689_v31 = vrot.slane %v7752_v45, 5  ;;  %v537_v26 = vld [vmem:[#allocation2 + $0x8c] sm:$0x1] }
  0x92   : > { %v1468_v32 = vsel %vm7720_vm13, %v1463_v52, %v1467_v48  ;;  %v1476_v39 = vor.u32 %v1475_v43, %v1472_v14  ;;  %v4272_v16 = vsel %vm1736_vm0, %v7794_v61, 0  ;;  %v9691_v25 = vrot.slane %v7739_v28, 5 }
  0x93   : > { %v3689_v33 = vsel %vm8069_vm1, %v9688_v15, %v3688_v53  ;;  %v3697_v2 = vrot.slane %v9689_v31, 4  ;;  %v9690_v49 = vmov %v9689_v31  ;;  %v6084_v7 = vcombine.low %v1458_v41, %v1468_v32 }
  0x94   : > { %v3696_v13 = vsel %vm8069_vm1, %v6256_v9, %v9690_v49  ;;  %v3692_v6 = vsel %vm8069_vm1, %v3690_v27, %v9691_v25  ;;  %v9692_v37 = vrot.slane %v7758_v23, 5  ;;  %v479_v45 = vsel %vm7600_vm3, 0, %v478_v44  ;;  %v8103_v34 = vld [vmem:[#allocation2 + $0x70] sm:$0xf] }
  0x95   : > { %v1477_v51 = vrot.slane %v1476_v39, 4  ;;  %v6272_v61 = vcombine.low %v3689_v33, %v3692_v6  ;;  %480 = vst [vmem:[#allocation2 + $0x78] sm:$0x1] %v479_v45  ;;  %v535_v28 = vsel %vm7607_vm5, 0, %v534_v56  ;;  %6787 = vmatprep.mubr.msk.bf16.mxu1 %vm1687_vm12, %v6084_v7  ;;  %v1479_v23 = vshll.u32 %v8103_v34, 16  ;;  %v583_v6 = vld [vmem:[%s7651_s11 + $0xc8] sm:$0xff] }
  0x96   : > { %v3699_v48 = vsel %vm8069_vm1, %v3697_v2, %v9692_v37  ;;  %v1483_v22 = vshrl.u32 %v8103_v34, 16  ;;  %536 = vst [vmem:[#allocation2 + $0x80] sm:$0x1] %v535_v28  ;;  %v842_v38 = vshrl.u32 %v7997_v0, 16  ;;  %v845_v18 = vshll.u32 %v7997_v0, 16 }
  0x97   : > { %v6273_v20 = vcombine.low %v3696_v13, %v3699_v48  ;;  %6941 = vmatprep.mubr.msk.bf16.mxu0 %vm1687_vm12, %v6272_v61  ;;  %v850_v53 = vshrl.u32 %v7999_v47, 16  ;;  %v853_v52 = vshll.u32 %v7999_v47, 16  ;;  %v482_v14 = vsel %vm7600_vm3, 0, %v481_v3  ;;  %v1230_v9 = vld [vmem:[#allocation2 + $0x74] sm:$0x1] }
  0x98   : > { %v538_v43 = vsel %vm7607_vm5, 0, %v537_v26  ;;  %v1481_v44 = vrot.slane %v1479_v23, 5  ;;  %v1485_v41 = vrot.slane %v1483_v22, 4  ;;  %v844_v15 = vrot.slane %v842_v38, 7  ;;  %483 = vst [vmem:[#allocation2 + $0x84] sm:$0x1] %v482_v14 }
  0x99   : > { %539 = vst [vmem:[#allocation2 + $0x8c] sm:$0x1] %v538_v43  ;;  %v859_v0 = vshrl.u32 %v8010_v29, 16  ;;  %v1489_v33 = vshll.u32 %v1230_v9, 16  ;;  %v852_v27 = vrot.slane %v850_v53, 7  ;;  %v862_v31 = vshll.u32 %v8010_v29, 16  ;;  %6942 = vmatmul.mubr.msk.bf16.vlgmr.msra.gmra.mrb[0].mxu0 %vm1687_vm12, %v6273_v20 }
  0x9a   : > { %v867_v47 = vshrl.u32 %v8018_v42, 16  ;;  %v8125_v2 = vld [vmem:[%s9642_s3 + $0xe] sm:$0x3]  ;;  %v1482_v56 = vsel %vm7720_vm13, %v1477_v51, %v1481_v44  ;;  %v1486_v32 = vor.u32 %v1485_v41, %v1481_v44  ;;  %v847_v39 = vor.u32 %v845_v18, %v844_v15  ;;  %6974 = vmatpush3.bf16.msra.mxu0 %v4272_v16  ;;  %v7386_v26 = vld [vmem:[#allocation2 + $0x24] sm:$0xf] }
  0x9b   : > { %v848_v49 = vrot.slane %v844_v15, 4  ;;  %v1491_v13 = vrot.slane %v1489_v33, 5  ;;  %v855_v7 = vor.u32 %v853_v52, %v852_v27  ;;  %v857_v25 = vrot.slane %v852_v27, 4  ;;  %7341 = vmatprep.subr.msk.bf16.mxu0 %vm1736_vm0, %v8125_v2  ;;  %v484_v53 = vld [vmem:[#allocation2 + $0x90] sm:$0x1] }
  0x9c   : > { %v861_v29 = vrot.slane %v859_v0, 7  ;;  %v1487_v37 = vrot.slane %v1486_v32, 4  ;;  %v1075_v48 = vld [vmem:[#allocation2 + $0x78] sm:$0xf]  ;;  %v869_v45 = vrot.slane %v867_v47, 7  ;;  %v870_v3 = vshll.u32 %v8018_v42, 16 }
  0x9d   : > { %v6257_v61 = vrot.slane %v7386_v26, 9  ;;  %v856_v51 = vsel %vm7626_vm8, %v848_v49, %v855_v7  ;;  %v1076_v16 = vsel %vm7642_vm9, %v847_v39, %v1075_v48  ;;  %v1079_v20 = vld [vmem:[#allocation2 + $0x80] sm:$0x1]  ;;  %v540_v52 = vld [vmem:[#allocation2 + $0x98] sm:$0x1]  ;;  %v3702_v44 = vrot.slane %v7811_v36, 5 }
  0x9e   : > { %v864_v28 = vor.u32 %v862_v31, %v861_v29  ;;  %v865_v23 = vrot.slane %v861_v29, 4  ;;  %v1492_v22 = vsel %vm7720_vm13, %v1487_v37, %v1491_v13  ;;  %1077 = vst [vmem:[#allocation2 + $0x78] sm:$0xf] %v1076_v16  ;;  %1078 = vst.msk [vmem:[#allocation2 + $0x7c] sm:$0xf] %vm1009_vm7, %v856_v51  ;;  %v1080_v42 = vsel %vm7600_vm3, %v857_v25, %v1079_v20  ;;  %v584_v25 = vld [vmem:[%s7651_s11 + $0xd0] sm:$0xff] }
  0x9f   : > { %v872_v38 = vor.u32 %v870_v3, %v869_v45  ;;  %v874_v18 = vrot.slane %v869_v45, 4  ;;  %v6085_v14 = vcombine.low %v1482_v56, %v1492_v22  ;;  %1081 = vst [vmem:[#allocation2 + $0x80] sm:$0x1] %v1080_v42  ;;  %v1082_v43 = vld [vmem:[#allocation2 + $0x84] sm:$0xf]  ;;  %v3705_v41 = vrot.slane %v7813_v46, 5 }
  0xa0   : > { %v1086_v9 = vld [vmem:[#allocation2 + $0x8c] sm:$0x1]  ;;  %v8145_v15 = vpack.c.bf16 %v583_v6, %v583_v6  ;;  %v1083_v33 = vsel %vm7642_vm9, %v864_v28, %v1082_v43  ;;  %v6258_v31 = vrot.slane %v7853_v59, 9  ;;  %v487_v47 = vld [vmem:[#allocation2 + $0x9c] sm:$0x1]  ;;  %v3703_v36 = vsel %vm8069_vm1, %v6257_v61, %v3702_v44 }
  0xa1   : > { %v873_v0 = vsel %vm7626_vm8, %v865_v23, %v872_v38  ;;  %v1087_v27 = vsel %vm7600_vm3, %v874_v18, %v1086_v9  ;;  %6788 = vmatmul.mubr.msk.bf16.gmra.mrb[16].mxu1 %vm1687_vm12, %v6085_v14  ;;  %1084 = vst [vmem:[#allocation2 + $0x84] sm:$0xf] %v1083_v33  ;;  %v3704_v46 = vrot.slane %v3702_v44, 4  ;;  %v3709_v56 = vrot.slane %v7871_v11, 5  ;;  %v543_v39 = vld [vmem:[#allocation2 + $0xa4] sm:$0x1] }
  0xa2   : > { %1085 = vst.msk [vmem:[#allocation2 + $0x88] sm:$0xf] %vm1009_vm7, %v873_v0  ;;  %1088 = vst [vmem:[#allocation2 + $0x8c] sm:$0x1] %v1087_v27  ;;  %v3712_v32 = vrot.slane %v7873_v12, 5  ;;  %v485_v59 = vsel %vm7600_vm3, 0, %v484_v53  ;;  %v8184_v28 = vpack.c.bf16 %v584_v25, %v584_v25 }
  0xa3   : > { %v541_v49 = vsel %vm7607_vm5, 0, %v540_v52  ;;  %v876_v13 = vshrl.u32 %v8039_v19, 16  ;;  %v879_v7 = vshll.u32 %v8039_v19, 16  ;;  %v3706_v29 = vsel %vm8069_vm1, %v3704_v46, %v3705_v41  ;;  %486 = vst [vmem:[#allocation2 + $0x90] sm:$0x1] %v485_v59  ;;  %v585_v19 = vld [vmem:[%s7651_s11 + $0xd8] sm:$0xff] }
  0xa4   : > { %v3710_v11 = vsel %vm8069_vm1, %v6258_v31, %v3709_v56  ;;  %v3711_v12 = vrot.slane %v3709_v56, 4  ;;  %542 = vst [vmem:[#allocation2 + $0x98] sm:$0x1] %v541_v49  ;;  %v884_v6 = vshrl.u32 %v8041_v1, 16  ;;  %v6274_v37 = vcombine.low %v3703_v36, %v3706_v29 }
  0xa5   : > { %v878_v48 = vrot.slane %v876_v13, 7  ;;  %v887_v45 = vshll.u32 %v8041_v1, 16  ;;  %v488_v3 = vsel %vm7600_vm3, 0, %v487_v47  ;;  %v8176_v26 = vld [vmem:[#allocation2 + $0x78] sm:$0xf]  ;;  %v544_v20 = vsel %vm7607_vm5, 0, %v543_v39 }
  0xa6   : > { %v8178_v61 = vld [vmem:[#allocation2 + $0x7c] sm:$0xf]  ;;  %v3713_v51 = vsel %vm8069_vm1, %v3711_v12, %v3712_v32  ;;  %v886_v16 = vrot.slane %v884_v6, 7  ;;  %489 = vst [vmem:[#allocation2 + $0x9c] sm:$0x1] %v488_v3  ;;  %v1494_v1 = vshrl.u32 %v8176_v26, 16  ;;  %6945 = vmatprep.mubr.msk.bf16.mxu0 %vm1687_vm12, %v6274_v37  ;;  %v8197_v46 = vpack.c.bf16 %v585_v19, %v585_v19 }
  0xa7   : > { %v1233_v23 = vld [vmem:[#allocation2 + $0x80] sm:$0x1]  ;;  %v1497_v22 = vshll.u32 %v8176_v26, 16  ;;  %v1503_v42 = vshll.u32 %v8178_v61, 16  ;;  %v1507_v38 = vshrl.u32 %v8178_v61, 16  ;;  %v6275_v53 = vcombine.low %v3710_v11, %v3713_v51 }
  0xa8   : > { %545 = vst [vmem:[#allocation2 + $0xa4] sm:$0x1] %v544_v20  ;;  %v1513_v18 = vshll.u32 %v1233_v23, 16  ;;  %v881_v52 = vor.u32 %v879_v7, %v878_v48  ;;  %v882_v14 = vrot.slane %v878_v48, 4  ;;  %v1496_v43 = vrot.slane %v1494_v1, 4 }
  0xa9   : > { %v1499_v9 = vrot.slane %v1497_v22, 5  ;;  %v1505_v44 = vrot.slane %v1503_v42, 5  ;;  %v1509_v41 = vrot.slane %v1507_v38, 4  ;;  %v8191_v0 = vld [vmem:[#allocation2 + $0x84] sm:$0xf]  ;;  %6946 = vmatmul.mubr.msk.bf16.gmra.mrb[4].mxu0 %vm1687_vm12, %v6275_v53  ;;  %v889_v36 = vor.u32 %v887_v45, %v886_v16 }
  0xaa   : > { %v1515_v33 = vrot.slane %v1513_v18, 5  ;;  %v8193_v27 = vld [vmem:[#allocation2 + $0x88] sm:$0xf]  ;;  %v1236_v31 = vld [vmem:[#allocation2 + $0x8c] sm:$0x1]  ;;  %v1518_v47 = vshrl.u32 %v8191_v0, 16 }
  0xab   : > { %v1500_v56 = vor.u32 %v1499_v9, %v1496_v43  ;;  %v1510_v32 = vor.u32 %v1509_v41, %v1505_v44  ;;  %v1521_v39 = vshll.u32 %v8191_v0, 16  ;;  %v1527_v59 = vshll.u32 %v8193_v27, 16  ;;  %v1089_v49 = vld [vmem:[#allocation2 + $0x90] sm:$0xf]  ;;  %v1093_v48 = vld [vmem:[#allocation2 + $0x98] sm:$0x1] }
  0xac   : > { %v1520_v13 = vrot.slane %v1518_v47, 4  ;;  %v1531_v7 = vshrl.u32 %v8193_v27, 16  ;;  %v1537_v25 = vshll.u32 %v1236_v31, 16  ;;  %v890_v29 = vsel %vm7626_vm8, %v882_v14, %v889_v36  ;;  %v8608_v5 = vld [vmem:[#allocation2 + $0x88] sm:$0xf] }
  0xad   : > { %v1501_v11 = vrot.slane %v1500_v56, 4  ;;  %v1511_v12 = vrot.slane %v1510_v32, 4  ;;  %v1523_v6 = vrot.slane %v1521_v39, 5  ;;  %v1529_v37 = vrot.slane %v1527_v59, 5  ;;  %1092 = vst.msk [vmem:[#allocation2 + $0x94] sm:$0xf] %vm1009_vm7, %v890_v29 }
  0xae   : > { %v1533_v45 = vrot.slane %v1531_v7, 4  ;;  %v1539_v3 = vrot.slane %v1537_v25, 5  ;;  %v891_v19 = vrot.slane %v886_v16, 4  ;;  %v1090_v51 = vsel %vm7642_vm9, %v881_v52, %v1089_v49  ;;  %v1096_v56 = vld [vmem:[#allocation2 + $0x9c] sm:$0xf] }
  0xaf   : > { %v1506_v20 = vsel %vm7720_vm13, %v1501_v11, %v1505_v44  ;;  %v1516_v23 = vsel %vm7720_vm13, %v1511_v12, %v1515_v33  ;;  %v1524_v1 = vor.u32 %v1523_v6, %v1520_v13  ;;  %1091 = vst [vmem:[#allocation2 + $0x90] sm:$0xf] %v1090_v51  ;;  %v893_v22 = vshrl.u32 %v8050_v35, 16  ;;  %v1100_v7 = vld [vmem:[#allocation2 + $0xa4] sm:$0x1] }
  0xb0   : > { %v6086_v42 = vcombine.low %v1506_v20, %v1516_v23  ;;  %v1534_v38 = vor.u32 %v1533_v45, %v1529_v37  ;;  %v1094_v18 = vsel %vm7600_vm3, %v891_v19, %v1093_v48  ;;  %v896_v16 = vshll.u32 %v8050_v35, 16  ;;  %v546_v19 = vld [vmem:[#allocation2 + $0xb0] sm:$0x1] }
  0xb1   : > { %v1525_v53 = vrot.slane %v1524_v1, 4  ;;  %1095 = vst [vmem:[#allocation2 + $0x98] sm:$0x1] %v1094_v18  ;;  %v895_v52 = vrot.slane %v893_v22, 7  ;;  %v901_v14 = vshrl.u32 %v8145_v15, 16  ;;  %v904_v43 = vshll.u32 %v8145_v15, 16 }
  0xb2   : > { %6791 = vmatprep.mubr.msk.bf16.mxu1 %vm1687_vm12, %v6086_v42  ;;  %v1535_v9 = vrot.slane %v1534_v38, 4  ;;  %v6259_v44 = vrot.slane %v7887_v4, 9  ;;  %v3716_v41 = vrot.slane %v7896_v30, 5  ;;  %v3719_v33 = vrot.slane %v7900_v17, 5 }
  0xb3   : > { %v1530_v31 = vsel %vm7720_vm13, %v1525_v53, %v1529_v37  ;;  %v898_v35 = vor.u32 %v896_v16, %v895_v52  ;;  %v899_v47 = vrot.slane %v895_v52, 4  ;;  %v903_v36 = vrot.slane %v901_v14, 7  ;;  %v490_v37 = vld [vmem:[#allocation2 + $0xa8] sm:$0x1] }
  0xb4   : > { %v1540_v32 = vsel %vm7720_vm13, %v1535_v9, %v1539_v3  ;;  %v8225_v15 = vld [vmem:[#allocation2 + $0x94] sm:$0xf]  ;;  %v3717_v39 = vsel %vm8069_vm1, %v6259_v44, %v3716_v41  ;;  %v3718_v4 = vrot.slane %v3716_v41, 4  ;;  %v6260_v30 = vrot.slane %v7916_v10, 9 }
  0xb5   : > { %v6087_v59 = vcombine.low %v1530_v31, %v1540_v32  ;;  %v1551_v17 = vshll.u32 %v8225_v15, 16  ;;  %v1555_v49 = vshrl.u32 %v8225_v15, 16  ;;  %v906_v13 = vor.u32 %v904_v43, %v903_v36  ;;  %v493_v43 = vld [vmem:[#allocation2 + $0xb4] sm:$0x1]  ;;  %v549_v31 = vld [vmem:[#allocation2 + $0xbc] sm:$0x1] }
  0xb6   : > { %v8232_v25 = vld [vmem:[#allocation2 + $0x90] sm:$0xf]  ;;  %v908_v29 = vrot.slane %v903_v36, 4  ;;  %v1097_v11 = vsel %vm7642_vm9, %v898_v35, %v1096_v56  ;;  %v3720_v12 = vsel %vm8069_vm1, %v3718_v4, %v3719_v33  ;;  %v3723_v6 = vrot.slane %v7940_v50, 5  ;;  %v586_v35 = vld [vmem:[%s7651_s11 + $0xe0] sm:$0xff] }
  0xb7   : > { %6792 = vmatmul.mubr.msk.bf16.gmra.mrb[20].mxu1 %vm1687_vm12, %v6087_v59  ;;  %v1542_v10 = vshrl.u32 %v8232_v25, 16  ;;  %v1545_v48 = vshll.u32 %v8232_v25, 16  ;;  %v1553_v45 = vrot.slane %v1551_v17, 5  ;;  %v1557_v3 = vrot.slane %v1555_v49, 4  ;;  %1098 = vst [vmem:[#allocation2 + $0x9c] sm:$0xf] %v1097_v11 }
  0xb8   : > { %v1239_v51 = vld [vmem:[#allocation2 + $0x98] sm:$0x1]  ;;  %v907_v20 = vsel %vm7626_vm8, %v899_v47, %v906_v13  ;;  %v1101_v23 = vsel %vm7600_vm3, %v908_v29, %v1100_v7  ;;  %v6276_v1 = vcombine.low %v3717_v39, %v3720_v12  ;;  %v3724_v50 = vsel %vm8069_vm1, %v6260_v30, %v3723_v6  ;;  %v587_v12 = vld [vmem:[%s7651_s11 + $0xe8] sm:$0xff] }
  0xb9   : > { %v1544_v22 = vrot.slane %v1542_v10, 4  ;;  %v1547_v42 = vrot.slane %v1545_v48, 5  ;;  %v1558_v38 = vor.u32 %v1557_v3, %v1553_v45  ;;  %v1561_v18 = vshll.u32 %v1239_v51, 16  ;;  %1099 = vst.msk [vmem:[#allocation2 + $0xa0] sm:$0xf] %vm1009_vm7, %v907_v20 }
  0xba   : > { %1102 = vst [vmem:[#allocation2 + $0xa4] sm:$0x1] %v1101_v23  ;;  %6949 = vmatprep.mubr.msk.bf16.mxu0 %vm1687_vm12, %v6276_v1  ;;  %v3725_v16 = vrot.slane %v3723_v6, 4  ;;  %v3726_v53 = vrot.slane %v7947_v58, 5  ;;  %v491_v52 = vsel %vm7600_vm3, 0, %v490_v37  ;;  %v547_v14 = vsel %vm7607_vm5, 0, %v546_v19 }
  0xbb   : > { %v1548_v9 = vor.u32 %v1547_v42, %v1544_v22  ;;  %v1559_v44 = vrot.slane %v1558_v38, 4  ;;  %v1563_v41 = vrot.slane %v1561_v18, 5  ;;  %492 = vst [vmem:[#allocation2 + $0xa8] sm:$0x1] %v491_v52  ;;  %548 = vst [vmem:[#allocation2 + $0xb0] sm:$0x1] %v547_v14  ;;  %v6485_v13 = vpack.c.bf16 %v586_v35, %v586_v35 }
  0xbc   : > { %v910_v33 = vshrl.u32 %v8184_v28, 16  ;;  %v3727_v47 = vsel %vm8069_vm1, %v3725_v16, %v3726_v53  ;;  %v913_v58 = vshll.u32 %v8184_v28, 16  ;;  %v918_v36 = vshrl.u32 %v8197_v46, 16 }
  0xbd   : > { %v921_v56 = vshll.u32 %v8197_v46, 16  ;;  %v1549_v32 = vrot.slane %v1548_v9, 4  ;;  %v1564_v39 = vsel %vm7720_vm13, %v1559_v44, %v1563_v41  ;;  %v6277_v4 = vcombine.low %v3724_v50, %v3727_v47 }
  0xbe   : > { %v912_v30 = vrot.slane %v910_v33, 7  ;;  %v8264_v59 = vld [vmem:[#allocation2 + $0x9c] sm:$0xf]  ;;  %v920_v17 = vrot.slane %v918_v36, 7  ;;  %v494_v49 = vsel %vm7600_vm3, 0, %v493_v43  ;;  %v550_v28 = vsel %vm7607_vm5, 0, %v549_v31 }
  0xbf   : > { %v1554_v46 = vsel %vm7720_vm13, %v1549_v32, %v1553_v45  ;;  %v1566_v7 = vshrl.u32 %v8264_v59, 16  ;;  %v1569_v29 = vshll.u32 %v8264_v59, 16  ;;  %6950 = vmatmul.mubr.msk.bf16.gmra.mrb[8].mxu0 %vm1687_vm12, %v6277_v4  ;;  %495 = vst [vmem:[#allocation2 + $0xb4] sm:$0x1] %v494_v49  ;;  %551 = vst [vmem:[#allocation2 + $0xbc] sm:$0x1] %v550_v28  ;;  %v6486_v38 = vpack.c.bf16 %v587_v12, %v587_v12 }
  0xc0   : > { %v915_v11 = vor.u32 %v913_v58, %v912_v30  ;;  %v6088_v6 = vcombine.low %v1554_v46, %v1564_v39  ;;  %v8276_v37 = vld [vmem:[#allocation2 + $0xa0] sm:$0xf]  ;;  %v916_v48 = vrot.slane %v912_v30, 4  ;;  %v923_v3 = vor.u32 %v921_v56, %v920_v17 }
  0xc1   : > { %v1242_v10 = vld [vmem:[#allocation2 + $0xa4] sm:$0x1]  ;;  %v925_v19 = vrot.slane %v920_v17, 4  ;;  %v1568_v51 = vrot.slane %v1566_v7, 4  ;;  %v1571_v20 = vrot.slane %v1569_v29, 5  ;;  %v1575_v45 = vshll.u32 %v8276_v37, 16 }
  0xc2   : > { %v1579_v23 = vshrl.u32 %v8276_v37, 16  ;;  %6795 = vmatprep.mubr.msk.bf16.mxu1 %vm1687_vm12, %v6088_v6  ;;  %v1585_v1 = vshll.u32 %v1242_v10, 16  ;;  %v924_v50 = vsel %vm7626_vm8, %v916_v48, %v923_v3  ;;  %v1103_v22 = vld [vmem:[#allocation2 + $0xa8] sm:$0xf]  ;;  %v1107_v42 = vld [vmem:[#allocation2 + $0xb0] sm:$0x1] }
  0xc3   : > { %v927_v18 = vshrl.u32 %v6485_v13, 16  ;;  %v1572_v16 = vor.u32 %v1571_v20, %v1568_v51  ;;  %v1577_v53 = vrot.slane %v1575_v45, 5  ;;  %v1104_v14 = vsel %vm7642_vm9, %v915_v11, %v1103_v22  ;;  %1106 = vst.msk [vmem:[#allocation2 + $0xac] sm:$0xf] %vm1009_vm7, %v924_v50  ;;  %v2642_v20 = vld [vmem:[#allocation2 + $0x6c] sm:$0xf] }
  0xc4   : > { %v1581_v52 = vrot.slane %v1579_v23, 4  ;;  %v1587_v43 = vrot.slane %v1585_v1, 5  ;;  %1105 = vst [vmem:[#allocation2 + $0xa8] sm:$0xf] %v1104_v14  ;;  %v1108_v9 = vsel %vm7600_vm3, %v925_v19, %v1107_v42  ;;  %v930_v41 = vshll.u32 %v6485_v13, 16  ;;  %v9693_v22 = vld [vmem:[#allocation8_spill] sm:$0xff] }
  0xc5   : > { %v929_v44 = vrot.slane %v927_v18, 7  ;;  %v1573_v33 = vrot.slane %v1572_v16, 4  ;;  %1109 = vst [vmem:[#allocation2 + $0xb0] sm:$0x1] %v1108_v9  ;;  %v935_v35 = vshrl.u32 %v6486_v38, 16  ;;  %v938_v47 = vshll.u32 %v6486_v38, 16 }
  0xc6   : > { %v1582_v31 = vor.u32 %v1581_v52, %v1577_v53  ;;  %v1110_v56 = vld [vmem:[#allocation2 + $0xb4] sm:$0xf]  ;;  %v6261_v32 = vrot.slane %v7992_v63, 9  ;;  %v3730_v17 = vrot.slane %v8013_v40, 5  ;;  %v1114_v28 = vld [vmem:[#allocation2 + $0xbc] sm:$0x1] }
  0xc7   : > { %v932_v58 = vor.u32 %v930_v41, %v929_v44  ;;  %v933_v36 = vrot.slane %v929_v44, 4  ;;  %v1578_v39 = vsel %vm7720_vm13, %v1573_v33, %v1577_v53  ;;  %v937_v30 = vrot.slane %v935_v35, 7  ;;  %v2643_v52 = vld [vmem:[#allocation2 + $0x70] sm:$0xf]  ;;  %v2644_v44 = vld [vmem:[#allocation2 + $0x74] sm:$0x1] }
  0xc8   : > { %v1583_v4 = vrot.slane %v1582_v31, 4  ;;  %v3733_v13 = vrot.slane %v8003_v55, 5  ;;  %v6262_v46 = vrot.slane %v8035_v54, 9  ;;  %v3737_v7 = vrot.slane %v8037_v62, 5 }
  0xc9   : > { %v1111_v49 = vsel %vm7642_vm9, %v932_v58, %v1110_v56  ;;  %v940_v29 = vor.u32 %v938_v47, %v937_v30  ;;  %v942_v11 = vrot.slane %v937_v30, 4  ;;  %v3731_v12 = vsel %vm8069_vm1, %v6261_v32, %v3730_v17 }
  0xca   : > { %v1588_v63 = vsel %vm7720_vm13, %v1583_v4, %v1587_v43  ;;  %1112 = vst [vmem:[#allocation2 + $0xb4] sm:$0xf] %v1111_v49  ;;  %v8301_v6 = vld [vmem:[#allocation2 + $0xac] sm:$0xf]  ;;  %v3732_v10 = vrot.slane %v3730_v17, 4  ;;  %v3738_v55 = vsel %vm8069_vm1, %v6262_v46, %v3737_v7  ;;  %v3739_v48 = vrot.slane %v3737_v7, 4 }
  0xcb   : > { %v6089_v40 = vcombine.low %v1578_v39, %v1588_v63  ;;  %v8305_v54 = vld [vmem:[#allocation2 + $0xa8] sm:$0xf]  ;;  %v1599_v62 = vshll.u32 %v8301_v6, 16  ;;  %v1603_v3 = vshrl.u32 %v8301_v6, 16  ;;  %v941_v19 = vsel %vm7626_vm8, %v933_v36, %v940_v29 }
  0xcc   : > { %v1115_v51 = vsel %vm7600_vm3, %v942_v11, %v1114_v28  ;;  %v1245_v45 = vld [vmem:[#allocation2 + $0xb0] sm:$0x1]  ;;  %v1590_v23 = vshrl.u32 %v8305_v54, 16  ;;  %v1593_v1 = vshll.u32 %v8305_v54, 16  ;;  %1113 = vst.msk [vmem:[#allocation2 + $0xb8] sm:$0xf] %vm1009_vm7, %v941_v19  ;;  %v3734_v50 = vsel %vm8069_vm1, %v3732_v10, %v3733_v13 }
  0xcd   : > { %6796 = vmatmul.mubr.msk.bf16.gmra.mrb[24].mxu1 %vm1687_vm12, %v6089_v40  ;;  %1116 = vst [vmem:[#allocation2 + $0xbc] sm:$0x1] %v1115_v51  ;;  %v3740_v42 = vrot.slane %v9693_v22, 5  ;;  %v1601_v38 = vrot.slane %v1599_v62, 5  ;;  %v1605_v18 = vrot.slane %v1603_v3, 4  ;;  %v1609_v16 = vshll.u32 %v1245_v45, 16 }
  0xce   : > { %v6278_v53 = vcombine.low %v3731_v12, %v3734_v50  ;;  %v1592_v14 = vrot.slane %v1590_v23, 4  ;;  %v1595_v43 = vrot.slane %v1593_v1, 5  ;;  %v6263_v35 = vrot.slane %v2642_v20, 9  ;;  %v2645_v62 = vld [vmem:[#allocation2 + $0x78] sm:$0xf] }
  0xcf   : > { %v3741_v9 = vsel %vm8069_vm1, %v3739_v48, %v3740_v42  ;;  %v1606_v41 = vor.u32 %v1605_v18, %v1601_v38  ;;  %v1611_v33 = vrot.slane %v1609_v16, 5  ;;  %v3744_v36 = vrot.slane %v2643_v52, 5  ;;  %v2646_v3 = vld [vmem:[#allocation2 + $0x7c] sm:$0xf]  ;;  %v2647_v45 = vld [vmem:[#allocation2 + $0x80] sm:$0x1] }
  0xd0   : > { %6953 = vmatprep.mubr.msk.bf16.mxu0 %vm1687_vm12, %v6278_v53  ;;  %v6279_v31 = vcombine.low %v3738_v55, %v3741_v9  ;;  %v1596_v47 = vor.u32 %v1595_v43, %v1592_v14  ;;  %v3747_v4 = vrot.slane %v2644_v44, 5  ;;  %v2648_v1 = vld [vmem:[#allocation2 + $0x84] sm:$0xf]  ;;  %v2649_v50 = vld [vmem:[#allocation2 + $0x88] sm:$0xf]  ;;  %v3751_v18 = vrot.slane %v2646_v3, 5 }
  0xd1   : > { %v8323_v58 = vld [vmem:[#allocation2 + $0xb4] sm:$0xf]  ;;  %v1607_v56 = vrot.slane %v1606_v41, 4  ;;  %v3746_v17 = vrot.slane %v3744_v36, 4  ;;  %v3745_v63 = vsel %vm8069_vm1, %v6263_v35, %v3744_v36  ;;  %v2650_v16 = vld [vmem:[#allocation2 + $0x8c] sm:$0x1] }
  0xd2   : > { %9694 = vst [vmem:[#allocation8_spill] sm:$0xff] %v8323_v58  ;;  %v1614_v32 = vshrl.u32 %v8323_v58, 16  ;;  %v1617_v39 = vshll.u32 %v8323_v58, 16  ;;  %6954 = vmatmul.mubr.msk.bf16.gmra.mrb[12].mxu0 %vm1687_vm12, %v6279_v31  ;;  %v1597_v30 = vrot.slane %v1596_v47, 4  ;;  %v3754_v53 = vrot.slane %v2647_v45, 5 }
  0xd3   : > { %v1612_v49 = vsel %vm7720_vm13, %v1607_v56, %v1611_v33  ;;  %v8330_v28 = vld [vmem:[#allocation2 + $0xb8] sm:$0xf]  ;;  %v3748_v48 = vsel %vm8069_vm1, %v3746_v17, %v3747_v4  ;;  %v2651_v52 = vld [vmem:[#allocation2 + $0x90] sm:$0xf]  ;;  %v2652_v14 = vld [vmem:[#allocation2 + $0x94] sm:$0xf] }
  0xd4   : > { %9695 = vst [vmem:[#allocation9_spill] sm:$0xff] %v8330_v28  ;;  %v8332_v13 = vld [vmem:[#allocation2 + $0xbc] sm:$0x1]  ;;  %v1616_v46 = vrot.slane %v1614_v32, 4  ;;  %v1619_v7 = vrot.slane %v1617_v39, 5  ;;  %v1602_v29 = vsel %vm7720_vm13, %v1597_v30, %v1601_v38  ;;  %v1623_v11 = vshll.u32 %v8330_v28, 16 }
  0xd5   : > { %9696 = vst [vmem:[#allocation10_spill] sm:$0xff] %v8332_v13  ;;  %v1627_v12 = vshrl.u32 %v8330_v28, 16  ;;  %v1633_v40 = vshll.u32 %v8332_v13, 16  ;;  %v6090_v10 = vcombine.low %v1602_v29, %v1612_v49  ;;  %v6280_v20 = vcombine.low %v3745_v63, %v3748_v48  ;;  %v8349_v33 = vld [vmem:[#allocation2] sm:$0xf] }
  0xd6   : > { %v1620_v55 = vor.u32 %v1619_v7, %v1616_v46  ;;  %v1625_v19 = vrot.slane %v1623_v11, 5  ;;  %v6264_v38 = vrot.slane %v2645_v62, 9  ;;  %v3753_v41 = vrot.slane %v3751_v18, 4  ;;  %v8351_v31 = vld [vmem:[#allocation2 + $0x4] sm:$0xf] }
  0xd7   : > { %v1629_v51 = vrot.slane %v1627_v12, 4  ;;  %6799 = vmatprep.mubr.msk.bf16.mxu1 %vm1687_vm12, %v6090_v10  ;;  %v1635_v42 = vrot.slane %v1633_v40, 5  ;;  %6957 = vmatprep.mubr.msk.bf16.mxu0 %vm1687_vm12, %v6280_v20  ;;  %v6108_v35 = vcombine.low %v8349_v33, %v8351_v31  ;;  %v6265_v47 = vrot.slane %v2648_v1, 9  ;;  %v2653_v32 = vld [vmem:[#allocation2 + $0x98] sm:$0x1] }
  0xd8   : > { %v1621_v23 = vrot.slane %v1620_v55, 4  ;;  %v3752_v44 = vsel %vm8069_vm1, %v6264_v38, %v3751_v18  ;;  %v3758_v36 = vrot.slane %v2649_v50, 5  ;;  %v3761_v56 = vrot.slane %v2650_v16, 5  ;;  %v2654_v49 = vld [vmem:[#allocation2 + $0x9c] sm:$0xf] }
  0xd9   : > { %v1630_v22 = vor.u32 %v1629_v51, %v1625_v19  ;;  %v3755_v4 = vsel %vm8069_vm1, %v3753_v41, %v3754_v53  ;;  %v6266_v30 = vrot.slane %v2651_v52, 9  ;;  %v3765_v17 = vrot.slane %v2652_v14, 5  ;;  %v2655_v46 = vld [vmem:[#allocation2 + $0xa0] sm:$0xf]  ;;  %v2656_v12 = vld [vmem:[#allocation2 + $0xa4] sm:$0x1] }
  0xda   : > { %v1626_v43 = vsel %vm7720_vm13, %v1621_v23, %v1625_v19  ;;  %v6281_v63 = vcombine.low %v3752_v44, %v3755_v4  ;;  %v3759_v29 = vsel %vm8069_vm1, %v6265_v47, %v3758_v36  ;;  %v3760_v11 = vrot.slane %v3758_v36, 4  ;;  %v2658_v55 = vld [vmem:[#allocation2 + $0xac] sm:$0xf]  ;;  %v2657_v19 = vld [vmem:[#allocation2 + $0xa8] sm:$0xf] }
  0xdb   : > { %v1631_v9 = vrot.slane %v1630_v22, 4  ;;  %v3767_v40 = vrot.slane %v3765_v17, 4  ;;  %v3768_v10 = vrot.slane %v2653_v32, 5  ;;  %v6267_v62 = vrot.slane %v2654_v49, 9  ;;  %v496_v51 = vld [vmem:[#allocation2 + $0xc0] sm:$0x1] }
  0xdc   : > { %6958 = vmatmul.mubr.msk.bf16.gmra.mrb[16].mxu0 %vm1687_vm12, %v6281_v63  ;;  %v3762_v48 = vsel %vm8069_vm1, %v3760_v11, %v3761_v56  ;;  %v3772_v3 = vrot.slane %v2655_v46, 5  ;;  %v3766_v45 = vsel %vm8069_vm1, %v6266_v30, %v3765_v17  ;;  %v3775_v1 = vrot.slane %v2656_v12, 5  ;;  %v2659_v50 = vld [vmem:[#allocation2 + $0xb0] sm:$0x1]  ;;  %v2661_v22 = vld [vmem:[#allocation2 + $0xb8] sm:$0xf] }
  0xdd   : > { %v1636_v39 = vsel %vm7720_vm13, %v1631_v9, %v1635_v42  ;;  %v6282_v20 = vcombine.low %v3759_v29, %v3762_v48  ;;  %v3769_v23 = vsel %vm8069_vm1, %v3767_v40, %v3768_v10  ;;  %v8370_v42 = vld [vmem:[#allocation2 + $0xc] sm:$0xf]  ;;  %v8372_v38 = vld [vmem:[#allocation2 + $0x10] sm:$0xf]  ;;  %v3779_v53 = vrot.slane %v2658_v55, 5  ;;  %v589_v49 = vld [vmem:[%s7651_s11 + $0xf8] sm:$0xff] }
  0xde   : > { %v6091_v7 = vcombine.low %v1626_v43, %v1636_v39  ;;  %v6109_v18 = vcombine.low %v8370_v42, %v8372_v38  ;;  %v3774_v16 = vrot.slane %v3772_v3, 4  ;;  %v2660_v52 = vld [vmem:[#allocation2 + $0xb4] sm:$0xf]  ;;  %v552_v14 = vld [vmem:[#allocation2 + $0xc8] sm:$0x1]  ;;  %v3773_v47 = vsel %vm8069_vm1, %v6267_v62, %v3772_v3 }
  0xdf   : > { %v7391_v43 = vld [vmem:[%s9642_s3 + $0x4] sm:$0x3]  ;;  %v8380_v44 = vld [vmem:[#allocation2 + $0x18] sm:$0xf]  ;;  %v8382_v41 = vld [vmem:[#allocation2 + $0x1c] sm:$0xf]  ;;  %6961 = vmatprep.mubr.msk.bf16.mxu0 %vm1687_vm12, %v6282_v20  ;;  %v6283_v39 = vcombine.low %v3766_v45, %v3769_v23  ;;  %v6488_v55 = vpack.c.bf16 %v589_v49, %v589_v49 }
  0xe0   : > { %6800 = vmatmul.mubr.msk.bf16.gmra.mrb[28].mxu1 %vm1687_vm12, %v6091_v7  ;;  %v2423_v9 = vsel %vm1736_vm0, %v7391_v43, 0  ;;  %v6268_v36 = vrot.slane %v2657_v19, 9  ;;  %v2662_v56 = vld [vmem:[#allocation2 + $0xbc] sm:$0x1]  ;;  %v588_v32 = vld [vmem:[%s7651_s11 + $0xf0] sm:$0xff]  ;;  %v3776_v4 = vsel %vm8069_vm1, %v3774_v16, %v3775_v1  ;;  %v3782_v30 = vrot.slane %v2659_v50, 5 }
  0xe1   : > { %6805 = vmatprep.mubr.msk.bf16.mxu1 %vm1687_vm12, %v6108_v35  ;;  %v6110_v35 = vcombine.low %v8380_v44, %v8382_v41  ;;  %v3786_v17 = vrot.slane %v2661_v22, 5  ;;  %v3781_v46 = vrot.slane %v3779_v53, 4  ;;  %v6269_v7 = vrot.slane %v2660_v52, 9  ;;  %v8400_v48 = vld [vmem:[%s9642_s3 + $0x6] sm:$0x3] }
  0xe2   : > { %v497_v63 = vsel %vm7600_vm3, 0, %v496_v51  ;;  %v553_v29 = vsel %vm7607_vm5, 0, %v552_v14  ;;  %v6284_v11 = vcombine.low %v3773_v47, %v3776_v4  ;;  %v3789_v40 = vrot.slane %v2662_v56, 5  ;;  %v8418_v16 = vld [vmem:[#allocation2 + $0x28] sm:$0xf] }
  0xe3   : > { %v3788_v12 = vrot.slane %v3786_v17, 4  ;;  %498 = vst [vmem:[#allocation2 + $0xc0] sm:$0x1] %v497_v63  ;;  %554 = vst [vmem:[#allocation2 + $0xc8] sm:$0x1] %v553_v29  ;;  %v6487_v10 = vpack.c.bf16 %v588_v32, %v588_v32  ;;  %v3780_v19 = vsel %vm8069_vm1, %v6268_v36, %v3779_v53  ;;  %v3783_v51 = vsel %vm8069_vm1, %v3781_v46, %v3782_v30 }
  0xe4   : > { %6962 = vmatmul.mubr.msk.bf16.gmra.mrb[20].mxu0 %vm1687_vm12, %v6283_v39  ;;  %v952_v20 = vshrl.u32 %v6488_v55, 16  ;;  %v955_v45 = vshll.u32 %v6488_v55, 16  ;;  %v3787_v23 = vsel %vm8069_vm1, %v6269_v7, %v3786_v17  ;;  %v6285_v52 = vcombine.low %v3780_v19, %v3783_v51  ;;  %v8439_v46 = vld [vmem:[#allocation2 + $0x3c] sm:$0xf]  ;;  %v8441_v7 = vld [vmem:[#allocation2 + $0x40] sm:$0xf] }
  0xe5   : > { %v944_v62 = vshrl.u32 %v6487_v10, 16  ;;  %v947_v3 = vshll.u32 %v6487_v10, 16  ;;  %6965 = vmatprep.mubr.msk.bf16.mxu0 %vm1687_vm12, %v6284_v11  ;;  %v3790_v1 = vsel %vm8069_vm1, %v3788_v12, %v3789_v40  ;;  %v6113_v21 = vcombine.low %v8439_v46, %v8441_v7  ;;  %v8445_v63 = vld [vmem:[#allocation2 + $0x48] sm:$0xf]  ;;  %v8447_v29 = vld [vmem:[#allocation2 + $0x4c] sm:$0xf] }
  0xe6   : > { %v954_v22 = vrot.slane %v952_v20, 7  ;;  %v6286_v36 = vcombine.low %v3787_v23, %v3790_v1  ;;  %v6114_v11 = vcombine.low %v8445_v63, %v8447_v29  ;;  %v8453_v19 = vld [vmem:[#allocation2 + $0x18] sm:$0xf]  ;;  %v8455_v51 = vld [vmem:[#allocation2 + $0x1c] sm:$0xf] }
  0xe7   : > { %v946_v50 = vrot.slane %v944_v62, 7  ;;  %v8459_v23 = vld [vmem:[#allocation2 + $0x54] sm:$0xf]  ;;  %v8461_v1 = vld [vmem:[#allocation2 + $0x58] sm:$0xf] }
  0xe8   : > { %6806 = vmatmul.mubr.msk.bf16.vlgmr.msra.gmra.mrb[0].mxu1 %vm1687_vm12, %v6109_v18  ;;  %v8416_v18 = vld [vmem:[#allocation2 + $0x24] sm:$0xf]  ;;  %v957_v56 = vor.u32 %v955_v45, %v954_v22  ;;  %v959_v32 = vrot.slane %v954_v22, 4 }
  0xe9   : > { %6838 = vmatpush3.bf16.msra.mxu1 %v2423_v9  ;;  %6809 = vmatprep.mubr.msk.bf16.mxu1 %vm1687_vm12, %v6110_v35  ;;  %v6111_v53 = vcombine.low %v8416_v18, %v8418_v16  ;;  %v949_v14 = vor.u32 %v947_v3, %v946_v50  ;;  %v950_v43 = vrot.slane %v946_v50, 4  ;;  %v8422_v9 = vld [vmem:[#allocation2 + $0x30] sm:$0xf]  ;;  %v8424_v35 = vld [vmem:[#allocation2 + $0x34] sm:$0xf]  ;;  %v6115_v50 = vcombine.low %v8459_v23, %v8461_v1 }
  0xea   : > { %7336 = vmatprep.subr.msk.bf16.mxu1 %vm1736_vm0, %v8400_v48  ;;  %v6112_v47 = vcombine.low %v8422_v9, %v8424_v35  ;;  %v1117_v39 = vld [vmem:[#allocation2 + $0xc0] sm:$0xf]  ;;  %v1121_v4 = vld [vmem:[#allocation2 + $0xc8] sm:$0x1] }
  0xeb   : > { %v1118_v30 = vsel %vm7642_vm9, %v949_v14, %v1117_v39  ;;  %v958_v17 = vsel %vm7626_vm8, %v950_v43, %v957_v56  ;;  %v1122_v49 = vsel %vm7600_vm3, %v959_v32, %v1121_v4  ;;  %v8469_v14 = vld [vmem:[#allocation2 + $0x60] sm:$0xf]  ;;  %v8471_v43 = vld [vmem:[#allocation2 + $0x64] sm:$0xf]  ;;  %v8480_v56 = vld [vmem:[#allocation2 + $0x28] sm:$0xf] }
  0xec   : > { %1119 = vst [vmem:[#allocation2 + $0xc0] sm:$0xf] %v1118_v30  ;;  %6966 = vmatmul.mubr.msk.bf16.gmra.mrb[24].mxu0 %vm1687_vm12, %v6285_v52  ;;  %1120 = vst.msk [vmem:[#allocation2 + $0xc4] sm:$0xf] %vm1009_vm7, %v958_v17  ;;  %v8483_v32 = vld [vmem:[#allocation2 + $0x30] sm:$0xf] }
  0xed   : > { %1123 = vst [vmem:[#allocation2 + $0xc8] sm:$0x1] %v1122_v49  ;;  %6969 = vmatprep.mubr.msk.bf16.mxu0 %vm1687_vm12, %v6286_v36  ;;  %v8478_v36 = vld [vmem:[#allocation2 + $0x24] sm:$0xf]  ;;  %v8485_v39 = vld [vmem:[#allocation2 + $0x34] sm:$0xf] }
  0xee   : > { %v6306_v4 = vcombine.low %v8478_v36, %v8480_v56  ;;  %v8489_v30 = vld [vmem:[#allocation2 + $0x6c] sm:$0xf]  ;;  %v4950_v49 = vsel %vm1736_vm0, %v8125_v2, 0  ;;  %v8508_v2 = vld [vmem:[#allocation2 + $0x40] sm:$0xf] }
  0xef   : > { %v6117_v17 = vcombine.low %v8489_v30, %v8103_v34  ;;  %v8506_v34 = vld [vmem:[#allocation2 + $0x3c] sm:$0xf] }
  0xf0   : > { %6810 = vmatmul.mubr.msk.bf16.gmra.mrb[4].mxu1 %vm1687_vm12, %v6111_v53  ;;  %v6305_v53 = vcombine.low %v8453_v19, %v8455_v51 }
  0xf1   : > { %6813 = vmatprep.mubr.msk.bf16.mxu1 %vm1687_vm12, %v6112_v47  ;;  %v6116_v47 = vcombine.low %v8469_v14, %v8471_v43 }
  0xf3   : > { %v2663_v12 = vld [vmem:[#allocation2 + $0xc0] sm:$0xf]  ;;  %v2664_v40 = vld [vmem:[#allocation2 + $0xc4] sm:$0xf] }
  0xf4   : > { %v2665_v10 = vld [vmem:[#allocation2 + $0xc8] sm:$0x1]  ;;  %v6270_v55 = vrot.slane %v2663_v12, 9  ;;  %v3793_v62 = vrot.slane %v2664_v40, 5  ;;  %v499_v12 = vld [vmem:[#allocation2 + $0xcc] sm:$0x1] }
  0xf5   : > { %v3796_v3 = vrot.slane %v2665_v10, 5  ;;  %v8503_v40 = vld [vmem:[%s9642_s3 + $0x10] sm:$0x3]  ;;  %v8510_v10 = vld [vmem:[#allocation2 + $0x8] sm:$0x1] }
  0xf6   : > { %v3794_v20 = vsel %vm8069_vm1, %v6270_v55, %v3793_v62  ;;  %v3795_v45 = vrot.slane %v3793_v62, 4  ;;  %v8516_v55 = vld [vmem:[#allocation2 + $0x48] sm:$0xf]  ;;  %v8518_v62 = vld [vmem:[#allocation2 + $0x4c] sm:$0xf] }
  0xf8   : > { %6814 = vmatmul.mubr.msk.bf16.gmra.mrb[8].mxu1 %vm1687_vm12, %v6113_v21  ;;  %v3797_v22 = vsel %vm8069_vm1, %v3795_v45, %v3796_v3  ;;  %v6118_v21 = vcombine.low %v8176_v26, %v8178_v61  ;;  %v2221_v61 = vrot.slane %v8372_v38, 5  ;;  %v7408_v3 = vld [vmem:[#allocation2 + $0x14] sm:$0x1]  ;;  %v8553_v45 = vld [vmem:[#allocation2 + $0x64] sm:$0xf]  ;;  %v9703_v38 = vrot.slane %v8510_v10, 5 }
  0xf9   : > { %6817 = vmatprep.mubr.msk.bf16.mxu1 %vm1687_vm12, %v6114_v11  ;;  %v6287_v52 = vcombine.low %v3794_v20, %v3797_v22  ;;  %v6307_v11 = vcombine.low %v8483_v32, %v8485_v39  ;;  %v2224_v20 = vrot.slane %v7408_v3, 5  ;;  %v500_v22 = vsel %vm7600_vm3, 0, %v499_v12  ;;  %v8537_v12 = vld [vmem:[#allocation2 + $0x54] sm:$0xf]  ;;  %v8539_v3 = vld [vmem:[#allocation2 + $0x58] sm:$0xf] }
  0xfa   : > { %501 = vst [vmem:[#allocation2 + $0xcc] sm:$0x1] %v500_v22  ;;  %v6120_v22 = vcombine.low %v8232_v25, %v8225_v15  ;;  %v2223_v25 = vrot.slane %v2221_v61, 4  ;;  %v7410_v10 = vld [vmem:[#allocation2 + $0x2c] sm:$0x1] }
  0xfb   : > { %6970 = vmatmul.mubr.msk.bf16.gmra.mrb[28].mxu0 %vm1687_vm12, %v6287_v52  ;;  %v6141_v52 = vrot.slane %v8370_v42, 9  ;;  %v7411_v42 = vld [vmem:[#allocation2 + $0x38] sm:$0x1] }
  0xfc   : > { %6975 = vmatprep.mubr.msk.bf16.mxu0 %vm1687_vm12, %v6305_v53 }
  0xfd   : > { %v8600_v15 = vsel %vm8069_vm1, %v6141_v52, %v2221_v61 }
 0x100   : > { %6818 = vmatmul.mubr.msk.bf16.gmra.mrb[12].mxu1 %vm1687_vm12, %v6115_v50  ;;  %v6121_v50 = vcombine.low %v8264_v59, %v8276_v37  ;;  %v9701_v37 = vld [vmem:[#allocation7_spill] sm:$0xff] }
 0x101   : > { %6821 = vmatprep.mubr.msk.bf16.mxu1 %vm1687_vm12, %v6116_v47  ;;  %v1194_v47 = vld [vmem:[#allocation2 + $0xcc] sm:$0xf] }
 0x102   : > { %v1195_v26 = vsel %vm7642_vm9, %v9701_v37, %v1194_v47  ;;  %v7409_v37 = vld [vmem:[#allocation2 + $0x20] sm:$0x1] }
 0x103   : > { %6976 = vmatmul.mubr.msk.bf16.vlgmr.msra.gmra.mrb[0].mxu0 %vm1687_vm12, %v6306_v4  ;;  %v6308_v4 = vcombine.low %v8506_v34, %v8508_v2  ;;  %1196 = vst [vmem:[#allocation2 + $0xcc] sm:$0xf] %v1195_v26  ;;  %v2231_v24 = vrot.slane %v7409_v37, 5  ;;  %v8642_v37 = vld [vmem:[#allocation2 + $0x94] sm:$0xf] }
 0x104   : > { %7008 = vmatpush3.bf16.msra.mxu0 %v4950_v49  ;;  %6979 = vmatprep.mubr.msk.bf16.mxu0 %vm1687_vm12, %v6307_v11  ;;  %v6119_v49 = vcombine.low %v8191_v0, %v8193_v27  ;;  %v6309_v11 = vcombine.low %v8516_v55, %v8518_v62  ;;  %v2214_v0 = vrot.slane %v8351_v31, 5  ;;  %v6310_v31 = vcombine.low %v8537_v12, %v8539_v3  ;;  %v8561_v27 = vld [vmem:[#allocation2 + $0x6c] sm:$0xf] }
 0x105   : > { %7342 = vmatprep.subr.msk.bf16.mxu0 %vm1736_vm0, %v8503_v40  ;;  %9697 = vst [vmem:[#allocation11_spill] sm:$0xff] %v8561_v27 }
 0x106   : > { %v2216_v53 = vrot.slane %v2214_v0, 4 }
 0x108   : > { %6822 = vmatmul.mubr.msk.bf16.gmra.mrb[16].mxu1 %vm1687_vm12, %v6117_v17  ;;  %v8545_v17 = vld [vmem:[#allocation2 + $0x60] sm:$0xf]  ;;  %v8619_v61 = vsel %vm8069_vm1, %v2216_v53, %v9703_v38  ;;  %v8640_v38 = vsel %vm1736_vm0, %v8400_v48, 0  ;;  %v9707_v53 = vshll.u32 %v8453_v19, 16 }
 0x109   : > { %6825 = vmatprep.mubr.msk.bf16.mxu1 %vm1687_vm12, %v6118_v21  ;;  %v6311_v59 = vcombine.low %v8545_v17, %v8553_v45  ;;  %v2228_v21 = vrot.slane %v8382_v41, 5  ;;  %v2238_v41 = vrot.slane %v7410_v10, 5  ;;  %v6144_v10 = vrot.slane %v8422_v9, 9 }
 0x10b   : > { %6980 = vmatmul.mubr.msk.bf16.gmra.mrb[4].mxu0 %vm1687_vm12, %v6308_v4  ;;  %v8567_v4 = vld [vmem:[#allocation2 + $0x70] sm:$0xf]  ;;  %v2230_v26 = vrot.slane %v2228_v21, 4 }
 0x10c   : > { %6983 = vmatprep.mubr.msk.bf16.mxu0 %vm1687_vm12, %v6309_v11  ;;  %9698 = vst [vmem:[#allocation12_spill] sm:$0xff] %v8567_v4  ;;  %v6140_v11 = vrot.slane %v8349_v33, 9  ;;  %v8589_v33 = vld [vmem:[#allocation2 + $0x7c] sm:$0xf] }
 0x10d   : > { %9700 = vst [vmem:[#allocation14_spill] sm:$0xff] %v8589_v33 }
 0x10e   : > { %v8613_v47 = vsel %vm8069_vm1, %v6140_v11, %v2214_v0  ;;  %v2245_v0 = vrot.slane %v7411_v42, 5 }
 0x110   : > { %6826 = vmatmul.mubr.msk.bf16.gmra.mrb[20].mxu1 %vm1687_vm12, %v6119_v49  ;;  %v6122_v49 = vcombine.low %v8305_v54, %v8301_v6  ;;  %v8587_v54 = vld [vmem:[#allocation2 + $0x78] sm:$0xf]  ;;  %v8606_v6 = vld [vmem:[#allocation2 + $0x84] sm:$0xf] }
 0x111   : > { %6829 = vmatprep.mubr.msk.bf16.mxu1 %vm1687_vm12, %v6120_v22  ;;  %9699 = vst [vmem:[#allocation13_spill] sm:$0xff] %v8587_v54  ;;  %v8604_v22 = vsel %vm8069_vm1, %v2223_v25, %v2224_v20  ;;  %9702 = vst [vmem:[#allocation7_spill] sm:$0xff] %v8606_v6  ;;  %v2235_v20 = vrot.slane %v8418_v16, 5  ;;  %v6313_v52 = vcombine.low %v8587_v54, %v8589_v33  ;;  %v6142_v25 = vrot.slane %v8380_v44, 9  ;;  %v8747_v33 = vld [vmem:[#allocation2 + $0x20] sm:$0x1] }
 0x112   : > { %v2242_v16 = vrot.slane %v8424_v35, 5  ;;  %v6157_v44 = vcombine.low %v8613_v47, %v8619_v61  ;;  %v8647_v47 = vld [vmem:[#allocation2 + $0x90] sm:$0xf]  ;;  %v8659_v35 = vld [vmem:[#allocation2 + $0x9c] sm:$0xf]  ;;  %v2249_v61 = vrot.slane %v8441_v7, 5 }
 0x113   : > { %6984 = vmatmul.mubr.msk.bf16.gmra.mrb[8].mxu0 %vm1687_vm12, %v6310_v31  ;;  %v8653_v48 = vsel %vm8069_vm1, %v6142_v25, %v2228_v21  ;;  %v8681_v31 = vld [vmem:[#allocation2 + $0xa8] sm:$0xf]  ;;  %v8683_v21 = vld [vmem:[#allocation2 + $0xac] sm:$0xf]  ;;  %v8702_v7 = vld [vmem:[#allocation2 + $0xb4] sm:$0xf] }
 0x114   : > { %6987 = vmatprep.mubr.msk.bf16.mxu0 %vm1687_vm12, %v6311_v59  ;;  %v2237_v59 = vrot.slane %v2235_v20, 4  ;;  %v2244_v11 = vrot.slane %v2242_v16, 4  ;;  %9709 = vst [vmem:[#allocation15_spill] sm:$0xff] %v8747_v33 }
 0x116   : > { %v8676_v9 = vsel %vm8069_vm1, %v2237_v59, %v2238_v41  ;;  %v9704_v41 = vcombine.low %v8561_v27, %v8567_v4  ;;  %v8696_v59 = vsel %vm8069_vm1, %v6144_v10, %v2242_v16  ;;  %v8700_v42 = vsel %vm8069_vm1, %v2244_v11, %v2245_v0  ;;  %v7414_v27 = vld [vmem:[#allocation2 + $0x5c] sm:$0x1] }
 0x117   : > { %v4477_v10 = vshll.u32 %v8455_v51, 16  ;;  %v2263_v11 = vrot.slane %v8461_v1, 5  ;;  %v9708_v1 = vshrl.u32 %v8455_v51, 16  ;;  %v9712_v51 = vcombine.low %v8606_v6, %v8608_v5  ;;  %v8772_v6 = vld [vmem:[#allocation2 + $0x2c] sm:$0x1] }
 0x118   : > { %6830 = vmatmul.mubr.msk.bf16.gmra.mrb[24].mxu1 %vm1687_vm12, %v6121_v50  ;;  %v6143_v50 = vrot.slane %v8416_v18, 9  ;;  %v8661_v18 = vld [vmem:[#allocation2 + $0xa0] sm:$0xf]  ;;  %9716 = vst [vmem:[#allocation16_spill] sm:$0xff] %v8772_v6 }
 0x119   : > { %6833 = vmatprep.mubr.msk.bf16.mxu1 %vm1687_vm12, %v6122_v49  ;;  %v8657_v49 = vsel %vm8069_vm1, %v2230_v26, %v2231_v24  ;;  %v6145_v24 = vrot.slane %v8439_v46, 9  ;;  %v8742_v8 = vrot.slane %v4477_v10, 5  ;;  %v2265_v13 = vrot.slane %v2263_v11, 4 }
 0x11a   : > { %v8672_v26 = vsel %vm8069_vm1, %v6143_v50, %v2235_v20  ;;  %v6159_v46 = vcombine.low %v8653_v48, %v8657_v49  ;;  %v2251_v48 = vrot.slane %v2249_v61, 4  ;;  %v7412_v49 = vld [vmem:[#allocation2 + $0x44] sm:$0x1]  ;;  %v8704_v20 = vld [vmem:[#allocation2 + $0xb8] sm:$0xf]  ;;  %v9705_v50 = vcombine.low %v8323_v58, %v8330_v28 }
 0x11b   : > { %6988 = vmatmul.mubr.msk.bf16.gmra.mrb[12].mxu0 %vm1687_vm12, %v9704_v41  ;;  %v2252_v25 = vrot.slane %v7412_v49, 5  ;;  %v8715_v0 = vsel %vm8069_vm1, %v6145_v24, %v2249_v61  ;;  %v2256_v49 = vrot.slane %v8447_v29, 5  ;;  %v4501_v29 = vshll.u32 %v8480_v56, 16 }
 0x11c   : > { %6991 = vmatprep.mubr.msk.bf16.mxu0 %vm1687_vm12, %v6313_v52  ;;  %v2270_v52 = vrot.slane %v8471_v43, 5  ;;  %v9706_v41 = vshrl.u32 %v8453_v19, 16  ;;  %v4473_v61 = vrot.slane %v9707_v53, 5  ;;  %v4483_v24 = vrot.slane %v9708_v1, 4 }
 0x11d   : > { %v2258_v54 = vrot.slane %v2256_v49, 4  ;;  %v2266_v43 = vrot.slane %v7414_v27, 5  ;;  %v9710_v19 = vshrl.u32 %v8478_v36, 16  ;;  %v9711_v10 = vshll.u32 %v8478_v36, 16 }
 0x11e   : > { %v4470_v16 = vrot.slane %v9706_v41, 4  ;;  %v6148_v41 = vrot.slane %v8469_v14, 9  ;;  %v2272_v1 = vrot.slane %v2270_v52, 4  ;;  %v8758_v27 = vrot.slane %v4501_v29, 5 }
 0x11f   : > { %v4494_v53 = vrot.slane %v9710_v19, 4  ;;  %v4497_v28 = vrot.slane %v9711_v10, 5  ;;  %v9713_v58 = vshrl.u32 %v8480_v56, 16  ;;  %v9714_v14 = vcombine.low %v8600_v15, %v8604_v22  ;;  %v7416_v19 = vld [vmem:[#allocation2 + $0x70] sm:$0xf] }
 0x120   : > { %6834 = vmatmul.mubr.msk.bf16.gmra.mrb[28].mxu1 %vm1687_vm12, %v9705_v50  ;;  %v6146_v50 = vrot.slane %v8445_v63, 9  ;;  %v6147_v63 = vrot.slane %v8459_v23, 9  ;;  %v7415_v23 = vld [vmem:[#allocation2 + $0x68] sm:$0x1]  ;;  %v9715_v36 = vcombine.low %v8647_v47, %v8642_v37  ;;  %v2277_v10 = vrot.slane %v7416_v19, 5 }
 0x121   : > { %6839 = vmatprep.mubr.msk.bf16.mxu1 %vm1687_vm12, %v6157_v44  ;;  %v8733_v44 = vsel %vm8069_vm1, %v2251_v48, %v2252_v25  ;;  %v7413_v25 = vld [vmem:[#allocation2 + $0x50] sm:$0x1]  ;;  %v4507_v4 = vrot.slane %v9713_v58, 4  ;;  %v4487_v29 = vshll.u32 %v8747_v33, 16  ;;  %v8882_v58 = vld [vmem:[#allocation2 + $0x44] sm:$0x1] }
 0x122   : > { %v2259_v48 = vrot.slane %v7413_v25, 5  ;;  %v2273_v25 = vrot.slane %v7415_v23, 5  ;;  %v4484_v23 = vor.u32 %v4483_v24, %v8742_v8  ;;  %v8779_v56 = vsel %vm8069_vm1, %v6146_v50, %v2256_v49  ;;  %9728 = vst [vmem:[#allocation18_spill] sm:$0xff] %v8882_v58 }
 0x123   : > { %6992 = vmatmul.mubr.msk.bf16.gmra.mrb[16].mxu0 %vm1687_vm12, %v9712_v51  ;;  %v4474_v51 = vor.u32 %v4473_v61, %v4470_v16  ;;  %v8787_v22 = vsel %vm8069_vm1, %v6147_v63, %v2263_v11  ;;  %v8791_v16 = vsel %vm8069_vm1, %v2265_v13, %v2266_v43  ;;  %v8799_v50 = vsel %vm8069_vm1, %v6148_v41, %v2270_v52  ;;  %v7417_v11 = vld [vmem:[%s9642_s3 + $0x8] sm:$0x3]  ;;  %v7418_v61 = vld [vmem:[#allocation2 + $0x74] sm:$0x1] }
 0x124   : > { %6995 = vmatprep.mubr.msk.bf16.mxu0 %vm1687_vm12, %v9715_v36  ;;  %v8783_v15 = vsel %vm8069_vm1, %v2258_v54, %v2259_v48  ;;  %v6149_v49 = vrot.slane %v8489_v30, 9  ;;  %v4498_v54 = vor.u32 %v4497_v28, %v4494_v53  ;;  %v8808_v13 = vsel %vm8069_vm1, %v2272_v1, %v2273_v25 }
 0x125   : > { %v2280_v24 = vrot.slane %v7418_v61, 5  ;;  %v4508_v48 = vor.u32 %v4507_v4, %v8758_v27  ;;  %v4511_v52 = vshll.u32 %v8772_v6, 16  ;;  %v2279_v63 = vrot.slane %v2277_v10, 4 }
 0x126   : > { %v4475_v43 = vrot.slane %v4474_v51, 4  ;;  %v4485_v30 = vrot.slane %v4484_v23, 4  ;;  %v4489_v28 = vrot.slane %v4487_v29, 5  ;;  %v6162_v41 = vcombine.low %v8715_v0, %v8733_v44  ;;  %v7419_v23 = vld [vmem:[#allocation2 + $0x7c] sm:$0xf] }
 0x127   : > { %v4525_v25 = vshll.u32 %v8485_v39, 16  ;;  %v8825_v36 = vsel %vm8069_vm1, %v6149_v49, %v2277_v10  ;;  %v4499_v19 = vrot.slane %v4498_v54, 4  ;;  %v9717_v0 = vcombine.low %v8659_v35, %v8661_v18 }
 0x128   : > { %6840 = vmatmul.mubr.msk.bf16.vlgmr.msra.gmra.mrb[0].mxu1 %vm1687_vm12, %v9714_v14  ;;  %v4509_v44 = vrot.slane %v4508_v48, 4  ;;  %v4513_v51 = vrot.slane %v4511_v52, 5  ;;  %v2284_v29 = vrot.slane %v7419_v23, 5  ;;  %v9718_v61 = vcombine.low %v8672_v26, %v8676_v9  ;;  %v7420_v52 = vld [vmem:[#allocation2 + $0x78] sm:$0xf] }
 0x129   : > { %6872 = vmatpush3.bf16.msra.mxu1 %v8640_v38  ;;  %6843 = vmatprep.mubr.msk.bf16.mxu1 %vm1687_vm12, %v6159_v46  ;;  %v8793_v38 = vld [vmem:[#allocation2 + $0xc0] sm:$0xf]  ;;  %v8795_v46 = vld [vmem:[#allocation2 + $0xc4] sm:$0xf]  ;;  %v9719_v10 = vcombine.low %v8681_v31, %v8683_v21  ;;  %v8842_v49 = vsel %vm8069_vm1, %v2279_v63, %v2280_v24  ;;  %v4480_v54 = vsel %vm7720_vm13, %v4475_v43, %v8742_v8  ;;  %v6150_v26 = vrot.slane %v7420_v52, 9 }
 0x12a   : > { %7338 = vmatprep.subr.msk.bf16.mxu1 %vm1736_vm0, %v7417_v11  ;;  %v6319_v1 = vcombine.low %v8793_v38, %v8795_v46  ;;  %v4549_v11 = vshll.u32 %v8508_v2, 16  ;;  %v4490_v48 = vsel %vm7720_vm13, %v4485_v30, %v4489_v28  ;;  %v9720_v9 = vcombine.low %v8696_v59, %v8700_v42  ;;  %v7421_v28 = vld [vmem:[#allocation2 + $0x80] sm:$0x1]  ;;  %v8864_v42 = vld [vmem:[#allocation2 + $0x38] sm:$0x1] }
 0x12b   : > { %6996 = vmatmul.mubr.msk.bf16.gmra.mrb[20].mxu0 %vm1687_vm12, %v9717_v0  ;;  %v9721_v0 = vshrl.u32 %v8483_v32, 16  ;;  %v9722_v24 = vshll.u32 %v8483_v32, 16  ;;  %v9723_v8 = vshrl.u32 %v8485_v39, 16  ;;  %v4504_v30 = vsel %vm7720_vm13, %v4499_v19, %v8758_v27  ;;  %9724 = vst [vmem:[#allocation17_spill] sm:$0xff] %v8864_v42 }
 0x12c   : > { %6999 = vmatprep.mubr.msk.bf16.mxu0 %vm1687_vm12, %v9719_v10  ;;  %v2287_v10 = vrot.slane %v7421_v28, 5  ;;  %v9725_v59 = vshrl.u32 %v8506_v34, 16  ;;  %v8872_v39 = vrot.slane %v4549_v11, 5  ;;  %v8880_v19 = vsel %vm1736_vm0, %v8503_v40, 0  ;;  %v7422_v28 = vld [vmem:[#allocation2 + $0x84] sm:$0xf] }
 0x12d   : > { %v4518_v23 = vrot.slane %v9721_v0, 4  ;;  %v4521_v63 = vrot.slane %v9722_v24, 5  ;;  %v4531_v43 = vrot.slane %v9723_v8, 4  ;;  %v2286_v0 = vrot.slane %v2284_v29, 4 }
 0x12e   : > { %v4542_v52 = vrot.slane %v9725_v59, 4  ;;  %v9727_v24 = vshrl.u32 %v8508_v2, 16  ;;  %v6151_v59 = vrot.slane %v7422_v28, 9  ;;  %v6338_v11 = vcombine.low %v4480_v54, %v4490_v48  ;;  %v7424_v28 = vld [vmem:[#allocation2 + $0x8c] sm:$0x1] }
 0x12f   : > { %v4522_v2 = vor.u32 %v4521_v63, %v4518_v23  ;;  %v4535_v27 = vshll.u32 %v8864_v42, 16  ;;  %v8894_v40 = vsel %vm8069_vm1, %v6150_v26, %v2284_v29  ;;  %v9729_v53 = vcombine.low %v8702_v7, %v8704_v20  ;;  %v7425_v63 = vld [vmem:[#allocation2 + $0x94] sm:$0xf] }
 0x130   : > { %6844 = vmatmul.mubr.msk.bf16.gmra.mrb[4].mxu1 %vm1687_vm12, %v9718_v61  ;;  %v8857_v61 = vrot.slane %v4525_v25, 5  ;;  %v4514_v25 = vsel %vm7720_vm13, %v4509_v44, %v4513_v51  ;;  %v4555_v8 = vrot.slane %v9727_v24, 4  ;;  %v8884_v44 = vld [vmem:[#allocation2 + $0xcc] sm:$0xf]  ;;  %v8886_v51 = vld [vmem:[#allocation2 + $0xd0] sm:$0xf]  ;;  %v8902_v54 = vsel %vm8069_vm1, %v2286_v0, %v2287_v10 }
 0x131   : > { %6847 = vmatprep.mubr.msk.bf16.mxu1 %vm1687_vm12, %v9720_v9  ;;  %v9726_v9 = vshll.u32 %v8506_v34, 16  ;;  %v7423_v34 = vld [vmem:[#allocation2 + $0x88] sm:$0xf]  ;;  %v8890_v14 = vcombine.low %v4504_v30, %v4514_v25  ;;  %v4559_v23 = vshll.u32 %v8882_v58, 16  ;;  %v6320_v29 = vcombine.low %v8884_v44, %v8886_v51  ;;  %v7426_v25 = vld [vmem:[#allocation2 + $0x90] sm:$0xf] }
 0x132   : > { %v4532_v24 = vor.u32 %v4531_v43, %v8857_v61  ;;  %v4556_v48 = vor.u32 %v4555_v8, %v8872_v39  ;;  %v2298_v43 = vrot.slane %v7425_v63, 5  ;;  %v4573_v30 = vshll.u32 %v8518_v62, 16  ;;  %v7427_v8 = vld [vmem:[#allocation2 + $0xa0] sm:$0xf] }
 0x133   : > { %v4545_v32 = vrot.slane %v9726_v9, 5  ;;  %v2291_v9 = vrot.slane %v7423_v34, 5  ;;  %v2294_v34 = vrot.slane %v7424_v28, 5  ;;  %7000 = vmatmul.mubr.msk.bf16.gmra.mrb[24].mxu0 %vm1687_vm12, %v9729_v53  ;;  %v9730_v10 = vcombine.low %v8779_v56, %v8783_v15  ;;  %v7428_v56 = vld [vmem:[#allocation2 + $0x98] sm:$0x1] }
 0x134   : > { %7003 = vmatprep.mubr.msk.bf16.mxu0 %vm1687_vm12, %v6319_v1  ;;  %v6152_v1 = vrot.slane %v7426_v25, 9  ;;  %v2305_v28 = vrot.slane %v7427_v8, 5  ;;  %v9731_v63 = vshrl.u32 %v8516_v55, 16  ;;  %v4557_v42 = vrot.slane %v4556_v48, 4  ;;  %v7430_v8 = vld [vmem:[#allocation2 + $0xa4] sm:$0x1] }
 0x135   : > { %v4546_v4 = vor.u32 %v4545_v32, %v4542_v52  ;;  %v8912_v53 = vsel %vm8069_vm1, %v6151_v59, %v2291_v9  ;;  %v2293_v26 = vrot.slane %v2291_v9, 4  ;;  %v4523_v52 = vrot.slane %v4522_v2, 4 }
 0x136   : > { %v4533_v32 = vrot.slane %v4532_v24, 4  ;;  %v4566_v59 = vrot.slane %v9731_v63, 4  ;;  %v9732_v9 = vshll.u32 %v8516_v55, 16  ;;  %v4561_v6 = vrot.slane %v4559_v23, 5 }
 0x137   : > { %v4547_v0 = vrot.slane %v4546_v4, 4  ;;  %v2300_v33 = vrot.slane %v2298_v43, 4  ;;  %v2301_v15 = vrot.slane %v7428_v56, 5  ;;  %v8925_v2 = vsel %vm8069_vm1, %v2293_v26, %v2294_v34  ;;  %v7429_v34 = vld [vmem:[#allocation2 + $0x9c] sm:$0xf] }
 0x138   : > { %6848 = vmatmul.mubr.msk.bf16.gmra.mrb[8].mxu1 %vm1687_vm12, %v6162_v41  ;;  %v4537_v41 = vrot.slane %v4535_v27, 5  ;;  %v4569_v58 = vrot.slane %v9732_v9, 5  ;;  %v8927_v27 = vrot.slane %v4573_v30, 5  ;;  %v9733_v4 = vshrl.u32 %v8518_v62, 16  ;;  %v8941_v30 = vld [vmem:[#allocation2 + $0x50] sm:$0x1] }
 0x139   : > { %6851 = vmatprep.mubr.msk.bf16.mxu1 %vm1687_vm12, %v9730_v10  ;;  %v4597_v10 = vshll.u32 %v8539_v3, 16  ;;  %v4528_v55 = vsel %vm7720_vm13, %v4523_v52, %v8857_v61  ;;  %v8939_v23 = vsel %vm8069_vm1, %v6152_v1, %v2298_v43  ;;  %v6153_v26 = vrot.slane %v7429_v34, 9  ;;  %v8953_v52 = vld [vmem:[#allocation2 + $0x5c] sm:$0x1] }
 0x13a   : > { %v4579_v24 = vrot.slane %v9733_v4, 4  ;;  %v4538_v48 = vsel %vm7720_vm13, %v4533_v32, %v4537_v41  ;;  %v4552_v62 = vsel %vm7720_vm13, %v4547_v0, %v8872_v39  ;;  %v2307_v25 = vrot.slane %v2305_v28, 4  ;;  %v7431_v4 = vld [vmem:[#allocation2 + $0xac] sm:$0xf] }
 0x13b   : > { %v2308_v63 = vrot.slane %v7430_v8, 5  ;;  %v4570_v9 = vor.u32 %v4569_v58, %v4566_v59  ;;  %7004 = vmatmul.mubr.msk.bf16.gmra.mrb[28].mxu0 %vm1687_vm12, %v6320_v29  ;;  %v4562_v61 = vsel %vm7720_vm13, %v4557_v42, %v4561_v6  ;;  %v8951_v43 = vsel %vm8069_vm1, %v2300_v33, %v2301_v15 }
 0x13c   : > { %v9734_v32 = vshrl.u32 %v8537_v12, 16  ;;  %v9735_v39 = vshll.u32 %v8537_v12, 16  ;;  %v9736_v58 = vcombine.low %v8787_v22, %v8791_v16  ;;  %7009 = vmatprep.mubr.msk.bf16.mxu0 %vm1687_vm12, %v6338_v11  ;;  %v4580_v6 = vor.u32 %v4579_v24, %v8927_v27 }
 0x13d   : > { %v4583_v33 = vshll.u32 %v8941_v30, 16  ;;  %v8966_v42 = vrot.slane %v4597_v10, 5  ;;  %v9737_v29 = vshrl.u32 %v8539_v3, 16  ;;  %v9738_v12 = vcombine.low %v8799_v50, %v8808_v13 }
 0x13e   : > { %v4590_v41 = vrot.slane %v9734_v32, 4  ;;  %v4593_v1 = vrot.slane %v9735_v39, 5  ;;  %v6167_v22 = vcombine.low %v8894_v40, %v8902_v54  ;;  %v6168_v16 = vcombine.low %v8912_v53, %v8925_v2  ;;  %v7433_v39 = vld [vmem:[#allocation2 + $0xb0] sm:$0x1] }
 0x13f   : > { %v4603_v0 = vrot.slane %v9737_v29, 4  ;;  %v6340_v11 = vcombine.low %v4528_v55, %v4538_v48  ;;  %v4621_v59 = vshll.u32 %v8553_v45, 16  ;;  %v8981_v56 = vsel %vm8069_vm1, %v6153_v26, %v2305_v28  ;;  %v7432_v28 = vld [vmem:[#allocation2 + $0xa8] sm:$0xf] }
 0x140   : > { %6852 = vmatmul.mubr.msk.bf16.gmra.mrb[12].mxu1 %vm1687_vm12, %v9736_v58  ;;  %v8985_v3 = vsel %vm8069_vm1, %v2307_v25, %v2308_v63  ;;  %v4571_v50 = vrot.slane %v4570_v9, 4  ;;  %v4607_v13 = vshll.u32 %v8953_v52, 16  ;;  %v6341_v15 = vcombine.low %v4552_v62, %v4562_v61  ;;  %v9002_v58 = vld [vmem:[#allocation2 + $0x68] sm:$0x1] }
 0x141   : > { %6855 = vmatprep.mubr.msk.bf16.mxu1 %vm1687_vm12, %v9738_v12  ;;  %v6169_v40 = vcombine.low %v8939_v23, %v8951_v43  ;;  %v4594_v54 = vor.u32 %v4593_v1, %v4590_v41  ;;  %v2312_v24 = vrot.slane %v7431_v4, 5  ;;  %v4581_v10 = vrot.slane %v4580_v6, 4  ;;  %v9742_v6 = vld [vmem:[#allocation12_spill] sm:$0xff]  ;;  %v9757_v23 = vld [vmem:[#allocation7_spill] sm:$0xff] }
 0x142   : > { %v4585_v55 = vrot.slane %v4583_v33, 5  ;;  %v4604_v48 = vor.u32 %v4603_v0, %v8966_v42  ;;  %v6154_v34 = vrot.slane %v7432_v28, 9  ;;  %v9739_v26 = vshrl.u32 %v8545_v17, 16  ;;  %v9743_v0 = vld [vmem:[#allocation8_spill] sm:$0xff] }
 0x143   : > { %v9740_v8 = vshll.u32 %v8545_v17, 16  ;;  %v8995_v9 = vrot.slane %v4621_v59, 5  ;;  %v9741_v62 = vshrl.u32 %v8553_v45, 16  ;;  %v4576_v32 = vsel %vm7720_vm13, %v4571_v50, %v8927_v27  ;;  %7010 = vmatmul.mubr.msk.bf16.vlgmr.msra.gmra.mrb[0].mxu0 %vm1687_vm12, %v8890_v14  ;;  %v9744_v45 = vld [vmem:[#allocation9_spill] sm:$0xff]  ;;  %v9746_v14 = vld [vmem:[#allocation10_spill] sm:$0xff] }
 0x144   : > { %v4614_v25 = vrot.slane %v9739_v26, 4  ;;  %v4609_v41 = vrot.slane %v4607_v13, 5  ;;  %v2315_v1 = vrot.slane %v7433_v39, 5  ;;  %v4645_v33 = vshll.u32 %v9742_v6, 16  ;;  %7042 = vmatpush3.bf16.msra.mxu0 %v8880_v19  ;;  %7013 = vmatprep.mubr.msk.bf16.mxu0 %vm1687_vm12, %v6340_v11 }
 0x145   : > { %v4617_v63 = vrot.slane %v9740_v8, 5  ;;  %v4627_v61 = vrot.slane %v9741_v62, 4  ;;  %v4595_v17 = vrot.slane %v4594_v54, 4  ;;  %v2314_v29 = vrot.slane %v2312_v24, 4  ;;  %v9747_v54 = vld [vmem:[#allocation14_spill] sm:$0xff]  ;;  %v9748_v8 = vld [vmem:[#allocation11_spill] sm:$0xff] }
 0x146   : > { %v6155_v12 = vrot.slane %v9743_v0, 9  ;;  %v2319_v59 = vrot.slane %v9744_v45, 5  ;;  %v9745_v4 = vcombine.low %v8825_v36, %v8842_v49  ;;  %v4586_v27 = vsel %vm7720_vm13, %v4581_v10, %v4585_v55  ;;  %v9752_v45 = vld [vmem:[#allocation13_spill] sm:$0xff] }
 0x147   : > { %v9018_v50 = vsel %vm8069_vm1, %v6154_v34, %v2312_v24  ;;  %v2322_v13 = vrot.slane %v9746_v14, 5  ;;  %v4669_v28 = vshll.u32 %v9747_v54, 16  ;;  %v4605_v36 = vrot.slane %v4604_v48, 4 }
 0x148   : > { %6856 = vmatmul.mubr.msk.bf16.gmra.mrb[16].mxu1 %vm1687_vm12, %v9745_v4  ;;  %v4618_v49 = vor.u32 %v4617_v63, %v4614_v25  ;;  %v4628_v26 = vor.u32 %v4627_v61, %v8995_v9  ;;  %v4631_v19 = vshll.u32 %v9002_v58, 16  ;;  %v9749_v10 = vshrl.u32 %v9748_v8, 16  ;;  %v9041_v63 = vld [vmem:[#allocation2 + $0x74] sm:$0x1] }
 0x149   : > { %6859 = vmatprep.mubr.msk.bf16.mxu1 %vm1687_vm12, %v6167_v22  ;;  %v9750_v24 = vshll.u32 %v9748_v8, 16  ;;  %v9030_v62 = vrot.slane %v4645_v33, 5  ;;  %v9751_v39 = vshrl.u32 %v9742_v6, 16  ;;  %v6342_v22 = vcombine.low %v4576_v32, %v4586_v27  ;;  %v555_v61 = vld [vmem:[#allocation2 + $0xd4] sm:$0x1] }
 0x14a   : > { %v4638_v55 = vrot.slane %v9749_v10, 4  ;;  %v4600_v11 = vsel %vm7720_vm13, %v4595_v17, %v8966_v42  ;;  %v9039_v48 = vsel %vm8069_vm1, %v2314_v29, %v2315_v1  ;;  %v2321_v25 = vrot.slane %v2319_v59, 4  ;;  %v9053_v10 = vld [vmem:[#allocation2 + $0x80] sm:$0x1] }
 0x14b   : > { %v4641_v34 = vrot.slane %v9750_v24, 5  ;;  %v4651_v0 = vrot.slane %v9751_v39, 4  ;;  %v9753_v4 = vshrl.u32 %v9752_v45, 16  ;;  %v9754_v14 = vshll.u32 %v9752_v45, 16  ;;  %7014 = vmatmul.mubr.msk.bf16.gmra.mrb[4].mxu0 %vm1687_vm12, %v6341_v15 }
 0x14c   : > { %v9047_v8 = vrot.slane %v4669_v28, 5  ;;  %v9755_v32 = vshrl.u32 %v9747_v54, 16  ;;  %v4610_v42 = vsel %vm7720_vm13, %v4605_v36, %v4609_v41  ;;  %v4619_v1 = vrot.slane %v4618_v49, 4  ;;  %7017 = vmatprep.mubr.msk.bf16.mxu0 %vm1687_vm12, %v6342_v22 }
 0x14d   : > { %v4662_v33 = vrot.slane %v9753_v4, 4  ;;  %v4665_v6 = vrot.slane %v9754_v14, 5  ;;  %v4629_v17 = vrot.slane %v4628_v26, 4  ;;  %v4633_v29 = vrot.slane %v4631_v19, 5 }
 0x14e   : > { %v4675_v27 = vrot.slane %v9755_v32, 4  ;;  %v4642_v24 = vor.u32 %v4641_v34, %v4638_v55  ;;  %v4652_v39 = vor.u32 %v4651_v0, %v9030_v62  ;;  %v4655_v4 = vshll.u32 %v9041_v63, 16 }
 0x14f   : > { %v556_v28 = vsel %vm7607_vm5, 0, %v555_v61  ;;  %v4793_v14 = vshrl.u32 %v8704_v20, 16  ;;  %v6170_v41 = vcombine.low %v8981_v56, %v8985_v3  ;;  %v6171_v54 = vcombine.low %v9018_v50, %v9039_v48 }
 0x150   : > { %v4693_v36 = vshll.u32 %v8608_v5, 16  ;;  %557 = vst [vmem:[#allocation2 + $0xd4] sm:$0x1] %v556_v28  ;;  %6860 = vmatmul.mubr.msk.bf16.gmra.mrb[20].mxu1 %vm1687_vm12, %v6168_v16  ;;  %v9073_v49 = vsel %vm8069_vm1, %v6155_v12, %v2319_v59  ;;  %v4666_v15 = vor.u32 %v4665_v6, %v4662_v33  ;;  %v4676_v56 = vor.u32 %v4675_v27, %v9047_v8 }
 0x151   : > { %v4679_v3 = vshll.u32 %v9053_v10, 16  ;;  %6863 = vmatprep.mubr.msk.bf16.mxu1 %vm1687_vm12, %v6169_v40  ;;  %v6343_v50 = vcombine.low %v4600_v11, %v4610_v42  ;;  %v4624_v53 = vsel %vm7720_vm13, %v4619_v1, %v8995_v9  ;;  %v4634_v2 = vsel %vm7720_vm13, %v4629_v17, %v4633_v29 }
 0x152   : > { %v4717_v16 = vshll.u32 %v8642_v37, 16  ;;  %v9089_v12 = vsel %vm8069_vm1, %v2321_v25, %v2322_v13  ;;  %v4643_v59 = vrot.slane %v4642_v24, 4  ;;  %v4653_v26 = vrot.slane %v4652_v39, 4  ;;  %v9099_v13 = vld [vmem:[#allocation2 + $0x8c] sm:$0x1] }
 0x153   : > { %v4657_v19 = vrot.slane %v4655_v4, 5  ;;  %v9758_v43 = vshrl.u32 %v9757_v23, 16  ;;  %v9759_v55 = vshll.u32 %v9757_v23, 16  ;;  %v9095_v0 = vrot.slane %v4693_v36, 5  ;;  %v9115_v39 = vld [vmem:[#allocation2 + $0x98] sm:$0x1]  ;;  %7018 = vmatmul.mubr.msk.bf16.gmra.mrb[8].mxu0 %vm1687_vm12, %v6343_v50 }
 0x154   : > { %v9760_v9 = vshrl.u32 %v8608_v5, 16  ;;  %v6344_v11 = vcombine.low %v4624_v53, %v4634_v2  ;;  %v4667_v48 = vrot.slane %v4666_v15, 4  ;;  %v4677_v61 = vrot.slane %v4676_v56, 4  ;;  %v9764_v36 = vld [vmem:[#allocation6_spill] sm:$0xff]  ;;  %v7437_v56 = vld [vmem:[#allocation2 + $0x1c] sm:$0xf] }
 0x155   : > { %v4686_v40 = vrot.slane %v9758_v43, 4  ;;  %v4689_v34 = vrot.slane %v9759_v55, 5  ;;  %v4681_v33 = vrot.slane %v4679_v3, 5  ;;  %v9761_v25 = vshrl.u32 %v8647_v47, 16 }
 0x156   : > { %v4699_v22 = vrot.slane %v9760_v9, 4  ;;  %v9762_v32 = vshll.u32 %v8647_v47, 16  ;;  %v9105_v42 = vrot.slane %v4717_v16, 5  ;;  %v9763_v1 = vshrl.u32 %v8642_v37, 16  ;;  %7021 = vmatprep.mubr.msk.bf16.mxu0 %vm1687_vm12, %v6344_v11 }
 0x157   : > { %v4710_v6 = vrot.slane %v9761_v25, 4  ;;  %v4804_v5 = vshrl.u32 %v8793_v38, 16  ;;  %v4648_v29 = vsel %vm7720_vm13, %v4643_v59, %v9030_v62  ;;  %v4658_v24 = vsel %vm7720_vm13, %v4653_v26, %v4657_v19  ;;  %v1198_v47 = vld [vmem:[#allocation2 + $0xd4] sm:$0x1] }
 0x158   : > { %v4713_v27 = vrot.slane %v9762_v32, 5  ;;  %v4723_v17 = vrot.slane %v9763_v1, 4  ;;  %v4741_v4 = vshll.u32 %v8661_v18, 16  ;;  %v4690_v45 = vor.u32 %v4689_v34, %v4686_v40  ;;  %6864 = vmatmul.mubr.msk.bf16.gmra.mrb[24].mxu1 %vm1687_vm12, %v6170_v41  ;;  %v7434_v32 = vld [vmem:[#allocation2 + $0xc] sm:$0xf] }
 0x159   : > { %v4700_v37 = vor.u32 %v4699_v22, %v9095_v0  ;;  %v4703_v28 = vshll.u32 %v9099_v13, 16  ;;  %v9765_v15 = vrot.slane %v9764_v36, 4  ;;  %v6172_v3 = vcombine.low %v9073_v49, %v9089_v12  ;;  %6867 = vmatprep.mubr.msk.bf16.mxu1 %vm1687_vm12, %v6171_v54  ;;  %v9146_v22 = vld [vmem:[#allocation2 + $0xa4] sm:$0x1] }
 0x15a   : > { %v4672_v50 = vsel %vm7720_vm13, %v4667_v48, %v9047_v8  ;;  %v4682_v53 = vsel %vm7720_vm13, %v4677_v61, %v4681_v33  ;;  %v4765_v2 = vshll.u32 %v8683_v21, 16  ;;  %v6345_v16 = vcombine.low %v4648_v29, %v4658_v24  ;;  %v9156_v24 = vld [vmem:[#allocation2 + $0xb0] sm:$0x1] }
 0x15b   : > { %v1199_v62 = vsel %vm7600_vm3, %v9765_v15, %v1198_v47  ;;  %v4714_v59 = vor.u32 %v4713_v27, %v4710_v6  ;;  %v4724_v41 = vor.u32 %v4723_v17, %v9105_v42  ;;  %v4727_v49 = vshll.u32 %v9115_v39, 16  ;;  %v7436_v15 = vld [vmem:[#allocation2 + $0x18] sm:$0xf] }
 0x15c   : > { %1200 = vst [vmem:[#allocation2 + $0xd4] sm:$0x1] %v1199_v62  ;;  %v9767_v12 = vshrl.u32 %v8659_v35, 16  ;;  %v9768_v19 = vshll.u32 %v8659_v35, 16  ;;  %v9142_v23 = vrot.slane %v4741_v4, 5  ;;  %v9769_v43 = vshrl.u32 %v8661_v18, 16  ;;  %7022 = vmatmul.mubr.msk.bf16.gmra.mrb[12].mxu0 %vm1687_vm12, %v6345_v16 }
 0x15d   : > { %v6346_v55 = vcombine.low %v4672_v50, %v4682_v53  ;;  %v4691_v34 = vrot.slane %v4690_v45, 4  ;;  %v4701_v54 = vrot.slane %v4700_v37, 4  ;;  %v4705_v9 = vrot.slane %v4703_v28, 5  ;;  %v7435_v18 = vld [vmem:[#allocation2 + $0x10] sm:$0xf] }
 0x15e   : > { %v4734_v26 = vrot.slane %v9767_v12, 4  ;;  %v4737_v8 = vrot.slane %v9768_v19, 5  ;;  %v4747_v40 = vrot.slane %v9769_v43, 4  ;;  %v9770_v11 = vshrl.u32 %v8681_v31, 16  ;;  %v7439_v16 = vld [vmem:[#allocation2 + $0x28] sm:$0xf] }
 0x15f   : > { %v9771_v61 = vshll.u32 %v8681_v31, 16  ;;  %v9152_v25 = vrot.slane %v4765_v2, 5  ;;  %v9772_v35 = vshrl.u32 %v8683_v21, 16  ;;  %v6190_v27 = vcombine.low %v7434_v32, %v7435_v18  ;;  %7025 = vmatprep.mubr.msk.bf16.mxu0 %vm1687_vm12, %v6346_v55 }
 0x160   : > { %v4758_v48 = vrot.slane %v9770_v11, 4  ;;  %v4715_v1 = vrot.slane %v4714_v59, 4  ;;  %v4725_v17 = vrot.slane %v4724_v41, 4  ;;  %v4729_v29 = vrot.slane %v4727_v49, 5  ;;  %6868 = vmatmul.mubr.msk.bf16.gmra.mrb[28].mxu1 %vm1687_vm12, %v6172_v3 }
 0x161   : > { %v4761_v33 = vrot.slane %v9771_v61, 5  ;;  %v4771_v6 = vrot.slane %v9772_v35, 4  ;;  %v4807_v4 = vshll.u32 %v8793_v38, 16  ;;  %v4738_v47 = vor.u32 %v4737_v8, %v4734_v26  ;;  %6873 = vmatprep.mubr.msk.bf16.mxu1 %vm1687_vm12, %v6190_v27 }
 0x162   : > { %v4748_v45 = vor.u32 %v4747_v40, %v9142_v23  ;;  %v4751_v31 = vshll.u32 %v9146_v22, 16  ;;  %v4817_v37 = vshrl.u32 %v8795_v46, 16  ;;  %v4696_v21 = vsel %vm7720_vm13, %v4691_v34, %v9095_v0  ;;  %v7438_v0 = vld [vmem:[#allocation2 + $0x24] sm:$0xf] }
 0x163   : > { %v4706_v28 = vsel %vm7720_vm13, %v4701_v54, %v4705_v9  ;;  %v4789_v36 = vshll.u32 %v8704_v20, 16  ;;  %v6191_v62 = vcombine.low %v7436_v15, %v7437_v56  ;;  %v4762_v50 = vor.u32 %v4761_v33, %v4758_v48 }
 0x164   : > { %v4772_v53 = vor.u32 %v4771_v6, %v9152_v25  ;;  %v4775_v2 = vshll.u32 %v9156_v24, 16  ;;  %v6192_v59 = vcombine.low %v7438_v0, %v7439_v16  ;;  %v4720_v41 = vsel %vm7720_vm13, %v4715_v1, %v9105_v42  ;;  %v7442_v0 = vld [vmem:[#allocation2 + $0x3c] sm:$0xf]  ;;  %v7443_v16 = vld [vmem:[#allocation2 + $0x40] sm:$0xf] }
 0x165   : > { %v4730_v3 = vsel %vm7720_vm13, %v4725_v17, %v4729_v29  ;;  %v4813_v49 = vshll.u32 %v8795_v46, 16  ;;  %v6347_v12 = vcombine.low %v4696_v21, %v4706_v28  ;;  %v4739_v26 = vrot.slane %v4738_v47, 4  ;;  %v9188_v46 = vld [vmem:[#allocation2 + $0xbc] sm:$0x1]  ;;  %v7441_v21 = vld [vmem:[#allocation2 + $0x34] sm:$0xf] }
 0x166   : > { %v4749_v19 = vrot.slane %v4748_v45, 4  ;;  %v4753_v8 = vrot.slane %v4751_v31, 5  ;;  %v9773_v43 = vshrl.u32 %v8702_v7, 16  ;;  %v9774_v55 = vshll.u32 %v8702_v7, 16  ;;  %v9775_v47 = vld [vmem:[#allocation3_spill] sm:$0xff] }
 0x167   : > { %v9184_v54 = vrot.slane %v4789_v36, 5  ;;  %v4795_v42 = vrot.slane %v4793_v14, 4  ;;  %v6348_v9 = vcombine.low %v4720_v41, %v4730_v3  ;;  %v4763_v11 = vrot.slane %v4762_v50, 4  ;;  %v9199_v14 = vld [vmem:[#allocation2 + $0xc8] sm:$0x1]  ;;  %7026 = vmatmul.mubr.msk.bf16.gmra.mrb[16].mxu0 %vm1687_vm12, %v6347_v12 }
 0x168   : > { %v4782_v40 = vrot.slane %v9773_v43, 4  ;;  %v4785_v34 = vrot.slane %v9774_v55, 5  ;;  %v4773_v48 = vrot.slane %v4772_v53, 4  ;;  %v4777_v61 = vrot.slane %v4775_v2, 5  ;;  %6874 = vmatmul.mubr.msk.bf16.vlgmr.msra.gmra.mrb[0].mxu1 %vm1687_vm12, %v6191_v62  ;;  %v9221_v12 = vld [vmem:[#allocation2 + $0xd4] sm:$0x1] }
 0x169   : > { %v4806_v33 = vrot.slane %v4804_v5, 4  ;;  %v4809_v35 = vrot.slane %v4807_v4, 5  ;;  %v9192_v6 = vrot.slane %v4813_v49, 5  ;;  %v4819_v32 = vrot.slane %v4817_v37, 4  ;;  %7029 = vmatprep.mubr.msk.bf16.mxu0 %vm1687_vm12, %v6348_v9  ;;  %7076 = vmatpush3.bf16.msra.mxu1 %v9775_v47  ;;  %v7440_v37 = vld [vmem:[#allocation2 + $0x30] sm:$0xf] }
 0x16a   : > { %v4828_v7 = vshrl.u32 %v8884_v44, 16  ;;  %v4841_v18 = vshrl.u32 %v8886_v51, 16  ;;  %v4744_v20 = vsel %vm7720_vm13, %v4739_v26, %v9142_v23  ;;  %v4754_v38 = vsel %vm7720_vm13, %v4749_v19, %v4753_v8  ;;  %6877 = vmatprep.mubr.msk.bf16.mxu1 %vm1687_vm12, %v6192_v59  ;;  %v9239_v9 = vld [vmem:[#allocation2 + $0x78] sm:$0xf] }
 0x16b   : > { %v4786_v5 = vor.u32 %v4785_v34, %v4782_v40  ;;  %v4796_v27 = vor.u32 %v4795_v42, %v9184_v54  ;;  %v4799_v1 = vshll.u32 %v9188_v46, 16  ;;  %v4831_v17 = vshll.u32 %v8884_v44, 16 }
 0x16c   : > { %v4768_v23 = vsel %vm7720_vm13, %v4763_v11, %v9152_v25  ;;  %v4778_v29 = vsel %vm7720_vm13, %v4773_v48, %v4777_v61  ;;  %v4837_v4 = vshll.u32 %v8886_v51, 16  ;;  %v4810_v45 = vor.u32 %v4809_v35, %v4806_v33  ;;  %v9243_v61 = vld [vmem:[#allocation2 + $0x7c] sm:$0xf]  ;;  %v7447_v35 = vld [vmem:[#allocation2 + $0x48] sm:$0xf] }
 0x16d   : > { %v4820_v44 = vor.u32 %v4819_v32, %v9192_v6  ;;  %v4823_v31 = vshll.u32 %v9199_v14, 16  ;;  %v6193_v28 = vcombine.low %v7440_v37, %v7441_v21  ;;  %v6349_v36 = vcombine.low %v4744_v20, %v4754_v38  ;;  %v7448_v32 = vld [vmem:[#allocation2 + $0x4c] sm:$0xf]  ;;  %v7453_v21 = vld [vmem:[#allocation2 + $0x34] sm:$0xf] }
 0x16e   : > { %v6350_v15 = vcombine.low %v4768_v23, %v4778_v29  ;;  %v4787_v25 = vrot.slane %v4786_v5, 4  ;;  %v4797_v56 = vrot.slane %v4796_v27, 4  ;;  %v4801_v62 = vrot.slane %v4799_v1, 5  ;;  %v7451_v23 = vld [vmem:[#allocation2 + $0x58] sm:$0xf] }
 0x16f   : > { %v4830_v50 = vrot.slane %v4828_v7, 4  ;;  %v4833_v53 = vrot.slane %v4831_v17, 5  ;;  %v9219_v51 = vrot.slane %v4837_v4, 5  ;;  %v4843_v2 = vrot.slane %v4841_v18, 4  ;;  %7030 = vmatmul.mubr.msk.bf16.gmra.mrb[20].mxu0 %vm1687_vm12, %v6349_v36  ;;  %v7450_v17 = vld [vmem:[#allocation2 + $0x54] sm:$0xf] }
 0x170   : > { %v6194_v59 = vcombine.low %v7442_v0, %v7443_v16  ;;  %v4811_v41 = vrot.slane %v4810_v45, 4  ;;  %v4821_v3 = vrot.slane %v4820_v44, 4  ;;  %v4825_v49 = vrot.slane %v4823_v31, 5  ;;  %6878 = vmatmul.mubr.msk.bf16.gmra.mrb[4].mxu1 %vm1687_vm12, %v6193_v28  ;;  %7033 = vmatprep.mubr.msk.bf16.mxu0 %vm1687_vm12, %v6350_v15  ;;  %v7452_v4 = vld [vmem:[#allocation2 + $0x18] sm:$0xf] }
 0x171   : > { %v4792_v26 = vsel %vm7720_vm13, %v4787_v25, %v9184_v54  ;;  %v4802_v19 = vsel %vm7720_vm13, %v4797_v56, %v4801_v62  ;;  %v4834_v8 = vor.u32 %v4833_v53, %v4830_v50  ;;  %v4844_v43 = vor.u32 %v4843_v2, %v9219_v51  ;;  %v7444_v54 = vld [vmem:[#allocation2 + $0x1c] sm:$0xf]  ;;  %v7454_v36 = vld [vmem:[#allocation2 + $0x24] sm:$0xf]  ;;  %v7455_v53 = vld [vmem:[#allocation2 + $0x80] sm:$0x1] }
 0x172   : > { %v4847_v40 = vshll.u32 %v9221_v12, 16  ;;  %6881 = vmatprep.mubr.msk.bf16.mxu1 %vm1687_vm12, %v6194_v59  ;;  %v4816_v55 = vsel %vm7720_vm13, %v4811_v41, %v9192_v6  ;;  %v4826_v34 = vsel %vm7720_vm13, %v4821_v3, %v4825_v49  ;;  %v5163_v42 = vrot.slane %v7444_v54, 5  ;;  %v7449_v6 = vld [vmem:[#allocation2 + $0x28] sm:$0xf]  ;;  %v9776_v44 = vld [vmem:[#allocation15_spill] sm:$0xff]  ;;  %v9777_v56 = vld [vmem:[#allocation16_spill] sm:$0xff] }
 0x173   : > { %v3209_v11 = vshrl.u32 %v9239_v9, 16  ;;  %v3212_v48 = vshll.u32 %v9239_v9, 16  ;;  %v3218_v33 = vshll.u32 %v9243_v61, 16  ;;  %v6195_v7 = vcombine.low %v7447_v35, %v7448_v32  ;;  %v7459_v35 = vld [vmem:[#allocation2 + $0x64] sm:$0xf] }
 0x174   : > { %v6351_v18 = vcombine.low %v4792_v26, %v4802_v19  ;;  %v5170_v20 = vrot.slane %v7449_v6, 5  ;;  %v6352_v38 = vcombine.low %v4816_v55, %v4826_v34  ;;  %v4835_v5 = vrot.slane %v4834_v8, 4  ;;  %v7456_v19 = vld [vmem:[#allocation2 + $0x30] sm:$0xf] }
 0x175   : > { %v4845_v27 = vrot.slane %v4844_v43, 4  ;;  %v4849_v1 = vrot.slane %v4847_v40, 5  ;;  %v6196_v29 = vcombine.low %v7450_v17, %v7451_v23  ;;  %v6370_v47 = vrot.slane %v7452_v4, 9  ;;  %v9778_v43 = vld [vmem:[#allocation17_spill] sm:$0xff]  ;;  %v9295_v17 = vld [vmem:[#allocation2 + $0x90] sm:$0xf] }
 0x176   : > { %v5165_v45 = vrot.slane %v5163_v42, 4  ;;  %v5166_v31 = vrot.slane %v9776_v44, 5  ;;  %v3222_v37 = vshrl.u32 %v9243_v61, 16  ;;  %v5177_v28 = vrot.slane %v7453_v21, 5  ;;  %v9297_v23 = vld [vmem:[#allocation2 + $0x94] sm:$0xf] }
 0x177   : > { %7034 = vmatmul.mubr.msk.bf16.gmra.mrb[24].mxu0 %vm1687_vm12, %v6351_v18  ;;  %v6371_v15 = vrot.slane %v7454_v36, 9  ;;  %v5172_v25 = vrot.slane %v5170_v20, 4  ;;  %v5173_v62 = vrot.slane %v9777_v56, 5  ;;  %v9250_v50 = vrot.slane %v3209_v11, 4  ;;  %v9283_v18 = vld [vmem:[#allocation2 + $0x70] sm:$0xf] }
 0x178   : > { %v3228_v2 = vshll.u32 %v7455_v53, 16  ;;  %6882 = vmatmul.mubr.msk.bf16.gmra.mrb[8].mxu1 %vm1687_vm12, %v6195_v7  ;;  %7037 = vmatprep.mubr.msk.bf16.mxu0 %vm1687_vm12, %v6352_v38  ;;  %v4840_v0 = vsel %vm7720_vm13, %v4835_v5, %v9219_v51  ;;  %v4850_v16 = vsel %vm7720_vm13, %v4845_v27, %v4849_v1  ;;  %v9259_v59 = vrot.slane %v3212_v48, 5  ;;  %v9281_v7 = vld [vmem:[#allocation2 + $0x6c] sm:$0xf]  ;;  %v9289_v5 = vld [vmem:[#allocation2 + $0x84] sm:$0xf] }
 0x179   : > { %v9261_v41 = vrot.slane %v3218_v33, 5  ;;  %6885 = vmatprep.mubr.msk.bf16.mxu1 %vm1687_vm12, %v6196_v29  ;;  %v5164_v3 = vsel %vm8069_vm1, %v6370_v47, %v5163_v42  ;;  %v5167_v49 = vsel %vm8069_vm1, %v5165_v45, %v5166_v31  ;;  %v9268_v26 = vrot.slane %v3222_v37, 4  ;;  %v7457_v42 = vld [vmem:[#allocation2 + $0x40] sm:$0xf]  ;;  %v9291_v27 = vld [vmem:[#allocation2 + $0x88] sm:$0xf] }
 0x17a   : > { %v6372_v8 = vrot.slane %v7456_v19, 9  ;;  %v5179_v51 = vrot.slane %v5177_v28, 4  ;;  %v5180_v40 = vrot.slane %v9778_v43, 5  ;;  %v6353_v55 = vcombine.low %v4840_v0, %v4850_v16  ;;  %v7458_v33 = vld [vmem:[#allocation2 + $0x60] sm:$0xf] }
 0x17b   : > { %v9273_v34 = vsel %vm8069_vm1, %v6371_v15, %v5170_v20  ;;  %v9277_v54 = vsel %vm8069_vm1, %v5172_v25, %v5173_v62  ;;  %v5184_v11 = vrot.slane %v7457_v42, 5  ;;  %v9279_v48 = vrot.slane %v3228_v2, 5  ;;  %v7466_v4 = vld [vmem:[#allocation2 + $0x3c] sm:$0xf]  ;;  %v7467_v37 = vld [vmem:[#allocation2 + $0x4c] sm:$0xf] }
 0x17c   : > { %v6197_v32 = vcombine.low %v7458_v33, %v7459_v35  ;;  %v6198_v6 = vcombine.low %v9281_v7, %v9283_v18  ;;  %v6387_v20 = vcombine.low %v5164_v3, %v5167_v49  ;;  %v6199_v38 = vcombine.low %v9239_v9, %v9243_v61  ;;  %v9779_v15 = vld [vmem:[#allocation18_spill] sm:$0xff]  ;;  %v9309_v56 = vld [vmem:[#allocation2 + $0x9c] sm:$0xf]  ;;  %v9311_v62 = vld [vmem:[#allocation2 + $0xa0] sm:$0xf] }
 0x17d   : > { %v6200_v1 = vcombine.low %v9289_v5, %v9291_v27  ;;  %v6201_v29 = vcombine.low %v9295_v17, %v9297_v23  ;;  %v6373_v47 = vrot.slane %v7466_v4, 9  ;;  %v6388_v45 = vcombine.low %v9273_v34, %v9277_v54  ;;  %v7470_v2 = vld [vmem:[#allocation2 + $0x58] sm:$0xf]  ;;  %v9319_v16 = vld [vmem:[#allocation2 + $0xa8] sm:$0xf] }
 0x17e   : > { %v5178_v44 = vsel %vm8069_vm1, %v6372_v8, %v5177_v28  ;;  %v5181_v31 = vsel %vm8069_vm1, %v5179_v51, %v5180_v40  ;;  %v5191_v21 = vrot.slane %v7467_v37, 5  ;;  %v5186_v36 = vrot.slane %v5184_v11, 4  ;;  %v9317_v28 = vld [vmem:[#allocation2 + $0xac] sm:$0xf]  ;;  %v7473_v49 = vld [vmem:[#allocation2 + $0x48] sm:$0xf] }
 0x17f   : > { %7038 = vmatmul.mubr.msk.bf16.gmra.mrb[28].mxu0 %vm1687_vm12, %v6353_v55  ;;  %v5187_v25 = vrot.slane %v9779_v15, 5  ;;  %v6202_v53 = vcombine.low %v9309_v56, %v9311_v62  ;;  %v5198_v0 = vrot.slane %v7470_v2, 5  ;;  %v6203_v3 = vcombine.low %v9319_v16, %v9317_v28  ;;  %v7474_v51 = vld [vmem:[#allocation2 + $0x64] sm:$0xf]  ;;  %v7475_v34 = vld [vmem:[#allocation2 + $0x54] sm:$0xf] }
 0x180   : > { %6886 = vmatmul.mubr.msk.bf16.gmra.mrb[12].mxu1 %vm1687_vm12, %v6197_v32  ;;  %7043 = vmatprep.mubr.msk.bf16.mxu0 %vm1687_vm12, %v6387_v20  ;;  %v6374_v19 = vrot.slane %v7473_v49, 9  ;;  %v5194_v8 = vrot.slane %v8941_v30, 5  ;;  %v5205_v43 = vrot.slane %v7474_v51, 5  ;;  %v6389_v40 = vcombine.low %v5178_v44, %v5181_v31  ;;  %v7476_v42 = vld [vmem:[#allocation2 + $0x70] sm:$0xf] }
 0x181   : > { %6889 = vmatprep.mubr.msk.bf16.mxu1 %vm1687_vm12, %v6198_v6  ;;  %v9327_v55 = vsel %vm8069_vm1, %v6373_v47, %v5184_v11  ;;  %v6375_v54 = vrot.slane %v7475_v34, 9  ;;  %v5212_v33 = vrot.slane %v7476_v42, 5  ;;  %v5193_v35 = vrot.slane %v5191_v21, 4  ;;  %v7477_v44 = vld [vmem:[#allocation2 + $0x60] sm:$0xf] }
 0x182   : > { %v5201_v32 = vrot.slane %v8953_v52, 5  ;;  %v3185_v20 = vshrl.u32 %v9281_v7, 16  ;;  %v3188_v30 = vshll.u32 %v9281_v7, 16  ;;  %v5188_v4 = vsel %vm8069_vm1, %v5186_v36, %v5187_v25  ;;  %v7478_v37 = vld [vmem:[#allocation2 + $0x6c] sm:$0xf] }
 0x183   : > { %v5200_v6 = vrot.slane %v5198_v0, 4  ;;  %v6376_v31 = vrot.slane %v7477_v44, 9  ;;  %v5208_v11 = vrot.slane %v9002_v58, 5  ;;  %v5207_v47 = vrot.slane %v5205_v43, 4  ;;  %v9339_v51 = vld [vmem:[#allocation2 + $0xb8] sm:$0xf] }
 0x184   : > { %v6377_v15 = vrot.slane %v7478_v37, 9  ;;  %v3194_v2 = vshll.u32 %v9283_v18, 16  ;;  %v3198_v49 = vshrl.u32 %v9283_v18, 16  ;;  %v5192_v52 = vsel %vm8069_vm1, %v6374_v19, %v5191_v21  ;;  %v9341_v7 = vld [vmem:[#allocation2 + $0xb4] sm:$0xf] }
 0x185   : > { %v5214_v25 = vrot.slane %v5212_v33, 4  ;;  %v5215_v58 = vrot.slane %v9041_v63, 5  ;;  %v6390_v34 = vcombine.low %v9327_v55, %v5188_v4  ;;  %v9347_v42 = vld [vmem:[#allocation2 + $0xc0] sm:$0xf]  ;;  %v9349_v44 = vld [vmem:[#allocation2 + $0xc4] sm:$0xf]  ;;  %v5195_v37 = vsel %vm8069_vm1, %v5193_v35, %v5194_v8 }
 0x186   : > { %v6205_v18 = vcombine.low %v9347_v42, %v9349_v44  ;;  %v3187_v21 = vrot.slane %v3185_v20, 4  ;;  %v3190_v19 = vrot.slane %v3188_v30, 5  ;;  %v9358_v36 = vsel %vm8069_vm1, %v6375_v54, %v5198_v0  ;;  %v7483_v61 = vld [vmem:[#allocation2 + $0x74] sm:$0x1]  ;;  %v7484_v35 = vld [vmem:[#allocation2 + $0x7c] sm:$0xf] }
 0x187   : > { %7044 = vmatmul.mubr.msk.bf16.vlgmr.msra.gmra.mrb[0].mxu0 %vm1687_vm12, %v6388_v45  ;;  %v9362_v63 = vsel %vm8069_vm1, %v5200_v6, %v5201_v32  ;;  %v9366_v55 = vsel %vm8069_vm1, %v6376_v31, %v5205_v43  ;;  %v9375_v45 = vsel %vm8069_vm1, %v5207_v47, %v5208_v11  ;;  %v9379_v0 = vsel %vm8069_vm1, %v6377_v15, %v5212_v33  ;;  %v7485_v11 = vld [vmem:[#allocation2 + $0x78] sm:$0xf] }
 0x188   : > { %6890 = vmatmul.mubr.msk.bf16.gmra.mrb[16].mxu1 %vm1687_vm12, %v6199_v38  ;;  %7047 = vmatprep.mubr.msk.bf16.mxu0 %vm1687_vm12, %v6389_v40  ;;  %v9381_v8 = vrot.slane %v3194_v2, 5  ;;  %v3200_v54 = vrot.slane %v3198_v49, 4  ;;  %v9389_v9 = vsel %vm8069_vm1, %v5214_v25, %v5215_v58  ;;  %v3204_v38 = vshll.u32 %v7483_v61, 16  ;;  %v7487_v61 = vld [vmem:[#allocation2 + $0x88] sm:$0xf] }
 0x189   : > { %6893 = vmatprep.mubr.msk.bf16.mxu1 %vm1687_vm12, %v6200_v1  ;;  %v3215_v43 = vor.u32 %v9259_v59, %v9250_v50  ;;  %v3225_v40 = vor.u32 %v9268_v26, %v9261_v41  ;;  %v3191_v33 = vor.u32 %v3190_v19, %v3187_v21  ;;  %v5219_v32 = vrot.slane %v7484_v35, 5 }
 0x18a   : > { %v3233_v20 = vshrl.u32 %v9289_v5, 16  ;;  %v3236_v30 = vshll.u32 %v9289_v5, 16  ;;  %v6391_v1 = vcombine.low %v5192_v52, %v5195_v37  ;;  %v6392_v4 = vcombine.low %v9358_v36, %v9362_v63  ;;  %v7486_v63 = vld [vmem:[#allocation2 + $0x84] sm:$0xf] }
 0x18b   : > { %v3242_v6 = vshll.u32 %v9291_v27, 16  ;;  %v3246_v31 = vshrl.u32 %v9291_v27, 16  ;;  %v6393_v50 = vcombine.low %v9366_v55, %v9375_v45  ;;  %v6394_v59 = vcombine.low %v9379_v0, %v9389_v9 }
 0x18c   : > { %v3201_v26 = vor.u32 %v3200_v54, %v9381_v8  ;;  %v6378_v47 = vrot.slane %v7485_v11, 9  ;;  %v3206_v15 = vrot.slane %v3204_v38, 5  ;;  %v3216_v5 = vrot.slane %v3215_v43, 4 }
 0x18d   : > { %v3226_v2 = vrot.slane %v3225_v40, 4  ;;  %v5222_v49 = vrot.slane %v9053_v10, 5  ;;  %v3192_v52 = vrot.slane %v3191_v33, 4  ;;  %v5221_v36 = vrot.slane %v5219_v32, 4  ;;  %v7488_v40 = vld [vmem:[#allocation2 + $0x8c] sm:$0x1] }
 0x18e   : > { %v3235_v25 = vrot.slane %v3233_v20, 4  ;;  %v3238_v58 = vrot.slane %v3236_v30, 5  ;;  %v9408_v27 = vrot.slane %v3242_v6, 5  ;;  %v3248_v21 = vrot.slane %v3246_v31, 4 }
 0x18f   : > { %7048 = vmatmul.mubr.msk.bf16.gmra.mrb[4].mxu0 %vm1687_vm12, %v6390_v34  ;;  %v3257_v19 = vshrl.u32 %v9295_v17, 16  ;;  %v3260_v37 = vshll.u32 %v9295_v17, 16  ;;  %v3202_v10 = vrot.slane %v3201_v26, 4  ;;  %v6379_v55 = vrot.slane %v7486_v63, 9 }
 0x190   : > { %6894 = vmatmul.mubr.msk.bf16.gmra.mrb[20].mxu1 %vm1687_vm12, %v6201_v29  ;;  %7051 = vmatprep.mubr.msk.bf16.mxu0 %vm1687_vm12, %v6391_v1  ;;  %v3266_v45 = vshll.u32 %v9297_v23, 16  ;;  %v3270_v34 = vshrl.u32 %v9297_v23, 16  ;;  %v3221_v17 = vsel %vm7720_vm13, %v3216_v5, %v9261_v41  ;;  %v3231_v29 = vsel %vm7720_vm13, %v3226_v2, %v9279_v48  ;;  %v7489_v5 = vld [vmem:[#allocation2 + $0x98] sm:$0x1] }
 0x191   : > { %6897 = vmatprep.mubr.msk.bf16.mxu1 %vm1687_vm12, %v6202_v53  ;;  %v9431_v54 = vsel %vm8069_vm1, %v6378_v47, %v5219_v32  ;;  %v5226_v38 = vrot.slane %v7487_v61, 5  ;;  %v9435_v23 = vsel %vm8069_vm1, %v5221_v36, %v5222_v49  ;;  %v5229_v53 = vrot.slane %v9099_v13, 5  ;;  %v7490_v49 = vld [vmem:[#allocation2 + $0x94] sm:$0xf] }
 0x192   : > { %v3239_v43 = vor.u32 %v3238_v58, %v3235_v25  ;;  %v3252_v33 = vshll.u32 %v7488_v40, 16  ;;  %v3197_v41 = vsel %vm7720_vm13, %v3192_v52, %v9381_v8  ;;  %v3249_v48 = vor.u32 %v3248_v21, %v9408_v27 }
 0x193   : > { %v3259_v35 = vrot.slane %v3257_v19, 4  ;;  %v3262_v32 = vrot.slane %v3260_v37, 5  ;;  %v3207_v20 = vsel %vm7720_vm13, %v3202_v10, %v3206_v15  ;;  %v9444_v30 = vcombine.low %v3221_v17, %v3231_v29  ;;  %v7491_v19 = vld [vmem:[#allocation2 + $0xa0] sm:$0xf] }
 0x194   : > { %v9446_v1 = vrot.slane %v3266_v45, 5  ;;  %v3272_v6 = vrot.slane %v3270_v34, 4  ;;  %v6395_v13 = vcombine.low %v9431_v54, %v9435_v23  ;;  %v5228_v31 = vrot.slane %v5226_v38, 4 }
 0x195   : > { %v3281_v26 = vshrl.u32 %v9309_v56, 16  ;;  %v3284_v8 = vshll.u32 %v9309_v56, 16  ;;  %v3240_v11 = vrot.slane %v3239_v43, 4  ;;  %v3254_v47 = vrot.slane %v3252_v33, 5  ;;  %v7493_v43 = vld [vmem:[#allocation2 + $0x9c] sm:$0xf] }
 0x196   : > { %v3276_v2 = vshll.u32 %v7489_v5, 16  ;;  %v5233_v52 = vrot.slane %v7490_v49, 5  ;;  %v3250_v15 = vrot.slane %v3249_v48, 4  ;;  %v3263_v36 = vor.u32 %v3262_v32, %v3259_v35  ;;  %v7494_v35 = vld [vmem:[#allocation2 + $0xa4] sm:$0x1] }
 0x197   : > { %7052 = vmatmul.mubr.msk.bf16.gmra.mrb[8].mxu0 %vm1687_vm12, %v6392_v4  ;;  %v3290_v25 = vshll.u32 %v9311_v62, 16  ;;  %v3294_v58 = vshrl.u32 %v9311_v62, 16  ;;  %v6231_v56 = vcombine.low %v3197_v41, %v3207_v20  ;;  %v9462_v21 = vsel %vm8069_vm1, %v6379_v55, %v5226_v38 }
 0x198   : > { %6898 = vmatmul.mubr.msk.bf16.gmra.mrb[24].mxu1 %vm1687_vm12, %v6203_v3  ;;  %7055 = vmatprep.mubr.msk.bf16.mxu0 %vm1687_vm12, %v6393_v50  ;;  %v3273_v4 = vor.u32 %v3272_v6, %v9446_v1  ;;  %v5240_v37 = vrot.slane %v7491_v19, 5  ;;  %v9780_v10 = vcombine.low %v9341_v7, %v9339_v51  ;;  %v9471_v62 = vsel %vm8069_vm1, %v5228_v31, %v5229_v53  ;;  %v7492_v3 = vld [vmem:[#allocation2 + $0x90] sm:$0xf] }
 0x199   : > { %v6380_v50 = vrot.slane %v7492_v3, 9  ;;  %v3283_v63 = vrot.slane %v3281_v26, 4  ;;  %v3286_v45 = vrot.slane %v3284_v8, 5  ;;  %v3245_v55 = vsel %vm7720_vm13, %v3240_v11, %v9408_v27 }
 0x19a   : > { %6901 = vmatprep.mubr.msk.bf16.mxu1 %vm1687_vm12, %v9780_v10  ;;  %v3278_v34 = vrot.slane %v3276_v2, 5  ;;  %v5235_v17 = vrot.slane %v5233_v52, 4  ;;  %v5236_v29 = vrot.slane %v9115_v39, 5  ;;  %v3255_v54 = vsel %vm7720_vm13, %v3250_v15, %v3254_v47 }
 0x19b   : > { %v3264_v61 = vrot.slane %v3263_v36, 4  ;;  %v9479_v38 = vrot.slane %v3290_v25, 5  ;;  %v3296_v23 = vrot.slane %v3294_v58, 4  ;;  %v3274_v53 = vrot.slane %v3273_v4, 4 }
 0x19c   : > { %v6381_v40 = vrot.slane %v7493_v43, 9  ;;  %v5242_v33 = vrot.slane %v5240_v37, 4  ;;  %v5243_v41 = vrot.slane %v9146_v22, 5  ;;  %v3287_v48 = vor.u32 %v3286_v45, %v3283_v63 }
 0x19d   : > { %v3300_v27 = vshll.u32 %v7494_v35, 16  ;;  %v3305_v32 = vshrl.u32 %v9319_v16, 16  ;;  %v3308_v39 = vshll.u32 %v9319_v16, 16  ;;  %v6396_v20 = vcombine.low %v9462_v21, %v9471_v62  ;;  %v7496_v21 = vld [vmem:[#allocation2 + $0xa8] sm:$0xf] }
 0x19e   : > { %v6233_v6 = vcombine.low %v3245_v55, %v3255_v54  ;;  %v5234_v31 = vsel %vm8069_vm1, %v6380_v50, %v5233_v52  ;;  %v5237_v26 = vsel %vm8069_vm1, %v5235_v17, %v5236_v29  ;;  %v3269_v22 = vsel %vm7720_vm13, %v3264_v61, %v9446_v1  ;;  %v7495_v1 = vld [vmem:[#allocation2 + $0xac] sm:$0xf]  ;;  %v7498_v54 = vld [vmem:[#allocation2 + $0xb8] sm:$0xf]  ;;  %v7500_v35 = vld [vmem:[#allocation2 + $0xc4] sm:$0xf] }
 0x19f   : > { %7056 = vmatmul.mubr.msk.bf16.gmra.mrb[12].mxu0 %vm1687_vm12, %v6394_v59  ;;  %v3297_v16 = vor.u32 %v3296_v23, %v9479_v38  ;;  %v3314_v8 = vshll.u32 %v9317_v28, 16  ;;  %v3318_v11 = vshrl.u32 %v9317_v28, 16  ;;  %v3279_v0 = vsel %vm7720_vm13, %v3274_v53, %v3278_v34 }
 0x1a0   : > { %6902 = vmatmul.mubr.msk.bf16.gmra.mrb[28].mxu1 %vm1687_vm12, %v6205_v18  ;;  %7059 = vmatprep.mubr.msk.bf16.mxu0 %vm1687_vm12, %v6395_v13  ;;  %v9509_v9 = vsel %vm8069_vm1, %v6381_v40, %v5240_v37  ;;  %v9513_v59 = vsel %vm8069_vm1, %v5242_v33, %v5243_v41  ;;  %v5247_v28 = vrot.slane %v7495_v1, 5  ;;  %v3288_v47 = vrot.slane %v3287_v48, 4  ;;  %v7499_v33 = vld [vmem:[#allocation2 + $0xb4] sm:$0xf] }
 0x1a1   : > { %6923 = vmatprep.mubr.msk.bf16.mxu1 %vm1687_vm12, %v6231_v56  ;;  %v3302_v5 = vrot.slane %v3300_v27, 5  ;;  %v3307_v18 = vrot.slane %v3305_v32, 4  ;;  %v3310_v2 = vrot.slane %v3308_v39, 5  ;;  %v3329_v13 = vshrl.u32 %v9341_v7, 16 }
 0x1a2   : > { %v3332_v49 = vshll.u32 %v9341_v7, 16  ;;  %v3338_v52 = vshll.u32 %v9339_v51, 16  ;;  %v3342_v15 = vshrl.u32 %v9339_v51, 16  ;;  %v3298_v36 = vrot.slane %v3297_v16, 4  ;;  %v7497_v51 = vld [vmem:[#allocation2 + $0xb0] sm:$0x1] }
 0x1a3   : > { %v9520_v25 = vrot.slane %v3314_v8, 5  ;;  %v3320_v58 = vrot.slane %v3318_v11, 4  ;;  %v6382_v4 = vrot.slane %v7496_v21, 9  ;;  %v6234_v19 = vcombine.low %v3269_v22, %v3279_v0 }
 0x1a4   : > { %v6397_v56 = vcombine.low %v5234_v31, %v5237_v26  ;;  %v5249_v37 = vrot.slane %v5247_v28, 4  ;;  %v5250_v10 = vrot.slane %v9156_v24, 5  ;;  %v6398_v62 = vcombine.low %v9509_v9, %v9513_v59  ;;  %v7502_v59 = vld [vmem:[#allocation2 + $0xc0] sm:$0xf] }
 0x1a5   : > { %v3293_v7 = vsel %vm7720_vm13, %v3288_v47, %v9479_v38  ;;  %v3311_v3 = vor.u32 %v3310_v2, %v3307_v18  ;;  %v3324_v50 = vshll.u32 %v7497_v51, 16  ;;  %v3331_v63 = vrot.slane %v3329_v13, 4 }
 0x1a6   : > { %v3334_v45 = vrot.slane %v3332_v49, 5  ;;  %v9528_v55 = vrot.slane %v3338_v52, 5  ;;  %v3344_v34 = vrot.slane %v3342_v15, 4  ;;  %v3303_v24 = vsel %vm7720_vm13, %v3298_v36, %v3302_v5  ;;  %v7503_v49 = vld [vmem:[#allocation2 + $0xc8] sm:$0x1] }
 0x1a7   : > { %7060 = vmatmul.mubr.msk.bf16.gmra.mrb[16].mxu0 %vm1687_vm12, %v6396_v20  ;;  %v3321_v17 = vor.u32 %v3320_v58, %v9520_v25  ;;  %v5248_v29 = vsel %vm8069_vm1, %v6382_v4, %v5247_v28  ;;  %v5254_v61 = vrot.slane %v7498_v54, 5  ;;  %v5251_v38 = vsel %vm8069_vm1, %v5249_v37, %v5250_v10  ;;  %v7501_v20 = vld [vmem:[#allocation2 + $0xbc] sm:$0x1]  ;;  %v7504_v15 = vld [vmem:[#allocation2 + $0xd0] sm:$0xf] }
 0x1a8   : > { %6924 = vmatmul.mubr.msk.bf16.vlgmr.msra.gmra.mrb[16].mxu1 %vm1687_vm12, %v9444_v30  ;;  %7063 = vmatprep.mubr.msk.bf16.mxu0 %vm1687_vm12, %v6397_v56  ;;  %v3353_v23 = vshrl.u32 %v9347_v42, 16  ;;  %v3356_v53 = vshll.u32 %v9347_v42, 16  ;;  %v3362_v43 = vshll.u32 %v9349_v44, 16  ;;  %v3326_v40 = vrot.slane %v3324_v50, 5 }
 0x1a9   : > { %6927 = vmatprep.mubr.msk.bf16.mxu1 %vm1687_vm12, %v6233_v6  ;;  %v6383_v41 = vrot.slane %v7499_v33, 9  ;;  %v3366_v48 = vshrl.u32 %v9349_v44, 16  ;;  %v5261_v30 = vrot.slane %v7500_v35, 5  ;;  %v6235_v27 = vcombine.low %v3293_v7, %v3303_v24  ;;  %v7505_v7 = vld [vmem:[#allocation2 + $0xcc] sm:$0xf] }
 0x1aa   : > { %v3335_v32 = vor.u32 %v3334_v45, %v3331_v63  ;;  %v3345_v39 = vor.u32 %v3344_v34, %v9528_v55  ;;  %v3348_v31 = vshll.u32 %v7501_v20, 16  ;;  %v3312_v26 = vrot.slane %v3311_v3, 4 }
 0x1ab   : > { %v3322_v22 = vrot.slane %v3321_v17, 4  ;;  %v6399_v42 = vcombine.low %v5248_v29, %v5251_v38  ;;  %v5257_v16 = vrot.slane %v9188_v46, 5  ;;  %v5256_v8 = vrot.slane %v5254_v61, 4 }
 0x1ac   : > { %v3355_v6 = vrot.slane %v3353_v23, 4  ;;  %v3358_v11 = vrot.slane %v3356_v53, 5  ;;  %v3364_v0 = vrot.slane %v3362_v43, 5  ;;  %v3368_v9 = vrot.slane %v3366_v48, 4 }
 0x1ad   : > { %v6384_v44 = vrot.slane %v7502_v59, 9  ;;  %v5263_v1 = vrot.slane %v5261_v30, 4  ;;  %v5264_v28 = vrot.slane %v9199_v14, 5  ;;  %v3336_v47 = vrot.slane %v3335_v32, 4 }
 0x1ae   : > { %v3346_v5 = vrot.slane %v3345_v39, 4  ;;  %v3350_v18 = vrot.slane %v3348_v31, 5  ;;  %v3317_v2 = vsel %vm7720_vm13, %v3312_v26, %v9520_v25  ;;  %v5255_v46 = vsel %vm8069_vm1, %v6383_v41, %v5254_v61 }
 0x1af   : > { %7064 = vmatmul.mubr.msk.bf16.gmra.mrb[20].mxu0 %vm1687_vm12, %v6398_v62  ;;  %v3327_v13 = vsel %vm7720_vm13, %v3322_v22, %v3326_v40  ;;  %v5258_v14 = vsel %vm8069_vm1, %v5256_v8, %v5257_v16  ;;  %v3372_v52 = vshll.u32 %v7503_v49, 16  ;;  %v5268_v36 = vrot.slane %v7504_v15, 5 }
 0x1b0   : > { %6928 = vmatmul.mubr.msk.bf16.gmra.mrb[20].mxu1 %vm1687_vm12, %v6234_v19  ;;  %7067 = vmatprep.mubr.msk.bf16.mxu0 %vm1687_vm12, %v6399_v42  ;;  %v3359_v25 = vor.u32 %v3358_v11, %v3355_v6  ;;  %v3369_v58 = vor.u32 %v3368_v9, %v3364_v0  ;;  %v5262_v21 = vsel %vm8069_vm1, %v6384_v44, %v5261_v30  ;;  %v6385_v3 = vrot.slane %v7505_v7, 9 }
 0x1b1   : > { %6931 = vmatprep.mubr.msk.bf16.mxu1 %vm1687_vm12, %v6235_v27  ;;  %v5265_v4 = vsel %vm8069_vm1, %v5263_v1, %v5264_v28  ;;  %v3341_v19 = vsel %vm7720_vm13, %v3336_v47, %v9528_v55  ;;  %v3351_v56 = vsel %vm7720_vm13, %v3346_v5, %v3350_v18  ;;  %v6236_v37 = vcombine.low %v3317_v2, %v3327_v13 }
 0x1b2   : > { %v6400_v10 = vcombine.low %v5255_v46, %v5258_v14  ;;  %v6401_v62 = vcombine.low %v5262_v21, %v5265_v4  ;;  %v5270_v51 = vrot.slane %v5268_v36, 4  ;;  %v5271_v50 = vrot.slane %v9221_v12, 5 }
 0x1b3   : > { %v6237_v63 = vcombine.low %v3341_v19, %v3351_v56  ;;  %v3360_v45 = vrot.slane %v3359_v25, 4  ;;  %v3370_v34 = vrot.slane %v3369_v58, 4  ;;  %v3374_v24 = vrot.slane %v3372_v52, 5 }
 0x1b4   : > { %v5269_v55 = vsel %vm8069_vm1, %v6385_v3, %v5268_v36  ;;  %v5272_v17 = vsel %vm8069_vm1, %v5270_v51, %v5271_v50 }
 0x1b5   : > { %v3365_v12 = vsel %vm7720_vm13, %v3360_v45, %v3364_v0  ;;  %v3375_v29 = vsel %vm7720_vm13, %v3370_v34, %v3374_v24  ;;  %v6402_v54 = vcombine.low %v5269_v55, %v5272_v17 }
 0x1b6   : > { %v6238_v61 = vcombine.low %v3365_v12, %v3375_v29 }
 0x1b7   : > { %7068 = vmatmul.mubr.msk.bf16.gmra.mrb[24].mxu0 %vm1687_vm12, %v6400_v10 }
 0x1b8   : > { %6932 = vmatmul.mubr.msk.bf16.gmra.mrb[24].mxu1 %vm1687_vm12, %v6236_v37  ;;  %7071 = vmatprep.mubr.msk.bf16.mxu0 %vm1687_vm12, %v6401_v62 }
 0x1b9   : > { %6935 = vmatprep.mubr.msk.bf16.mxu1 %vm1687_vm12, %v6237_v63 }
 0x1bf   : > { %7072 = vmatmul.mubr.msk.bf16.gmra.mrb[28].mxu0 %vm1687_vm12, %v6402_v54 }
 0x1c0   : > { %6936 = vmatmul.mubr.msk.bf16.gmra.mrb[28].mxu1 %vm1687_vm12, %v6238_v61 }
 0x23b   : > { %v6875_v38 = vpop.f32.mrb[0].mxu1 }
 0x23c   : > { %v2833_v23 = vpop.f32.mrb[1].mxu1 }
 0x23d   : > { %v6876_v53 = vpop.f32.mrb[2].mxu1 }
 0x23e   : > { %v2836_v57 = vpop.f32.mrb[3].mxu1 }
 0x243   : > { %v6879_v43 = vpop.f32.mrb[4].mxu1 }
 0x244   : > { %v2849_v40 = vpop.f32.mrb[5].mxu1 }
 0x245   : > { %v6880_v33 = vpop.f32.mrb[6].mxu1 }
 0x246   : > { %v2852_v41 = vpop.f32.mrb[7].mxu1 }
 0x24b   : > { %v6883_v48 = vpop.f32.mrb[8].mxu1 }
 0x24c   : > { %v2865_v35 = vpop.f32.mrb[9].mxu1 }
 0x24d   : > { %v6884_v30 = vpop.f32.mrb[10].mxu1 }
 0x24e   : > { %v9586_v60 = vpop.f32.mrb[11].mxu1 }
 0x253   : > { %v9589_v27 = vpop.f32.mrb[12].mxu1 }
 0x254   : > { %v9591_v32 = vpop.f32.mrb[13].mxu1 }
 0x255   : > { %v9593_v39 = vpop.f32.mrb[14].mxu1 }
 0x256   : > { %v9595_v20 = vpop.f32.mrb[15].mxu1 }
 0x25a   : > { %v7045_v31 = vpop.f32.mrb[0].mxu0 }
 0x25b   : > { %v7077_v26 = vadd.f32 %v7045_v31, %v6875_v38  ;;  %v5408_v22 = vpop.f32.mrb[1].mxu0 }
 0x25c   : > { %v7078_v42 = vadd.f32 %v5408_v22, %v2833_v23  ;;  %v7046_v16 = vpop.f32.mrb[2].mxu0 }
 0x25d   : > { %v7079_v8 = vadd.f32 %v7046_v16, %v6876_v53  ;;  %v5411_v6 = vpop.f32.mrb[3].mxu0  ;;  %v5767_v28 = vmul.f32 %v7077_v26, %v7077_v26 }
 0x25e   : > { %v7080_v11 = vadd.f32 %v5411_v6, %v2836_v57  ;;  %v5765_v9 = vmul.f32 %v7078_v42, %v7078_v42 }
 0x25f   : > { %v6529_v0 = vpack.c.bf16 %v7079_v8, %v7077_v26  ;;  %v5768_v13 = vmul.f32 %v7079_v8, %v7079_v8 }
 0x260   : > { %v6524_v59 = vpack.c.bf16 %v7080_v11, %v7078_v42  ;;  %v5727_v44 = vadd.f32 %v7080_v11, %v7078_v42  ;;  %v5766_v1 = vmul.f32 %v7080_v11, %v7080_v11 }
 0x261   : > { %6601 = vst [vmem:[%s9600_s8 + $0x8] sm:$0xff] %v6529_v0  }
 0x262   : > { %6525 = vst [vmem:[%s9600_s8] sm:$0xff] %v6524_v59   ;;  %v5728_v47 = vadd.f32 %v7077_v26, %v5727_v44  ;;  %v5797_v5 = vadd.f32 %v5766_v1, %v5765_v9  ;;  %v7049_v18 = vpop.f32.mrb[4].mxu0 }
 0x263   : > { %v7081_v2 = vadd.f32 %v7049_v18, %v6879_v43  ;;  %v5424_v46 = vpop.f32.mrb[5].mxu0 }
 0x264   : > { %v5798_v14 = vadd.f32 %v5797_v5, %v5767_v28  ;;  %v7082_v49 = vadd.f32 %v5424_v46, %v2849_v40  ;;  %v5729_v52 = vadd.f32 %v7079_v8, %v5728_v47  ;;  %v7050_v15 = vpop.f32.mrb[6].mxu0 }
 0x265   : > { %v7083_v36 = vadd.f32 %v7050_v15, %v6880_v33  ;;  %v5427_v25 = vpop.f32.mrb[7].mxu0  ;;  %v5771_v3 = vmul.f32 %v7081_v2, %v7081_v2 }
 0x266   : > { %v5730_v58 = vadd.f32 %v7082_v49, %v5729_v52  ;;  %v5769_v21 = vmul.f32 %v7082_v49, %v7082_v49  ;;  %v5799_v4 = vadd.f32 %v5798_v14, %v5768_v13  ;;  %v7084_v19 = vadd.f32 %v5427_v25, %v2852_v41 }
 0x267   : > { %v6539_v56 = vpack.c.bf16 %v7083_v36, %v7081_v2  ;;  %v5772_v24 = vmul.f32 %v7083_v36, %v7083_v36 }
 0x268   : > { %v5800_v37 = vadd.f32 %v5799_v4, %v5769_v21  ;;  %v6534_v10 = vpack.c.bf16 %v7084_v19, %v7082_v49  ;;  %v5731_v62 = vadd.f32 %v7084_v19, %v5730_v58  ;;  %v5770_v7 = vmul.f32 %v7084_v19, %v7084_v19 }
 0x269   : > { %6603 = vst [vmem:[%s9600_s8 + $0x18] sm:$0xff] %v6539_v56  }
 0x26a   : > { %6602 = vst [vmem:[%s9600_s8 + $0x10] sm:$0xff] %v6534_v10   ;;  %v5732_v51 = vadd.f32 %v7081_v2, %v5731_v62  ;;  %v5801_v50 = vadd.f32 %v5800_v37, %v5770_v7  ;;  %v7053_v63 = vpop.f32.mrb[8].mxu0 }
 0x26b   : > { %v7085_v45 = vadd.f32 %v7053_v63, %v6883_v48  ;;  %v5440_v34 = vpop.f32.mrb[9].mxu0 }
 0x26c   : > { %v5802_v55 = vadd.f32 %v5801_v50, %v5771_v3  ;;  %v7086_v17 = vadd.f32 %v5440_v34, %v2865_v35  ;;  %v5733_v12 = vadd.f32 %v7083_v36, %v5732_v51  ;;  %v7054_v29 = vpop.f32.mrb[10].mxu0 }
 0x26d   : > { %v7087_v54 = vadd.f32 %v7054_v29, %v6884_v30  ;;  %v5443_v61 = vpop.f32.mrb[11].mxu0  ;;  %v5775_v31 = vmul.f32 %v7085_v45, %v7085_v45 }
 0x26e   : > { %v5734_v38 = vadd.f32 %v7086_v17, %v5733_v12  ;;  %v5773_v23 = vmul.f32 %v7086_v17, %v7086_v17  ;;  %v5803_v53 = vadd.f32 %v5802_v55, %v5772_v24  ;;  %v7088_v57 = vadd.f32 %v5443_v61, %v9586_v60 }
 0x26f   : > { %v6549_v43 = vpack.c.bf16 %v7087_v54, %v7085_v45  ;;  %v5776_v16 = vmul.f32 %v7087_v54, %v7087_v54 }
 0x270   : > { %v5804_v40 = vadd.f32 %v5803_v53, %v5773_v23  ;;  %v6544_v33 = vpack.c.bf16 %v7088_v57, %v7086_v17  ;;  %v5735_v41 = vadd.f32 %v7088_v57, %v5734_v38  ;;  %v5774_v48 = vmul.f32 %v7088_v57, %v7088_v57 }
 0x271   : > { %6605 = vst [vmem:[%s9600_s8 + $0x28] sm:$0xff] %v6549_v43  }
 0x272   : > { %6604 = vst [vmem:[%s9600_s8 + $0x20] sm:$0xff] %v6544_v33   ;;  %v5736_v26 = vadd.f32 %v7085_v45, %v5735_v41  ;;  %v5805_v35 = vadd.f32 %v5804_v40, %v5774_v48  ;;  %v7057_v22 = vpop.f32.mrb[12].mxu0 }
 0x273   : > { %v7089_v42 = vadd.f32 %v7057_v22, %v9589_v27  ;;  %v5456_v30 = vpop.f32.mrb[13].mxu0 }
 0x274   : > { %v5806_v8 = vadd.f32 %v5805_v35, %v5775_v31  ;;  %v7090_v6 = vadd.f32 %v5456_v30, %v9591_v32  ;;  %v5737_v60 = vadd.f32 %v7087_v54, %v5736_v26  ;;  %v7058_v11 = vpop.f32.mrb[14].mxu0 }
 0x275   : > { %v7091_v0 = vadd.f32 %v7058_v11, %v9593_v39  ;;  %v5459_v9 = vpop.f32.mrb[15].mxu0  ;;  %v5779_v46 = vmul.f32 %v7089_v42, %v7089_v42 }
 0x276   : > { %v5738_v59 = vadd.f32 %v7090_v6, %v5737_v60  ;;  %v5777_v44 = vmul.f32 %v7090_v6, %v7090_v6  ;;  %v5807_v1 = vadd.f32 %v5806_v8, %v5776_v16  ;;  %v7092_v28 = vadd.f32 %v5459_v9, %v9595_v20 }
 0x277   : > { %v6559_v47 = vpack.c.bf16 %v7091_v0, %v7089_v42  ;;  %v5780_v39 = vmul.f32 %v7091_v0, %v7091_v0 }
 0x278   : > { %v5808_v5 = vadd.f32 %v5807_v1, %v5777_v44  ;;  %v6554_v27 = vpack.c.bf16 %v7092_v28, %v7090_v6  ;;  %v5739_v18 = vadd.f32 %v7092_v28, %v5738_v59  ;;  %v5778_v2 = vmul.f32 %v7092_v28, %v7092_v28 }
 0x279   : > { %6607 = vst [vmem:[%s9600_s8 + $0x38] sm:$0xff] %v6559_v47  }
 0x27a   : > { %6606 = vst [vmem:[%s9600_s8 + $0x30] sm:$0xff] %v6554_v27   ;;  %v5740_v32 = vadd.f32 %v7089_v42, %v5739_v18  ;;  %v5809_v13 = vadd.f32 %v5808_v5, %v5778_v2  ;;  %v7061_v14 = vpop.f32.mrb[16].mxu0 }
 0x27b   : > { %v6925_v49 = vpop.f32.mrb[16].mxu1  ;;  %v5472_v52 = vpop.f32.mrb[17].mxu0 }
 0x27c   : > { %v5810_v15 = vadd.f32 %v5809_v13, %v5779_v46  ;;  %v3575_v36 = vpop.f32.mrb[17].mxu1  ;;  %v7093_v25 = vadd.f32 %v7061_v14, %v6925_v49  ;;  %v5741_v58 = vadd.f32 %v7091_v0, %v5740_v32  ;;  %v7062_v20 = vpop.f32.mrb[18].mxu0 }
 0x27d   : > { %v6926_v21 = vpop.f32.mrb[18].mxu1  ;;  %v7094_v4 = vadd.f32 %v5472_v52, %v3575_v36  ;;  %v5475_v19 = vpop.f32.mrb[19].mxu0 }
 0x27e   : > { %v5811_v56 = vadd.f32 %v5810_v15, %v5780_v39  ;;  %v3578_v37 = vpop.f32.mrb[19].mxu1  ;;  %v7095_v10 = vadd.f32 %v7062_v20, %v6926_v21  ;;  %v5783_v55 = vmul.f32 %v7093_v25, %v7093_v25 }
 0x27f   : > { %v5742_v62 = vadd.f32 %v7094_v4, %v5741_v58  ;;  %v5781_v7 = vmul.f32 %v7094_v4, %v7094_v4  ;;  %v7096_v3 = vadd.f32 %v5475_v19, %v3578_v37 }
 0x280   : > { %v6569_v51 = vpack.c.bf16 %v7095_v10, %v7093_v25  ;;  %v5784_v53 = vmul.f32 %v7095_v10, %v7095_v10 }
 0x281   : > { %v5812_v50 = vadd.f32 %v5811_v56, %v5781_v7  ;;  %v6564_v63 = vpack.c.bf16 %v7096_v3, %v7094_v4  ;;  %v5743_v45 = vadd.f32 %v7096_v3, %v5742_v62  ;;  %v5782_v34 = vmul.f32 %v7096_v3, %v7096_v3 }
 0x282   : > { %6609 = vst [vmem:[%s9600_s8 + $0x48] sm:$0xff] %v6569_v51   ;;  %v7065_v24 = vpop.f32.mrb[20].mxu0 }
 0x283   : > { %6608 = vst [vmem:[%s9600_s8 + $0x40] sm:$0xff] %v6564_v63   ;;  %v5744_v17 = vadd.f32 %v7093_v25, %v5743_v45  ;;  %v5813_v12 = vadd.f32 %v5812_v50, %v5782_v34  ;;  %v6929_v29 = vpop.f32.mrb[20].mxu1  ;;  %v5488_v54 = vpop.f32.mrb[21].mxu0 }
 0x284   : > { %v3591_v61 = vpop.f32.mrb[21].mxu1  ;;  %v7097_v38 = vadd.f32 %v7065_v24, %v6929_v29  ;;  %v7066_v23 = vpop.f32.mrb[22].mxu0 }
 0x285   : > { %v5814_v57 = vadd.f32 %v5813_v12, %v5783_v55  ;;  %v6930_v43 = vpop.f32.mrb[22].mxu1  ;;  %v7098_v40 = vadd.f32 %v5488_v54, %v3591_v61  ;;  %v5745_v33 = vadd.f32 %v7095_v10, %v5744_v17  ;;  %v5491_v41 = vpop.f32.mrb[23].mxu0 }
 0x286   : > { %v3594_v48 = vpop.f32.mrb[23].mxu1  ;;  %v7099_v31 = vadd.f32 %v7066_v23, %v6930_v43  ;;  %v5787_v0 = vmul.f32 %v7097_v38, %v7097_v38 }
 0x287   : > { %v5746_v26 = vadd.f32 %v7098_v40, %v5745_v33  ;;  %v5785_v35 = vmul.f32 %v7098_v40, %v7098_v40  ;;  %v5815_v22 = vadd.f32 %v5814_v57, %v5784_v53  ;;  %v7100_v42 = vadd.f32 %v5491_v41, %v3594_v48 }
 0x288   : > { %v6579_v30 = vpack.c.bf16 %v7099_v31, %v7097_v38  ;;  %v5788_v27 = vmul.f32 %v7099_v31, %v7099_v31 }
 0x289   : > { %v5816_v16 = vadd.f32 %v5815_v22, %v5785_v35  ;;  %v6574_v8 = vpack.c.bf16 %v7100_v42, %v7098_v40  ;;  %v5747_v6 = vadd.f32 %v7100_v42, %v5746_v26  ;;  %v5786_v60 = vmul.f32 %v7100_v42, %v7100_v42 }
 0x28a   : > { %6611 = vst [vmem:[%s9600_s8 + $0x58] sm:$0xff] %v6579_v30   ;;  %v7069_v11 = vpop.f32.mrb[24].mxu0 }
 0x28b   : > { %6610 = vst [vmem:[%s9600_s8 + $0x50] sm:$0xff] %v6574_v8   ;;  %v5748_v9 = vadd.f32 %v7097_v38, %v5747_v6  ;;  %v5817_v59 = vadd.f32 %v5816_v16, %v5786_v60  ;;  %v6933_v44 = vpop.f32.mrb[24].mxu1  ;;  %v5504_v1 = vpop.f32.mrb[25].mxu0 }
 0x28c   : > { %v3607_v28 = vpop.f32.mrb[25].mxu1  ;;  %v7101_v47 = vadd.f32 %v7069_v11, %v6933_v44  ;;  %v7070_v5 = vpop.f32.mrb[26].mxu0 }
 0x28d   : > { %v5818_v18 = vadd.f32 %v5817_v59, %v5787_v0  ;;  %v6934_v2 = vpop.f32.mrb[26].mxu1  ;;  %v7102_v46 = vadd.f32 %v5504_v1, %v3607_v28  ;;  %v5749_v32 = vadd.f32 %v7099_v31, %v5748_v9  ;;  %v5507_v13 = vpop.f32.mrb[27].mxu0 }
 0x28e   : > { %v3610_v14 = vpop.f32.mrb[27].mxu1  ;;  %v7103_v49 = vadd.f32 %v7070_v5, %v6934_v2  ;;  %v5791_v56 = vmul.f32 %v7101_v47, %v7101_v47 }
 0x28f   : > { %v5750_v52 = vadd.f32 %v7102_v46, %v5749_v32  ;;  %v5789_v39 = vmul.f32 %v7102_v46, %v7102_v46  ;;  %v5819_v15 = vadd.f32 %v5818_v18, %v5788_v27  ;;  %v7104_v36 = vadd.f32 %v5507_v13, %v3610_v14 }
 0x290   : > { %v6589_v25 = vpack.c.bf16 %v7103_v49, %v7101_v47  ;;  %v5792_v63 = vmul.f32 %v7103_v49, %v7103_v49 }
 0x291   : > { %v5820_v58 = vadd.f32 %v5819_v15, %v5789_v39  ;;  %v6584_v20 = vpack.c.bf16 %v7104_v36, %v7102_v46  ;;  %v5751_v21 = vadd.f32 %v7104_v36, %v5750_v52  ;;  %v5790_v4 = vmul.f32 %v7104_v36, %v7104_v36 }
 0x292   : > { %6613 = vst [vmem:[%s9600_s8 + $0x68] sm:$0xff] %v6589_v25   ;;  %v7073_v19 = vpop.f32.mrb[28].mxu0 }
 0x293   : > { %6612 = vst [vmem:[%s9600_s8 + $0x60] sm:$0xff] %v6584_v20   ;;  %v5752_v37 = vadd.f32 %v7101_v47, %v5751_v21  ;;  %v5821_v10 = vadd.f32 %v5820_v58, %v5790_v4  ;;  %v6937_v62 = vpop.f32.mrb[28].mxu1  ;;  %v5520_v7 = vpop.f32.mrb[29].mxu0 }
 0x294   : > { %v3623_v3 = vpop.f32.mrb[29].mxu1  ;;  %v7105_v51 = vadd.f32 %v7073_v19, %v6937_v62  ;;  %v7074_v50 = vpop.f32.mrb[30].mxu0 }
 0x295   : > { %v5822_v45 = vadd.f32 %v5821_v10, %v5791_v56  ;;  %v6938_v34 = vpop.f32.mrb[30].mxu1  ;;  %v7106_v24 = vadd.f32 %v5520_v7, %v3623_v3  ;;  %v5753_v55 = vadd.f32 %v7103_v49, %v5752_v37  ;;  %v5523_v17 = vpop.f32.mrb[31].mxu0 }
 0x296   : > { %v3626_v12 = vpop.f32.mrb[31].mxu1  ;;  %v7107_v29 = vadd.f32 %v7074_v50, %v6938_v34  ;;  %v5795_v41 = vmul.f32 %v7105_v51, %v7105_v51 }
 0x297   : > { %v5754_v54 = vadd.f32 %v7106_v24, %v5753_v55  ;;  %v5793_v61 = vmul.f32 %v7106_v24, %v7106_v24  ;;  %v5823_v38 = vadd.f32 %v5822_v45, %v5792_v63  ;;  %v7108_v23 = vadd.f32 %v5523_v17, %v3626_v12 }
 0x298   : > { %v6599_v53 = vpack.c.bf16 %v7107_v29, %v7105_v51  ;;  %v5796_v26 = vmul.f32 %v7107_v29, %v7107_v29 }
 0x299   : > { %v5824_v57 = vadd.f32 %v5823_v38, %v5793_v61  ;;  %v6594_v43 = vpack.c.bf16 %v7108_v23, %v7106_v24  ;;  %v5755_v40 = vadd.f32 %v7108_v23, %v5754_v54  ;;  %v5794_v33 = vmul.f32 %v7108_v23, %v7108_v23 }
 0x29a   : > { %6615 = vst [vmem:[%s9600_s8 + $0x78] sm:$0xff] %v6599_v53  }
 0x29b   : > { %6614 = vst [vmem:[%s9600_s8 + $0x70] sm:$0xff] %v6594_v43   ;;  %v5756_v48 = vadd.f32 %v7105_v51, %v5755_v40  ;;  %v5825_v31 = vadd.f32 %v5824_v57, %v5794_v33 }
 0x29d   : > { %v5757_v35 = vadd.f32 %v7107_v29, %v5756_v48  ;;  %v5826_v22 = vadd.f32 %v5825_v31, %v5795_v41 }
 0x29f   : > { %v5758_v42 = vrot.slane %v5757_v35, 4  ;;  %v5827_v30 = vadd.f32 %v5826_v22, %v5796_v26 }
 0x2a1   : > { %v5759_v16 = vadd.f32 %v5758_v42, %v5757_v35  ;;  %v5828_v8 = vrot.slane %v5827_v30, 4 }
 0x2a3   : > { %v5760_v6 = vrot.slane %v5759_v16, 2  ;;  %v5829_v60 = vadd.f32 %v5828_v8, %v5827_v30 }
 0x2a5   : > { %v5761_v11 = vadd.f32 %v5760_v6, %v5759_v16  ;;  %v5830_v0 = vrot.slane %v5829_v60, 2 }
 0x2a7   : > { %v5762_v9 = vrot.slane %v5761_v11, 1  ;;  %v5831_v59 = vadd.f32 %v5830_v0, %v5829_v60 }
 0x2a9   : > { %v5763_v44 = vadd.f32 %v5762_v9, %v5761_v11  ;;  %v5832_v1 = vrot.slane %v5831_v59, 1 }
 0x2ab   : > { %v5833_v28 = vadd.f32 %v5832_v1, %v5831_v59  ;;  %5835 = vst [vmem:[%s436_s12] sm:$0xff] %v5763_v44 }
 0x2ad   : > { %5836 = vst [vmem:[%s442_s15] sm:$0xff] %v5833_v28 }
 0x2ae PF: > { %s17_s1 = sadd.s32 1, %s7528_s1   ;;  %s9781_s21 = smov %s7524_s22 }
 0x2af   : > { %p14_p6 = scmp.ge.s32.totalorder %s17_s1, 4   ;;  %s9782_s22 = smov %s9784_s2 }
 0x2b1   :  { %16 = sbr.rel (!%p14_p6) target bundleno = 2 (0x2), region = 107 }

</bundles_post_ra>
